<compile_context>
chip_gen: v7x
topology: tpu7x:2x2x1
jax: 0.10.0
libtpu: 0.0.40
codegen_flags: <defaults>
</compile_context>

<pallas_src>
import functools

import numpy as np
import jax
import jax.numpy as jnp
from jax import lax
from jax.experimental import pallas as pl
from jax.experimental.pallas import tpu as pltpu


# ----------------------------- model constants ----------------------------- #

H = W = 32                     # input spatial size (32x32 RGB -> 480-dim flatten)
C_IN, C1, C2, C3 = 3, 6, 16, 120
K1, K2, K3 = 5, 5, 4
HIDDEN, N_CLASSES = 84, 10

IMG_PER_BLOCK = 4              # images processed per grid step
PAD = 16                       # scratch tail rows (largest shifted row read = 14)


# --------------------- host-side Toeplitz weight builders ------------------- #
# Activation layout inside the kernel: a 2-D slab (rows, lanes) with
#   row  = image_in_block * 32 + h          (full 32-row "a trous" resolution)
#   lane = w * C + c                        (width-major, channel-minor)
# A conv then becomes   out[h] = sum_i  act[h + dil*i] @ W_i
# where W_i[(iw)*Cin + ci, (ow)*Cout + co] holds the filter taps (and, for
# conv2/conv3, the folded-in 2x2 average pooling of the previous stage).

def _row_conv1(w):   # w: (6, 3, 5, 5) -> (5, 96, 192)
    mats = []
    for i in range(K1):
        acc = jnp.zeros((W * C_IN, W * C1), jnp.float32)
        ow = np.arange(W - K1 + 1)                         # valid output cols 0..27
        for j in range(K1):
            s = np.zeros((W, W), np.float32)
            s[ow + j, ow] = 1.0
            acc = acc + jnp.kron(jnp.asarray(s), w[:, :, i, j].T.astype(jnp.float32))
        mats.append(acc)
    return jnp.stack(mats)


def _row_conv2(w):   # w: (16, 6, 5, 5) -> (5, 192, 512); pool1 folded (dilation 2)
    mats = []
    for i in range(K2):
        acc = jnp.zeros((W * C1, W * C2), jnp.float32)
        ow = 2 * np.arange(10)                             # valid dilated cols 0,2,...,18
        for j in range(K2):
            s = np.zeros((W, W), np.float32)
            s[ow + 2 * j, ow] += 1.0                       # pool lane offset 0
            s[ow + 2 * j + 1, ow] += 1.0                   # pool lane offset 1
            acc = acc + jnp.kron(jnp.asarray(0.25 * s),
                                 w[:, :, i, j].T.astype(jnp.float32))
        mats.append(acc)
    return jnp.stack(mats)


def _row_conv3(w):   # w: (120, 16, 4, 4) -> (4, 512, 240); pool2 folded (dilation 4)
    mats = []
    for i in range(K3):
        acc = jnp.zeros((W * C2, 2 * C3), jnp.float32)
        b = np.arange(2)                                   # valid output cols b in {0,1}
        for j in range(K3):
            s = np.zeros((W, 2), np.float32)
            s[4 * b + 4 * j, b] += 1.0
            s[4 * b + 4 * j + 2, b] += 1.0
            acc = acc + jnp.kron(jnp.asarray(0.25 * s),
                                 w[:, :, i, j].T.astype(jnp.float32))
        mats.append(acc)
    return jnp.stack(mats)


# ------------------------------ fused kernel ------------------------------- #

def _lenet_block_kernel(x_ref, a1_ref, a2_ref, a3_ref, g0_ref, g1_ref,
                        m0_ref, m1_ref, b1_ref, l2w_ref, b2_ref,
                        o_ref, xs_ref, s1_ref, s2_ref, *, rows):
    f32 = jnp.float32
    R = rows

    # Keep the tail rows finite: they only ever feed garbage ("a trous" invalid)
    # rows, but uninitialized VMEM could carry NaN/Inf which 0-weights would not mask.
    xs_ref[R:R + PAD, :] = jnp.zeros((PAD, W * C_IN), f32)
    s1_ref[R:R + PAD, :] = jnp.zeros((PAD, W * C1), f32)
    s2_ref[R:R + PAD, :] = jnp.zeros((PAD, W * C2), f32)

    # Stage the input block into a row-padded slab so shifted row reads stay in-bounds.
    xs_ref[0:R, :] = x_ref[0]

    # ---- conv1 + ReLU: 5 row taps, carry accumulation, single store ---------
    acc = jnp.dot(xs_ref[0:R, :], a1_ref[0], preferred_element_type=f32)
    for i in range(1, K1):
        acc = acc + jnp.dot(xs_ref[i:i + R, :], a1_ref[i], preferred_element_type=f32)
    s1_ref[0:R, :] = jnp.maximum(acc, 0.0)

    # ---- pool1 + conv2 + ReLU (pool lane part folded into a2) ---------------
    acc = None
    for i in range(K2):
        q = s1_ref[2 * i:2 * i + R, :] + s1_ref[2 * i + 1:2 * i + 1 + R, :]
        t = jnp.dot(q, a2_ref[i], preferred_element_type=f32)
        acc = t if acc is None else acc + t
    s2_ref[0:R, :] = jnp.maximum(acc, 0.0)

    # ---- pool2 + conv3 (pool lane part folded into a3) ----------------------
    acc = None
    for i in range(K3):
        q = s2_ref[4 * i:4 * i + R, :] + s2_ref[4 * i + 2:4 * i + 2 + R, :]
        t = jnp.dot(q, a3_ref[i], preferred_element_type=f32)
        acc = t if acc is None else acc + t
    # acc: (R, 240); valid conv3 outputs live at rows img*32 + 4a, lanes b*120 + co.

    # ---- dense epilogue: select 2x2 valid rows, ReLU, linear1+ReLU, linear2 --
    y0 = jnp.maximum(jnp.dot(g0_ref[...], acc, preferred_element_type=f32), 0.0)
    y1 = jnp.maximum(jnp.dot(g1_ref[...], acc, preferred_element_type=f32), 0.0)
    z1 = (jnp.dot(y0, m0_ref[...], preferred_element_type=f32)
          + jnp.dot(y1, m1_ref[...], preferred_element_type=f32)
          + b1_ref[...])
    z1 = jnp.maximum(z1, 0.0)
    o_ref[0] = (jnp.dot(z1, l2w_ref[...], preferred_element_type=f32)
                + b2_ref[...]).astype(o_ref.dtype)


# ------------------------------ host wrapper -------------------------------- #

def _full_spec(a):
    nd = a.ndim
    return pl.BlockSpec(a.shape, lambda b, _nd=nd: (0,) * _nd)


def lenet_small_forward(x_nchw, params, *, img_per_block=IMG_PER_BLOCK):
    n = x_nchw.shape[0]
    n_blk = -(-n // img_per_block)
    n_pad = n_blk * img_per_block
    rows = img_per_block * H

    # Input slab: (n_blk, IMG*32, 96), lane = w*3 + c.
    x = jnp.transpose(x_nchw, (0, 2, 3, 1)).astype(jnp.float32).reshape(n, H, W * C_IN)
    if n_pad != n:
        x = jnp.concatenate([x, jnp.zeros((n_pad - n, H, W * C_IN), jnp.float32)], 0)
    x = x.reshape(n_blk, rows, W * C_IN)

    # One-time parameter re-layout (tiny XLA ops on parameters only).
    a1 = _row_conv1(params["conv1_w"])
    a2 = _row_conv2(params["conv2_w"])
    a3 = _row_conv3(params["conv3_w"])

    l1 = params["lin1_w"].reshape(HIDDEN, C3, 2, 2)        # [o, c, a, b], flat = c*4+a*2+b
    m0 = jnp.transpose(l1[:, :, 0, :], (2, 1, 0)).reshape(2 * C3, HIDDEN)
    m1 = jnp.transpose(l1[:, :, 1, :], (2, 1, 0)).reshape(2 * C3, HIDDEN)
    b1 = params["lin1_b"].reshape(1, HIDDEN)
    l2w = params["lin2_w"].T
    b2 = params["lin2_b"].reshape(1, N_CLASSES)

    # Row-selection matrices for the conv3 output positions a=0 / a=1 per image.
    sel0 = np.zeros((img_per_block, rows), np.float32)
    sel1 = np.zeros((img_per_block, rows), np.float32)
    for m in range(img_per_block):
        sel0[m, m * H] = 1.0
        sel1[m, m * H + 4] = 1.0
    sel0 = jnp.asarray(sel0)
    sel1 = jnp.asarray(sel1)

    out = pl.pallas_call(
        functools.partial(_lenet_block_kernel, rows=rows),
        grid=(n_blk,),
        out_shape=jax.ShapeDtypeStruct((n_blk, img_per_block, N_CLASSES), jnp.float32),
        in_specs=[
            pl.BlockSpec((1, rows, W * C_IN), lambda b: (b, 0, 0)),
            _full_spec(a1), _full_spec(a2), _full_spec(a3),
            _full_spec(sel0), _full_spec(sel1),
            _full_spec(m0), _full_spec(m1), _full_spec(b1),
            _full_spec(l2w), _full_spec(b2),
        ],
        out_specs=pl.BlockSpec((1, img_per_block, N_CLASSES), lambda b: (b, 0, 0)),
        scratch_shapes=[
            pltpu.VMEM((rows + PAD, W * C_IN), jnp.float32),   # staged input
            pltpu.VMEM((rows + PAD, W * C1), jnp.float32),     # relu(conv1)
            pltpu.VMEM((rows + PAD, W * C2), jnp.float32),     # relu(conv2)
        ],
        compiler_params=pltpu.CompilerParams(dimension_semantics=("parallel",)),
    )(x, a1, a2, a3, sel0, sel1, m0, m1, b1, l2w, b2)

    return out.reshape(n_pad, N_CLASSES)[:n]


# --------------------------- pure-JAX reference ----------------------------- #

def reference_forward(x, p):
    def conv(t, w):
        return lax.conv_general_dilated(
            t, w, (1, 1), "VALID", dimension_numbers=("NCHW", "OIHW", "NCHW"))

    def pool(t):
        n, c, h, w = t.shape
        return t.reshape(n, c, h // 2, 2, w // 2, 2).mean(axis=(3, 5))

    h1 = pool(jax.nn.relu(conv(x, p["conv1_w"])))
    h2 = pool(jax.nn.relu(conv(h1, p["conv2_w"])))
    h3 = jax.nn.relu(conv(h2, p["conv3_w"]))
    flat = h3.reshape(h3.shape[0], -1)
    z = jax.nn.relu(flat @ p["lin1_w"].T + p["lin1_b"])
    return z @ p["lin2_w"].T + p["lin2_b"]


# ---------------------------------- main ------------------------------------ #

def make_params(key):
    ks = jax.random.split(key, 7)

    def init(k, shape, fan_in):
        return (jax.random.normal(k, shape, jnp.float32) / np.sqrt(fan_in)).astype(jnp.float32)

    return {
        "conv1_w": init(ks[0], (C1, C_IN, K1, K1), C_IN * K1 * K1),
        "conv2_w": init(ks[1], (C2, C1, K2, K2), C1 * K2 * K2),
        "conv3_w": init(ks[2], (C3, C2, K3, K3), C2 * K3 * K3),
        "lin1_w": init(ks[3], (HIDDEN, 480), 480),
        "lin1_b": init(ks[4], (HIDDEN,), 480),
        "lin2_w": init(ks[5], (N_CLASSES, HIDDEN), HIDDEN),
        "lin2_b": init(ks[6], (N_CLASSES,), HIDDEN),
    }


if __name__ == "__main__":
    root = jax.random.PRNGKey(0)
    k_x, k_p = jax.random.split(root)
    # Input consistent with the module: 32x32 RGB (480 = 120*2*2 flatten).
    # batch=6 with 4 images/block -> 2 grid steps (second block partially padded).
    x = jax.random.normal(k_x, (6, 3, 32, 32), jnp.float32)
    params = make_params(k_p)

    fwd = jax.jit(lenet_small_forward)
    out = jax.block_until_ready(fwd(x, params))
    assert out.shape == (6, 10) and out.dtype == jnp.float32

    ref = jax.block_until_ready(reference_forward(x, params))
    np.testing.assert_allclose(np.asarray(out), np.asarray(ref), rtol=2e-3, atol=2e-3)

    print("KERNEL_OK")
</pallas_src>

<mosaic_0001>
module attributes {stable_mosaic.version = 11 : i64} {
  func.func @_lenet_block_kernel(%arg0: i32, %arg1: memref<1x128x96xf32, #tpu.memory_space<vmem>>, %arg2: memref<5x96x192xf32, #tpu.memory_space<vmem>>, %arg3: memref<5x192x512xf32, #tpu.memory_space<vmem>>, %arg4: memref<4x512x240xf32, #tpu.memory_space<vmem>>, %arg5: memref<4x128xf32, #tpu.memory_space<vmem>>, %arg6: memref<4x128xf32, #tpu.memory_space<vmem>>, %arg7: memref<240x84xf32, #tpu.memory_space<vmem>>, %arg8: memref<240x84xf32, #tpu.memory_space<vmem>>, %arg9: memref<1x84xf32, #tpu.memory_space<vmem>>, %arg10: memref<84x10xf32, #tpu.memory_space<vmem>>, %arg11: memref<1x10xf32, #tpu.memory_space<vmem>>, %arg12: memref<1x4x10xf32, #tpu.memory_space<vmem>>, %arg13: memref<144x96xf32, #tpu.memory_space<vmem>>, %arg14: memref<144x192xf32, #tpu.memory_space<vmem>>, %arg15: memref<144x512xf32, #tpu.memory_space<vmem>>) attributes {dimension_semantics = [#tpu.dimension_semantics<parallel>], iteration_bounds = array<i64: 2>, scalar_prefetch = 0 : i64, scratch_operands = 3 : i64, tpu.core_type = #tpu.core_type<tc>, window_params = [{transform_indices = @transform_0, window_bounds = array<i64: 1, 128, 96>}, {pipeline_mode = #tpu.pipeline_mode<synchronous>, transform_indices = @transform_1, window_bounds = array<i64: 5, 96, 192>}, {pipeline_mode = #tpu.pipeline_mode<synchronous>, transform_indices = @transform_2, window_bounds = array<i64: 5, 192, 512>}, {pipeline_mode = #tpu.pipeline_mode<synchronous>, transform_indices = @transform_3, window_bounds = array<i64: 4, 512, 240>}, {pipeline_mode = #tpu.pipeline_mode<synchronous>, transform_indices = @transform_4, window_bounds = array<i64: 4, 128>}, {pipeline_mode = #tpu.pipeline_mode<synchronous>, transform_indices = @transform_5, window_bounds = array<i64: 4, 128>}, {pipeline_mode = #tpu.pipeline_mode<synchronous>, transform_indices = @transform_6, window_bounds = array<i64: 240, 84>}, {pipeline_mode = #tpu.pipeline_mode<synchronous>, transform_indices = @transform_7, window_bounds = array<i64: 240, 84>}, {pipeline_mode = #tpu.pipeline_mode<synchronous>, transform_indices = @transform_8, window_bounds = array<i64: 1, 84>}, {pipeline_mode = #tpu.pipeline_mode<synchronous>, transform_indices = @transform_9, window_bounds = array<i64: 84, 10>}, {pipeline_mode = #tpu.pipeline_mode<synchronous>, transform_indices = @transform_10, window_bounds = array<i64: 1, 10>}, {transform_indices = @transform_11, window_bounds = array<i64: 1, 4, 10>}]} {
    %cst = arith.constant 0.000000e+00 : f32
    %0 = vector.broadcast %cst : f32 to vector<16x96xf32>
    %c128 = arith.constant 128 : index
    %c0 = arith.constant 0 : index
    %1 = vector.load %arg13[%c128, %c0] : memref<144x96xf32, #tpu.memory_space<vmem>>, vector<16x96xf32>
    tpu.vector_store %arg13[%c128, %c0], %0 {strides = array<i32>} : memref<144x96xf32, #tpu.memory_space<vmem>>, vector<16x96xf32>,
    %cst_0 = arith.constant 0.000000e+00 : f32
    %2 = vector.broadcast %cst_0 : f32 to vector<16x192xf32>
    %c128_1 = arith.constant 128 : index
    %c0_2 = arith.constant 0 : index
    %3 = vector.load %arg14[%c128_1, %c0_2] : memref<144x192xf32, #tpu.memory_space<vmem>>, vector<16x192xf32>
    tpu.vector_store %arg14[%c128_1, %c0_2], %2 {strides = array<i32>} : memref<144x192xf32, #tpu.memory_space<vmem>>, vector<16x192xf32>,
    %cst_3 = arith.constant 0.000000e+00 : f32
    %4 = vector.broadcast %cst_3 : f32 to vector<16x512xf32>
    %c128_4 = arith.constant 128 : index
    %c0_5 = arith.constant 0 : index
    %5 = vector.load %arg15[%c128_4, %c0_5] : memref<144x512xf32, #tpu.memory_space<vmem>>, vector<16x512xf32>
    tpu.vector_store %arg15[%c128_4, %c0_5], %4 {strides = array<i32>} : memref<144x512xf32, #tpu.memory_space<vmem>>, vector<16x512xf32>,
    %c0_6 = arith.constant 0 : index
    %c0_7 = arith.constant 0 : index
    %c0_8 = arith.constant 0 : index
    %6 = vector.load %arg1[%c0_6, %c0_7, %c0_8] : memref<1x128x96xf32, #tpu.memory_space<vmem>>, vector<1x128x96xf32>
    %7 = vector.shape_cast %6 : vector<1x128x96xf32> to vector<128x96xf32>
    %c0_9 = arith.constant 0 : index
    %c0_10 = arith.constant 0 : index
    %8 = vector.load %arg13[%c0_9, %c0_10] : memref<144x96xf32, #tpu.memory_space<vmem>>, vector<128x96xf32>
    tpu.vector_store %arg13[%c0_9, %c0_10], %7 {strides = array<i32>} : memref<144x96xf32, #tpu.memory_space<vmem>>, vector<128x96xf32>,
    %c0_11 = arith.constant 0 : index
    %c0_12 = arith.constant 0 : index
    %9 = vector.load %arg13[%c0_11, %c0_12] : memref<144x96xf32, #tpu.memory_space<vmem>>, vector<128x96xf32>
    %c0_13 = arith.constant 0 : index
    %c0_14 = arith.constant 0 : index
    %c0_15 = arith.constant 0 : index
    %10 = vector.load %arg2[%c0_13, %c0_14, %c0_15] : memref<5x96x192xf32, #tpu.memory_space<vmem>>, vector<1x96x192xf32>
    %11 = vector.shape_cast %10 : vector<1x96x192xf32> to vector<96x192xf32>
    %cst_16 = arith.constant dense<0.000000e+00> : vector<128x192xf32>
    %12 = tpu.matmul %9, %11, %cst_16 {dimension_numbers = #tpu.dot_dimension_numbers<[1], [0], [0], [1], [0, 0, 1, 1], [], []>} : vector<128x96xf32>, vector<96x192xf32>, vector<128x192xf32> -> vector<128x192xf32>
    %c1 = arith.constant 1 : index
    %c0_17 = arith.constant 0 : index
    %13 = vector.load %arg13[%c1, %c0_17] : memref<144x96xf32, #tpu.memory_space<vmem>>, vector<128x96xf32>
    %c1_18 = arith.constant 1 : index
    %c0_19 = arith.constant 0 : index
    %c0_20 = arith.constant 0 : index
    %14 = vector.load %arg2[%c1_18, %c0_19, %c0_20] : memref<5x96x192xf32, #tpu.memory_space<vmem>>, vector<1x96x192xf32>
    %15 = vector.shape_cast %14 : vector<1x96x192xf32> to vector<96x192xf32>
    %cst_21 = arith.constant dense<0.000000e+00> : vector<128x192xf32>
    %16 = tpu.matmul %13, %15, %cst_21 {dimension_numbers = #tpu.dot_dimension_numbers<[1], [0], [0], [1], [0, 0, 1, 1], [], []>} : vector<128x96xf32>, vector<96x192xf32>, vector<128x192xf32> -> vector<128x192xf32>
    %17 = arith.addf %12, %16 : vector<128x192xf32>
    %c2 = arith.constant 2 : index
    %c0_22 = arith.constant 0 : index
    %18 = vector.load %arg13[%c2, %c0_22] : memref<144x96xf32, #tpu.memory_space<vmem>>, vector<128x96xf32>
    %c2_23 = arith.constant 2 : index
    %c0_24 = arith.constant 0 : index
    %c0_25 = arith.constant 0 : index
    %19 = vector.load %arg2[%c2_23, %c0_24, %c0_25] : memref<5x96x192xf32, #tpu.memory_space<vmem>>, vector<1x96x192xf32>
    %20 = vector.shape_cast %19 : vector<1x96x192xf32> to vector<96x192xf32>
    %cst_26 = arith.constant dense<0.000000e+00> : vector<128x192xf32>
    %21 = tpu.matmul %18, %20, %cst_26 {dimension_numbers = #tpu.dot_dimension_numbers<[1], [0], [0], [1], [0, 0, 1, 1], [], []>} : vector<128x96xf32>, vector<96x192xf32>, vector<128x192xf32> -> vector<128x192xf32>
    %22 = arith.addf %17, %21 : vector<128x192xf32>
    %c3 = arith.constant 3 : index
    %c0_27 = arith.constant 0 : index
    %23 = vector.load %arg13[%c3, %c0_27] : memref<144x96xf32, #tpu.memory_space<vmem>>, vector<128x96xf32>
    %c3_28 = arith.constant 3 : index
    %c0_29 = arith.constant 0 : index
    %c0_30 = arith.constant 0 : index
    %24 = vector.load %arg2[%c3_28, %c0_29, %c0_30] : memref<5x96x192xf32, #tpu.memory_space<vmem>>, vector<1x96x192xf32>
    %25 = vector.shape_cast %24 : vector<1x96x192xf32> to vector<96x192xf32>
    %cst_31 = arith.constant dense<0.000000e+00> : vector<128x192xf32>
    %26 = tpu.matmul %23, %25, %cst_31 {dimension_numbers = #tpu.dot_dimension_numbers<[1], [0], [0], [1], [0, 0, 1, 1], [], []>} : vector<128x96xf32>, vector<96x192xf32>, vector<128x192xf32> -> vector<128x192xf32>
    %27 = arith.addf %22, %26 : vector<128x192xf32>
    %c4 = arith.constant 4 : index
    %c0_32 = arith.constant 0 : index
    %28 = vector.load %arg13[%c4, %c0_32] : memref<144x96xf32, #tpu.memory_space<vmem>>, vector<128x96xf32>
    %c4_33 = arith.constant 4 : index
    %c0_34 = arith.constant 0 : index
    %c0_35 = arith.constant 0 : index
    %29 = vector.load %arg2[%c4_33, %c0_34, %c0_35] : memref<5x96x192xf32, #tpu.memory_space<vmem>>, vector<1x96x192xf32>
    %30 = vector.shape_cast %29 : vector<1x96x192xf32> to vector<96x192xf32>
    %cst_36 = arith.constant dense<0.000000e+00> : vector<128x192xf32>
    %31 = tpu.matmul %28, %30, %cst_36 {dimension_numbers = #tpu.dot_dimension_numbers<[1], [0], [0], [1], [0, 0, 1, 1], [], []>} : vector<128x96xf32>, vector<96x192xf32>, vector<128x192xf32> -> vector<128x192xf32>
    %32 = arith.addf %27, %31 : vector<128x192xf32>
    %cst_37 = arith.constant 0.000000e+00 : f32
    %33 = vector.broadcast %cst_37 : f32 to vector<128x192xf32>
    %34 = arith.maximumf %32, %33 : vector<128x192xf32>
    %c0_38 = arith.constant 0 : index
    %c0_39 = arith.constant 0 : index
    %35 = vector.load %arg14[%c0_38, %c0_39] : memref<144x192xf32, #tpu.memory_space<vmem>>, vector<128x192xf32>
    tpu.vector_store %arg14[%c0_38, %c0_39], %34 {strides = array<i32>} : memref<144x192xf32, #tpu.memory_space<vmem>>, vector<128x192xf32>,
    %c0_40 = arith.constant 0 : index
    %c0_41 = arith.constant 0 : index
    %36 = vector.load %arg14[%c0_40, %c0_41] : memref<144x192xf32, #tpu.memory_space<vmem>>, vector<128x192xf32>
    %c1_42 = arith.constant 1 : index
    %c0_43 = arith.constant 0 : index
    %37 = vector.load %arg14[%c1_42, %c0_43] : memref<144x192xf32, #tpu.memory_space<vmem>>, vector<128x192xf32>
    %38 = arith.addf %36, %37 : vector<128x192xf32>
    %c0_44 = arith.constant 0 : index
    %c0_45 = arith.constant 0 : index
    %c0_46 = arith.constant 0 : index
    %39 = vector.load %arg3[%c0_44, %c0_45, %c0_46] : memref<5x192x512xf32, #tpu.memory_space<vmem>>, vector<1x192x512xf32>
    %40 = vector.shape_cast %39 : vector<1x192x512xf32> to vector<192x512xf32>
    %cst_47 = arith.constant dense<0.000000e+00> : vector<128x512xf32>
    %41 = tpu.matmul %38, %40, %cst_47 {dimension_numbers = #tpu.dot_dimension_numbers<[1], [0], [0], [1], [0, 0, 1, 1], [], []>} : vector<128x192xf32>, vector<192x512xf32>, vector<128x512xf32> -> vector<128x512xf32>
    %c2_48 = arith.constant 2 : index
    %c0_49 = arith.constant 0 : index
    %42 = vector.load %arg14[%c2_48, %c0_49] : memref<144x192xf32, #tpu.memory_space<vmem>>, vector<128x192xf32>
    %c3_50 = arith.constant 3 : index
    %c0_51 = arith.constant 0 : index
    %43 = vector.load %arg14[%c3_50, %c0_51] : memref<144x192xf32, #tpu.memory_space<vmem>>, vector<128x192xf32>
    %44 = arith.addf %42, %43 : vector<128x192xf32>
    %c1_52 = arith.constant 1 : index
    %c0_53 = arith.constant 0 : index
    %c0_54 = arith.constant 0 : index
    %45 = vector.load %arg3[%c1_52, %c0_53, %c0_54] : memref<5x192x512xf32, #tpu.memory_space<vmem>>, vector<1x192x512xf32>
    %46 = vector.shape_cast %45 : vector<1x192x512xf32> to vector<192x512xf32>
    %cst_55 = arith.constant dense<0.000000e+00> : vector<128x512xf32>
    %47 = tpu.matmul %44, %46, %cst_55 {dimension_numbers = #tpu.dot_dimension_numbers<[1], [0], [0], [1], [0, 0, 1, 1], [], []>} : vector<128x192xf32>, vector<192x512xf32>, vector<128x512xf32> -> vector<128x512xf32>
    %48 = arith.addf %41, %47 : vector<128x512xf32>
    %c4_56 = arith.constant 4 : index
    %c0_57 = arith.constant 0 : index
    %49 = vector.load %arg14[%c4_56, %c0_57] : memref<144x192xf32, #tpu.memory_space<vmem>>, vector<128x192xf32>
    %c5 = arith.constant 5 : index
    %c0_58 = arith.constant 0 : index
    %50 = vector.load %arg14[%c5, %c0_58] : memref<144x192xf32, #tpu.memory_space<vmem>>, vector<128x192xf32>
    %51 = arith.addf %49, %50 : vector<128x192xf32>
    %c2_59 = arith.constant 2 : index
    %c0_60 = arith.constant 0 : index
    %c0_61 = arith.constant 0 : index
    %52 = vector.load %arg3[%c2_59, %c0_60, %c0_61] : memref<5x192x512xf32, #tpu.memory_space<vmem>>, vector<1x192x512xf32>
    %53 = vector.shape_cast %52 : vector<1x192x512xf32> to vector<192x512xf32>
    %cst_62 = arith.constant dense<0.000000e+00> : vector<128x512xf32>
    %54 = tpu.matmul %51, %53, %cst_62 {dimension_numbers = #tpu.dot_dimension_numbers<[1], [0], [0], [1], [0, 0, 1, 1], [], []>} : vector<128x192xf32>, vector<192x512xf32>, vector<128x512xf32> -> vector<128x512xf32>
    %55 = arith.addf %48, %54 : vector<128x512xf32>
    %c6 = arith.constant 6 : index
    %c0_63 = arith.constant 0 : index
    %56 = vector.load %arg14[%c6, %c0_63] : memref<144x192xf32, #tpu.memory_space<vmem>>, vector<128x192xf32>
    %c7 = arith.constant 7 : index
    %c0_64 = arith.constant 0 : index
    %57 = vector.load %arg14[%c7, %c0_64] : memref<144x192xf32, #tpu.memory_space<vmem>>, vector<128x192xf32>
    %58 = arith.addf %56, %57 : vector<128x192xf32>
    %c3_65 = arith.constant 3 : index
    %c0_66 = arith.constant 0 : index
    %c0_67 = arith.constant 0 : index
    %59 = vector.load %arg3[%c3_65, %c0_66, %c0_67] : memref<5x192x512xf32, #tpu.memory_space<vmem>>, vector<1x192x512xf32>
    %60 = vector.shape_cast %59 : vector<1x192x512xf32> to vector<192x512xf32>
    %cst_68 = arith.constant dense<0.000000e+00> : vector<128x512xf32>
    %61 = tpu.matmul %58, %60, %cst_68 {dimension_numbers = #tpu.dot_dimension_numbers<[1], [0], [0], [1], [0, 0, 1, 1], [], []>} : vector<128x192xf32>, vector<192x512xf32>, vector<128x512xf32> -> vector<128x512xf32>
    %62 = arith.addf %55, %61 : vector<128x512xf32>
    %c8 = arith.constant 8 : index
    %c0_69 = arith.constant 0 : index
    %63 = vector.load %arg14[%c8, %c0_69] : memref<144x192xf32, #tpu.memory_space<vmem>>, vector<128x192xf32>
    %c9 = arith.constant 9 : index
    %c0_70 = arith.constant 0 : index
    %64 = vector.load %arg14[%c9, %c0_70] : memref<144x192xf32, #tpu.memory_space<vmem>>, vector<128x192xf32>
    %65 = arith.addf %63, %64 : vector<128x192xf32>
    %c4_71 = arith.constant 4 : index
    %c0_72 = arith.constant 0 : index
    %c0_73 = arith.constant 0 : index
    %66 = vector.load %arg3[%c4_71, %c0_72, %c0_73] : memref<5x192x512xf32, #tpu.memory_space<vmem>>, vector<1x192x512xf32>
    %67 = vector.shape_cast %66 : vector<1x192x512xf32> to vector<192x512xf32>
    %cst_74 = arith.constant dense<0.000000e+00> : vector<128x512xf32>
    %68 = tpu.matmul %65, %67, %cst_74 {dimension_numbers = #tpu.dot_dimension_numbers<[1], [0], [0], [1], [0, 0, 1, 1], [], []>} : vector<128x192xf32>, vector<192x512xf32>, vector<128x512xf32> -> vector<128x512xf32>
    %69 = arith.addf %62, %68 : vector<128x512xf32>
    %cst_75 = arith.constant 0.000000e+00 : f32
    %70 = vector.broadcast %cst_75 : f32 to vector<128x512xf32>
    %71 = arith.maximumf %69, %70 : vector<128x512xf32>
    %c0_76 = arith.constant 0 : index
    %c0_77 = arith.constant 0 : index
    %72 = vector.load %arg15[%c0_76, %c0_77] : memref<144x512xf32, #tpu.memory_space<vmem>>, vector<128x512xf32>
    tpu.vector_store %arg15[%c0_76, %c0_77], %71 {strides = array<i32>} : memref<144x512xf32, #tpu.memory_space<vmem>>, vector<128x512xf32>,
    %c0_78 = arith.constant 0 : index
    %c0_79 = arith.constant 0 : index
    %73 = vector.load %arg15[%c0_78, %c0_79] : memref<144x512xf32, #tpu.memory_space<vmem>>, vector<128x512xf32>
    %c2_80 = arith.constant 2 : index
    %c0_81 = arith.constant 0 : index
    %74 = vector.load %arg15[%c2_80, %c0_81] : memref<144x512xf32, #tpu.memory_space<vmem>>, vector<128x512xf32>
    %75 = arith.addf %73, %74 : vector<128x512xf32>
    %c0_82 = arith.constant 0 : index
    %c0_83 = arith.constant 0 : index
    %c0_84 = arith.constant 0 : index
    %76 = vector.load %arg4[%c0_82, %c0_83, %c0_84] : memref<4x512x240xf32, #tpu.memory_space<vmem>>, vector<1x512x240xf32>
    %77 = vector.shape_cast %76 : vector<1x512x240xf32> to vector<512x240xf32>
    %cst_85 = arith.constant dense<0.000000e+00> : vector<128x240xf32>
    %78 = tpu.matmul %75, %77, %cst_85 {dimension_numbers = #tpu.dot_dimension_numbers<[1], [0], [0], [1], [0, 0, 1, 1], [], []>} : vector<128x512xf32>, vector<512x240xf32>, vector<128x240xf32> -> vector<128x240xf32>
    %c4_86 = arith.constant 4 : index
    %c0_87 = arith.constant 0 : index
    %79 = vector.load %arg15[%c4_86, %c0_87] : memref<144x512xf32, #tpu.memory_space<vmem>>, vector<128x512xf32>
    %c6_88 = arith.constant 6 : index
    %c0_89 = arith.constant 0 : index
    %80 = vector.load %arg15[%c6_88, %c0_89] : memref<144x512xf32, #tpu.memory_space<vmem>>, vector<128x512xf32>
    %81 = arith.addf %79, %80 : vector<128x512xf32>
    %c1_90 = arith.constant 1 : index
    %c0_91 = arith.constant 0 : index
    %c0_92 = arith.constant 0 : index
    %82 = vector.load %arg4[%c1_90, %c0_91, %c0_92] : memref<4x512x240xf32, #tpu.memory_space<vmem>>, vector<1x512x240xf32>
    %83 = vector.shape_cast %82 : vector<1x512x240xf32> to vector<512x240xf32>
    %cst_93 = arith.constant dense<0.000000e+00> : vector<128x240xf32>
    %84 = tpu.matmul %81, %83, %cst_93 {dimension_numbers = #tpu.dot_dimension_numbers<[1], [0], [0], [1], [0, 0, 1, 1], [], []>} : vector<128x512xf32>, vector<512x240xf32>, vector<128x240xf32> -> vector<128x240xf32>
    %85 = arith.addf %78, %84 : vector<128x240xf32>
    %c8_94 = arith.constant 8 : index
    %c0_95 = arith.constant 0 : index
    %86 = vector.load %arg15[%c8_94, %c0_95] : memref<144x512xf32, #tpu.memory_space<vmem>>, vector<128x512xf32>
    %c10 = arith.constant 10 : index
    %c0_96 = arith.constant 0 : index
    %87 = vector.load %arg15[%c10, %c0_96] : memref<144x512xf32, #tpu.memory_space<vmem>>, vector<128x512xf32>
    %88 = arith.addf %86, %87 : vector<128x512xf32>
    %c2_97 = arith.constant 2 : index
    %c0_98 = arith.constant 0 : index
    %c0_99 = arith.constant 0 : index
    %89 = vector.load %arg4[%c2_97, %c0_98, %c0_99] : memref<4x512x240xf32, #tpu.memory_space<vmem>>, vector<1x512x240xf32>
    %90 = vector.shape_cast %89 : vector<1x512x240xf32> to vector<512x240xf32>
    %cst_100 = arith.constant dense<0.000000e+00> : vector<128x240xf32>
    %91 = tpu.matmul %88, %90, %cst_100 {dimension_numbers = #tpu.dot_dimension_numbers<[1], [0], [0], [1], [0, 0, 1, 1], [], []>} : vector<128x512xf32>, vector<512x240xf32>, vector<128x240xf32> -> vector<128x240xf32>
    %92 = arith.addf %85, %91 : vector<128x240xf32>
    %c12 = arith.constant 12 : index
    %c0_101 = arith.constant 0 : index
    %93 = vector.load %arg15[%c12, %c0_101] : memref<144x512xf32, #tpu.memory_space<vmem>>, vector<128x512xf32>
    %c14 = arith.constant 14 : index
    %c0_102 = arith.constant 0 : index
    %94 = vector.load %arg15[%c14, %c0_102] : memref<144x512xf32, #tpu.memory_space<vmem>>, vector<128x512xf32>
    %95 = arith.addf %93, %94 : vector<128x512xf32>
    %c3_103 = arith.constant 3 : index
    %c0_104 = arith.constant 0 : index
    %c0_105 = arith.constant 0 : index
    %96 = vector.load %arg4[%c3_103, %c0_104, %c0_105] : memref<4x512x240xf32, #tpu.memory_space<vmem>>, vector<1x512x240xf32>
    %97 = vector.shape_cast %96 : vector<1x512x240xf32> to vector<512x240xf32>
    %cst_106 = arith.constant dense<0.000000e+00> : vector<128x240xf32>
    %98 = tpu.matmul %95, %97, %cst_106 {dimension_numbers = #tpu.dot_dimension_numbers<[1], [0], [0], [1], [0, 0, 1, 1], [], []>} : vector<128x512xf32>, vector<512x240xf32>, vector<128x240xf32> -> vector<128x240xf32>
    %99 = arith.addf %92, %98 : vector<128x240xf32>
    %c0_107 = arith.constant 0 : index
    %c0_108 = arith.constant 0 : index
    %100 = vector.load %arg5[%c0_107, %c0_108] : memref<4x128xf32, #tpu.memory_space<vmem>>, vector<4x128xf32>
    %cst_109 = arith.constant dense<0.000000e+00> : vector<4x240xf32>
    %101 = tpu.matmul %100, %99, %cst_109 {dimension_numbers = #tpu.dot_dimension_numbers<[1], [0], [0], [1], [0, 0, 1, 1], [], []>} : vector<4x128xf32>, vector<128x240xf32>, vector<4x240xf32> -> vector<4x240xf32>
    %cst_110 = arith.constant 0.000000e+00 : f32
    %102 = vector.broadcast %cst_110 : f32 to vector<4x240xf32>
    %103 = arith.maximumf %101, %102 : vector<4x240xf32>
    %c0_111 = arith.constant 0 : index
    %c0_112 = arith.constant 0 : index
    %104 = vector.load %arg6[%c0_111, %c0_112] : memref<4x128xf32, #tpu.memory_space<vmem>>, vector<4x128xf32>
    %cst_113 = arith.constant dense<0.000000e+00> : vector<4x240xf32>
    %105 = tpu.matmul %104, %99, %cst_113 {dimension_numbers = #tpu.dot_dimension_numbers<[1], [0], [0], [1], [0, 0, 1, 1], [], []>} : vector<4x128xf32>, vector<128x240xf32>, vector<4x240xf32> -> vector<4x240xf32>
    %cst_114 = arith.constant 0.000000e+00 : f32
    %106 = vector.broadcast %cst_114 : f32 to vector<4x240xf32>
    %107 = arith.maximumf %105, %106 : vector<4x240xf32>
    %c0_115 = arith.constant 0 : index
    %c0_116 = arith.constant 0 : index
    %108 = vector.load %arg7[%c0_115, %c0_116] : memref<240x84xf32, #tpu.memory_space<vmem>>, vector<240x84xf32>
    %cst_117 = arith.constant dense<0.000000e+00> : vector<4x84xf32>
    %109 = tpu.matmul %103, %108, %cst_117 {dimension_numbers = #tpu.dot_dimension_numbers<[1], [0], [0], [1], [0, 0, 1, 1], [], []>} : vector<4x240xf32>, vector<240x84xf32>, vector<4x84xf32> -> vector<4x84xf32>
    %c0_118 = arith.constant 0 : index
    %c0_119 = arith.constant 0 : index
    %110 = vector.load %arg8[%c0_118, %c0_119] : memref<240x84xf32, #tpu.memory_space<vmem>>, vector<240x84xf32>
    %cst_120 = arith.constant dense<0.000000e+00> : vector<4x84xf32>
    %111 = tpu.matmul %107, %110, %cst_120 {dimension_numbers = #tpu.dot_dimension_numbers<[1], [0], [0], [1], [0, 0, 1, 1], [], []>} : vector<4x240xf32>, vector<240x84xf32>, vector<4x84xf32> -> vector<4x84xf32>
    %112 = arith.addf %109, %111 : vector<4x84xf32>
    %c0_121 = arith.constant 0 : index
    %c0_122 = arith.constant 0 : index
    %113 = vector.load %arg9[%c0_121, %c0_122] : memref<1x84xf32, #tpu.memory_space<vmem>>, vector<1x84xf32>
    %114 = vector.broadcast %113 : vector<1x84xf32> to vector<4x84xf32>
    %115 = arith.addf %112, %114 : vector<4x84xf32>
    %cst_123 = arith.constant 0.000000e+00 : f32
    %116 = vector.broadcast %cst_123 : f32 to vector<4x84xf32>
    %117 = arith.maximumf %115, %116 : vector<4x84xf32>
    %c0_124 = arith.constant 0 : index
    %c0_125 = arith.constant 0 : index
    %118 = vector.load %arg10[%c0_124, %c0_125] : memref<84x10xf32, #tpu.memory_space<vmem>>, vector<84x10xf32>
    %cst_126 = arith.constant dense<0.000000e+00> : vector<4x10xf32>
    %119 = tpu.matmul %117, %118, %cst_126 {dimension_numbers = #tpu.dot_dimension_numbers<[1], [0], [0], [1], [0, 0, 1, 1], [], []>} : vector<4x84xf32>, vector<84x10xf32>, vector<4x10xf32> -> vector<4x10xf32>
    %c0_127 = arith.constant 0 : index
    %c0_128 = arith.constant 0 : index
    %120 = vector.load %arg11[%c0_127, %c0_128] : memref<1x10xf32, #tpu.memory_space<vmem>>, vector<1x10xf32>
    %121 = vector.broadcast %120 : vector<1x10xf32> to vector<4x10xf32>
    %122 = arith.addf %119, %121 : vector<4x10xf32>
    %c0_129 = arith.constant 0 : index
    %c0_130 = arith.constant 0 : index
    %c0_131 = arith.constant 0 : index
    %123 = vector.load %arg12[%c0_129, %c0_130, %c0_131] : memref<1x4x10xf32, #tpu.memory_space<vmem>>, vector<1x4x10xf32>
    %124 = vector.shape_cast %123 : vector<1x4x10xf32> to vector<4x10xf32>
    %125 = vector.shape_cast %122 : vector<4x10xf32> to vector<1x4x10xf32>
    tpu.vector_store %arg12[%c0_129, %c0_130, %c0_131], %125 {strides = array<i32>} : memref<1x4x10xf32, #tpu.memory_space<vmem>>, vector<1x4x10xf32>,
    return
  }
  func.func @transform_0(%arg0: i32) -> (i32, i32, i32) {
    %c0_i32 = arith.constant 0 : i32
    %c0_i32_0 = arith.constant 0 : i32
    %c0_i32_1 = arith.constant 0 : i32
    return %arg0, %c0_i32, %c0_i32_0 : i32, i32, i32
  }
  func.func @transform_1(%arg0: i32) -> (i32, i32, i32) {
    %c0_i32 = arith.constant 0 : i32
    %c0_i32_0 = arith.constant 0 : i32
    %c0_i32_1 = arith.constant 0 : i32
    %c0_i32_2 = arith.constant 0 : i32
    return %c0_i32, %c0_i32_0, %c0_i32_1 : i32, i32, i32
  }
  func.func @transform_2(%arg0: i32) -> (i32, i32, i32) {
    %c0_i32 = arith.constant 0 : i32
    %c0_i32_0 = arith.constant 0 : i32
    %c0_i32_1 = arith.constant 0 : i32
    %c0_i32_2 = arith.constant 0 : i32
    return %c0_i32, %c0_i32_0, %c0_i32_1 : i32, i32, i32
  }
  func.func @transform_3(%arg0: i32) -> (i32, i32, i32) {
    %c0_i32 = arith.constant 0 : i32
    %c0_i32_0 = arith.constant 0 : i32
    %c0_i32_1 = arith.constant 0 : i32
    %c0_i32_2 = arith.constant 0 : i32
    return %c0_i32, %c0_i32_0, %c0_i32_1 : i32, i32, i32
  }
  func.func @transform_4(%arg0: i32) -> (i32, i32) {
    %c0_i32 = arith.constant 0 : i32
    %c0_i32_0 = arith.constant 0 : i32
    %c0_i32_1 = arith.constant 0 : i32
    return %c0_i32, %c0_i32_0 : i32, i32
  }
  func.func @transform_5(%arg0: i32) -> (i32, i32) {
    %c0_i32 = arith.constant 0 : i32
    %c0_i32_0 = arith.constant 0 : i32
    %c0_i32_1 = arith.constant 0 : i32
    return %c0_i32, %c0_i32_0 : i32, i32
  }
  func.func @transform_6(%arg0: i32) -> (i32, i32) {
    %c0_i32 = arith.constant 0 : i32
    %c0_i32_0 = arith.constant 0 : i32
    %c0_i32_1 = arith.constant 0 : i32
    return %c0_i32, %c0_i32_0 : i32, i32
  }
  func.func @transform_7(%arg0: i32) -> (i32, i32) {
    %c0_i32 = arith.constant 0 : i32
    %c0_i32_0 = arith.constant 0 : i32
    %c0_i32_1 = arith.constant 0 : i32
    return %c0_i32, %c0_i32_0 : i32, i32
  }
  func.func @transform_8(%arg0: i32) -> (i32, i32) {
    %c0_i32 = arith.constant 0 : i32
    %c0_i32_0 = arith.constant 0 : i32
    %c0_i32_1 = arith.constant 0 : i32
    return %c0_i32, %c0_i32_0 : i32, i32
  }
  func.func @transform_9(%arg0: i32) -> (i32, i32) {
    %c0_i32 = arith.constant 0 : i32
    %c0_i32_0 = arith.constant 0 : i32
    %c0_i32_1 = arith.constant 0 : i32
    return %c0_i32, %c0_i32_0 : i32, i32
  }
  func.func @transform_10(%arg0: i32) -> (i32, i32) {
    %c0_i32 = arith.constant 0 : i32
    %c0_i32_0 = arith.constant 0 : i32
    %c0_i32_1 = arith.constant 0 : i32
    return %c0_i32, %c0_i32_0 : i32, i32
  }
  func.func @transform_11(%arg0: i32) -> (i32, i32, i32) {
    %c0_i32 = arith.constant 0 : i32
    %c0_i32_0 = arith.constant 0 : i32
    %c0_i32_1 = arith.constant 0 : i32
    return %arg0, %c0_i32, %c0_i32_0 : i32, i32, i32
  }
}

</mosaic_0001>

<bundles_post_ra>
// kernel: lenet_small_forward.1
= control target key start
LH: loop header
LB: loop body
LE: loop exit
PB: predicated region body
PF: predicated region fallthrough
CT: control target
= control target key end

     0   :  { %16 = vsyncpa [#allocation6], 0  ;;  %s19088_s0 = inlined_call_operand.vmem [shape: f32[2,128,96], index: 0, kind: input, shape index: {}]   ;;  %s19089_s1 = inlined_call_operand.vmem [shape: f32[5,96,192], index: 1, kind: input, shape index: {}]   ;;  %s19090_s2 = inlined_call_operand.vmem [shape: f32[5,192,512], index: 2, kind: input, shape index: {}]   ;;  %s19091_s3 = inlined_call_operand.vmem [shape: f32[4,512,240], index: 3, kind: input, shape index: {}]   ;;  %s19092_s4 = inlined_call_operand.vmem [shape: f32[4,128], index: 4, kind: input, shape index: {}]   ;;  %s19093_s5 = inlined_call_operand.vmem [shape: f32[4,128], index: 5, kind: input, shape index: {}]   ;;  %s19094_s6 = inlined_call_operand.vmem [shape: f32[240,84], index: 6, kind: input, shape index: {}]   ;;  %s19095_s7 = inlined_call_operand.vmem [shape: f32[240,84], index: 7, kind: input, shape index: {}]   ;;  %s19096_s8 = inlined_call_operand.vmem [shape: f32[1,84], index: 8, kind: input, shape index: {}]   ;;  %s19097_s9 = inlined_call_operand.vmem [shape: f32[84,10], index: 9, kind: input, shape index: {}]   ;;  %s19098_s10 = inlined_call_operand.vmem [shape: f32[1,10], index: 10, kind: input, shape index: {}]   ;;  %s19099_s11 = inlined_call_operand.hbm [shape: f32[2,4,10], index: 11, kind: output, shape index: {}]  }
   0x1   :  { %18 = vsyncpa [#allocation6 + $0x1], 0  ;;  %s12451_s17 = smov 0   ;;  %s12453_s18 = smov 0  }
   0x2   :  { %s12455_s19 = smov 0   ;;  %s12457_s20 = smov 0  }
   0x3 LB: > { %19262 = sst [smem:[#allocation8_spill]] %s12381_s19  ;;  %s12472_s21 = sadd.s32 4294967295, %s12385_s20   ;;  %s12385_s20 = sphi %s12457_s20, %s19606_s20   ;;  %s12381_s19 = sphi %s12455_s19, %s19603_s19   ;;  %s12377_s18 = sphi %s12453_s18, %s19605_s18   ;;  %s12373_s17 = sphi %s12451_s17, %s19604_s17  }
   0x4   : > { %s9137_s22 = sadd.s32 4294967294, %s12385_s20   ;;  %s12476_s23 = sadd.s32 1, %s12385_s20  }
   0x5   : > { %s267_s24 = sadd.s32 1, %s12381_s19  ;;  %s264_s25 = ssub.s32 %s12385_s20, %s12476_s23 }
   0x6   : > { %p277_p0 = scmp.ne.s32.totalorder %s12381_s19, %s12377_s18  ;;  %p265_p1 = scmp.eq.s32.totalorder %s264_s25, 0 }
   0x7   : > { %p278_p2 = scmp.eq.s32.totalorder %s12472_s21, 1  ;;  %p283_p3 = scmp.ne.s32.totalorder %s12377_s18, %s12373_s17 }
   0x8   : > { %p284_p4 = scmp.eq.s32.totalorder %s9137_s22, 1  ;;  %p9140_p7 = scmp.ge.s32.totalorder %s12385_s20, 1 }
   0x9   : > { %s12487_s26 = scalar_select %p265_p1, %s12381_s19, %s267_s24  }
   0xa   : > { %p12489_p5 = por %p278_p2, %p277_p0  ;;  %p12493_p6 = por %p284_p4, %p283_p3 }
   0xb   : > { %19263 = sst [smem:[#allocation9_spill]] %s12487_s26  ;;  %p340_p8 = scmp.lt.s32.totalorder %s12385_s20, 3 }
   0xd   : > { %p341_p9 = pnand %p9140_p7, %p340_p8 }
   0xf   : > { %344 = sbr.rel (%p341_p9) target bundleno = 2771 (0xad3), region = 64 }
  0x16   : > { %v9145_v0 = vld [vmem:[%s19089_s1 + $0xc8] sm:$0xff]  ;;  %v9147_v1 = vld [vmem:[%s19089_s1 + $0xd8] sm:$0xff]  ;;  %v9144_v2 = vld [vmem:[%s19089_s1 + $0xc0] sm:$0xff]  ;;  %p380_p10 = scmp.lt.s32.totalorder %s12472_s21, 1  ;;  %vm385_vm0 = vcmask 785408   ;;  %v12387_v7 = vmov 0.0  }
  0x17   : > { %v10296_v3 = vpack.c.bf16 %v9147_v1, %v9145_v0  ;;  %v9146_v4 = vld [vmem:[%s19089_s1 + $0xd0] sm:$0xff]  ;;  %v9149_v5 = vld [vmem:[%s19089_s1 + $0xe8] sm:$0xff]  ;;  %v9151_v6 = vld [vmem:[%s19089_s1 + $0xf8] sm:$0xff]  ;;  %626 = vmatprep.mubr.f32.mxu0 %v12387_v7  ;;  %388 = vst [vmem:[#allocation3 + $0x100] sm:$0xff] %v12387_v7  ;;  %vm389_vm1 = vcmask 523264   ;;  %vm1912_vm2 = vcmask 1046528  }
  0x18   : > { %391 = vst [vmem:[#allocation3 + $0x110] sm:$0xff] %v12387_v7  ;;  %393 = vst [vmem:[#allocation4 + $0x200] sm:$0xff] %v12387_v7  ;;  %v10298_v8 = vpack.c.bf16 %v9146_v4, %v9144_v2  ;;  %v10300_v9 = vpack.c.bf16 %v9151_v6, %v9149_v5  ;;  %v9148_v10 = vld [vmem:[%s19089_s1 + $0xe0] sm:$0xff]  ;;  %v9150_v11 = vld [vmem:[%s19089_s1 + $0xf0] sm:$0xff]  ;;  %s381_s24 = scalar_select %p380_p10, %s12472_s21, 1  ;;  %vm2302_vm3 = vcmask 1045504  }
  0x19   : > { %394 = vst [vmem:[#allocation4 + $0x208] sm:$0xff] %v12387_v7  ;;  %395 = vst [vmem:[#allocation4 + $0x210] sm:$0xff] %v12387_v7  ;;  %v9153_v12 = vld [vmem:[%s19089_s1 + $0x108] sm:$0xff]  ;;  %10297 = vmatprep.subr.bf16.mxu0 %v10296_v3  ;;  %v9155_v13 = vld [vmem:[%s19089_s1 + $0x118] sm:$0xff]  ;;  %v10302_v14 = vpack.c.bf16 %v9150_v11, %v9148_v10  ;;  %vm3230_vm4 = vcmask 1043456   ;;  %vm3866_vm5 = vcmask 1041408  }
  0x1a   : > { %396 = vst [vmem:[#allocation4 + $0x218] sm:$0xff] %v12387_v7  ;;  %397 = vst [vmem:[#allocation4 + $0x220] sm:$0xff] %v12387_v7  ;;  %10299 = vmatpush1.bf16.msra.mxu0 %v10298_v8  ;;  %s10258_s30 = sshll.u32 %s381_s24, 7  ;;  %v10304_v15 = vpack.c.bf16 %v9155_v13, %v9153_v12  ;;  %v9152_v16 = vld [vmem:[%s19089_s1 + $0x100] sm:$0xff]  ;;  %v9154_v17 = vld [vmem:[%s19089_s1 + $0x110] sm:$0xff]  ;;  %vm8811_vm6 = vcmask 916480  }
  0x1b   : > { %398 = vst [vmem:[#allocation4 + $0x228] sm:$0xff] %v12387_v7  ;;  %399 = vst [vmem:[#allocation4 + $0x230] sm:$0xff] %v12387_v7  ;;  %10301 = vmatprep.subr.bf16.mxu0 %v10300_v9  ;;  %s12555_s26 = scalar_lea.vmem %s19088_s0, %s10258_s30  ;;  %v9157_v18 = vld [vmem:[%s19089_s1 + $0x128] sm:$0xff]  ;;  %v9159_v19 = vld [vmem:[%s19089_s1 + $0x138] sm:$0xff]  ;;  %v10306_v20 = vpack.c.bf16 %v9154_v17, %v9152_v16  ;;  %vm12389_vm7 = vmmov 0   ;;  %vm8985_vm8 = vcmask 687104  }
  0x1c   : > { %400 = vst [vmem:[#allocation4 + $0x238] sm:$0xff] %v12387_v7  ;;  %386 = vst.msk [vmem:[#allocation2 + $0x80] sm:$0xff] %vm385_vm0, %v12387_v7  ;;  %v9156_v21 = vld [vmem:[%s19089_s1 + $0x120] sm:$0xff]  ;;  %v402_v23 = vld [vmem:[%s12555_s26 + $0x8] sm:$0xff]  ;;  %v10308_v24 = vpack.c.bf16 %v9159_v19, %v9157_v18  ;;  %s377_s16 = sand.u32 1, %s12377_s18   ;;  %s10255_s24 = sshll.u32 %s12472_s21, 6 }
  0x1d   : > { %v401_v22 = vld [vmem:[%s12555_s26] sm:$0xff]  ;;  %v9158_v25 = vld [vmem:[%s19089_s1 + $0x130] sm:$0xff]  ;;  %v9161_v26 = vld [vmem:[%s19089_s1 + $0x148] sm:$0xff]  ;;  %418 = vst.msk [vmem:[#allocation2 + $0x8] sm:$0xff] %vm385_vm0, %v402_v23  ;;  %s9141_s22 = sshll.u32 %s377_s16, 2  ;;  %vm9062_vm9 = vcmask 76800   ;;  %s19046_s19 = scalar_lea.hbm %s19099_s11, %s10255_s24 }
  0x1e   : > { %10303 = vmatpush1.bf16.msra.mxu0 %v10302_v14  ;;  %417 = vst.msk [vmem:[#allocation2] sm:$0xff] %vm385_vm0, %v401_v22  ;;  %v403_v27 = vld [vmem:[%s12555_s26 + $0x10] sm:$0xff]  ;;  %v9163_v28 = vld [vmem:[%s19089_s1 + $0x158] sm:$0xff]  ;;  %v405_v30 = vld [vmem:[%s12555_s26 + $0x20] sm:$0xff]  ;;  %v10310_v31 = vpack.c.bf16 %v9158_v25, %v9156_v21  ;;  %s379_s12 = scalar_lea.vmem [#allocation5], %s9141_s22  ;;  %s12390_s21 = smov [#allocation5]  }
  0x1f   : > { %10305 = vmatprep.subr.bf16.mxu0 %v10304_v15  ;;  %419 = vst.msk [vmem:[#allocation2 + $0x10] sm:$0xff] %vm385_vm0, %v403_v27  ;;  %v404_v29 = vld [vmem:[%s12555_s26 + $0x18] sm:$0xff]  ;;  %421 = vst.msk [vmem:[#allocation2 + $0x20] sm:$0xff] %vm385_vm0, %v405_v30  ;;  %v406_v32 = vld [vmem:[%s12555_s26 + $0x28] sm:$0xff]  ;;  %v10312_v34 = vpack.c.bf16 %v9163_v28, %v9161_v26  ;;  %s9078_s13 = sshll.u32 %s379_s12, 4  ;;  %s12327_s22 = sshll.u32 %s12390_s21, 4  ;;  %s19048_s13 = int_to_ptr.vmem [resolvable:$true] %s9078_s13  ;;  %s12328_s22 = int_to_ptr.vmem [resolvable:$false] %s12327_s22 }
  0x20   : > { %420 = vst.msk [vmem:[#allocation2 + $0x18] sm:$0xff] %vm385_vm0, %v404_v29  ;;  %v407_v33 = vld [vmem:[%s12555_s26 + $0x30] sm:$0xff]  ;;  %v9160_v35 = vld [vmem:[%s19089_s1 + $0x140] sm:$0xff]  ;;  %422 = vst.msk [vmem:[#allocation2 + $0x28] sm:$0xff] %vm385_vm0, %v406_v32  ;;  %s12323_s15 = scalar_lea.vmem %s19048_s13, 64  ;;  %s12329_s25 = scalar_lea.vmem %s12328_s22, 128 }
  0x21   : > { %v9162_v36 = vld [vmem:[%s19089_s1 + $0x150] sm:$0xff]  ;;  %423 = vst.msk [vmem:[#allocation2 + $0x30] sm:$0xff] %vm385_vm0, %v407_v33  ;;  %v408_v37 = vld [vmem:[%s12555_s26 + $0x38] sm:$0xff]  ;;  %v9165_v38 = vld [vmem:[%s19089_s1 + $0x168] sm:$0xff]  ;;  %p12324_p11 = scmp.ne.s32.totalorder %s19048_s13, %s12323_s15  ;;  %p12330_p0 = scmp.lt.s32.totalorder %s19048_s13, %s12328_s22 }
  0x22   : > { %10307 = vmatpush1.bf16.msra.mxu0 %v10306_v20  ;;  %v9167_v39 = vld [vmem:[%s19089_s1 + $0x178] sm:$0xff]  ;;  %424 = vst.msk [vmem:[#allocation2 + $0x38] sm:$0xff] %vm385_vm0, %v408_v37  ;;  %v409_v40 = vld [vmem:[%s12555_s26 + $0x40] sm:$0xff]  ;;  %v410_v41 = vld [vmem:[%s12555_s26 + $0x48] sm:$0xff]  ;;  %v10314_v42 = vpack.c.bf16 %v9162_v36, %v9160_v35  ;;  %p12331_p1 = scmp.lt.s32.totalorder %s12329_s25, %s12323_s15 }
  0x23   : > { %10309 = vmatprep.subr.bf16.mxu0 %v10308_v24  ;;  %425 = vst.msk [vmem:[#allocation2 + $0x40] sm:$0xff] %vm385_vm0, %v409_v40  ;;  %426 = vst.msk [vmem:[#allocation2 + $0x48] sm:$0xff] %vm385_vm0, %v410_v41  ;;  %v411_v43 = vld [vmem:[%s12555_s26 + $0x50] sm:$0xff]  ;;  %v10316_v44 = vpack.c.bf16 %v9167_v39, %v9165_v38  ;;  %v9164_v45 = vld [vmem:[%s19089_s1 + $0x160] sm:$0xff]  ;;  %p12325_p12 = pnand %p12324_p11, %p12489_p5 }
  0x24   : > { %v9166_v46 = vld [vmem:[%s19089_s1 + $0x170] sm:$0xff]  ;;  %427 = vst.msk [vmem:[#allocation2 + $0x50] sm:$0xff] %vm385_vm0, %v411_v43  ;;  %v412_v47 = vld [vmem:[%s12555_s26 + $0x58] sm:$0xff]  ;;  %v450_v48 = vld [vmem:[%s19089_s1 + $0x8] sm:$0xff]  ;;  %p12332_p2 = por %p12331_p1, %p12330_p0 }
  0x25   : > { %v452_v49 = vld [vmem:[%s19089_s1 + $0x18] sm:$0xff]  ;;  %428 = vst.msk [vmem:[#allocation2 + $0x58] sm:$0xff] %vm385_vm0, %v412_v47  ;;  %v413_v50 = vld [vmem:[%s12555_s26 + $0x60] sm:$0xff]  ;;  %v10318_v51 = vpack.c.bf16 %v9166_v46, %v9164_v45  ;;  %v451_v54 = vld [vmem:[%s19089_s1 + $0x10] sm:$0xff]  ;;  %p12326_p13 = pneg %p12325_p12 }
  0x26   : > { %10311 = vmatpush1.bf16.msra.mxu0 %v10310_v31  ;;  %429 = vst.msk [vmem:[#allocation2 + $0x60] sm:$0xff] %vm385_vm0, %v413_v50  ;;  %v449_v52 = vld [vmem:[%s19089_s1] sm:$0xff]  ;;  %v10320_v53 = vpack.c.bf16 %v452_v49, %v450_v48  ;;  %v414_v55 = vld [vmem:[%s12555_s26 + $0x68] sm:$0xff]  ;;  %v415_v56 = vld [vmem:[%s12555_s26 + $0x70] sm:$0xff] }
  0x27   : > { %10313 = vmatprep.subr.bf16.mxu0 %v10312_v34  ;;  %v454_v57 = vld [vmem:[%s19089_s1 + $0x28] sm:$0xff]  ;;  %v456_v58 = vld [vmem:[%s19089_s1 + $0x38] sm:$0xff]  ;;  %430 = vst.msk [vmem:[#allocation2 + $0x68] sm:$0xff] %vm385_vm0, %v414_v55  ;;  %431 = vst.msk [vmem:[#allocation2 + $0x70] sm:$0xff] %vm385_vm0, %v415_v56  ;;  %v10322_v61 = vpack.c.bf16 %v451_v54, %v449_v52  ;;  %p12333_p3 = pnand %p12332_p2, %p12326_p13 }
  0x28   : > { %v416_v59 = vld [vmem:[%s12555_s26 + $0x78] sm:$0xff]  ;;  %v473_v60 = vld [vmem:[#allocation2 + $0x1] sm:$0xff]  ;;  %v10324_v62 = vpack.c.bf16 %v456_v58, %v454_v57  ;;  %v455_v0 = vld [vmem:[%s19089_s1 + $0x30] sm:$0xff]  ;;  %s9065_s26 = scalar_lea.sflag [#allocation6], %s377_s16 }
  0x29   : > { %432 = vst.msk [vmem:[#allocation2 + $0x78] sm:$0xff] %vm385_vm0, %v416_v59  ;;  %v453_v63 = vld [vmem:[%s19089_s1 + $0x20] sm:$0xff]  ;;  %v458_v1 = vld [vmem:[%s19089_s1 + $0x48] sm:$0xff]  ;;  %v460_v2 = vld [vmem:[%s19089_s1 + $0x58] sm:$0xff] }
  0x2a   : > { %10315 = vmatpush1.bf16.msra.mxu0 %v10314_v42  ;;  %v474_v3 = vld [vmem:[#allocation2 + $0x9] sm:$0xff]  ;;  %v10326_v4 = vpack.c.bf16 %v455_v0, %v453_v63  ;;  %v10328_v5 = vpack.c.bf16 %v460_v2, %v458_v1  ;;  %v457_v6 = vld [vmem:[%s19089_s1 + $0x40] sm:$0xff]  ;;  %v464_v10 = vld [vmem:[%s19089_s1 + $0x78] sm:$0xff] }
  0x2b   : > { %10317 = vmatprep.subr.bf16.mxu0 %v10316_v44  ;;  %v459_v8 = vld [vmem:[%s19089_s1 + $0x50] sm:$0xff]  ;;  %v462_v9 = vld [vmem:[%s19089_s1 + $0x68] sm:$0xff]  ;;  %v461_v14 = vld [vmem:[%s19089_s1 + $0x60] sm:$0xff] }
  0x2c   : > { %v475_v11 = vld [vmem:[#allocation2 + $0x11] sm:$0xff]  ;;  %v10330_v12 = vpack.c.bf16 %v459_v8, %v457_v6  ;;  %v10332_v13 = vpack.c.bf16 %v464_v10, %v462_v9  ;;  %v466_v16 = vld [vmem:[%s19089_s1 + $0x88] sm:$0xff]  ;;  %v476_v18 = vld [vmem:[#allocation2 + $0x19] sm:$0xff] }
  0x2d   : > { %v463_v15 = vld [vmem:[%s19089_s1 + $0x70] sm:$0xff]  ;;  %v468_v17 = vld [vmem:[%s19089_s1 + $0x98] sm:$0xff]  ;;  %v465_v21 = vld [vmem:[%s19089_s1 + $0x80] sm:$0xff] }
  0x2e   : > { %10319 = vmatpush1.bf16.msra.mxu0 %v10318_v51  ;;  %v10334_v19 = vpack.c.bf16 %v463_v15, %v461_v14  ;;  %v10336_v20 = vpack.c.bf16 %v468_v17, %v466_v16  ;;  %v467_v22 = vld [vmem:[%s19089_s1 + $0x90] sm:$0xff]  ;;  %v470_v23 = vld [vmem:[%s19089_s1 + $0xa8] sm:$0xff]  ;;  %v472_v24 = vld [vmem:[%s19089_s1 + $0xb8] sm:$0xff] }
  0x2f   : > { %10321 = vmatprep.subr.bf16.mxu0 %v10320_v53  ;;  %v477_v25 = vld [vmem:[#allocation2 + $0x21] sm:$0xff]  ;;  %v10338_v26 = vpack.c.bf16 %v467_v22, %v465_v21  ;;  %v10340_v27 = vpack.c.bf16 %v472_v24, %v470_v23  ;;  %v471_v29 = vld [vmem:[%s19089_s1 + $0xb0] sm:$0xff]  ;;  %v9203_v31 = vld [vmem:[%s19089_s1 + $0x198] sm:$0xff] }
  0x30   : > { %v469_v28 = vld [vmem:[%s19089_s1 + $0xa0] sm:$0xff]  ;;  %v9201_v30 = vld [vmem:[%s19089_s1 + $0x188] sm:$0xff]  ;;  %v479_v35 = vld [vmem:[#allocation2 + $0x31] sm:$0xff] }
  0x31   : > { %9168 = vmatmul.mubr.msk.f32.vlgmr.msra.gmra.mrb[0].mxu0 %vm385_vm0, %v473_v60  ;;  %v478_v32 = vld [vmem:[#allocation2 + $0x29] sm:$0xff]  ;;  %v10342_v33 = vpack.c.bf16 %v471_v29, %v469_v28  ;;  %v10344_v34 = vpack.c.bf16 %v9203_v31, %v9201_v30  ;;  %v480_v36 = vld [vmem:[#allocation2 + $0x39] sm:$0xff]  ;;  %v481_v37 = vld [vmem:[#allocation2 + $0x41] sm:$0xff] }
  0x32   : > { %632 = vmatprep.mubr.f32.mxu0 %v12387_v7  ;;  %10323 = vmatpush1.bf16.msra.mxu0 %v10322_v61  ;;  %v482_v38 = vld [vmem:[#allocation2 + $0x49] sm:$0xff]  ;;  %v483_v39 = vld [vmem:[#allocation2 + $0x51] sm:$0xff]  ;;  %v484_v40 = vld [vmem:[#allocation2 + $0x59] sm:$0xff] }
  0x33   : > { %10325 = vmatprep.subr.bf16.mxu0 %v10324_v62  ;;  %v485_v41 = vld [vmem:[#allocation2 + $0x61] sm:$0xff]  ;;  %v486_v42 = vld [vmem:[#allocation2 + $0x69] sm:$0xff]  ;;  %v487_v43 = vld [vmem:[#allocation2 + $0x71] sm:$0xff] }
  0x34   : > { %v488_v44 = vld [vmem:[#allocation2 + $0x79] sm:$0xff]  ;;  %v9202_v46 = vld [vmem:[%s19089_s1 + $0x190] sm:$0xff]  ;;  %v9205_v47 = vld [vmem:[%s19089_s1 + $0x1a8] sm:$0xff] }
  0x35   : > { %9169 = vmatmul.mubr.msk.f32.gmra.mrb[2].mxu0 %vm385_vm0, %v474_v3  ;;  %v9200_v45 = vld [vmem:[%s19089_s1 + $0x180] sm:$0xff]  ;;  %v9207_v48 = vld [vmem:[%s19089_s1 + $0x1b8] sm:$0xff]  ;;  %v9206_v53 = vld [vmem:[%s19089_s1 + $0x1b0] sm:$0xff] }
  0x36   : > { %638 = vmatprep.mubr.f32.mxu0 %v12387_v7  ;;  %10327 = vmatpush1.bf16.msra.mxu0 %v10326_v4  ;;  %v433_v49 = vld [vmem:[#allocation2] sm:$0xff]  ;;  %v10346_v50 = vpack.c.bf16 %v9202_v46, %v9200_v45  ;;  %v10348_v51 = vpack.c.bf16 %v9207_v48, %v9205_v47  ;;  %v9209_v54 = vld [vmem:[%s19089_s1 + $0x1c8] sm:$0xff]  ;;  %v9211_v55 = vld [vmem:[%s19089_s1 + $0x1d8] sm:$0xff] }
  0x37   : > { %10329 = vmatprep.subr.bf16.mxu0 %v10328_v5  ;;  %v9204_v52 = vld [vmem:[%s19089_s1 + $0x1a0] sm:$0xff]  ;;  %v434_v56 = vld [vmem:[#allocation2 + $0x8] sm:$0xff]  ;;  %v10352_v58 = vpack.c.bf16 %v9211_v55, %v9209_v54  ;;  %v9210_v60 = vld [vmem:[%s19089_s1 + $0x1d0] sm:$0xff] }
  0x38   : > { %v10350_v57 = vpack.c.bf16 %v9206_v53, %v9204_v52  ;;  %v9208_v59 = vld [vmem:[%s19089_s1 + $0x1c0] sm:$0xff]  ;;  %v9213_v61 = vld [vmem:[%s19089_s1 + $0x1e8] sm:$0xff]  ;;  %v9215_v62 = vld [vmem:[%s19089_s1 + $0x1f8] sm:$0xff] }
  0x39   : > { %9170 = vmatmul.mubr.msk.f32.gmra.mrb[4].mxu0 %vm385_vm0, %v475_v11  ;;  %v435_v63 = vld [vmem:[#allocation2 + $0x10] sm:$0xff]  ;;  %v10354_v0 = vpack.c.bf16 %v9210_v60, %v9208_v59  ;;  %v10356_v1 = vpack.c.bf16 %v9215_v62, %v9213_v61  ;;  %v9212_v2 = vld [vmem:[%s19089_s1 + $0x1e0] sm:$0xff]  ;;  %v9217_v4 = vld [vmem:[%s19089_s1 + $0x208] sm:$0xff] }
  0x3a   : > { %644 = vmatprep.mubr.f32.mxu0 %v12387_v7  ;;  %10331 = vmatpush1.bf16.msra.mxu0 %v10330_v12  ;;  %v9214_v3 = vld [vmem:[%s19089_s1 + $0x1f0] sm:$0xff]  ;;  %v9219_v5 = vld [vmem:[%s19089_s1 + $0x218] sm:$0xff]  ;;  %v9216_v10 = vld [vmem:[%s19089_s1 + $0x200] sm:$0xff] }
  0x3b   : > { %10333 = vmatprep.subr.bf16.mxu0 %v10332_v13  ;;  %v436_v6 = vld [vmem:[#allocation2 + $0x18] sm:$0xff]  ;;  %v10358_v8 = vpack.c.bf16 %v9214_v3, %v9212_v2  ;;  %v10360_v9 = vpack.c.bf16 %v9219_v5, %v9217_v4  ;;  %v9218_v11 = vld [vmem:[%s19089_s1 + $0x210] sm:$0xff]  ;;  %v9221_v12 = vld [vmem:[%s19089_s1 + $0x228] sm:$0xff] }
  0x3c   : > { %v9223_v13 = vld [vmem:[%s19089_s1 + $0x238] sm:$0xff]  ;;  %v437_v14 = vld [vmem:[#allocation2 + $0x20] sm:$0xff]  ;;  %v10362_v15 = vpack.c.bf16 %v9218_v11, %v9216_v10  ;;  %v438_v21 = vld [vmem:[#allocation2 + $0x28] sm:$0xff] }
  0x3d   : > { %9171 = vmatmul.mubr.msk.f32.gmra.mrb[6].mxu0 %vm385_vm0, %v476_v18  ;;  %v10364_v16 = vpack.c.bf16 %v9223_v13, %v9221_v12  ;;  %v9220_v17 = vld [vmem:[%s19089_s1 + $0x220] sm:$0xff]  ;;  %v9222_v18 = vld [vmem:[%s19089_s1 + $0x230] sm:$0xff]  ;;  %v444_v29 = vld [vmem:[#allocation2 + $0x58] sm:$0xff] }
  0x3e   : > { %650 = vmatprep.mubr.f32.mxu0 %v12387_v7  ;;  %10335 = vmatpush1.bf16.msra.mxu0 %v10334_v19  ;;  %v9241_v19 = vld [vmem:[%s19089_s1 + $0x248] sm:$0xff]  ;;  %v10366_v22 = vpack.c.bf16 %v9222_v18, %v9220_v17  ;;  %v439_v24 = vld [vmem:[#allocation2 + $0x30] sm:$0xff]  ;;  %v445_v30 = vld [vmem:[#allocation2 + $0x60] sm:$0xff] }
  0x3f   : > { %10337 = vmatprep.subr.bf16.mxu0 %v10336_v20  ;;  %v9243_v20 = vld [vmem:[%s19089_s1 + $0x258] sm:$0xff]  ;;  %v443_v28 = vld [vmem:[#allocation2 + $0x50] sm:$0xff]  ;;  %v446_v31 = vld [vmem:[#allocation2 + $0x68] sm:$0xff] }
  0x40   : > { %v10368_v23 = vpack.c.bf16 %v9243_v20, %v9241_v19  ;;  %v933_v45 = vld [vmem:[#allocation2 + $0xa] sm:$0xff]  ;;  %v9248_v48 = vld [vmem:[%s19089_s1 + $0x280] sm:$0xff]  ;;  %v934_v52 = vld [vmem:[#allocation2 + $0x12] sm:$0xff] }
  0x41   : > { %9172 = vmatmul.mubr.msk.f32.gmra.mrb[8].mxu0 %vm385_vm0, %v477_v25  ;;  %v440_v25 = vld [vmem:[#allocation2 + $0x38] sm:$0xff]  ;;  %v9252_v55 = vld [vmem:[%s19089_s1 + $0x2a0] sm:$0xff]  ;;  %v937_v10 = vld [vmem:[#allocation2 + $0x2a] sm:$0xff] }
  0x42   : > { %656 = vmatprep.mubr.f32.mxu0 %v12387_v7  ;;  %10339 = vmatpush1.bf16.msra.mxu0 %v10338_v26  ;;  %v441_v26 = vld [vmem:[#allocation2 + $0x40] sm:$0xff]  ;;  %v938_v13 = vld [vmem:[#allocation2 + $0x32] sm:$0xff]  ;;  %v945_v20 = vld [vmem:[#allocation2 + $0x6a] sm:$0xff] }
  0x43   : > { %10341 = vmatprep.subr.bf16.mxu0 %v10340_v27  ;;  %v442_v27 = vld [vmem:[#allocation2 + $0x48] sm:$0xff]  ;;  %v935_v59 = vld [vmem:[#allocation2 + $0x1a] sm:$0xff]  ;;  %v942_v17 = vld [vmem:[#allocation2 + $0x52] sm:$0xff] }
  0x44   : > { %v9256_v62 = vld [vmem:[%s19089_s1 + $0x2c0] sm:$0xff] }
  0x45   : > { %9173 = vmatmul.mubr.msk.f32.gmra.mrb[10].mxu0 %vm385_vm0, %v478_v32  ;;  %v447_v32 = vld [vmem:[#allocation2 + $0x70] sm:$0xff]  ;;  %v936_v2 = vld [vmem:[#allocation2 + $0x22] sm:$0xff]  ;;  %v943_v18 = vld [vmem:[#allocation2 + $0x5a] sm:$0xff] }
  0x46   : > { %662 = vmatprep.mubr.f32.mxu0 %v12387_v7  ;;  %10343 = vmatpush1.bf16.msra.mxu0 %v10342_v33  ;;  %v448_v33 = vld [vmem:[#allocation2 + $0x78] sm:$0xff]  ;;  %v9260_v5 = vld [vmem:[%s19089_s1 + $0x2e0] sm:$0xff] }
  0x47   : > { %10345 = vmatprep.subr.bf16.mxu0 %v10344_v34  ;;  %v9240_v34 = vld [vmem:[%s19089_s1 + $0x240] sm:$0xff] }
  0x48   : > { %v944_v19 = vld [vmem:[#allocation2 + $0x62] sm:$0xff] }
  0x49   : > { %9174 = vmatmul.mubr.msk.f32.gmra.mrb[12].mxu0 %vm385_vm0, %v479_v35  ;;  %v9242_v35 = vld [vmem:[%s19089_s1 + $0x250] sm:$0xff] }
  0x4a   : > { %668 = vmatprep.mubr.f32.mxu0 %v12387_v7 }
  0x4d   : > { %9175 = vmatmul.mubr.msk.f32.gmra.mrb[14].mxu0 %vm385_vm0, %v480_v36  ;;  %v9245_v36 = vld [vmem:[%s19089_s1 + $0x268] sm:$0xff] }
  0x4e   : > { %674 = vmatprep.mubr.f32.mxu0 %v12387_v7 }
  0x51   : > { %9176 = vmatmul.mubr.msk.f32.gmra.mrb[16].mxu0 %vm385_vm0, %v481_v37  ;;  %v9247_v37 = vld [vmem:[%s19089_s1 + $0x278] sm:$0xff] }
  0x52   : > { %680 = vmatprep.mubr.f32.mxu0 %v12387_v7 }
  0x55   : > { %9177 = vmatmul.mubr.msk.f32.gmra.mrb[18].mxu0 %vm385_vm0, %v482_v38  ;;  %v932_v38 = vld [vmem:[#allocation2 + $0x2] sm:$0xff] }
  0x56   : > { %686 = vmatprep.mubr.f32.mxu0 %v12387_v7 }
  0x59   : > { %9178 = vmatmul.mubr.msk.f32.gmra.mrb[20].mxu0 %vm385_vm0, %v483_v39  ;;  %v10370_v39 = vpack.c.bf16 %v9242_v35, %v9240_v34  ;;  %v9324_v35 = vld [vmem:[%s19090_s2 + $0x320] sm:$0xff] }
  0x5a   : > { %692 = vmatprep.mubr.f32.mxu0 %v12387_v7 }
  0x5d   : > { %9179 = vmatmul.mubr.msk.f32.gmra.mrb[22].mxu0 %vm385_vm0, %v484_v40  ;;  %v10372_v40 = vpack.c.bf16 %v9247_v37, %v9245_v36  ;;  %v9329_v36 = vld [vmem:[%s19090_s2 + $0x348] sm:$0xff] }
  0x5e   : > { %698 = vmatprep.mubr.f32.mxu0 %v12387_v7  ;;  %v9333_v37 = vld [vmem:[%s19090_s2 + $0x368] sm:$0xff] }
  0x61   : > { %9180 = vmatmul.mubr.msk.f32.gmra.mrb[24].mxu0 %vm385_vm0, %v485_v41  ;;  %v9244_v41 = vld [vmem:[%s19089_s1 + $0x260] sm:$0xff] }
  0x62   : > { %704 = vmatprep.mubr.f32.mxu0 %v12387_v7 }
  0x65   : > { %9181 = vmatmul.mubr.msk.f32.gmra.mrb[26].mxu0 %vm385_vm0, %v486_v42  ;;  %v9246_v42 = vld [vmem:[%s19089_s1 + $0x270] sm:$0xff] }
  0x66   : > { %710 = vmatprep.mubr.f32.mxu0 %v12387_v7  ;;  %v10374_v46 = vpack.c.bf16 %v9246_v42, %v9244_v41  ;;  %v10420_v41 = vpack.c.bf16 %v9333_v37, %v9329_v36  ;;  %v9328_v42 = vld [vmem:[%s19090_s2 + $0x340] sm:$0xff]  ;;  %v1227_v36 = vld [vmem:[#allocation2 + $0x6b] sm:$0xff]  ;;  %v1228_v37 = vld [vmem:[#allocation2 + $0x73] sm:$0xff] }
  0x69   : > { %9182 = vmatmul.mubr.msk.f32.gmra.mrb[28].mxu0 %vm385_vm0, %v487_v43  ;;  %v9249_v43 = vld [vmem:[%s19089_s1 + $0x288] sm:$0xff] }
  0x6a   : > { %716 = vmatprep.mubr.f32.mxu0 %v12387_v7 }
  0x6d   : > { %9183 = vmatmul.mubr.msk.f32.gmra.mrb[30].mxu0 %vm385_vm0, %v488_v44  ;;  %v9251_v44 = vld [vmem:[%s19089_s1 + $0x298] sm:$0xff] }
  0x6e   : > { %835 = vmatprep.mubr.f32.mxu0 %v12387_v7  ;;  %v10376_v47 = vpack.c.bf16 %v9251_v44, %v9249_v43  ;;  %v9332_v43 = vld [vmem:[%s19090_s2 + $0x360] sm:$0xff]  ;;  %v9291_v44 = vld [vmem:[%s19089_s1 + $0x358] sm:$0xff] }
  0x71   : > { %9184 = vmatmul.mubr.msk.f32.vlgmr.msra.gmra.mrb[0].mxu0 %vm385_vm0, %v433_v49  ;;  %v9250_v49 = vld [vmem:[%s19089_s1 + $0x290] sm:$0xff] }
  0x72   : > { %841 = vmatprep.mubr.f32.mxu0 %v12387_v7  ;;  %10347 = vmatpush1.bf16.msra.mxu0 %v10346_v50  ;;  %v9253_v50 = vld [vmem:[%s19089_s1 + $0x2a8] sm:$0xff]  ;;  %v10378_v53 = vpack.c.bf16 %v9250_v49, %v9248_v48 }
  0x73   : > { %10349 = vmatprep.subr.bf16.mxu0 %v10348_v51  ;;  %v9255_v51 = vld [vmem:[%s19089_s1 + $0x2b8] sm:$0xff]  ;;  %v1215_v48 = vld [vmem:[#allocation2 + $0xb] sm:$0xff] }
  0x74   : > { %v10380_v54 = vpack.c.bf16 %v9255_v51, %v9253_v50  ;;  %v9336_v50 = vld [vmem:[%s19090_s2 + $0x380] sm:$0xff] }
  0x75   : > { %9185 = vmatmul.mubr.msk.f32.gmra.mrb[2].mxu0 %vm385_vm0, %v434_v56  ;;  %v9254_v56 = vld [vmem:[%s19089_s1 + $0x2b0] sm:$0xff]  ;;  %v9340_v51 = vld [vmem:[%s19090_s2 + $0x3a0] sm:$0xff] }
  0x76   : > { %847 = vmatprep.mubr.f32.mxu0 %v12387_v7  ;;  %10351 = vmatpush1.bf16.msra.mxu0 %v10350_v57  ;;  %v9257_v57 = vld [vmem:[%s19089_s1 + $0x2c8] sm:$0xff]  ;;  %v10382_v60 = vpack.c.bf16 %v9254_v56, %v9252_v55 }
  0x77   : > { %10353 = vmatprep.subr.bf16.mxu0 %v10352_v58  ;;  %v9259_v58 = vld [vmem:[%s19089_s1 + $0x2d8] sm:$0xff]  ;;  %v9293_v55 = vld [vmem:[%s19089_s1 + $0x368] sm:$0xff] }
  0x78   : > { %v10384_v61 = vpack.c.bf16 %v9259_v58, %v9257_v57  ;;  %v9295_v57 = vld [vmem:[%s19089_s1 + $0x378] sm:$0xff]  ;;  %v9345_v58 = vld [vmem:[%s19090_s2 + $0x3c8] sm:$0xff] }
  0x79   : > { %9186 = vmatmul.mubr.msk.f32.gmra.mrb[4].mxu0 %vm385_vm0, %v435_v63  ;;  %v9258_v63 = vld [vmem:[%s19089_s1 + $0x2d0] sm:$0xff] }
  0x7a   : > { %853 = vmatprep.mubr.f32.mxu0 %v12387_v7  ;;  %10355 = vmatpush1.bf16.msra.mxu0 %v10354_v0  ;;  %v9261_v0 = vld [vmem:[%s19089_s1 + $0x2e8] sm:$0xff]  ;;  %v10386_v3 = vpack.c.bf16 %v9258_v63, %v9256_v62  ;;  %v9344_v63 = vld [vmem:[%s19090_s2 + $0x3c0] sm:$0xff] }
  0x7b   : > { %10357 = vmatprep.subr.bf16.mxu0 %v10356_v1  ;;  %v9263_v1 = vld [vmem:[%s19089_s1 + $0x2f8] sm:$0xff] }
  0x7c   : > { %v10388_v4 = vpack.c.bf16 %v9263_v1, %v9261_v0  ;;  %v9348_v0 = vld [vmem:[%s19090_s2 + $0x3e0] sm:$0xff]  ;;  %v10404_v1 = vpack.c.bf16 %v9295_v57, %v9293_v55  ;;  %v9361_v55 = vld [vmem:[%s19090_s2 + $0x448] sm:$0xff] }
  0x7d   : > { %9187 = vmatmul.mubr.msk.f32.gmra.mrb[6].mxu0 %vm385_vm0, %v436_v6  ;;  %v9262_v6 = vld [vmem:[%s19089_s1 + $0x2f0] sm:$0xff] }
  0x7e   : > { %859 = vmatprep.mubr.f32.mxu0 %v12387_v7  ;;  %10359 = vmatpush1.bf16.msra.mxu0 %v10358_v8  ;;  %v9281_v8 = vld [vmem:[%s19089_s1 + $0x308] sm:$0xff]  ;;  %v10390_v11 = vpack.c.bf16 %v9262_v6, %v9260_v5  ;;  %v9299_v6 = vld [vmem:[%s19089_s1 + $0x398] sm:$0xff] }
  0x7f   : > { %10361 = vmatprep.subr.bf16.mxu0 %v10360_v9  ;;  %v9283_v9 = vld [vmem:[%s19089_s1 + $0x318] sm:$0xff] }
  0x80   : > { %v10392_v12 = vpack.c.bf16 %v9283_v9, %v9281_v8  ;;  %v9353_v8 = vld [vmem:[%s19090_s2 + $0x408] sm:$0xff] }
  0x81   : > { %9188 = vmatmul.mubr.msk.f32.gmra.mrb[8].mxu0 %vm385_vm0, %v437_v14  ;;  %v939_v14 = vld [vmem:[#allocation2 + $0x3a] sm:$0xff]  ;;  %v9357_v9 = vld [vmem:[%s19090_s2 + $0x428] sm:$0xff] }
  0x82   : > { %865 = vmatprep.mubr.f32.mxu0 %v12387_v7  ;;  %10363 = vmatpush1.bf16.msra.mxu0 %v10362_v15  ;;  %v940_v15 = vld [vmem:[#allocation2 + $0x42] sm:$0xff] }
  0x83   : > { %10365 = vmatprep.subr.bf16.mxu0 %v10364_v16  ;;  %v941_v16 = vld [vmem:[#allocation2 + $0x4a] sm:$0xff] }
  0x85   : > { %9189 = vmatmul.mubr.msk.f32.gmra.mrb[10].mxu0 %vm385_vm0, %v438_v21  ;;  %v946_v21 = vld [vmem:[#allocation2 + $0x72] sm:$0xff] }
  0x86   : > { %871 = vmatprep.mubr.f32.mxu0 %v12387_v7  ;;  %10367 = vmatpush1.bf16.msra.mxu0 %v10366_v22  ;;  %v947_v22 = vld [vmem:[#allocation2 + $0x7a] sm:$0xff] }
  0x87   : > { %10369 = vmatprep.subr.bf16.mxu0 %v10368_v23  ;;  %v9280_v23 = vld [vmem:[%s19089_s1 + $0x300] sm:$0xff] }
  0x89   : > { %9190 = vmatmul.mubr.msk.f32.gmra.mrb[12].mxu0 %vm385_vm0, %v439_v24  ;;  %v9282_v24 = vld [vmem:[%s19089_s1 + $0x310] sm:$0xff] }
  0x8a   : > { %877 = vmatprep.mubr.f32.mxu0 %v12387_v7 }
  0x8d   : > { %9191 = vmatmul.mubr.msk.f32.gmra.mrb[14].mxu0 %vm385_vm0, %v440_v25  ;;  %v1214_v25 = vld [vmem:[#allocation2 + $0x3] sm:$0xff] }
  0x8e   : > { %883 = vmatprep.mubr.f32.mxu0 %v12387_v7 }
  0x91   : > { %9192 = vmatmul.mubr.msk.f32.gmra.mrb[16].mxu0 %vm385_vm0, %v441_v26  ;;  %v9285_v26 = vld [vmem:[%s19089_s1 + $0x328] sm:$0xff] }
  0x92   : > { %889 = vmatprep.mubr.f32.mxu0 %v12387_v7 }
  0x95   : > { %9193 = vmatmul.mubr.msk.f32.gmra.mrb[18].mxu0 %vm385_vm0, %v442_v27  ;;  %v9287_v27 = vld [vmem:[%s19089_s1 + $0x338] sm:$0xff] }
  0x96   : > { %895 = vmatprep.mubr.f32.mxu0 %v12387_v7 }
  0x99   : > { %9194 = vmatmul.mubr.msk.f32.gmra.mrb[20].mxu0 %vm385_vm0, %v443_v28  ;;  %v9284_v28 = vld [vmem:[%s19089_s1 + $0x320] sm:$0xff] }
  0x9a   : > { %901 = vmatprep.mubr.f32.mxu0 %v12387_v7 }
  0x9d   : > { %9195 = vmatmul.mubr.msk.f32.gmra.mrb[22].mxu0 %vm385_vm0, %v444_v29  ;;  %v9286_v29 = vld [vmem:[%s19089_s1 + $0x330] sm:$0xff] }
  0x9e   : > { %907 = vmatprep.mubr.f32.mxu0 %v12387_v7  ;;  %v10398_v49 = vpack.c.bf16 %v9286_v29, %v9284_v28  ;;  %v1220_v29 = vld [vmem:[#allocation2 + $0x33] sm:$0xff] }
  0xa1   : > { %9196 = vmatmul.mubr.msk.f32.gmra.mrb[24].mxu0 %vm385_vm0, %v445_v30  ;;  %v9321_v30 = vld [vmem:[%s19090_s2 + $0x308] sm:$0xff] }
  0xa2   : > { %913 = vmatprep.mubr.f32.mxu0 %v12387_v7 }
  0xa5   : > { %9197 = vmatmul.mubr.msk.f32.gmra.mrb[26].mxu0 %vm385_vm0, %v446_v31  ;;  %v9325_v31 = vld [vmem:[%s19090_s2 + $0x328] sm:$0xff] }
  0xa6   : > { %919 = vmatprep.mubr.f32.mxu0 %v12387_v7  ;;  %v10416_v34 = vpack.c.bf16 %v9325_v31, %v9321_v30  ;;  %v1221_v30 = vld [vmem:[#allocation2 + $0x3b] sm:$0xff]  ;;  %v1222_v31 = vld [vmem:[#allocation2 + $0x43] sm:$0xff] }
  0xa8   : > { %10417 = vmatprep.subr.bf16.mxu1 %v10416_v34  ;;  %v1225_v34 = vld [vmem:[#allocation2 + $0x5b] sm:$0xff] }
  0xa9   : > { %9198 = vmatmul.mubr.msk.f32.gmra.mrb[28].mxu0 %vm385_vm0, %v447_v32  ;;  %v9320_v32 = vld [vmem:[%s19090_s2 + $0x300] sm:$0xff] }
  0xaa   : > { %925 = vmatprep.mubr.f32.mxu0 %v12387_v7 }
  0xad   : > { %9199 = vmatmul.mubr.msk.f32.gmra.mrb[30].mxu0 %vm385_vm0, %v448_v33  ;;  %v10394_v33 = vpack.c.bf16 %v9282_v24, %v9280_v23 }
  0xae   : > { %1085 = vmatprep.mubr.f32.mxu0 %v12387_v7 }
  0xb1   : > { %9224 = vmatmul.mubr.msk.f32.vlgmr.msra.gmra.mrb[0].mxu0 %vm385_vm0, %v932_v38  ;;  %v10396_v38 = vpack.c.bf16 %v9287_v27, %v9285_v26  ;;  %v9302_v26 = vld [vmem:[%s19089_s1 + $0x3b0] sm:$0xff] }
  0xb2   : > { %1091 = vmatprep.mubr.f32.mxu0 %v12387_v7  ;;  %10371 = vmatpush1.bf16.msra.mxu0 %v10370_v39  ;;  %v9289_v39 = vld [vmem:[%s19089_s1 + $0x348] sm:$0xff] }
  0xb3   : > { %10373 = vmatprep.subr.bf16.mxu0 %v10372_v40  ;;  %v10418_v40 = vpack.c.bf16 %v9324_v35, %v9320_v32  ;;  %v1219_v27 = vld [vmem:[#allocation2 + $0x2b] sm:$0xff]  ;;  %v1226_v35 = vld [vmem:[#allocation2 + $0x63] sm:$0xff] }
  0xb4   : > { %v1223_v32 = vld [vmem:[#allocation2 + $0x4b] sm:$0xff] }
  0xb5   : > { %9225 = vmatmul.mubr.msk.f32.gmra.mrb[2].mxu0 %vm385_vm0, %v933_v45  ;;  %v9337_v45 = vld [vmem:[%s19090_s2 + $0x388] sm:$0xff]  ;;  %10419 = vmatpush1.bf16.msra.mxu1 %v10418_v40  ;;  %v12227_v40 = vld [vmem:[#allocation3 + $0x100] sm:$0xff] }
  0xb6   : > { %1097 = vmatprep.mubr.f32.mxu0 %v12387_v7  ;;  %10375 = vmatpush1.bf16.msra.mxu0 %v10374_v46  ;;  %v9341_v46 = vld [vmem:[%s19090_s2 + $0x3a8] sm:$0xff]  ;;  %390 = vst.msk [vmem:[#allocation3 + $0x108] sm:$0xff] %vm389_vm1, %v12227_v40  ;;  %392 = vst.msk [vmem:[#allocation3 + $0x118] sm:$0xff] %vm389_vm1, %v12227_v40 }
  0xb7   : > { %10377 = vmatprep.subr.bf16.mxu0 %v10376_v47  ;;  %v10422_v47 = vpack.c.bf16 %v9332_v43, %v9328_v42  ;;  %10421 = vmatprep.subr.bf16.mxu1 %v10420_v41  ;;  %v10424_v56 = vpack.c.bf16 %v9341_v46, %v9337_v45  ;;  %v1497_v41 = vld [vmem:[#allocation2 + $0xc] sm:$0xff]  ;;  %v1498_v42 = vld [vmem:[#allocation2 + $0x14] sm:$0xff]  ;;  %v1499_v43 = vld [vmem:[#allocation2 + $0x1c] sm:$0xff] }
  0xb8   : > { %v1502_v45 = vld [vmem:[#allocation2 + $0x34] sm:$0xff]  ;;  %v1503_v46 = vld [vmem:[#allocation2 + $0x3c] sm:$0xff] }
  0xb9   : > { %9226 = vmatmul.mubr.msk.f32.gmra.mrb[4].mxu0 %vm385_vm0, %v934_v52  ;;  %v10400_v52 = vpack.c.bf16 %v9291_v44, %v9289_v39  ;;  %10423 = vmatpush1.bf16.msra.mxu1 %v10422_v47  ;;  %v1496_v39 = vld [vmem:[#allocation2 + $0x4] sm:$0xff] }
  0xba   : > { %1103 = vmatprep.mubr.f32.mxu0 %v12387_v7  ;;  %10379 = vmatpush1.bf16.msra.mxu0 %v10378_v53  ;;  %v9288_v53 = vld [vmem:[%s19089_s1 + $0x340] sm:$0xff] }
  0xbb   : > { %10381 = vmatprep.subr.bf16.mxu0 %v10380_v54  ;;  %v9290_v54 = vld [vmem:[%s19089_s1 + $0x350] sm:$0xff]  ;;  %10425 = vmatprep.subr.bf16.mxu1 %v10424_v56  ;;  %v1500_v44 = vld [vmem:[#allocation2 + $0x24] sm:$0xff] }
  0xbc   : > { %v10402_v62 = vpack.c.bf16 %v9290_v54, %v9288_v53  ;;  %v1504_v47 = vld [vmem:[#allocation2 + $0x44] sm:$0xff]  ;;  %v1510_v53 = vld [vmem:[#allocation2 + $0x74] sm:$0xff]  ;;  %v1511_v54 = vld [vmem:[#allocation2 + $0x7c] sm:$0xff] }
  0xbd   : > { %9227 = vmatmul.mubr.msk.f32.gmra.mrb[6].mxu0 %vm385_vm0, %v935_v59  ;;  %v9349_v59 = vld [vmem:[%s19090_s2 + $0x3e8] sm:$0xff] }
  0xbe   : > { %1109 = vmatprep.mubr.f32.mxu0 %v12387_v7  ;;  %10383 = vmatpush1.bf16.msra.mxu0 %v10382_v60  ;;  %v10426_v60 = vpack.c.bf16 %v9340_v51, %v9336_v50  ;;  %v10428_v5 = vpack.c.bf16 %v9349_v59, %v9345_v58  ;;  %v1507_v50 = vld [vmem:[#allocation2 + $0x5c] sm:$0xff]  ;;  %v1508_v51 = vld [vmem:[#allocation2 + $0x64] sm:$0xff] }
  0xbf   : > { %10385 = vmatprep.subr.bf16.mxu0 %v10384_v61  ;;  %v1216_v61 = vld [vmem:[#allocation2 + $0x13] sm:$0xff]  ;;  %v9365_v56 = vld [vmem:[%s19090_s2 + $0x468] sm:$0xff]  ;;  %v9360_v58 = vld [vmem:[%s19090_s2 + $0x440] sm:$0xff] }
  0xc0   : > { %10427 = vmatpush1.bf16.msra.mxu1 %v10426_v60  ;;  %v10436_v57 = vpack.c.bf16 %v9365_v56, %v9361_v55  ;;  %v9364_v59 = vld [vmem:[%s19090_s2 + $0x460] sm:$0xff] }
  0xc1   : > { %9228 = vmatmul.mubr.msk.f32.gmra.mrb[8].mxu0 %vm385_vm0, %v936_v2  ;;  %v9292_v2 = vld [vmem:[%s19089_s1 + $0x360] sm:$0xff]  ;;  %10429 = vmatprep.subr.bf16.mxu1 %v10428_v5  ;;  %v10438_v60 = vpack.c.bf16 %v9364_v59, %v9360_v58 }
  0xc2   : > { %1115 = vmatprep.mubr.f32.mxu0 %v12387_v7  ;;  %10387 = vmatpush1.bf16.msra.mxu0 %v10386_v3  ;;  %v9294_v3 = vld [vmem:[%s19089_s1 + $0x370] sm:$0xff] }
  0xc3   : > { %10389 = vmatprep.subr.bf16.mxu0 %v10388_v4  ;;  %v9297_v4 = vld [vmem:[%s19089_s1 + $0x388] sm:$0xff] }
  0xc5   : > { %9229 = vmatmul.mubr.msk.f32.gmra.mrb[10].mxu0 %vm385_vm0, %v937_v10  ;;  %v10430_v10 = vpack.c.bf16 %v9348_v0, %v9344_v63  ;;  %v9368_v0 = vld [vmem:[%s19090_s2 + $0x480] sm:$0xff] }
  0xc6   : > { %1121 = vmatprep.mubr.f32.mxu0 %v12387_v7  ;;  %10391 = vmatpush1.bf16.msra.mxu0 %v10390_v11  ;;  %v1217_v11 = vld [vmem:[#allocation2 + $0x1b] sm:$0xff] }
  0xc7   : > { %10393 = vmatprep.subr.bf16.mxu0 %v10392_v12  ;;  %v10406_v12 = vpack.c.bf16 %v9294_v3, %v9292_v2  ;;  %10431 = vmatpush1.bf16.msra.mxu1 %v10430_v10  ;;  %v9377_v3 = vld [vmem:[%s19090_s2 + $0x4c8] sm:$0xff] }
  0xc8   : > { %v9385_v10 = vld [vmem:[%s19090_s2 + $0x508] sm:$0xff] }
  0xc9   : > { %9230 = vmatmul.mubr.msk.f32.gmra.mrb[12].mxu0 %vm385_vm0, %v938_v13  ;;  %v9352_v13 = vld [vmem:[%s19090_s2 + $0x400] sm:$0xff] }
  0xca   : > { %1127 = vmatprep.mubr.f32.mxu0 %v12387_v7 }
  0xcd   : > { %9231 = vmatmul.mubr.msk.f32.gmra.mrb[14].mxu0 %vm385_vm0, %v939_v14  ;;  %v9356_v14 = vld [vmem:[%s19090_s2 + $0x420] sm:$0xff] }
  0xce   : > { %1133 = vmatprep.mubr.f32.mxu0 %v12387_v7 }
  0xd1   : > { %9232 = vmatmul.mubr.msk.f32.gmra.mrb[16].mxu0 %vm385_vm0, %v940_v15  ;;  %v10408_v15 = vpack.c.bf16 %v9299_v6, %v9297_v4  ;;  %v9381_v4 = vld [vmem:[%s19090_s2 + $0x4e8] sm:$0xff]  ;;  %v9376_v6 = vld [vmem:[%s19090_s2 + $0x4c0] sm:$0xff] }
  0xd2   : > { %1139 = vmatprep.mubr.f32.mxu0 %v12387_v7  ;;  %v10444_v5 = vpack.c.bf16 %v9381_v4, %v9377_v3 }
  0xd5   : > { %9233 = vmatmul.mubr.msk.f32.gmra.mrb[18].mxu0 %vm385_vm0, %v941_v16  ;;  %v9296_v16 = vld [vmem:[%s19089_s1 + $0x380] sm:$0xff] }
  0xd6   : > { %1145 = vmatprep.mubr.f32.mxu0 %v12387_v7 }
  0xd9   : > { %9234 = vmatmul.mubr.msk.f32.gmra.mrb[20].mxu0 %vm385_vm0, %v942_v17  ;;  %v9298_v17 = vld [vmem:[%s19089_s1 + $0x390] sm:$0xff] }
  0xda   : > { %1151 = vmatprep.mubr.f32.mxu0 %v12387_v7  ;;  %v10410_v23 = vpack.c.bf16 %v9298_v17, %v9296_v16  ;;  %v9393_v16 = vld [vmem:[%s19090_s2 + $0x548] sm:$0xff] }
  0xdb   : > { %v9397_v17 = vld [vmem:[%s19090_s2 + $0x568] sm:$0xff] }
  0xdd   : > { %9235 = vmatmul.mubr.msk.f32.gmra.mrb[22].mxu0 %vm385_vm0, %v943_v18  ;;  %v10432_v18 = vpack.c.bf16 %v9357_v9, %v9353_v8  ;;  %v9380_v8 = vld [vmem:[%s19090_s2 + $0x4e0] sm:$0xff] }
  0xde   : > { %1157 = vmatprep.mubr.f32.mxu0 %v12387_v7  ;;  %v10446_v9 = vpack.c.bf16 %v9380_v8, %v9376_v6 }
  0xdf   : > { %10433 = vmatprep.subr.bf16.mxu1 %v10432_v18  ;;  %v10452_v18 = vpack.c.bf16 %v9397_v17, %v9393_v16 }
  0xe1   : > { %9236 = vmatmul.mubr.msk.f32.gmra.mrb[24].mxu0 %vm385_vm0, %v944_v19  ;;  %v9301_v19 = vld [vmem:[%s19089_s1 + $0x3a8] sm:$0xff] }
  0xe2   : > { %1163 = vmatprep.mubr.f32.mxu0 %v12387_v7 }
  0xe5   : > { %9237 = vmatmul.mubr.msk.f32.gmra.mrb[26].mxu0 %vm385_vm0, %v945_v20  ;;  %v9303_v20 = vld [vmem:[%s19089_s1 + $0x3b8] sm:$0xff] }
  0xe6   : > { %1169 = vmatprep.mubr.f32.mxu0 %v12387_v7  ;;  %v10412_v24 = vpack.c.bf16 %v9303_v20, %v9301_v19  ;;  %v9392_v19 = vld [vmem:[%s19090_s2 + $0x540] sm:$0xff] }
  0xe7   : > { %v9396_v20 = vld [vmem:[%s19090_s2 + $0x560] sm:$0xff] }
  0xe9   : > { %9238 = vmatmul.mubr.msk.f32.gmra.mrb[28].mxu0 %vm385_vm0, %v946_v21  ;;  %v10434_v21 = vpack.c.bf16 %v9356_v14, %v9352_v13  ;;  %v9384_v13 = vld [vmem:[%s19090_s2 + $0x500] sm:$0xff] }
  0xea   : > { %1175 = vmatprep.mubr.f32.mxu0 %v12387_v7  ;;  %v9388_v14 = vld [vmem:[%s19090_s2 + $0x520] sm:$0xff] }
  0xeb   : > { %10435 = vmatpush1.bf16.msra.mxu1 %v10434_v21  ;;  %v10454_v21 = vpack.c.bf16 %v9396_v20, %v9392_v19 }
  0xec   : > { %10437 = vmatprep.subr.bf16.mxu1 %v10436_v57 }
  0xed   : > { %9239 = vmatmul.mubr.msk.f32.gmra.mrb[30].mxu0 %vm385_vm0, %v947_v22  ;;  %v1218_v22 = vld [vmem:[#allocation2 + $0x23] sm:$0xff] }
  0xee   : > { %1367 = vmatprep.mubr.f32.mxu0 %v12387_v7 }
  0xef   : > { %10439 = vmatpush1.bf16.msra.mxu1 %v10438_v60 }
  0xf1   : > { %9264 = vmatmul.mubr.msk.f32.vlgmr.msra.gmra.mrb[0].mxu0 %vm385_vm0, %v1214_v25  ;;  %v9300_v25 = vld [vmem:[%s19089_s1 + $0x3a0] sm:$0xff] }
  0xf2   : > { %1373 = vmatprep.mubr.f32.mxu0 %v12387_v7  ;;  %10395 = vmatpush1.bf16.msra.mxu0 %v10394_v33  ;;  %v10414_v28 = vpack.c.bf16 %v9302_v26, %v9300_v25  ;;  %v1224_v33 = vld [vmem:[#allocation2 + $0x53] sm:$0xff]  ;;  %v9400_v25 = vld [vmem:[%s19090_s2 + $0x580] sm:$0xff] }
  0xf3   : > { %10397 = vmatprep.subr.bf16.mxu0 %v10396_v38  ;;  %v1229_v38 = vld [vmem:[#allocation2 + $0x7b] sm:$0xff] }
  0xf4   : > { %v9404_v26 = vld [vmem:[%s19090_s2 + $0x5a0] sm:$0xff] }
  0xf5   : > { %9265 = vmatmul.mubr.msk.f32.gmra.mrb[2].mxu0 %vm385_vm0, %v1215_v48  ;;  %v1505_v48 = vld [vmem:[#allocation2 + $0x4c] sm:$0xff] }
  0xf6   : > { %1379 = vmatprep.mubr.f32.mxu0 %v12387_v7  ;;  %10399 = vmatpush1.bf16.msra.mxu0 %v10398_v49  ;;  %v1506_v49 = vld [vmem:[#allocation2 + $0x54] sm:$0xff] }
  0xf7   : > { %10401 = vmatprep.subr.bf16.mxu0 %v10400_v52  ;;  %v1509_v52 = vld [vmem:[#allocation2 + $0x6c] sm:$0xff] }
  0xf9   : > { %9266 = vmatmul.mubr.msk.f32.gmra.mrb[4].mxu0 %vm385_vm0, %v1216_v61  ;;  %v9369_v61 = vld [vmem:[%s19090_s2 + $0x488] sm:$0xff] }
  0xfa   : > { %1385 = vmatprep.mubr.f32.mxu0 %v12387_v7  ;;  %10403 = vmatpush1.bf16.msra.mxu0 %v10402_v62  ;;  %v9373_v62 = vld [vmem:[%s19090_s2 + $0x4a8] sm:$0xff] }
  0xfb   : > { %10405 = vmatprep.subr.bf16.mxu0 %v10404_v1  ;;  %v10440_v63 = vpack.c.bf16 %v9373_v62, %v9369_v61  ;;  %v9372_v1 = vld [vmem:[%s19090_s2 + $0x4a0] sm:$0xff] }
  0xfc   : > { %v10442_v2 = vpack.c.bf16 %v9372_v1, %v9368_v0 }
  0xfd   : > { %9267 = vmatmul.mubr.msk.f32.gmra.mrb[6].mxu0 %vm385_vm0, %v1217_v11  ;;  %10441 = vmatprep.subr.bf16.mxu1 %v10440_v63  ;;  %v9389_v11 = vld [vmem:[%s19090_s2 + $0x528] sm:$0xff] }
  0xfe   : > { %1391 = vmatprep.mubr.f32.mxu0 %v12387_v7  ;;  %10407 = vmatpush1.bf16.msra.mxu0 %v10406_v12  ;;  %v10448_v12 = vpack.c.bf16 %v9389_v11, %v9385_v10 }
  0xff   : > { %10409 = vmatprep.subr.bf16.mxu0 %v10408_v15  ;;  %10443 = vmatpush1.bf16.msra.mxu1 %v10442_v2  ;;  %v10450_v15 = vpack.c.bf16 %v9388_v14, %v9384_v13 }
 0x100   : > { %10445 = vmatprep.subr.bf16.mxu1 %v10444_v5 }
 0x101   : > { %9268 = vmatmul.mubr.msk.f32.gmra.mrb[8].mxu0 %vm385_vm0, %v1218_v22  ;;  %v9401_v22 = vld [vmem:[%s19090_s2 + $0x588] sm:$0xff] }
 0x102   : > { %1397 = vmatprep.mubr.f32.mxu0 %v12387_v7  ;;  %10411 = vmatpush1.bf16.msra.mxu0 %v10410_v23  ;;  %v9405_v23 = vld [vmem:[%s19090_s2 + $0x5a8] sm:$0xff] }
 0x103   : > { %10413 = vmatprep.subr.bf16.mxu0 %v10412_v24  ;;  %10447 = vmatpush1.bf16.msra.mxu1 %v10446_v9  ;;  %v10456_v24 = vpack.c.bf16 %v9405_v23, %v9401_v22  ;;  %v9322_v22 = vld [vmem:[%s19090_s2 + $0x310] sm:$0xff] }
 0x104   : > { %10449 = vmatprep.subr.bf16.mxu1 %v10448_v12  ;;  %v9326_v23 = vld [vmem:[%s19090_s2 + $0x330] sm:$0xff] }
 0x105   : > { %9269 = vmatmul.mubr.msk.f32.gmra.mrb[10].mxu0 %vm385_vm0, %v1219_v27  ;;  %v10458_v27 = vpack.c.bf16 %v9404_v26, %v9400_v25 }
 0x106   : > { %1403 = vmatprep.mubr.f32.mxu0 %v12387_v7  ;;  %10415 = vmatpush1.bf16.msra.mxu0 %v10414_v28  ;;  %v9409_v28 = vld [vmem:[%s19090_s2 + $0x5c8] sm:$0xff] }
 0x107   : > { %10451 = vmatpush1.bf16.msra.mxu1 %v10450_v15 }
 0x108   : > { %10453 = vmatprep.subr.bf16.mxu1 %v10452_v18 }
 0x109   : > { %9270 = vmatmul.mubr.msk.f32.gmra.mrb[12].mxu0 %vm385_vm0, %v1220_v29  ;;  %v9413_v29 = vld [vmem:[%s19090_s2 + $0x5e8] sm:$0xff] }
 0x10a   : > { %1409 = vmatprep.mubr.f32.mxu0 %v12387_v7 }
 0x10b   : > { %10455 = vmatpush1.bf16.msra.mxu1 %v10454_v21 }
 0x10c   : > { %10457 = vmatprep.subr.bf16.mxu1 %v10456_v24 }
 0x10d   : > { %9271 = vmatmul.mubr.msk.f32.gmra.mrb[14].mxu0 %vm385_vm0, %v1221_v30  ;;  %v10460_v30 = vpack.c.bf16 %v9413_v29, %v9409_v28  ;;  %v9331_v29 = vld [vmem:[%s19090_s2 + $0x358] sm:$0xff] }
 0x10e   : > { %1415 = vmatprep.mubr.f32.mxu0 %v12387_v7 }
 0x10f   : > { %10459 = vmatpush1.bf16.msra.mxu1 %v10458_v27 }
 0x110   : > { %10461 = vmatprep.subr.bf16.mxu1 %v10460_v30  ;;  %v9335_v30 = vld [vmem:[%s19090_s2 + $0x378] sm:$0xff] }
 0x111   : > { %9272 = vmatmul.mubr.msk.f32.gmra.mrb[16].mxu0 %vm385_vm0, %v1222_v31  ;;  %v9408_v31 = vld [vmem:[%s19090_s2 + $0x5c0] sm:$0xff] }
 0x112   : > { %1421 = vmatprep.mubr.f32.mxu0 %v12387_v7 }
 0x115   : > { %9273 = vmatmul.mubr.msk.f32.gmra.mrb[18].mxu0 %vm385_vm0, %v1223_v32  ;;  %v9412_v32 = vld [vmem:[%s19090_s2 + $0x5e0] sm:$0xff] }
 0x116   : > { %1427 = vmatprep.mubr.f32.mxu0 %v12387_v7 }
 0x119   : > { %9274 = vmatmul.mubr.msk.f32.gmra.mrb[20].mxu0 %vm385_vm0, %v1224_v33  ;;  %v10462_v33 = vpack.c.bf16 %v9412_v32, %v9408_v31 }
 0x11a   : > { %1433 = vmatprep.mubr.f32.mxu0 %v12387_v7 }
 0x11b   : > { %10463 = vmatpush1.bf16.msra.mxu1 %v10462_v33 }
 0x11d   : > { %9275 = vmatmul.mubr.msk.f32.gmra.mrb[22].mxu0 %vm385_vm0, %v1225_v34  ;;  %v9323_v34 = vld [vmem:[%s19090_s2 + $0x318] sm:$0xff] }
 0x11e   : > { %1439 = vmatprep.mubr.f32.mxu0 %v12387_v7 }
 0x121   : > { %9276 = vmatmul.mubr.msk.f32.gmra.mrb[24].mxu0 %vm385_vm0, %v1226_v35  ;;  %v9327_v35 = vld [vmem:[%s19090_s2 + $0x338] sm:$0xff] }
 0x122   : > { %1445 = vmatprep.mubr.f32.mxu0 %v12387_v7 }
 0x125   : > { %9277 = vmatmul.mubr.msk.f32.gmra.mrb[26].mxu0 %vm385_vm0, %v1227_v36  ;;  %v10464_v36 = vpack.c.bf16 %v9327_v35, %v9323_v34 }
 0x126   : > { %1451 = vmatprep.mubr.f32.mxu0 %v12387_v7 }
 0x127   : > { %10465 = vmatprep.subr.bf16.mxu1 %v10464_v36 }
 0x129   : > { %9278 = vmatmul.mubr.msk.f32.gmra.mrb[28].mxu0 %vm385_vm0, %v1228_v37 }
 0x12a   : > { %1457 = vmatprep.mubr.f32.mxu0 %v12387_v7 }
 0x12d   : > { %9279 = vmatmul.mubr.msk.f32.gmra.mrb[30].mxu0 %vm385_vm0, %v1229_v38 }
 0x12e   : > { %1649 = vmatprep.mubr.f32.mxu0 %v12387_v7  ;;  %v1501_v7 = vld [vmem:[#allocation2 + $0x2c] sm:$0xff] }
 0x131   : > { %9304 = vmatmul.mubr.msk.f32.vlgmr.msra.gmra.mrb[0].mxu0 %vm385_vm0, %v1496_v39 }
 0x132   : > { %1655 = vmatprep.mubr.f32.mxu0 %v12227_v40 }
 0x135   : > { %9305 = vmatmul.mubr.msk.f32.gmra.mrb[2].mxu0 %vm385_vm0, %v1497_v41 }
 0x136   : > { %1661 = vmatprep.mubr.f32.mxu0 %v12227_v40 }
 0x139   : > { %9306 = vmatmul.mubr.msk.f32.gmra.mrb[4].mxu0 %vm385_vm0, %v1498_v42 }
 0x13a   : > { %1667 = vmatprep.mubr.f32.mxu0 %v12227_v40 }
 0x13d   : > { %9307 = vmatmul.mubr.msk.f32.gmra.mrb[6].mxu0 %vm385_vm0, %v1499_v43 }
 0x13e   : > { %1673 = vmatprep.mubr.f32.mxu0 %v12227_v40 }
 0x141   : > { %9308 = vmatmul.mubr.msk.f32.gmra.mrb[8].mxu0 %vm385_vm0, %v1500_v44 }
 0x142   : > { %1679 = vmatprep.mubr.f32.mxu0 %v12227_v40 }
 0x145   : > { %9309 = vmatmul.mubr.msk.f32.gmra.mrb[10].mxu0 %vm385_vm0, %v1501_v7 }
 0x146   : > { %1685 = vmatprep.mubr.f32.mxu0 %v12227_v40 }
 0x149   : > { %9310 = vmatmul.mubr.msk.f32.gmra.mrb[12].mxu0 %vm385_vm0, %v1502_v45 }
 0x14a   : > { %1691 = vmatprep.mubr.f32.mxu0 %v12227_v40 }
 0x14d   : > { %9311 = vmatmul.mubr.msk.f32.gmra.mrb[14].mxu0 %vm385_vm0, %v1503_v46 }
 0x14e   : > { %1697 = vmatprep.mubr.f32.mxu0 %v12227_v40 }
 0x151   : > { %9312 = vmatmul.mubr.msk.f32.gmra.mrb[16].mxu0 %vm385_vm0, %v1504_v47 }
 0x152   : > { %1703 = vmatprep.mubr.f32.mxu0 %v12227_v40 }
 0x155   : > { %9313 = vmatmul.mubr.msk.f32.gmra.mrb[18].mxu0 %vm385_vm0, %v1505_v48 }
 0x156   : > { %1709 = vmatprep.mubr.f32.mxu0 %v12227_v40 }
 0x159   : > { %9314 = vmatmul.mubr.msk.f32.gmra.mrb[20].mxu0 %vm385_vm0, %v1506_v49 }
 0x15a   : > { %1715 = vmatprep.mubr.f32.mxu0 %v12227_v40 }
 0x15d   : > { %9315 = vmatmul.mubr.msk.f32.gmra.mrb[22].mxu0 %vm385_vm0, %v1507_v50 }
 0x15e   : > { %1721 = vmatprep.mubr.f32.mxu0 %v12227_v40 }
 0x161   : > { %9316 = vmatmul.mubr.msk.f32.gmra.mrb[24].mxu0 %vm385_vm0, %v1508_v51 }
 0x162   : > { %1727 = vmatprep.mubr.f32.mxu0 %v12227_v40 }
 0x165   : > { %9317 = vmatmul.mubr.msk.f32.gmra.mrb[26].mxu0 %vm385_vm0, %v1509_v52 }
 0x166   : > { %1733 = vmatprep.mubr.f32.mxu0 %v12227_v40 }
 0x169   : > { %9318 = vmatmul.mubr.msk.f32.gmra.mrb[28].mxu0 %vm385_vm0, %v1510_v53 }
 0x16a   : > { %1739 = vmatprep.mubr.f32.mxu0 %v12227_v40 }
 0x16d   : > { %9319 = vmatmul.mubr.msk.f32.gmra.mrb[30].mxu0 %vm385_vm0, %v1511_v54 }
 0x204   : > { %v1651_v37 = vpop.f32.mrb[0].mxu0 }
 0x205   : > { %v1778_v38 = vmax.f32 %v1651_v37, 0.0  ;;  %v1653_v39 = vpop.f32.mrb[1].mxu0 }
 0x206   : > { %v1779_v40 = vmax.f32 %v1653_v39, 0.0 }
 0x207   : > { %1810 = vst [vmem:[#allocation3] sm:$0xff] %v1778_v38  ;;  %v10466_v38 = vpack.c.bf16 %v9326_v23, %v9322_v22 }
 0x208   : > { %1811 = vst.msk [vmem:[#allocation3 + $0x8] sm:$0xff] %vm389_vm1, %v1779_v40  ;;  %v1657_v41 = vpop.f32.mrb[2].mxu0 }
 0x209   : > { %v1780_v42 = vmax.f32 %v1657_v41, 0.0  ;;  %v1659_v43 = vpop.f32.mrb[3].mxu0 }
 0x20a   : > { %v1781_v44 = vmax.f32 %v1659_v43, 0.0  ;;  %v9330_v43 = vld [vmem:[%s19090_s2 + $0x350] sm:$0xff] }
 0x20b   : > { %1812 = vst [vmem:[#allocation3 + $0x10] sm:$0xff] %v1780_v42  ;;  %v13214_v56 = vrot.slane %v1780_v42, 1 }
 0x20c   : > { %1813 = vst.msk [vmem:[#allocation3 + $0x18] sm:$0xff] %vm389_vm1, %v1781_v44  ;;  %v1663_v7 = vpop.f32.mrb[4].mxu0  ;;  %v9334_v44 = vld [vmem:[%s19090_s2 + $0x370] sm:$0xff] }
 0x20d   : > { %v1782_v45 = vmax.f32 %v1663_v7, 0.0  ;;  %v1665_v46 = vpop.f32.mrb[5].mxu0 }
 0x20e   : > { %v1783_v47 = vmax.f32 %v1665_v46, 0.0  ;;  %v2143_v48 = vld [vmem:[#allocation3] sm:$0xf8] }
 0x20f   : > { %1814 = vst [vmem:[#allocation3 + $0x20] sm:$0xff] %v1782_v45  ;;  %v2151_v50 = vrot.slane %v2143_v48, 1  ;;  %v2144_v53 = vld [vmem:[#allocation3 + $0x8] sm:$0xf8]  ;;  %v1919_v54 = vrot.slane %v1782_v45, 1 }
 0x210   : > { %1815 = vst.msk [vmem:[#allocation3 + $0x28] sm:$0xff] %vm389_vm1, %v1783_v47  ;;  %v1669_v49 = vpop.f32.mrb[6].mxu0  ;;  %v2153_v60 = vrot.slane %v2144_v53, 1  ;;  %v2139_v4 = vld [vmem:[#allocation3] sm:$0xfc] }
 0x211   : > { %v13212_v51 = vmax.f32 %v1669_v49, 0.0  ;;  %v1671_v52 = vpop.f32.mrb[7].mxu0  ;;  %v2152_v61 = vsel %vm1912_vm2, %v2151_v50, %v13214_v56  ;;  %v1920_v0 = vsel %vm1912_vm2, %v13214_v56, %v1919_v54  ;;  %v2140_v6 = vld [vmem:[#allocation3 + $0x8] sm:$0xfc] }
 0x212   : > { %v1785_v55 = vmax.f32 %v1671_v52, 0.0  ;;  %v2165_v8 = vadd.f32 %v2152_v61, %v2139_v4  ;;  %v13231_v12 = vadd.f32 %v1920_v0, %v1780_v42  ;;  %v10468_v42 = vpack.c.bf16 %v9335_v30, %v9331_v29  ;;  %v9339_v49 = vld [vmem:[%s19090_s2 + $0x398] sm:$0xff] }
 0x213   : > { %1816 = vst [vmem:[#allocation3 + $0x30] sm:$0xff] %v13212_v51  ;;  %v1845_v57 = vld [vmem:[#allocation3 + $0x18] sm:$0xff]  ;;  %v1923_v1 = vrot.slane %v13212_v51, 1  ;;  %v9343_v50 = vld [vmem:[%s19090_s2 + $0x3b8] sm:$0xff] }
 0x214   : > { %1817 = vst.msk [vmem:[#allocation3 + $0x38] sm:$0xff] %vm389_vm1, %v1785_v55  ;;  %v1675_v58 = vpop.f32.mrb[8].mxu0  ;;  %v13218_v59 = vrot.slane %v1845_v57, 1  ;;  %v2303_v20 = vrot.slane %v2165_v8, 2  ;;  %v2304_v26 = vrot.slane %v13231_v12, 2 }
 0x215   : > { %v13222_v62 = vmax.f32 %v1675_v58, 0.0  ;;  %v1677_v63 = vpop.f32.mrb[9].mxu0  ;;  %v1924_v15 = vsel %vm1912_vm2, %v1919_v54, %v1923_v1 }
 0x216   : > { %v1787_v2 = vmax.f32 %v1677_v63, 0.0  ;;  %v2154_v3 = vsel %vm1912_vm2, %v2153_v60, %v13218_v59  ;;  %v13250_v28 = vadd.f32 %v1924_v15, %v1782_v45  ;;  %v13280_v45 = vsel %vm2302_vm3, %v2303_v20, %v2304_v26 }
 0x217   : > { %1818 = vst [vmem:[#allocation3 + $0x40] sm:$0xff] %v13222_v62  ;;  %v1847_v5 = vld [vmem:[#allocation3 + $0x28] sm:$0xff]  ;;  %v2166_v11 = vadd.f32 %v2154_v3, %v2140_v6  ;;  %v1927_v16 = vrot.slane %v13222_v62, 1  ;;  %v10470_v60 = vpack.c.bf16 %v9334_v44, %v9330_v43  ;;  %v9342_v3 = vld [vmem:[%s19090_s2 + $0x3b0] sm:$0xff] }
 0x218   : > { %1819 = vst.msk [vmem:[#allocation3 + $0x48] sm:$0xff] %vm389_vm1, %v1787_v2  ;;  %v1681_v9 = vpop.f32.mrb[10].mxu0  ;;  %v1921_v10 = vrot.slane %v1847_v5, 1  ;;  %v2309_v46 = vrot.slane %v13250_v28, 2  ;;  %v9338_v2 = vld [vmem:[%s19090_s2 + $0x390] sm:$0xff] }
 0x219   : > { %v13233_v13 = vmax.f32 %v1681_v9, 0.0  ;;  %v1683_v14 = vpop.f32.mrb[11].mxu0  ;;  %v2306_v25 = vrot.slane %v2166_v11, 2  ;;  %v1928_v34 = vsel %vm1912_vm2, %v1923_v1, %v1927_v16  ;;  %v10472_v1 = vpack.c.bf16 %v9343_v50, %v9339_v49  ;;  %v9351_v11 = vld [vmem:[%s19090_s2 + $0x3f8] sm:$0xff] }
 0x21a   : > { %v1789_v17 = vmax.f32 %v1683_v14, 0.0  ;;  %v1922_v18 = vsel %vm1912_vm2, %v13218_v59, %v1921_v10  ;;  %v13284_v48 = vadd.f32 %v1928_v34, %v13212_v51 }
 0x21b   : > { %1820 = vst [vmem:[#allocation3 + $0x50] sm:$0xff] %v13233_v13  ;;  %v13240_v19 = vadd.f32 %v1922_v18, %v1845_v57  ;;  %v1849_v21 = vld [vmem:[#allocation3 + $0x38] sm:$0xff]  ;;  %v1931_v35 = vrot.slane %v13233_v13, 1 }
 0x21c   : > { %1821 = vst.msk [vmem:[#allocation3 + $0x58] sm:$0xff] %vm389_vm1, %v1789_v17  ;;  %v1687_v24 = vpop.f32.mrb[12].mxu0  ;;  %v1925_v27 = vrot.slane %v1849_v21, 1  ;;  %v2313_v6 = vrot.slane %v13284_v48, 2 }
 0x21d   : > { %v13258_v31 = vmax.f32 %v1687_v24, 0.0  ;;  %v1689_v32 = vpop.f32.mrb[13].mxu0  ;;  %v2307_v33 = vrot.slane %v13240_v19, 2  ;;  %v1932_v55 = vsel %vm1912_vm2, %v1927_v16, %v1931_v35 }
 0x21e   : > { %v1791_v36 = vmax.f32 %v1689_v32, 0.0  ;;  %v1926_v37 = vsel %vm1912_vm2, %v1921_v10, %v1925_v27  ;;  %v13319_v9 = vadd.f32 %v1932_v55, %v13222_v62  ;;  %v9347_v10 = vld [vmem:[%s19090_s2 + $0x3d8] sm:$0xff]  ;;  %v13350_v30 = vsel %vm2302_vm3, %v2309_v46, %v2313_v6 }
 0x21f   : > { %1822 = vst [vmem:[#allocation3 + $0x60] sm:$0xff] %v13258_v31  ;;  %v13266_v39 = vsel %vm2302_vm3, %v2306_v25, %v2307_v33  ;;  %v13268_v40 = vadd.f32 %v1926_v37, %v1847_v5  ;;  %v1851_v41 = vld [vmem:[#allocation3 + $0x48] sm:$0xff]  ;;  %v1935_v51 = vrot.slane %v13258_v31, 1  ;;  %v13315_v5 = vsel %vm2302_vm3, %v2304_v26, %v2309_v46  ;;  %v9346_v26 = vld [vmem:[%s19090_s2 + $0x3d0] sm:$0xff] }
 0x220   : > { %1823 = vst.msk [vmem:[#allocation3 + $0x68] sm:$0xff] %vm389_vm1, %v1791_v36  ;;  %v1693_v7 = vpop.f32.mrb[14].mxu0  ;;  %9416 = vmatprep.mubr.msk.f32.mxu1 %vm389_vm1, %v13266_v39  ;;  %v1929_v47 = vrot.slane %v1851_v41, 1  ;;  %v10476_v25 = vpack.c.bf16 %v9351_v11, %v9347_v10  ;;  %v2317_v32 = vrot.slane %v13319_v9, 2  ;;  %v9359_v36 = vld [vmem:[%s19090_s2 + $0x438] sm:$0xff] }
 0x221   : > { %v13292_v52 = vmax.f32 %v1693_v7, 0.0  ;;  %v1695_v53 = vpop.f32.mrb[15].mxu0  ;;  %2482 = vmatmul.mubr.f32.vlgmr.msra.gmra.mrb[0].mxu1 %v13280_v45  ;;  %v2311_v54 = vrot.slane %v13268_v40, 2  ;;  %v1936_v17 = vsel %vm1912_vm2, %v1931_v35, %v1935_v51  ;;  %v9355_v35 = vld [vmem:[%s19090_s2 + $0x418] sm:$0xff] }
 0x222   : > { %v1793_v57 = vmax.f32 %v1695_v53, 0.0  ;;  %10467 = vmatpush1.bf16.msra.mxu1 %v10466_v38  ;;  %v1930_v58 = vsel %vm1912_vm2, %v1925_v27, %v1929_v47  ;;  %v9350_v27 = vld [vmem:[%s19090_s2 + $0x3f0] sm:$0xff]  ;;  %v13354_v34 = vadd.f32 %v1936_v17, %v13233_v13  ;;  %v10480_v50 = vpack.c.bf16 %v9359_v36, %v9355_v35 }
 0x223   : > { %1824 = vst [vmem:[#allocation3 + $0x70] sm:$0xff] %v13292_v52  ;;  %v13301_v61 = vsel %vm2302_vm3, %v2307_v33, %v2311_v54  ;;  %v13303_v63 = vadd.f32 %v1930_v58, %v1849_v21  ;;  %10469 = vmatprep.subr.bf16.mxu1 %v10468_v42  ;;  %v1853_v0 = vld [vmem:[#allocation3 + $0x58] sm:$0xff]  ;;  %v1939_v62 = vrot.slane %v13292_v52, 1  ;;  %v10474_v21 = vpack.c.bf16 %v9342_v3, %v9338_v2  ;;  %v9354_v53 = vld [vmem:[%s19090_s2 + $0x410] sm:$0xff] }
 0x224   : > { %1825 = vst.msk [vmem:[#allocation3 + $0x78] sm:$0xff] %vm389_vm1, %v1793_v57  ;;  %v1699_v4 = vpop.f32.mrb[16].mxu0  ;;  %9417 = vmatprep.mubr.msk.f32.mxu1 %vm389_vm1, %v13301_v61  ;;  %v1933_v8 = vrot.slane %v1853_v0, 1  ;;  %19266 = vst [vmem:[#allocation10_spill] sm:$0xff] %v13354_v34  ;;  %v10478_v7 = vpack.c.bf16 %v9350_v27, %v9346_v26  ;;  %v2321_v57 = vrot.slane %v13354_v34, 2 }
 0x225   : > { %v13327_v14 = vmax.f32 %v1699_v4, 0.0  ;;  %v1701_v15 = vpop.f32.mrb[17].mxu0  ;;  %2488 = vmatmul.mubr.f32.gmra.mrb[2].mxu1 %v13315_v5  ;;  %v2315_v16 = vrot.slane %v13303_v63, 2  ;;  %v1940_v42 = vsel %vm1912_vm2, %v1935_v51, %v1939_v62  ;;  %v13385_v51 = vsel %vm2302_vm3, %v2313_v6, %v2317_v32 }
 0x226   : > { %v1795_v18 = vmax.f32 %v1701_v15, 0.0  ;;  %10471 = vmatpush1.bf16.msra.mxu1 %v10470_v60  ;;  %v1934_v20 = vsel %vm1912_vm2, %v1929_v47, %v1933_v8  ;;  %v13389_v60 = vadd.f32 %v1940_v42, %v13258_v31 }
 0x227   : > { %1826 = vst [vmem:[#allocation3 + $0x80] sm:$0xff] %v13327_v14  ;;  %v13336_v22 = vsel %vm2302_vm3, %v2311_v54, %v2315_v16  ;;  %v13338_v23 = vadd.f32 %v1934_v20, %v1851_v41  ;;  %10473 = vmatprep.subr.bf16.mxu1 %v10472_v1  ;;  %v1855_v24 = vld [vmem:[#allocation3 + $0x68] sm:$0xff]  ;;  %v1943_v13 = vrot.slane %v13327_v14, 1  ;;  %v9358_v54 = vld [vmem:[%s19090_s2 + $0x430] sm:$0xff] }
 0x228   : > { %1827 = vst.msk [vmem:[#allocation3 + $0x88] sm:$0xff] %vm389_vm1, %v1795_v18  ;;  %v1705_v29 = vpop.f32.mrb[18].mxu0  ;;  %9418 = vmatprep.mubr.msk.f32.mxu1 %vm389_vm1, %v13336_v22  ;;  %v1937_v33 = vrot.slane %v1855_v24, 1  ;;  %19268 = vst [vmem:[#allocation12_spill] sm:$0xff] %v13389_v60  ;;  %v9367_v1 = vld [vmem:[%s19090_s2 + $0x478] sm:$0xff]  ;;  %v10482_v11 = vpack.c.bf16 %v9358_v54, %v9354_v53  ;;  %v9366_v20 = vld [vmem:[%s19090_s2 + $0x470] sm:$0xff] }
 0x229   : > { %v13362_v37 = vmax.f32 %v1705_v29, 0.0  ;;  %v1707_v38 = vpop.f32.mrb[19].mxu0  ;;  %2494 = vmatmul.mubr.f32.gmra.mrb[4].mxu1 %v13350_v30  ;;  %v2319_v41 = vrot.slane %v13338_v23, 2  ;;  %v1944_v6 = vsel %vm1912_vm2, %v1939_v62, %v1943_v13  ;;  %v9362_v62 = vld [vmem:[%s19090_s2 + $0x450] sm:$0xff]  ;;  %v9371_v29 = vld [vmem:[%s19090_s2 + $0x498] sm:$0xff] }
 0x22a   : > { %v1797_v43 = vmax.f32 %v1707_v38, 0.0  ;;  %v1938_v44 = vsel %vm1912_vm2, %v1933_v8, %v1937_v33  ;;  %10475 = vmatpush1.bf16.msra.mxu1 %v10474_v21  ;;  %v13424_v27 = vadd.f32 %v1944_v6, %v13292_v52  ;;  %v9374_v54 = vld [vmem:[%s19090_s2 + $0x4b0] sm:$0xff] }
 0x22b   : > { %1828 = vst [vmem:[#allocation3 + $0x90] sm:$0xff] %v13362_v37  ;;  %v13371_v46 = vsel %vm2302_vm3, %v2315_v16, %v2319_v41  ;;  %v13373_v47 = vadd.f32 %v1938_v44, %v1853_v0  ;;  %v1857_v49 = vld [vmem:[#allocation3 + $0x78] sm:$0xff]  ;;  %10477 = vmatprep.subr.bf16.mxu1 %v10476_v25  ;;  %v9363_v0 = vld [vmem:[%s19090_s2 + $0x458] sm:$0xff]  ;;  %v1947_v31 = vrot.slane %v13362_v37, 1  ;;  %v2325_v25 = vrot.slane %v13389_v60, 2 }
 0x22c   : > { %1829 = vst.msk [vmem:[#allocation3 + $0x98] sm:$0xff] %vm389_vm1, %v1797_v43  ;;  %v1711_v55 = vpop.f32.mrb[20].mxu0  ;;  %9419 = vmatprep.mubr.msk.f32.mxu1 %vm389_vm1, %v13371_v46  ;;  %v1941_v58 = vrot.slane %v1857_v49, 1  ;;  %v10484_v18 = vpack.c.bf16 %v9367_v1, %v9363_v0  ;;  %19270 = vst [vmem:[#allocation14_spill] sm:$0xff] %v13424_v27  ;;  %v10486_v43 = vpack.c.bf16 %v9366_v20, %v9362_v62 }
 0x22d   : > { %19267 = vst [vmem:[#allocation11_spill] sm:$0xff] %v13373_v47  ;;  %v13397_v2 = vmax.f32 %v1711_v55, 0.0  ;;  %v1713_v3 = vpop.f32.mrb[21].mxu0  ;;  %2500 = vmatmul.mubr.f32.gmra.mrb[6].mxu1 %v13385_v51  ;;  %v2323_v4 = vrot.slane %v13373_v47, 2  ;;  %v1948_v38 = vsel %vm1912_vm2, %v1943_v13, %v1947_v31  ;;  %v9370_v13 = vld [vmem:[%s19090_s2 + $0x490] sm:$0xff] }
 0x22e   : > { %v1799_v8 = vmax.f32 %v1713_v3, 0.0  ;;  %v1942_v10 = vsel %vm1912_vm2, %v1937_v33, %v1941_v58  ;;  %10479 = vmatpush1.bf16.msra.mxu1 %v10478_v7  ;;  %v9375_v33 = vld [vmem:[%s19090_s2 + $0x4b8] sm:$0xff]  ;;  %v13459_v1 = vadd.f32 %v1948_v38, %v13327_v14  ;;  %v10490_v62 = vpack.c.bf16 %v9374_v54, %v9370_v13 }
 0x22f   : > { %1830 = vst [vmem:[#allocation3 + $0xa0] sm:$0xff] %v13397_v2  ;;  %v13406_v15 = vsel %vm2302_vm3, %v2319_v41, %v2323_v4  ;;  %v13408_v16 = vadd.f32 %v1942_v10, %v1855_v24  ;;  %v1859_v17 = vld [vmem:[#allocation3 + $0x88] sm:$0xff]  ;;  %10481 = vmatprep.subr.bf16.mxu1 %v10480_v50  ;;  %v13420_v24 = vsel %vm2302_vm3, %v2317_v32, %v2321_v57  ;;  %v1951_v52 = vrot.slane %v13397_v2, 1 }
 0x230   : > { %1831 = vst.msk [vmem:[#allocation3 + $0xa8] sm:$0xff] %vm389_vm1, %v1799_v8  ;;  %v1717_v21 = vpop.f32.mrb[22].mxu0  ;;  %9420 = vmatprep.mubr.msk.f32.mxu1 %vm389_vm1, %v13406_v15  ;;  %v1945_v26 = vrot.slane %v1859_v17, 1  ;;  %v10488_v53 = vpack.c.bf16 %v9375_v33, %v9371_v29  ;;  %19272 = vst [vmem:[#allocation16_spill] sm:$0xff] %v13459_v1  ;;  %v9379_v3 = vld [vmem:[%s19090_s2 + $0x4d8] sm:$0xff] }
 0x231   : > { %19269 = vst [vmem:[#allocation13_spill] sm:$0xff] %v13408_v16  ;;  %v13432_v35 = vmax.f32 %v1717_v21, 0.0  ;;  %v1719_v36 = vpop.f32.mrb[23].mxu0  ;;  %2506 = vmatmul.mubr.f32.gmra.mrb[8].mxu1 %v13420_v24  ;;  %v2327_v32 = vrot.slane %v13408_v16, 2  ;;  %v1952_v10 = vsel %vm1912_vm2, %v1947_v31, %v1951_v52  ;;  %v9378_v31 = vld [vmem:[%s19090_s2 + $0x4d0] sm:$0xff] }
 0x232   : > { %v1801_v41 = vmax.f32 %v1719_v36, 0.0  ;;  %v1946_v42 = vsel %vm1912_vm2, %v1941_v58, %v1945_v26  ;;  %10483 = vmatpush1.bf16.msra.mxu1 %v10482_v11  ;;  %v2329_v58 = vrot.slane %v13424_v27, 2 }
 0x233   : > { %1832 = vst [vmem:[#allocation3 + $0xb0] sm:$0xff] %v13432_v35  ;;  %v13441_v44 = vsel %vm2302_vm3, %v2323_v4, %v2327_v32  ;;  %v13443_v7 = vadd.f32 %v1946_v42, %v1857_v49  ;;  %v1861_v50 = vld [vmem:[#allocation3 + $0x98] sm:$0xff]  ;;  %10485 = vmatprep.subr.bf16.mxu1 %v10484_v18  ;;  %v13455_v49 = vsel %vm2302_vm3, %v2321_v57, %v2325_v25  ;;  %v9383_v4 = vld [vmem:[%s19090_s2 + $0x4f8] sm:$0xff]  ;;  %v1955_v14 = vrot.slane %v13432_v35, 1 }
 0x234   : > { %1833 = vst.msk [vmem:[#allocation3 + $0xb8] sm:$0xff] %vm389_vm1, %v1801_v41  ;;  %v1723_v55 = vpop.f32.mrb[24].mxu0  ;;  %9421 = vmatprep.mubr.msk.f32.mxu1 %vm389_vm1, %v13441_v44  ;;  %v1949_v0 = vrot.slane %v1861_v50, 1  ;;  %v10492_v33 = vpack.c.bf16 %v9383_v4, %v9379_v3  ;;  %v13494_v41 = vadd.f32 %v1952_v10, %v13362_v37  ;;  %v9387_v42 = vld [vmem:[%s19090_s2 + $0x518] sm:$0xff] }
 0x235   : > { %19271 = vst [vmem:[#allocation15_spill] sm:$0xff] %v13443_v7  ;;  %v13467_v6 = vmax.f32 %v1723_v55, 0.0  ;;  %v1725_v8 = vpop.f32.mrb[25].mxu0  ;;  %2512 = vmatmul.mubr.f32.gmra.mrb[10].mxu1 %v13455_v49  ;;  %v2331_v57 = vrot.slane %v13443_v7, 2  ;;  %v1956_v54 = vsel %vm1912_vm2, %v1951_v52, %v1955_v14  ;;  %v9386_v52 = vld [vmem:[%s19090_s2 + $0x510] sm:$0xff] }
 0x236   : > { %v1803_v11 = vmax.f32 %v1725_v8, 0.0  ;;  %v1950_v18 = vsel %vm1912_vm2, %v1945_v26, %v1949_v0  ;;  %10487 = vmatpush1.bf16.msra.mxu1 %v10486_v43  ;;  %v9382_v26 = vld [vmem:[%s19090_s2 + $0x4f0] sm:$0xff]  ;;  %19274 = vst [vmem:[#allocation18_spill] sm:$0xff] %v13494_v41  ;;  %v9391_v43 = vld [vmem:[%s19090_s2 + $0x538] sm:$0xff] }
 0x237   : > { %1834 = vst [vmem:[#allocation3 + $0xc0] sm:$0xff] %v13467_v6  ;;  %v13476_v20 = vsel %vm2302_vm3, %v2327_v32, %v2331_v57  ;;  %v13478_v21 = vadd.f32 %v1950_v18, %v1859_v17  ;;  %v1863_v29 = vld [vmem:[#allocation3 + $0xa8] sm:$0xff]  ;;  %10489 = vmatprep.subr.bf16.mxu1 %v10488_v53  ;;  %v13490_v17 = vsel %vm2302_vm3, %v2325_v25, %v2329_v58  ;;  %v2333_v32 = vrot.slane %v13459_v1, 2 }
 0x238   : > { %1835 = vst.msk [vmem:[#allocation3 + $0xc8] sm:$0xff] %vm389_vm1, %v1803_v11  ;;  %v1729_v36 = vpop.f32.mrb[26].mxu0  ;;  %9422 = vmatprep.mubr.msk.f32.mxu1 %vm389_vm1, %v13476_v20  ;;  %v1953_v38 = vrot.slane %v1863_v29, 1  ;;  %v1959_v37 = vrot.slane %v13467_v6, 1  ;;  %v10494_v4 = vpack.c.bf16 %v9382_v26, %v9378_v31  ;;  %v10496_v18 = vpack.c.bf16 %v9391_v43, %v9387_v42  ;;  %v9395_v26 = vld [vmem:[%s19090_s2 + $0x558] sm:$0xff] }
 0x239   : > { %19273 = vst [vmem:[#allocation17_spill] sm:$0xff] %v13478_v21  ;;  %v13502_v53 = vmax.f32 %v1729_v36, 0.0  ;;  %v1731_v13 = vpop.f32.mrb[27].mxu0  ;;  %2518 = vmatmul.mubr.f32.gmra.mrb[12].mxu1 %v13490_v17  ;;  %v2335_v25 = vrot.slane %v13478_v21, 2  ;;  %v13529_v31 = vadd.f32 %v1956_v54, %v13397_v2  ;;  %v9399_v36 = vld [vmem:[%s19090_s2 + $0x578] sm:$0xff] }
 0x23a   : > { %v1805_v55 = vmax.f32 %v1731_v13, 0.0  ;;  %v1954_v3 = vsel %vm1912_vm2, %v1949_v0, %v1953_v38  ;;  %10491 = vmatpush1.bf16.msra.mxu1 %v10490_v62  ;;  %v9390_v0 = vld [vmem:[%s19090_s2 + $0x530] sm:$0xff]  ;;  %v1960_v13 = vsel %vm1912_vm2, %v1955_v14, %v1959_v37  ;;  %v10500_v21 = vpack.c.bf16 %v9399_v36, %v9395_v26  ;;  %v9407_v26 = vld [vmem:[%s19090_s2 + $0x5b8] sm:$0xff] }
 0x23b   : > { %1836 = vst [vmem:[#allocation3 + $0xd0] sm:$0xff] %v13502_v53  ;;  %v13511_v8 = vsel %vm2302_vm3, %v2331_v57, %v2335_v25  ;;  %v13513_v10 = vadd.f32 %v1954_v3, %v1861_v50  ;;  %v1865_v11 = vld [vmem:[#allocation3 + $0xb8] sm:$0xff]  ;;  %10493 = vmatprep.subr.bf16.mxu1 %v10492_v33  ;;  %v13525_v50 = vsel %vm2302_vm3, %v2329_v58, %v2333_v32  ;;  %v2337_v57 = vrot.slane %v13494_v41, 2  ;;  %v9394_v14 = vld [vmem:[%s19090_s2 + $0x550] sm:$0xff] }
 0x23c   : > { %1837 = vst.msk [vmem:[#allocation3 + $0xd8] sm:$0xff] %vm389_vm1, %v1805_v55  ;;  %v1735_v62 = vpop.f32.mrb[28].mxu0  ;;  %9423 = vmatprep.mubr.msk.f32.mxu1 %vm389_vm1, %v13511_v8  ;;  %v1957_v33 = vrot.slane %v1865_v11, 1  ;;  %19276 = vst [vmem:[#allocation20_spill] sm:$0xff] %v13529_v31  ;;  %v1963_v2 = vrot.slane %v13502_v53, 1  ;;  %v10498_v3 = vpack.c.bf16 %v9390_v0, %v9386_v52  ;;  %v13564_v52 = vadd.f32 %v1960_v13, %v13432_v35  ;;  %v9403_v0 = vld [vmem:[%s19090_s2 + $0x598] sm:$0xff] }
 0x23d   : > { %19275 = vst [vmem:[#allocation19_spill] sm:$0xff] %v13513_v10  ;;  %v13537_v42 = vmax.f32 %v1735_v62, 0.0  ;;  %v1737_v43 = vpop.f32.mrb[29].mxu0  ;;  %2524 = vmatmul.mubr.f32.gmra.mrb[14].mxu1 %v13525_v50  ;;  %v2339_v58 = vrot.slane %v13513_v10, 2  ;;  %v10504_v7 = vpack.c.bf16 %v9407_v26, %v9403_v0 }
 0x23e   : > { %v1807_v54 = vmax.f32 %v1737_v43, 0.0  ;;  %v1958_v55 = vsel %vm1912_vm2, %v1953_v38, %v1957_v33  ;;  %10495 = vmatpush1.bf16.msra.mxu1 %v10494_v4  ;;  %v9398_v38 = vld [vmem:[%s19090_s2 + $0x570] sm:$0xff]  ;;  %19278 = vst [vmem:[#allocation22_spill] sm:$0xff] %v13564_v52 }
 0x23f   : > { %1838 = vst [vmem:[#allocation3 + $0xe0] sm:$0xff] %v13537_v42  ;;  %v13546_v41 = vsel %vm2302_vm3, %v2335_v25, %v2339_v58  ;;  %v13548_v62 = vadd.f32 %v1958_v55, %v1863_v29  ;;  %v1867_v1 = vld [vmem:[#allocation3 + $0xc8] sm:$0xff]  ;;  %10497 = vmatprep.subr.bf16.mxu1 %v10496_v18  ;;  %v13560_v29 = vsel %vm2302_vm3, %v2333_v32, %v2337_v57  ;;  %v2341_v25 = vrot.slane %v13529_v31, 2 }
 0x240   : > { %1839 = vst.msk [vmem:[#allocation3 + $0xe8] sm:$0xff] %vm389_vm1, %v1807_v54  ;;  %v1741_v4 = vpop.f32.mrb[30].mxu0  ;;  %9424 = vmatprep.mubr.msk.f32.mxu1 %vm389_vm1, %v13546_v41  ;;  %v1961_v18 = vrot.slane %v1867_v1, 1  ;;  %v1964_v54 = vsel %vm1912_vm2, %v1959_v37, %v1963_v2  ;;  %v1967_v35 = vrot.slane %v13537_v42, 1  ;;  %v10502_v31 = vpack.c.bf16 %v9398_v38, %v9394_v14  ;;  %v9402_v37 = vld [vmem:[%s19090_s2 + $0x590] sm:$0xff]  ;;  %v9411_v14 = vld [vmem:[%s19090_s2 + $0x5d8] sm:$0xff] }
 0x241   : > { %19277 = vst [vmem:[#allocation21_spill] sm:$0xff] %v13548_v62  ;;  %v13572_v36 = vmax.f32 %v1741_v4, 0.0  ;;  %v1743_v43 = vpop.f32.mrb[31].mxu0  ;;  %2530 = vmatmul.mubr.f32.gmra.mrb[16].mxu1 %v13560_v29  ;;  %v2343_v32 = vrot.slane %v13548_v62, 2  ;;  %v9415_v38 = vld [vmem:[%s19090_s2 + $0x5f8] sm:$0xff] }
 0x242   : > { %v1809_v13 = vmax.f32 %v1743_v43, 0.0  ;;  %v1962_v55 = vsel %vm1912_vm2, %v1957_v33, %v1961_v18  ;;  %10499 = vmatpush1.bf16.msra.mxu1 %v10498_v3  ;;  %v9406_v33 = vld [vmem:[%s19090_s2 + $0x5b0] sm:$0xff]  ;;  %v13599_v3 = vadd.f32 %v1964_v54, %v13467_v6  ;;  %v2146_v43 = vld [vmem:[#allocation3 + $0x108] sm:$0x7] }
 0x243   : > { %1840 = vst [vmem:[#allocation3 + $0xf0] sm:$0xff] %v13572_v36  ;;  %v13581_v10 = vsel %vm2302_vm3, %v2339_v58, %v2343_v32  ;;  %v13583_v4 = vadd.f32 %v1962_v55, %v1865_v11  ;;  %v1869_v27 = vld [vmem:[#allocation3 + $0xd8] sm:$0xff]  ;;  %10501 = vmatprep.subr.bf16.mxu1 %v10500_v21  ;;  %v13595_v58 = vsel %vm2302_vm3, %v2337_v57, %v2341_v25  ;;  %v2345_v11 = vrot.slane %v13564_v52, 2  ;;  %v13614_v54 = vld [vmem:[#allocation3 + $0x100] sm:$0x7] }
 0x244   : > { %1841 = vst.msk [vmem:[#allocation3 + $0xf8] sm:$0xff] %vm389_vm1, %v1809_v13  ;;  %9425 = vmatprep.mubr.msk.f32.mxu1 %vm389_vm1, %v13581_v10  ;;  %v1965_v21 = vrot.slane %v1869_v27, 1  ;;  %19280 = vst [vmem:[#allocation24_spill] sm:$0xff] %v13599_v3  ;;  %v1968_v57 = vsel %vm1912_vm2, %v1963_v2, %v1967_v35  ;;  %v13611_v26 = vrot.slane %v13572_v36, 1  ;;  %v10506_v13 = vpack.c.bf16 %v9406_v33, %v9402_v37  ;;  %v1877_v55 = vld [vmem:[#allocation3 + $0x108] sm:$0x1] }
 0x245   : > { %19279 = vst [vmem:[#allocation23_spill] sm:$0xff] %v13583_v4  ;;  %2536 = vmatmul.mubr.f32.gmra.mrb[18].mxu1 %v13595_v58  ;;  %v2347_v0 = vrot.slane %v13583_v4, 2  ;;  %v10508_v4 = vpack.c.bf16 %v9415_v38, %v9411_v14  ;;  %v9410_v2 = vld [vmem:[%s19090_s2 + $0x5d0] sm:$0xff]  ;;  %v2044_v37 = vld [vmem:[%s19090_s2 + $0x8] sm:$0xff]  ;;  %v2155_v38 = vrot.slane %v13614_v54, 1 }
 0x246   : > { %19281 = vst [vmem:[#allocation25_spill] sm:$0xff] %v13611_v26  ;;  %v1966_v6 = vsel %vm1912_vm2, %v1961_v18, %v1965_v21  ;;  %10503 = vmatpush1.bf16.msra.mxu1 %v10502_v31  ;;  %v9414_v31 = vld [vmem:[%s19090_s2 + $0x5f0] sm:$0xff]  ;;  %v13630_v18 = vsel %vm2302_vm3, %v2341_v25, %v2345_v11  ;;  %v2048_v33 = vld [vmem:[%s19090_s2 + $0x28] sm:$0xff]  ;;  %v1972_v25 = vsel %vm1912_vm2, %v1967_v35, %v13611_v26 }
 0x247   : > { %v13617_v52 = vsel %vm2302_vm3, %v2343_v32, %v2347_v0  ;;  %v13619_v62 = vadd.f32 %v1966_v6, %v1867_v1  ;;  %v1871_v60 = vld [vmem:[#allocation3 + $0xe8] sm:$0xff]  ;;  %10505 = vmatprep.subr.bf16.mxu1 %v10504_v7  ;;  %v2349_v1 = vrot.slane %v13599_v3, 2  ;;  %v13634_v7 = vadd.f32 %v1968_v57, %v13502_v53 }
 0x248   : > { %9426 = vmatprep.mubr.msk.f32.mxu1 %vm389_vm1, %v13617_v52  ;;  %v1969_v32 = vrot.slane %v1871_v60, 1  ;;  %v2157_v57 = vrot.slane %v2146_v43, 1  ;;  %v10510_v6 = vpack.c.bf16 %v9414_v31, %v9410_v2  ;;  %v1977_v3 = vrot.slane %v1877_v55, 1 }
 0x249   : > { %19282 = vst [vmem:[#allocation26_spill] sm:$0xff] %v13619_v62  ;;  %2542 = vmatmul.mubr.f32.gmra.mrb[20].mxu1 %v13630_v18  ;;  %v2351_v14 = vrot.slane %v13619_v62, 2  ;;  %v10512_v62 = vpack.c.bf16 %v2048_v33, %v2044_v37  ;;  %v13658_v35 = vsel %vm2302_vm3, %v2345_v11, %v2349_v1  ;;  %v13665_v54 = vadd.f32 %v1972_v25, %v13537_v42  ;;  %v13683_v37 = vld [vmem:[#allocation3 + $0x108] sm:$0x1f] }
 0x24a   : > { %v1970_v53 = vsel %vm1912_vm2, %v1965_v21, %v1969_v32  ;;  %10507 = vmatpush1.bf16.msra.mxu1 %v10506_v13  ;;  %v2353_v21 = vrot.slane %v13634_v7, 2  ;;  %v2142_v13 = vld [vmem:[#allocation3 + $0x108] sm:$0x3] }
 0x24b   : > { %v13648_v16 = vld [vmem:[#allocation3 + $0xf8] sm:$0xff]  ;;  %v13651_v34 = vsel %vm2302_vm3, %v2347_v0, %v2351_v14  ;;  %v13653_v47 = vadd.f32 %v1970_v53, %v1869_v27  ;;  %10509 = vmatprep.subr.bf16.mxu1 %v10508_v4  ;;  %19284 = vst [vmem:[#allocation28_spill] sm:$0xff] %v13665_v54  ;;  %v2156_v4 = vsel %vm1912_vm2, %v13611_v26, %v2155_v38  ;;  %v2357_v33 = vrot.slane %v13665_v54, 2  ;;  %v2141_v53 = vld [vmem:[#allocation3 + $0x100] sm:$0x3] }
 0x24c   : > { %9427 = vmatprep.mubr.msk.f32.mxu1 %vm389_vm1, %v13651_v34  ;;  %v13662_v43 = vrot.slane %v13648_v16, 1  ;;  %v2170_v25 = vadd.f32 %v2157_v57, %v2142_v13 }
 0x24d   : > { %19283 = vst [vmem:[#allocation27_spill] sm:$0xff] %v13653_v47  ;;  %2548 = vmatmul.mubr.f32.gmra.mrb[22].mxu1 %v13658_v35  ;;  %v2355_v27 = vrot.slane %v13653_v47, 2 }
 0x24e   : > { %v1974_v0 = vsel %vm1912_vm2, %v1969_v32, %v13662_v43  ;;  %v2158_v11 = vsel %vm1912_vm2, %v13662_v43, %v2157_v57  ;;  %10511 = vmatpush1.bf16.msra.mxu1 %v10510_v6  ;;  %v1978_v55 = vsel %vm1912_vm2, %v13662_v43, %v1977_v3  ;;  %v13688_v32 = vsel %vm2302_vm3, %v2349_v1, %v2353_v21 }
 0x24f   : > { %v13678_v42 = vsel %vm2302_vm3, %v2351_v14, %v2355_v27  ;;  %v13680_v2 = vadd.f32 %v1974_v0, %v1871_v60  ;;  %v2168_v31 = vadd.f32 %v2158_v11, %v13648_v16  ;;  %10513 = vmatprep.subr.bf16.mxu1 %v10512_v62  ;;  %v2167_v3 = vadd.f32 %v2156_v4, %v13572_v36 }
 0x250   : > { %9428 = vmatprep.mubr.msk.f32.mxu1 %vm389_vm1, %v13678_v42  ;;  %v13693_v14 = vadd.f32 %v1978_v55, %v13648_v16  ;;  %v19134_v6 = vrot.slane %v13683_v37, 1  ;;  %v13704_v1 = vsel %vm2302_vm3, %v2353_v21, %v2357_v33  ;;  %v2169_v11 = vadd.f32 %v2155_v38, %v2141_v53 }
 0x251   : > { %2554 = vmatmul.mubr.f32.gmra.mrb[24].mxu1 %v13688_v32  ;;  %v2359_v60 = vrot.slane %v13680_v2, 2  ;;  %v2363_v62 = vrot.slane %v2168_v31, 2  ;;  %v2361_v4 = vrot.slane %v2167_v3, 2  ;;  %v2367_v57 = vrot.slane %v2170_v25, 2  ;;  %v2043_v3 = vld [vmem:[%s19090_s2] sm:$0xff]  ;;  %v2052_v25 = vld [vmem:[%s19090_s2 + $0x48] sm:$0xff] }
 0x252   : > { %v2365_v21 = vrot.slane %v2169_v11, 2 }
 0x253   : > { %v13699_v0 = vsel %vm2302_vm3, %v2355_v27, %v2359_v60  ;;  %v13708_v55 = vsel %vm2302_vm3, %v2359_v60, %v2363_v62  ;;  %v3114_v27 = vsel %vm1912_vm2, %v13662_v43, %v19134_v6  ;;  %v13717_v13 = vsel %vm2302_vm3, %v2357_v33, %v2361_v4  ;;  %v2047_v33 = vld [vmem:[%s19090_s2 + $0x20] sm:$0xff] }
 0x254   : > { %9429 = vmatprep.mubr.msk.f32.mxu1 %vm389_vm1, %v13699_v0  ;;  %v13720_v38 = vadd.f32 %v3114_v27, %v13648_v16  ;;  %v13724_v31 = vsel %vm2302_vm3, %v2363_v62, %v2367_v57  ;;  %v13735_v60 = vsel %vm2302_vm3, %v2361_v4, %v2365_v21  ;;  %v2056_v62 = vld [vmem:[%s19090_s2 + $0x68] sm:$0xff]  ;;  %v10514_v53 = vpack.c.bf16 %v2047_v33, %v2043_v3  ;;  %v2051_v4 = vld [vmem:[%s19090_s2 + $0x40] sm:$0xff] }
 0x255   : > { %2560 = vmatmul.mubr.f32.gmra.mrb[26].mxu1 %v13704_v1  ;;  %v10516_v11 = vpack.c.bf16 %v2056_v62, %v2052_v25  ;;  %v2055_v57 = vld [vmem:[%s19090_s2 + $0x60] sm:$0xff]  ;;  %v2060_v27 = vld [vmem:[%s19090_s2 + $0x88] sm:$0xff] }
 0x256   : > { %9430 = vmatprep.mubr.msk.f32.mxu1 %vm389_vm1, %v13708_v55  ;;  %v2064_v21 = vld [vmem:[%s19090_s2 + $0xa8] sm:$0xff]  ;;  %v2059_v33 = vld [vmem:[%s19090_s2 + $0x80] sm:$0xff] }
 0x257   : > { %v10520_v3 = vpack.c.bf16 %v2064_v21, %v2060_v27  ;;  %v2063_v25 = vld [vmem:[%s19090_s2 + $0xa0] sm:$0xff]  ;;  %v2068_v62 = vld [vmem:[%s19090_s2 + $0xc8] sm:$0xff] }
 0x259   : > { %2566 = vmatmul.mubr.f32.gmra.mrb[28].mxu1 %v13717_v13 }
 0x25a   : > { %9431 = vmatprep.mubr.msk.f32.mxu1 %vm389_vm1, %v13724_v31 }
 0x25d   : > { %2572 = vmatmul.mubr.f32.gmra.mrb[30].mxu1 %v13735_v60 }
 0x25e   : > { %9432 = vmatprep.mubr.msk.f32.mxu1 %vm389_vm1, %v13266_v39  ;;  %v10518_v39 = vpack.c.bf16 %v2055_v57, %v2051_v4  ;;  %v2071_v4 = vld [vmem:[%s19090_s2 + $0xe0] sm:$0xff]  ;;  %v2076_v57 = vld [vmem:[%s19090_s2 + $0x108] sm:$0xff] }
 0x261   : > { %2643 = vmatmul.mubr.f32.vlgmr.msra.gmra.mrb[32].mxu1 %v13280_v45  ;;  %v2072_v45 = vld [vmem:[%s19090_s2 + $0xe8] sm:$0xff] }
 0x262   : > { %9433 = vmatprep.mubr.msk.f32.mxu1 %vm389_vm1, %v13301_v61  ;;  %10515 = vmatpush1.bf16.msra.mxu1 %v10514_v53  ;;  %v10522_v61 = vpack.c.bf16 %v2063_v25, %v2059_v33  ;;  %v10524_v53 = vpack.c.bf16 %v2072_v45, %v2068_v62 }
 0x263   : > { %10517 = vmatprep.subr.bf16.mxu1 %v10516_v11  ;;  %v2067_v11 = vld [vmem:[%s19090_s2 + $0xc0] sm:$0xff] }
 0x264   : > { %v10526_v27 = vpack.c.bf16 %v2071_v4, %v2067_v11 }
 0x265   : > { %2649 = vmatmul.mubr.f32.gmra.mrb[34].mxu1 %v13315_v5  ;;  %v2080_v5 = vld [vmem:[%s19090_s2 + $0x128] sm:$0xff] }
 0x266   : > { %9434 = vmatprep.mubr.msk.f32.mxu1 %vm389_vm1, %v13336_v22  ;;  %10519 = vmatpush1.bf16.msra.mxu1 %v10518_v39  ;;  %v13789_v22 = vld [vmem:[#allocation3 + $0x108] sm:$0x7f]  ;;  %v10528_v21 = vpack.c.bf16 %v2080_v5, %v2076_v57  ;;  %v2075_v39 = vld [vmem:[%s19090_s2 + $0x100] sm:$0xff]  ;;  %v2100_v5 = vld [vmem:[%s19090_s2 + $0x1c8] sm:$0xff] }
 0x267   : > { %10521 = vmatprep.subr.bf16.mxu1 %v10520_v3  ;;  %19285 = vst [vmem:[#allocation29_spill] sm:$0xff] %v13789_v22  ;;  %v2079_v3 = vld [vmem:[%s19090_s2 + $0x120] sm:$0xff]  ;;  %v19133_v33 = vrot.slane %v13789_v22, 1  ;;  %v9550_v22 = vld [vmem:[%s19090_s2 + $0x830] sm:$0xff] }
 0x268   : > { %v10530_v25 = vpack.c.bf16 %v2079_v3, %v2075_v39  ;;  %v2095_v57 = vld [vmem:[%s19090_s2 + $0x1a0] sm:$0xff]  ;;  %v2108_v3 = vld [vmem:[%s19090_s2 + $0x208] sm:$0xff] }
 0x269   : > { %2655 = vmatmul.mubr.f32.gmra.mrb[36].mxu1 %v13350_v30  ;;  %v2084_v30 = vld [vmem:[%s19090_s2 + $0x148] sm:$0xff]  ;;  %v3750_v62 = vsel %vm1912_vm2, %v13662_v43, %v19133_v33  ;;  %v2103_v39 = vld [vmem:[%s19090_s2 + $0x1e0] sm:$0xff]  ;;  %v9542_v33 = vld [vmem:[%s19090_s2 + $0x7f0] sm:$0xff] }
 0x26a   : > { %9435 = vmatprep.mubr.msk.f32.mxu1 %vm389_vm1, %v13371_v46  ;;  %10523 = vmatpush1.bf16.msra.mxu1 %v10522_v61  ;;  %v2088_v46 = vld [vmem:[%s19090_s2 + $0x168] sm:$0xff]  ;;  %v2083_v61 = vld [vmem:[%s19090_s2 + $0x140] sm:$0xff] }
 0x26b   : > { %10525 = vmatprep.subr.bf16.mxu1 %v10524_v53  ;;  %v10532_v45 = vpack.c.bf16 %v2088_v46, %v2084_v30  ;;  %v13820_v53 = vadd.f32 %v3750_v62, %v13648_v16  ;;  %v2096_v43 = vld [vmem:[%s19090_s2 + $0x1a8] sm:$0xff]  ;;  %v2091_v16 = vld [vmem:[%s19090_s2 + $0x180] sm:$0xff] }
 0x26c   : > { %v2107_v46 = vld [vmem:[%s19090_s2 + $0x200] sm:$0xff]  ;;  %v2116_v62 = vld [vmem:[%s19090_s2 + $0x248] sm:$0xff] }
 0x26d   : > { %2661 = vmatmul.mubr.f32.gmra.mrb[38].mxu1 %v13385_v51  ;;  %v2087_v51 = vld [vmem:[%s19090_s2 + $0x160] sm:$0xff]  ;;  %19286 = vst [vmem:[#allocation30_spill] sm:$0xff] %v13820_v53 }
 0x26e   : > { %9436 = vmatprep.mubr.msk.f32.mxu1 %vm389_vm1, %v13406_v15  ;;  %10527 = vmatpush1.bf16.msra.mxu1 %v10526_v27  ;;  %v2092_v15 = vld [vmem:[%s19090_s2 + $0x188] sm:$0xff]  ;;  %v10534_v11 = vpack.c.bf16 %v2087_v51, %v2083_v61  ;;  %v2115_v61 = vld [vmem:[%s19090_s2 + $0x240] sm:$0xff] }
 0x26f   : > { %10529 = vmatprep.subr.bf16.mxu1 %v10528_v21  ;;  %v10536_v4 = vpack.c.bf16 %v2096_v43, %v2092_v15  ;;  %v2099_v21 = vld [vmem:[%s19090_s2 + $0x1c0] sm:$0xff]  ;;  %v2124_v15 = vld [vmem:[%s19090_s2 + $0x288] sm:$0xff] }
 0x270   : > { %v2119_v51 = vld [vmem:[%s19090_s2 + $0x260] sm:$0xff] }
 0x271   : > { %2667 = vmatmul.mubr.f32.gmra.mrb[40].mxu1 %v13420_v24  ;;  %v2104_v24 = vld [vmem:[%s19090_s2 + $0x1e8] sm:$0xff] }
 0x272   : > { %9437 = vmatprep.mubr.msk.f32.mxu1 %vm389_vm1, %v13441_v44  ;;  %10531 = vmatpush1.bf16.msra.mxu1 %v10530_v25  ;;  %v10538_v44 = vpack.c.bf16 %v2095_v57, %v2091_v16  ;;  %v10540_v27 = vpack.c.bf16 %v2104_v24, %v2100_v5  ;;  %v2111_v25 = vld [vmem:[%s19090_s2 + $0x220] sm:$0xff]  ;;  %v2132_v16 = vld [vmem:[%s19090_s2 + $0x2c8] sm:$0xff] }
 0x273   : > { %10533 = vmatprep.subr.bf16.mxu1 %v10532_v45  ;;  %v2131_v5 = vld [vmem:[%s19090_s2 + $0x2c0] sm:$0xff] }
 0x274   : > { %v2135_v24 = vld [vmem:[%s19090_s2 + $0x2e0] sm:$0xff] }
 0x275   : > { %2673 = vmatmul.mubr.f32.gmra.mrb[42].mxu1 %v13455_v49  ;;  %v2112_v49 = vld [vmem:[%s19090_s2 + $0x228] sm:$0xff] }
 0x276   : > { %9438 = vmatprep.mubr.msk.f32.mxu1 %vm389_vm1, %v13476_v20  ;;  %10535 = vmatpush1.bf16.msra.mxu1 %v10534_v11  ;;  %v10542_v20 = vpack.c.bf16 %v2103_v39, %v2099_v21  ;;  %v10544_v30 = vpack.c.bf16 %v2112_v49, %v2108_v3  ;;  %v2123_v11 = vld [vmem:[%s19090_s2 + $0x280] sm:$0xff]  ;;  %v1842_v3 = vld [vmem:[#allocation3] sm:$0xff] }
 0x277   : > { %10537 = vmatprep.subr.bf16.mxu1 %v10536_v4  ;;  %v2127_v4 = vld [vmem:[%s19090_s2 + $0x2a0] sm:$0xff] }
 0x279   : > { %2679 = vmatmul.mubr.f32.gmra.mrb[44].mxu1 %v13490_v17  ;;  %v2120_v17 = vld [vmem:[%s19090_s2 + $0x268] sm:$0xff] }
 0x27a   : > { %9439 = vmatprep.mubr.msk.f32.mxu1 %vm389_vm1, %v13511_v8  ;;  %10539 = vmatpush1.bf16.msra.mxu1 %v10538_v44  ;;  %v10546_v8 = vpack.c.bf16 %v2111_v25, %v2107_v46  ;;  %v10548_v45 = vpack.c.bf16 %v2120_v17, %v2116_v62  ;;  %v2046_v44 = vld [vmem:[%s19090_s2 + $0x18] sm:$0xff]  ;;  %v2053_v46 = vld [vmem:[%s19090_s2 + $0x50] sm:$0xff] }
 0x27b   : > { %10541 = vmatprep.subr.bf16.mxu1 %v10540_v27  ;;  %v2057_v25 = vld [vmem:[%s19090_s2 + $0x70] sm:$0xff]  ;;  %v2066_v62 = vld [vmem:[%s19090_s2 + $0xb8] sm:$0xff] }
 0x27c   : > { %v10566_v17 = vpack.c.bf16 %v2057_v25, %v2053_v46  ;;  %v2101_v46 = vld [vmem:[%s19090_s2 + $0x1d0] sm:$0xff] }
 0x27d   : > { %2685 = vmatmul.mubr.f32.gmra.mrb[46].mxu1 %v13525_v50  ;;  %v10550_v50 = vpack.c.bf16 %v2119_v51, %v2115_v61  ;;  %v2065_v61 = vld [vmem:[%s19090_s2 + $0xb0] sm:$0xff]  ;;  %v2070_v51 = vld [vmem:[%s19090_s2 + $0xd8] sm:$0xff] }
 0x27e   : > { %9440 = vmatprep.mubr.msk.f32.mxu1 %vm389_vm1, %v13546_v41  ;;  %10543 = vmatpush1.bf16.msra.mxu1 %v10542_v20  ;;  %v2128_v41 = vld [vmem:[%s19090_s2 + $0x2a8] sm:$0xff]  ;;  %v2105_v25 = vld [vmem:[%s19090_s2 + $0x1f0] sm:$0xff] }
 0x27f   : > { %10545 = vmatprep.subr.bf16.mxu1 %v10544_v30  ;;  %v10552_v43 = vpack.c.bf16 %v2128_v41, %v2124_v15  ;;  %v2074_v15 = vld [vmem:[%s19090_s2 + $0xf8] sm:$0xff] }
 0x281   : > { %2691 = vmatmul.mubr.f32.gmra.mrb[48].mxu1 %v13560_v29  ;;  %v10554_v29 = vpack.c.bf16 %v2127_v4, %v2123_v11  ;;  %v2073_v11 = vld [vmem:[%s19090_s2 + $0xf0] sm:$0xff]  ;;  %v2078_v4 = vld [vmem:[%s19090_s2 + $0x118] sm:$0xff] }
 0x282   : > { %9441 = vmatprep.mubr.msk.f32.mxu1 %vm389_vm1, %v13581_v10  ;;  %10547 = vmatpush1.bf16.msra.mxu1 %v10546_v8  ;;  %v2136_v10 = vld [vmem:[%s19090_s2 + $0x2e8] sm:$0xff] }
 0x283   : > { %10549 = vmatprep.subr.bf16.mxu1 %v10548_v45  ;;  %v10556_v57 = vpack.c.bf16 %v2136_v10, %v2132_v16  ;;  %v2061_v45 = vld [vmem:[%s19090_s2 + $0x90] sm:$0xff]  ;;  %v2082_v16 = vld [vmem:[%s19090_s2 + $0x138] sm:$0xff] }
 0x284   : > { %v10570_v41 = vpack.c.bf16 %v2065_v61, %v2061_v45  ;;  %v10590_v45 = vpack.c.bf16 %v2105_v25, %v2101_v46  ;;  %v19298_v46 = vld [vmem:[#allocation20_spill] sm:$0xff]  ;;  %v19299_v25 = vld [vmem:[#allocation23_spill] sm:$0xff] }
 0x285   : > { %2697 = vmatmul.mubr.f32.gmra.mrb[50].mxu1 %v13595_v58  ;;  %v10558_v58 = vpack.c.bf16 %v2135_v24, %v2131_v5  ;;  %v2081_v5 = vld [vmem:[%s19090_s2 + $0x130] sm:$0xff]  ;;  %v2086_v24 = vld [vmem:[%s19090_s2 + $0x158] sm:$0xff] }
 0x286   : > { %9442 = vmatprep.mubr.msk.f32.mxu1 %vm389_vm1, %v13617_v52  ;;  %10551 = vmatpush1.bf16.msra.mxu1 %v10550_v50  ;;  %v2050_v52 = vld [vmem:[%s19090_s2 + $0x38] sm:$0xff]  ;;  %v10572_v50 = vpack.c.bf16 %v2074_v15, %v2070_v51  ;;  %v2109_v51 = vld [vmem:[%s19090_s2 + $0x210] sm:$0xff] }
 0x287   : > { %10553 = vmatprep.subr.bf16.mxu1 %v10552_v43  ;;  %v10560_v27 = vpack.c.bf16 %v2050_v52, %v2046_v44  ;;  %v2069_v43 = vld [vmem:[%s19090_s2 + $0xd0] sm:$0xff]  ;;  %v2090_v44 = vld [vmem:[%s19090_s2 + $0x178] sm:$0xff] }
 0x288   : > { %v10574_v10 = vpack.c.bf16 %v2073_v11, %v2069_v43  ;;  %v2113_v15 = vld [vmem:[%s19090_s2 + $0x230] sm:$0xff]  ;;  %v19292_v43 = vld [vmem:[#allocation14_spill] sm:$0xff] }
 0x289   : > { %2703 = vmatmul.mubr.f32.gmra.mrb[52].mxu1 %v13630_v18  ;;  %v1875_v18 = vld [vmem:[#allocation3 + $0x8] sm:$0xfe]  ;;  %v19293_v11 = vld [vmem:[#allocation17_spill] sm:$0xff] }
 0x28a   : > { %9443 = vmatprep.mubr.msk.f32.mxu1 %vm389_vm1, %v13651_v34  ;;  %10555 = vmatpush1.bf16.msra.mxu1 %v10554_v29  ;;  %v1874_v34 = vld [vmem:[#allocation3] sm:$0xfe]  ;;  %v1916_v21 = vrot.slane %v1875_v18, 1  ;;  %v10576_v29 = vpack.c.bf16 %v2082_v16, %v2078_v4  ;;  %v10594_v4 = vpack.c.bf16 %v2113_v15, %v2109_v51  ;;  %v19302_v51 = vld [vmem:[#allocation24_spill] sm:$0xff]  ;;  %v1876_v15 = vld [vmem:[#allocation3 + $0x100] sm:$0x1] }
 0x28b   : > { %10557 = vmatprep.subr.bf16.mxu1 %v10556_v57  ;;  %v1913_v39 = vrot.slane %v1874_v34, 1  ;;  %v2077_v57 = vld [vmem:[%s19090_s2 + $0x110] sm:$0xff]  ;;  %v2094_v34 = vld [vmem:[%s19090_s2 + $0x198] sm:$0xff] }
 0x28c   : > { %v10578_v52 = vpack.c.bf16 %v2081_v5, %v2077_v57  ;;  %v2089_v18 = vld [vmem:[%s19090_s2 + $0x170] sm:$0xff]  ;;  %v2126_v57 = vld [vmem:[%s19090_s2 + $0x298] sm:$0xff] }
 0x28d   : > { %2709 = vmatmul.mubr.f32.gmra.mrb[54].mxu1 %v13658_v35  ;;  %v1918_v35 = vsel %vm1912_vm2, %v1916_v21, %v13218_v59  ;;  %v2098_v21 = vld [vmem:[%s19090_s2 + $0x1b8] sm:$0xff] }
 0x28e   : > { %9444 = vmatprep.mubr.msk.f32.mxu1 %vm389_vm1, %v13678_v42  ;;  %10559 = vmatpush1.bf16.msra.mxu1 %v10558_v58  ;;  %v1843_v42 = vld [vmem:[#allocation3 + $0x8] sm:$0xff]  ;;  %v10580_v58 = vpack.c.bf16 %v2090_v44, %v2086_v24  ;;  %v19294_v24 = vld [vmem:[#allocation16_spill] sm:$0xff]  ;;  %v19295_v44 = vld [vmem:[#allocation19_spill] sm:$0xff] }
 0x28f   : > { %10561 = vmatprep.subr.bf16.mxu1 %v10560_v27  ;;  %v2085_v27 = vld [vmem:[%s19090_s2 + $0x150] sm:$0xff]  ;;  %v2130_v5 = vld [vmem:[%s19090_s2 + $0x2b8] sm:$0xff]  ;;  %v3261_v6 = vrot.slane %v19294_v24, 4 }
 0x291   : > { %2715 = vmatmul.mubr.f32.gmra.mrb[56].mxu1 %v13688_v32  ;;  %v2045_v32 = vld [vmem:[%s19090_s2 + $0x10] sm:$0xff] }
 0x292   : > { %9445 = vmatprep.mubr.msk.f32.mxu1 %vm389_vm1, %v13699_v0  ;;  %v2049_v0 = vld [vmem:[%s19090_s2 + $0x30] sm:$0xff] }
 0x293   : > { %v10562_v49 = vpack.c.bf16 %v2049_v0, %v2045_v32  ;;  %v2093_v32 = vld [vmem:[%s19090_s2 + $0x190] sm:$0xff] }
 0x294   : > { %v2097_v0 = vld [vmem:[%s19090_s2 + $0x1b0] sm:$0xff] }
 0x295   : > { %2721 = vmatmul.mubr.f32.gmra.mrb[58].mxu1 %v13704_v1  ;;  %v13941_v1 = vadd.f32 %v1918_v35, %v1843_v42  ;;  %v10582_v35 = vpack.c.bf16 %v2089_v18, %v2085_v27  ;;  %v10584_v42 = vpack.c.bf16 %v2098_v21, %v2094_v34  ;;  %v2125_v27 = vld [vmem:[%s19090_s2 + $0x290] sm:$0xff]  ;;  %v2134_v34 = vld [vmem:[%s19090_s2 + $0x2d8] sm:$0xff] }
 0x296   : > { %9446 = vmatprep.mubr.msk.f32.mxu1 %vm389_vm1, %v13708_v55  ;;  %v1915_v55 = vsel %vm1912_vm2, %v1913_v39, %v13214_v56  ;;  %v19287_v39 = vld [vmem:[#allocation11_spill] sm:$0xff]  ;;  %v2129_v18 = vld [vmem:[%s19090_s2 + $0x2b0] sm:$0xff]  ;;  %v2138_v21 = vld [vmem:[%s19090_s2 + $0x2f8] sm:$0xff] }
 0x297   : > { %v13954_v20 = vadd.f32 %v1915_v55, %v1842_v3  ;;  %v2102_v55 = vld [vmem:[%s19090_s2 + $0x1d8] sm:$0xff]  ;;  %v19289_v3 = vld [vmem:[#allocation13_spill] sm:$0xff] }
 0x299   : > { %2727 = vmatmul.mubr.f32.gmra.mrb[60].mxu1 %v13717_v13  ;;  %v2054_v13 = vld [vmem:[%s19090_s2 + $0x58] sm:$0xff] }
 0x29a   : > { %9447 = vmatprep.mubr.msk.f32.mxu1 %vm389_vm1, %v13724_v31  ;;  %v2058_v31 = vld [vmem:[%s19090_s2 + $0x78] sm:$0xff] }
 0x29b   : > { %v10564_v30 = vpack.c.bf16 %v2058_v31, %v2054_v13  ;;  %v2106_v13 = vld [vmem:[%s19090_s2 + $0x1f8] sm:$0xff] }
 0x29c   : > { %v19288_v31 = vld [vmem:[#allocation10_spill] sm:$0xff] }
 0x29d   : > { %2733 = vmatmul.mubr.f32.gmra.mrb[62].mxu1 %v13735_v60  ;;  %v2062_v60 = vld [vmem:[%s19090_s2 + $0x98] sm:$0xff] }
 0x29e   : > { %9448 = vmatprep.mubr.msk.f32.mxu1 %vm389_vm1, %v13941_v1  ;;  %v10568_v8 = vpack.c.bf16 %v2066_v62, %v2062_v60  ;;  %v2110_v60 = vld [vmem:[%s19090_s2 + $0x218] sm:$0xff] }
 0x29f   : > { %v2114_v62 = vld [vmem:[%s19090_s2 + $0x238] sm:$0xff] }
 0x2a0   : > { %v10592_v61 = vpack.c.bf16 %v2114_v62, %v2110_v60 }
 0x2a1   : > { %2838 = vmatmul.mubr.f32.vlgmr.msra.gmra.mrb[0].mxu1 %v13954_v20 }
 0x2a2   : > { %9449 = vmatprep.mubr.msk.f32.mxu1 %vm389_vm1, %v13240_v19  ;;  %10563 = vmatpush1.bf16.msra.mxu1 %v10562_v49  ;;  %v10586_v49 = vpack.c.bf16 %v2097_v0, %v2093_v32  ;;  %v10602_v32 = vpack.c.bf16 %v2129_v18, %v2125_v27  ;;  %v10604_v0 = vpack.c.bf16 %v2138_v21, %v2134_v34  ;;  %v9497_v27 = vld [vmem:[%s19090_s2 + $0x688] sm:$0xff]  ;;  %v9496_v21 = vld [vmem:[%s19090_s2 + $0x680] sm:$0xff] }
 0x2a3   : > { %10565 = vmatprep.subr.bf16.mxu1 %v10564_v30  ;;  %v10588_v30 = vpack.c.bf16 %v2106_v13, %v2102_v55  ;;  %v2133_v55 = vld [vmem:[%s19090_s2 + $0x2d0] sm:$0xff]  ;;  %v9501_v18 = vld [vmem:[%s19090_s2 + $0x6a8] sm:$0xff] }
 0x2a4   : > { %v2137_v13 = vld [vmem:[%s19090_s2 + $0x2f0] sm:$0xff]  ;;  %v10616_v34 = vpack.c.bf16 %v9501_v18, %v9497_v27  ;;  %v9533_v27 = vld [vmem:[%s19090_s2 + $0x7a8] sm:$0xff] }
 0x2a5   : > { %2844 = vmatmul.mubr.f32.gmra.mrb[2].mxu1 %v13231_v12  ;;  %v10606_v60 = vpack.c.bf16 %v2137_v13, %v2133_v55 }
 0x2a6   : > { %9450 = vmatprep.mubr.msk.f32.mxu1 %vm389_vm1, %v13268_v40  ;;  %10567 = vmatpush1.bf16.msra.mxu1 %v10566_v17  ;;  %v19290_v17 = vld [vmem:[#allocation12_spill] sm:$0xff] }
 0x2a7   : > { %10569 = vmatprep.subr.bf16.mxu1 %v10568_v8  ;;  %v19291_v8 = vld [vmem:[#allocation15_spill] sm:$0xff] }
 0x2a9   : > { %2850 = vmatmul.mubr.f32.gmra.mrb[4].mxu1 %v13250_v28 }
 0x2aa   : > { %9451 = vmatprep.mubr.msk.f32.mxu1 %vm389_vm1, %v13303_v63  ;;  %10571 = vmatpush1.bf16.msra.mxu1 %v10570_v41  ;;  %v2118_v41 = vld [vmem:[%s19090_s2 + $0x258] sm:$0xff] }
 0x2ab   : > { %10573 = vmatprep.subr.bf16.mxu1 %v10572_v50  ;;  %v2122_v50 = vld [vmem:[%s19090_s2 + $0x278] sm:$0xff] }
 0x2ac   : > { %v10596_v16 = vpack.c.bf16 %v2122_v50, %v2118_v41  ;;  %v1975_v41 = vrot.slane %v1876_v15, 1 }
 0x2ad   : > { %2856 = vmatmul.mubr.f32.gmra.mrb[6].mxu1 %v13284_v48 }
 0x2ae   : > { %9452 = vmatprep.mubr.msk.f32.mxu1 %vm389_vm1, %v13338_v23  ;;  %10575 = vmatpush1.bf16.msra.mxu1 %v10574_v10  ;;  %v2117_v10 = vld [vmem:[%s19090_s2 + $0x250] sm:$0xff]  ;;  %v1976_v50 = vsel %vm1912_vm2, %v13611_v26, %v1975_v41 }
 0x2af   : > { %10577 = vmatprep.subr.bf16.mxu1 %v10576_v29  ;;  %v2121_v29 = vld [vmem:[%s19090_s2 + $0x270] sm:$0xff] }
 0x2b1   : > { %2862 = vmatmul.mubr.f32.gmra.mrb[8].mxu1 %v13319_v9 }
 0x2b2   : > { %9453 = vmatprep.mubr.msk.f32.mxu1 %vm389_vm1, %v19287_v39  ;;  %10579 = vmatpush1.bf16.msra.mxu1 %v10578_v52  ;;  %v10598_v52 = vpack.c.bf16 %v2121_v29, %v2117_v10  ;;  %v9484_v10 = vld [vmem:[%s19090_s2 + $0x620] sm:$0xff]  ;;  %v9489_v29 = vld [vmem:[%s19090_s2 + $0x648] sm:$0xff] }
 0x2b3   : > { %10581 = vmatprep.subr.bf16.mxu1 %v10580_v58  ;;  %v10600_v58 = vpack.c.bf16 %v2130_v5, %v2126_v57  ;;  %v9493_v57 = vld [vmem:[%s19090_s2 + $0x668] sm:$0xff] }
 0x2b4   : > { %v10612_v5 = vpack.c.bf16 %v9493_v57, %v9489_v29  ;;  %v9525_v29 = vld [vmem:[%s19090_s2 + $0x768] sm:$0xff] }
 0x2b5   : > { %2868 = vmatmul.mubr.f32.gmra.mrb[10].mxu1 %v19288_v31 }
 0x2b6   : > { %9454 = vmatprep.mubr.msk.f32.mxu1 %vm389_vm1, %v19289_v3  ;;  %10583 = vmatpush1.bf16.msra.mxu1 %v10582_v35  ;;  %v19296_v35 = vld [vmem:[#allocation18_spill] sm:$0xff] }
 0x2b7   : > { %10585 = vmatprep.subr.bf16.mxu1 %v10584_v42  ;;  %v19297_v42 = vld [vmem:[#allocation21_spill] sm:$0xff]  ;;  %v3265_v53 = vrot.slane %v19296_v35, 4 }
 0x2b9   : > { %2874 = vmatmul.mubr.f32.gmra.mrb[12].mxu1 %v19290_v17 }
 0x2ba   : > { %9455 = vmatprep.mubr.msk.f32.mxu1 %vm389_vm1, %v19291_v8  ;;  %10587 = vmatpush1.bf16.msra.mxu1 %v10586_v49  ;;  %v9481_v49 = vld [vmem:[%s19090_s2 + $0x608] sm:$0xff] }
 0x2bb   : > { %10589 = vmatprep.subr.bf16.mxu1 %v10588_v30  ;;  %v9485_v30 = vld [vmem:[%s19090_s2 + $0x628] sm:$0xff] }
 0x2bc   : > { %v10608_v62 = vpack.c.bf16 %v9485_v30, %v9481_v49  ;;  %v9504_v49 = vld [vmem:[%s19090_s2 + $0x6c0] sm:$0xff] }
 0x2bd   : > { %2880 = vmatmul.mubr.f32.gmra.mrb[14].mxu1 %v19292_v43  ;;  %v9508_v30 = vld [vmem:[%s19090_s2 + $0x6e0] sm:$0xff] }
 0x2be   : > { %9456 = vmatprep.mubr.msk.f32.mxu1 %vm389_vm1, %v19293_v11  ;;  %10591 = vmatpush1.bf16.msra.mxu1 %v10590_v45  ;;  %v19300_v45 = vld [vmem:[#allocation22_spill] sm:$0xff]  ;;  %v10622_v15 = vpack.c.bf16 %v9508_v30, %v9504_v49  ;;  %v9540_v49 = vld [vmem:[%s19090_s2 + $0x7e0] sm:$0xff]  ;;  %v9545_v30 = vld [vmem:[%s19090_s2 + $0x808] sm:$0xff] }
 0x2bf   : > { %10593 = vmatprep.subr.bf16.mxu1 %v10592_v61  ;;  %v19301_v61 = vld [vmem:[#allocation26_spill] sm:$0xff] }
 0x2c1   : > { %2886 = vmatmul.mubr.f32.gmra.mrb[16].mxu1 %v19294_v24 }
 0x2c2   : > { %9457 = vmatprep.mubr.msk.f32.mxu1 %vm389_vm1, %v19295_v44  ;;  %10595 = vmatpush1.bf16.msra.mxu1 %v10594_v4  ;;  %v14136_v4 = vadd.f32 %v1976_v50, %v13572_v36  ;;  %v9512_v50 = vld [vmem:[%s19090_s2 + $0x700] sm:$0xff] }
 0x2c3   : > { %10597 = vmatprep.subr.bf16.mxu1 %v10596_v16  ;;  %v9480_v16 = vld [vmem:[%s19090_s2 + $0x600] sm:$0xff] }
 0x2c4   : > { %v10610_v36 = vpack.c.bf16 %v9484_v10, %v9480_v16  ;;  %v9516_v16 = vld [vmem:[%s19090_s2 + $0x720] sm:$0xff]  ;;  %v9521_v10 = vld [vmem:[%s19090_s2 + $0x748] sm:$0xff] }
 0x2c5   : > { %2892 = vmatmul.mubr.f32.gmra.mrb[18].mxu1 %v19296_v35  ;;  %v10626_v57 = vpack.c.bf16 %v9516_v16, %v9512_v50  ;;  %v9548_v50 = vld [vmem:[%s19090_s2 + $0x820] sm:$0xff]  ;;  %v9553_v16 = vld [vmem:[%s19090_s2 + $0x848] sm:$0xff] }
 0x2c6   : > { %9458 = vmatprep.mubr.msk.f32.mxu1 %vm389_vm1, %v19297_v42  ;;  %10599 = vmatpush1.bf16.msra.mxu1 %v10598_v52  ;;  %v9488_v52 = vld [vmem:[%s19090_s2 + $0x640] sm:$0xff] }
 0x2c7   : > { %10601 = vmatprep.subr.bf16.mxu1 %v10600_v58  ;;  %v9492_v58 = vld [vmem:[%s19090_s2 + $0x660] sm:$0xff] }
 0x2c9   : > { %2898 = vmatmul.mubr.f32.gmra.mrb[20].mxu1 %v19298_v46 }
 0x2ca   : > { %9459 = vmatprep.mubr.msk.f32.mxu1 %vm389_vm1, %v19299_v25  ;;  %10603 = vmatpush1.bf16.msra.mxu1 %v10602_v32  ;;  %v9500_v32 = vld [vmem:[%s19090_s2 + $0x6a0] sm:$0xff] }
 0x2cb   : > { %10605 = vmatprep.subr.bf16.mxu1 %v10604_v0  ;;  %v9505_v0 = vld [vmem:[%s19090_s2 + $0x6c8] sm:$0xff]  ;;  %v10618_v55 = vpack.c.bf16 %v9500_v32, %v9496_v21  ;;  %v9532_v21 = vld [vmem:[%s19090_s2 + $0x7a0] sm:$0xff] }
 0x2cc   : > { %v9537_v32 = vld [vmem:[%s19090_s2 + $0x7c8] sm:$0xff] }
 0x2cd   : > { %2904 = vmatmul.mubr.f32.gmra.mrb[22].mxu1 %v19300_v45 }
 0x2ce   : > { %9460 = vmatprep.mubr.msk.f32.mxu1 %vm389_vm1, %v19301_v61  ;;  %10607 = vmatpush1.bf16.msra.mxu1 %v10606_v60  ;;  %v9513_v60 = vld [vmem:[%s19090_s2 + $0x708] sm:$0xff] }
 0x2cf   : > { %10609 = vmatprep.subr.bf16.mxu1 %v10608_v62  ;;  %v9517_v62 = vld [vmem:[%s19090_s2 + $0x728] sm:$0xff] }
 0x2d0   : > { %v10624_v41 = vpack.c.bf16 %v9517_v62, %v9513_v60  ;;  %v9549_v60 = vld [vmem:[%s19090_s2 + $0x828] sm:$0xff] }
 0x2d1   : > { %2910 = vmatmul.mubr.f32.gmra.mrb[24].mxu1 %v19302_v51 }
 0x2d2   : > { %9461 = vmatprep.mubr.msk.f32.mxu1 %vm389_vm1, %v13653_v47 }
 0x2d5   : > { %2916 = vmatmul.mubr.f32.gmra.mrb[26].mxu1 %v13634_v7 }
 0x2d6   : > { %9462 = vmatprep.mubr.msk.f32.mxu1 %vm389_vm1, %v13680_v2 }
 0x2d9   : > { %2922 = vmatmul.mubr.f32.gmra.mrb[28].mxu1 %v13665_v54 }
 0x2da   : > { %9463 = vmatprep.mubr.msk.f32.mxu1 %vm389_vm1, %v13693_v14 }
 0x2dd   : > { %2928 = vmatmul.mubr.f32.gmra.mrb[30].mxu1 %v14136_v4 }
 0x2de   : > { %9464 = vmatprep.mubr.msk.f32.mxu1 %vm389_vm1, %v13941_v1  ;;  %v10614_v1 = vpack.c.bf16 %v9492_v58, %v9488_v52  ;;  %v9524_v52 = vld [vmem:[%s19090_s2 + $0x760] sm:$0xff]  ;;  %v9529_v58 = vld [vmem:[%s19090_s2 + $0x788] sm:$0xff] }
 0x2e1   : > { %2999 = vmatmul.mubr.f32.vlgmr.msra.gmra.mrb[32].mxu1 %v13954_v20  ;;  %v9509_v20 = vld [vmem:[%s19090_s2 + $0x6e8] sm:$0xff] }
 0x2e2   : > { %9465 = vmatprep.mubr.msk.f32.mxu1 %vm389_vm1, %v13240_v19  ;;  %10611 = vmatpush1.bf16.msra.mxu1 %v10610_v36  ;;  %v10620_v13 = vpack.c.bf16 %v9509_v20, %v9505_v0  ;;  %v10628_v36 = vpack.c.bf16 %v9525_v29, %v9521_v10  ;;  %v9541_v0 = vld [vmem:[%s19090_s2 + $0x7e8] sm:$0xff] }
 0x2e3   : > { %10613 = vmatprep.subr.bf16.mxu1 %v10612_v5  ;;  %v9520_v5 = vld [vmem:[%s19090_s2 + $0x740] sm:$0xff]  ;;  %v9557_v10 = vld [vmem:[%s19090_s2 + $0x868] sm:$0xff] }
 0x2e4   : > { %v10630_v18 = vpack.c.bf16 %v9524_v52, %v9520_v5  ;;  %v9556_v5 = vld [vmem:[%s19090_s2 + $0x860] sm:$0xff]  ;;  %v9561_v52 = vld [vmem:[%s19090_s2 + $0x888] sm:$0xff] }
 0x2e5   : > { %3005 = vmatmul.mubr.f32.gmra.mrb[34].mxu1 %v13231_v12 }
 0x2e6   : > { %9466 = vmatprep.mubr.msk.f32.mxu1 %vm389_vm1, %v13268_v40  ;;  %10615 = vmatpush1.bf16.msra.mxu1 %v10614_v1  ;;  %v10632_v1 = vpack.c.bf16 %v9533_v27, %v9529_v58  ;;  %v9565_v58 = vld [vmem:[%s19090_s2 + $0x8a8] sm:$0xff] }
 0x2e7   : > { %10617 = vmatprep.subr.bf16.mxu1 %v10616_v34  ;;  %v9528_v34 = vld [vmem:[%s19090_s2 + $0x780] sm:$0xff] }
 0x2e8   : > { %v10634_v20 = vpack.c.bf16 %v9532_v21, %v9528_v34  ;;  %v9564_v34 = vld [vmem:[%s19090_s2 + $0x8a0] sm:$0xff]  ;;  %v9569_v21 = vld [vmem:[%s19090_s2 + $0x8c8] sm:$0xff] }
 0x2e9   : > { %3011 = vmatmul.mubr.f32.gmra.mrb[36].mxu1 %v13250_v28 }
 0x2ea   : > { %9467 = vmatprep.mubr.msk.f32.mxu1 %vm389_vm1, %v13303_v63  ;;  %10619 = vmatpush1.bf16.msra.mxu1 %v10618_v55  ;;  %v10636_v55 = vpack.c.bf16 %v9541_v0, %v9537_v32  ;;  %v9573_v32 = vld [vmem:[%s19090_s2 + $0x8e8] sm:$0xff] }
 0x2eb   : > { %10621 = vmatprep.subr.bf16.mxu1 %v10620_v13  ;;  %v9536_v13 = vld [vmem:[%s19090_s2 + $0x7c0] sm:$0xff] }
 0x2ec   : > { %v10638_v62 = vpack.c.bf16 %v9540_v49, %v9536_v13  ;;  %v9572_v13 = vld [vmem:[%s19090_s2 + $0x8e0] sm:$0xff]  ;;  %v9483_v49 = vld [vmem:[%s19090_s2 + $0x618] sm:$0xff] }
 0x2ed   : > { %3017 = vmatmul.mubr.f32.gmra.mrb[38].mxu1 %v13284_v48 }
 0x2ee   : > { %9468 = vmatprep.mubr.msk.f32.mxu1 %vm389_vm1, %v13338_v23  ;;  %10623 = vmatpush1.bf16.msra.mxu1 %v10622_v15  ;;  %v10640_v15 = vpack.c.bf16 %v9549_v60, %v9545_v30  ;;  %v9487_v30 = vld [vmem:[%s19090_s2 + $0x638] sm:$0xff] }
 0x2ef   : > { %10625 = vmatprep.subr.bf16.mxu1 %v10624_v41  ;;  %v9544_v41 = vld [vmem:[%s19090_s2 + $0x800] sm:$0xff] }
 0x2f0   : > { %v10642_v29 = vpack.c.bf16 %v9548_v50, %v9544_v41  ;;  %v3100_v41 = vld [vmem:[#allocation3 + $0x8] sm:$0xe0] }
 0x2f1   : > { %3023 = vmatmul.mubr.f32.gmra.mrb[40].mxu1 %v13319_v9 }
 0x2f2   : > { %9469 = vmatprep.mubr.msk.f32.mxu1 %vm389_vm1, %v19287_v39  ;;  %10627 = vmatpush1.bf16.msra.mxu1 %v10626_v57  ;;  %v10644_v57 = vpack.c.bf16 %v9557_v10, %v9553_v16  ;;  %v3109_v16 = vrot.slane %v3100_v41, 1 }
 0x2f3   : > { %10629 = vmatprep.subr.bf16.mxu1 %v10628_v36  ;;  %v9552_v36 = vld [vmem:[%s19090_s2 + $0x840] sm:$0xff] }
 0x2f4   : > { %v10646_v27 = vpack.c.bf16 %v9556_v5, %v9552_v36  ;;  %v3110_v10 = vsel %vm1912_vm2, %v3109_v16, %v13218_v59  ;;  %v3095_v5 = vld [vmem:[#allocation3] sm:$0xf0] }
 0x2f5   : > { %3029 = vmatmul.mubr.f32.gmra.mrb[42].mxu1 %v19288_v31 }
 0x2f6   : > { %9470 = vmatprep.mubr.msk.f32.mxu1 %vm389_vm1, %v19289_v3  ;;  %10631 = vmatpush1.bf16.msra.mxu1 %v10630_v18  ;;  %v10648_v18 = vpack.c.bf16 %v9565_v58, %v9561_v52  ;;  %v3235_v58 = vrot.slane %v13240_v19, 4 }
 0x2f7   : > { %10633 = vmatprep.subr.bf16.mxu1 %v10632_v1  ;;  %v9560_v1 = vld [vmem:[%s19090_s2 + $0x880] sm:$0xff] }
 0x2f8   : > { %v10650_v0 = vpack.c.bf16 %v9564_v34, %v9560_v1  ;;  %v9486_v1 = vld [vmem:[%s19090_s2 + $0x630] sm:$0xff] }
 0x2f9   : > { %3035 = vmatmul.mubr.f32.gmra.mrb[44].mxu1 %v19290_v17 }
 0x2fa   : > { %9471 = vmatprep.mubr.msk.f32.mxu1 %vm389_vm1, %v19291_v8  ;;  %10635 = vmatpush1.bf16.msra.mxu1 %v10634_v20  ;;  %v10652_v20 = vpack.c.bf16 %v9573_v32, %v9569_v21  ;;  %v3232_v21 = vrot.slane %v13231_v12, 4  ;;  %v9491_v32 = vld [vmem:[%s19090_s2 + $0x658] sm:$0xff] }
 0x2fb   : > { %10637 = vmatprep.subr.bf16.mxu1 %v10636_v55  ;;  %v9568_v55 = vld [vmem:[%s19090_s2 + $0x8c0] sm:$0xff] }
 0x2fc   : > { %v10654_v60 = vpack.c.bf16 %v9572_v13, %v9568_v55 }
 0x2fd   : > { %3041 = vmatmul.mubr.f32.gmra.mrb[46].mxu1 %v19292_v43 }
 0x2fe   : > { %9472 = vmatprep.mubr.msk.f32.mxu1 %vm389_vm1, %v19293_v11  ;;  %10639 = vmatpush1.bf16.msra.mxu1 %v10638_v62  ;;  %v10656_v62 = vpack.c.bf16 %v9487_v30, %v9483_v49  ;;  %v9490_v49 = vld [vmem:[%s19090_s2 + $0x650] sm:$0xff] }
 0x2ff   : > { %10641 = vmatprep.subr.bf16.mxu1 %v10640_v15  ;;  %v3099_v15 = vld [vmem:[#allocation3] sm:$0xe0] }
 0x300   : > { %v3107_v50 = vrot.slane %v3099_v15, 1  ;;  %v9494_v30 = vld [vmem:[%s19090_s2 + $0x670] sm:$0xff]  ;;  %v9503_v15 = vld [vmem:[%s19090_s2 + $0x6b8] sm:$0xff] }
 0x301   : > { %3047 = vmatmul.mubr.f32.gmra.mrb[48].mxu1 %v19294_v24  ;;  %v10662_v16 = vpack.c.bf16 %v9494_v30, %v9490_v49  ;;  %v3251_v30 = vrot.slane %v19287_v39, 4  ;;  %v3281_v24 = vrot.slane %v13634_v7, 4 }
 0x302   : > { %9473 = vmatprep.mubr.msk.f32.mxu1 %vm389_vm1, %v19295_v44  ;;  %10643 = vmatpush1.bf16.msra.mxu1 %v10642_v29  ;;  %v3108_v29 = vsel %vm1912_vm2, %v3107_v50, %v13214_v56  ;;  %v3243_v50 = vrot.slane %v13303_v63, 4 }
 0x303   : > { %10645 = vmatprep.subr.bf16.mxu1 %v10644_v57  ;;  %v3096_v57 = vld [vmem:[#allocation3 + $0x8] sm:$0xf0]  ;;  %v3121_v52 = vadd.f32 %v3108_v29, %v3095_v5  ;;  %v9498_v29 = vld [vmem:[%s19090_s2 + $0x690] sm:$0xff]  ;;  %v3241_v5 = vrot.slane %v13284_v48, 4 }
 0x304   : > { %v3122_v36 = vadd.f32 %v3110_v10, %v3096_v57  ;;  %v9502_v57 = vld [vmem:[%s19090_s2 + $0x6b0] sm:$0xff] }
 0x305   : > { %3053 = vmatmul.mubr.f32.gmra.mrb[50].mxu1 %v19296_v35  ;;  %v3231_v34 = vrot.slane %v3121_v52, 4  ;;  %v9507_v52 = vld [vmem:[%s19090_s2 + $0x6d8] sm:$0xff]  ;;  %v9558_v35 = vld [vmem:[%s19090_s2 + $0x870] sm:$0xff] }
 0x306   : > { %9474 = vmatprep.mubr.msk.f32.mxu1 %vm389_vm1, %v19297_v42  ;;  %10647 = vmatpush1.bf16.msra.mxu1 %v10646_v27  ;;  %v3234_v27 = vrot.slane %v3122_v36, 4 }
 0x307   : > { %10649 = vmatprep.subr.bf16.mxu1 %v10648_v18  ;;  %v9482_v18 = vld [vmem:[%s19090_s2 + $0x610] sm:$0xff] }
 0x308   : > { %v10658_v55 = vpack.c.bf16 %v9486_v1, %v9482_v18  ;;  %v3247_v18 = vrot.slane %v13338_v23, 4  ;;  %v10666_v1 = vpack.c.bf16 %v9502_v57, %v9498_v29  ;;  %v9523_v29 = vld [vmem:[%s19090_s2 + $0x758] sm:$0xff] }
 0x309   : > { %3059 = vmatmul.mubr.f32.gmra.mrb[52].mxu1 %v19298_v46  ;;  %v9527_v57 = vld [vmem:[%s19090_s2 + $0x778] sm:$0xff] }
 0x30a   : > { %9475 = vmatprep.mubr.msk.f32.mxu1 %vm389_vm1, %v19299_v25  ;;  %10651 = vmatpush1.bf16.msra.mxu1 %v10650_v0  ;;  %v14350_v0 = vsel %vm3230_vm4, %v3234_v27, %v3235_v58  ;;  %v14419_v49 = vsel %vm3230_vm4, %v3243_v50, %v3247_v18 }
 0x30b   : > { %10653 = vmatprep.subr.bf16.mxu1 %v10652_v20  ;;  %v3239_v20 = vrot.slane %v13268_v40, 4 }
 0x30d   : > { %3065 = vmatmul.mubr.f32.gmra.mrb[54].mxu1 %v19300_v45  ;;  %v14373_v41 = vsel %vm3230_vm4, %v3235_v58, %v3239_v20  ;;  %v9511_v58 = vld [vmem:[%s19090_s2 + $0x6f8] sm:$0xff]  ;;  %v14396_v27 = vsel %vm3230_vm4, %v3239_v20, %v3243_v50  ;;  %v3245_v20 = vrot.slane %v13319_v9, 4 }
 0x30e   : > { %9476 = vmatprep.mubr.msk.f32.mxu1 %vm389_vm1, %v19301_v61  ;;  %10655 = vmatpush1.bf16.msra.mxu1 %v10654_v60  ;;  %v3237_v60 = vrot.slane %v13250_v28, 4 }
 0x30f   : > { %10657 = vmatprep.subr.bf16.mxu1 %v10656_v62  ;;  %v9499_v62 = vld [vmem:[%s19090_s2 + $0x698] sm:$0xff]  ;;  %v14431_v50 = vsel %vm3230_vm4, %v3241_v5, %v3245_v20 }
 0x310   : > { %v10664_v10 = vpack.c.bf16 %v9503_v15, %v9499_v62  ;;  %v14385_v36 = vsel %vm3230_vm4, %v3232_v21, %v3237_v60  ;;  %v9514_v15 = vld [vmem:[%s19090_s2 + $0x710] sm:$0xff] }
 0x311   : > { %3071 = vmatmul.mubr.f32.gmra.mrb[56].mxu1 %v19302_v51 }
 0x312   : > { %9477 = vmatprep.mubr.msk.f32.mxu1 %vm389_vm1, %v13653_v47 }
 0x315   : > { %3077 = vmatmul.mubr.f32.gmra.mrb[58].mxu1 %v13634_v7 }
 0x316   : > { %9478 = vmatprep.mubr.msk.f32.mxu1 %vm389_vm1, %v13680_v2 }
 0x319   : > { %3083 = vmatmul.mubr.f32.gmra.mrb[60].mxu1 %v13665_v54 }
 0x31a   : > { %9479 = vmatprep.mubr.msk.f32.mxu1 %vm389_vm1, %v13693_v14  ;;  %v9495_v14 = vld [vmem:[%s19090_s2 + $0x678] sm:$0xff] }
 0x31b   : > { %v10660_v13 = vpack.c.bf16 %v9495_v14, %v9491_v32  ;;  %v9510_v32 = vld [vmem:[%s19090_s2 + $0x6f0] sm:$0xff]  ;;  %v14408_v14 = vsel %vm3230_vm4, %v3237_v60, %v3241_v5 }
 0x31d   : > { %3089 = vmatmul.mubr.f32.gmra.mrb[62].mxu1 %v14136_v4  ;;  %v14362_v4 = vsel %vm3230_vm4, %v3231_v34, %v3232_v21  ;;  %v10668_v34 = vpack.c.bf16 %v9511_v58, %v9507_v52  ;;  %v9506_v21 = vld [vmem:[%s19090_s2 + $0x6d0] sm:$0xff]  ;;  %v14442_v52 = vsel %vm3230_vm4, %v3247_v18, %v3251_v30  ;;  %v3255_v58 = vrot.slane %v19289_v3, 4 }
 0x31e   : > { %9576 = vmatprep.mubr.msk.f32.mxu1 %vm389_vm1, %v14350_v0  ;;  %v10670_v60 = vpack.c.bf16 %v9510_v32, %v9506_v21  ;;  %v9526_v21 = vld [vmem:[%s19090_s2 + $0x770] sm:$0xff]  ;;  %v3253_v32 = vrot.slane %v19290_v17, 4 }
 0x321   : > { %3410 = vmatmul.mubr.f32.vlgmr.msra.gmra.mrb[0].mxu1 %v14362_v4 }
 0x322   : > { %9577 = vmatprep.mubr.msk.f32.mxu1 %vm389_vm1, %v14373_v41  ;;  %10659 = vmatpush1.bf16.msra.mxu1 %v10658_v55  ;;  %v9515_v55 = vld [vmem:[%s19090_s2 + $0x718] sm:$0xff] }
 0x323   : > { %10661 = vmatprep.subr.bf16.mxu1 %v10660_v13  ;;  %v9519_v13 = vld [vmem:[%s19090_s2 + $0x738] sm:$0xff] }
 0x324   : > { %v10672_v62 = vpack.c.bf16 %v9519_v13, %v9515_v55  ;;  %v9531_v55 = vld [vmem:[%s19090_s2 + $0x798] sm:$0xff] }
 0x325   : > { %3416 = vmatmul.mubr.f32.gmra.mrb[2].mxu1 %v14385_v36  ;;  %v9535_v13 = vld [vmem:[%s19090_s2 + $0x7b8] sm:$0xff] }
 0x326   : > { %9578 = vmatprep.mubr.msk.f32.mxu1 %vm389_vm1, %v14396_v27  ;;  %10663 = vmatpush1.bf16.msra.mxu1 %v10662_v16  ;;  %v9518_v16 = vld [vmem:[%s19090_s2 + $0x730] sm:$0xff] }
 0x327   : > { %10665 = vmatprep.subr.bf16.mxu1 %v10664_v10  ;;  %v3249_v10 = vrot.slane %v19288_v31, 4  ;;  %v10674_v5 = vpack.c.bf16 %v9518_v16, %v9514_v15  ;;  %v10680_v15 = vpack.c.bf16 %v9535_v13, %v9531_v55  ;;  %v9530_v16 = vld [vmem:[%s19090_s2 + $0x790] sm:$0xff] }
 0x328   : > { %v9538_v13 = vld [vmem:[%s19090_s2 + $0x7d0] sm:$0xff] }
 0x329   : > { %3422 = vmatmul.mubr.f32.gmra.mrb[4].mxu1 %v14408_v14  ;;  %v14454_v18 = vsel %vm3230_vm4, %v3245_v20, %v3249_v10 }
 0x32a   : > { %9579 = vmatprep.mubr.msk.f32.mxu1 %vm389_vm1, %v14419_v49  ;;  %10667 = vmatpush1.bf16.msra.mxu1 %v10666_v1  ;;  %v10676_v1 = vpack.c.bf16 %v9527_v57, %v9523_v29  ;;  %v9534_v29 = vld [vmem:[%s19090_s2 + $0x7b0] sm:$0xff]  ;;  %v3257_v57 = vrot.slane %v19292_v43, 4 }
 0x32b   : > { %10669 = vmatprep.subr.bf16.mxu1 %v10668_v34  ;;  %v9522_v34 = vld [vmem:[%s19090_s2 + $0x750] sm:$0xff] }
 0x32c   : > { %v10678_v20 = vpack.c.bf16 %v9526_v21, %v9522_v34  ;;  %v3263_v21 = vrot.slane %v19293_v11, 4 }
 0x32d   : > { %3428 = vmatmul.mubr.f32.gmra.mrb[6].mxu1 %v14431_v50 }
 0x32e   : > { %9580 = vmatprep.mubr.msk.f32.mxu1 %vm389_vm1, %v14442_v52  ;;  %10671 = vmatpush1.bf16.msra.mxu1 %v10670_v60  ;;  %v14465_v60 = vsel %vm3230_vm4, %v3251_v30, %v3255_v58  ;;  %v14477_v30 = vsel %vm3230_vm4, %v3249_v10, %v3253_v32  ;;  %v10682_v10 = vpack.c.bf16 %v9534_v29, %v9530_v16  ;;  %v3267_v29 = vrot.slane %v19295_v44, 4  ;;  %v9574_v44 = vld [vmem:[%s19090_s2 + $0x8f0] sm:$0xff] }
 0x32f   : > { %10673 = vmatprep.subr.bf16.mxu1 %v10672_v62  ;;  %v3259_v62 = vrot.slane %v19291_v8, 4 }
 0x331   : > { %3434 = vmatmul.mubr.f32.gmra.mrb[8].mxu1 %v14454_v18  ;;  %v14488_v34 = vsel %vm3230_vm4, %v3255_v58, %v3259_v62  ;;  %v14500_v58 = vsel %vm3230_vm4, %v3253_v32, %v3257_v57  ;;  %v14511_v16 = vsel %vm3230_vm4, %v3259_v62, %v3263_v21  ;;  %v10686_v32 = vpack.c.bf16 %v9542_v33, %v9538_v13  ;;  %v9559_v33 = vld [vmem:[%s19090_s2 + $0x878] sm:$0xff] }
 0x332   : > { %9581 = vmatprep.mubr.msk.f32.mxu1 %vm389_vm1, %v14465_v60  ;;  %10675 = vmatpush1.bf16.msra.mxu1 %v10674_v5  ;;  %v9539_v5 = vld [vmem:[%s19090_s2 + $0x7d8] sm:$0xff]  ;;  %v14523_v62 = vsel %vm3230_vm4, %v3257_v57, %v3261_v6  ;;  %v3271_v13 = vrot.slane %v19297_v42, 4  ;;  %v3269_v42 = vrot.slane %v19298_v46, 4  ;;  %v9566_v46 = vld [vmem:[%s19090_s2 + $0x8b0] sm:$0xff] }
 0x333   : > { %10677 = vmatprep.subr.bf16.mxu1 %v10676_v1  ;;  %v9543_v1 = vld [vmem:[%s19090_s2 + $0x7f8] sm:$0xff] }
 0x334   : > { %v10684_v55 = vpack.c.bf16 %v9543_v1, %v9539_v5  ;;  %v9546_v1 = vld [vmem:[%s19090_s2 + $0x810] sm:$0xff] }
 0x335   : > { %3440 = vmatmul.mubr.f32.gmra.mrb[10].mxu1 %v14477_v30  ;;  %v10690_v57 = vpack.c.bf16 %v9550_v22, %v9546_v1  ;;  %v9567_v22 = vld [vmem:[%s19090_s2 + $0x8b8] sm:$0xff]  ;;  %v3275_v1 = vrot.slane %v19299_v25, 4  ;;  %v3273_v25 = vrot.slane %v19300_v45, 4  ;;  %v9570_v45 = vld [vmem:[%s19090_s2 + $0x8d0] sm:$0xff] }
 0x336   : > { %9582 = vmatprep.mubr.msk.f32.mxu1 %vm389_vm1, %v14488_v34  ;;  %10679 = vmatpush1.bf16.msra.mxu1 %v10678_v20  ;;  %v9547_v20 = vld [vmem:[%s19090_s2 + $0x818] sm:$0xff] }
 0x337   : > { %10681 = vmatprep.subr.bf16.mxu1 %v10680_v15  ;;  %v9551_v15 = vld [vmem:[%s19090_s2 + $0x838] sm:$0xff] }
 0x338   : > { %v10688_v5 = vpack.c.bf16 %v9551_v15, %v9547_v20  ;;  %v9554_v15 = vld [vmem:[%s19090_s2 + $0x850] sm:$0xff] }
 0x339   : > { %3446 = vmatmul.mubr.f32.gmra.mrb[12].mxu1 %v14500_v58 }
 0x33a   : > { %9583 = vmatprep.mubr.msk.f32.mxu1 %vm389_vm1, %v14511_v16  ;;  %10683 = vmatpush1.bf16.msra.mxu1 %v10682_v10  ;;  %v9555_v10 = vld [vmem:[%s19090_s2 + $0x858] sm:$0xff] }
 0x33b   : > { %10685 = vmatprep.subr.bf16.mxu1 %v10684_v55  ;;  %v14534_v55 = vsel %vm3230_vm4, %v3263_v21, %v3267_v29  ;;  %v10692_v20 = vpack.c.bf16 %v9559_v33, %v9555_v10  ;;  %v14546_v21 = vsel %vm3230_vm4, %v3261_v6, %v3265_v53  ;;  %v10694_v6 = vpack.c.bf16 %v9558_v35, %v9554_v15  ;;  %v9562_v33 = vld [vmem:[%s19090_s2 + $0x890] sm:$0xff]  ;;  %v9575_v35 = vld [vmem:[%s19090_s2 + $0x8f8] sm:$0xff] }
 0x33c   : > { %v3279_v15 = vrot.slane %v19301_v61, 4  ;;  %v3277_v61 = vrot.slane %v19302_v51, 4 }
 0x33d   : > { %3452 = vmatmul.mubr.f32.gmra.mrb[14].mxu1 %v14523_v62 }
 0x33e   : > { %9584 = vmatprep.mubr.msk.f32.mxu1 %vm389_vm1, %v14534_v55  ;;  %10687 = vmatpush1.bf16.msra.mxu1 %v10686_v32  ;;  %v9563_v32 = vld [vmem:[%s19090_s2 + $0x898] sm:$0xff]  ;;  %v14609_v51 = vsel %vm3230_vm4, %v3273_v25, %v3277_v61 }
 0x33f   : > { %10689 = vmatprep.subr.bf16.mxu1 %v10688_v5  ;;  %v14557_v5 = vsel %vm3230_vm4, %v3267_v29, %v3271_v13  ;;  %v10696_v10 = vpack.c.bf16 %v9567_v22, %v9563_v32  ;;  %v14569_v29 = vsel %vm3230_vm4, %v3265_v53, %v3269_v42  ;;  %v3101_v53 = vld [vmem:[#allocation3 + $0x100] sm:$0x1f]  ;;  %v10698_v32 = vpack.c.bf16 %v9566_v46, %v9562_v33  ;;  %v9613_v46 = vld [vmem:[%s19090_s2 + $0x928] sm:$0xff] }
 0x340   : > { %v3283_v33 = vrot.slane %v13653_v47, 4  ;;  %v3287_v47 = vrot.slane %v13680_v2, 4 }
 0x341   : > { %3458 = vmatmul.mubr.f32.gmra.mrb[16].mxu1 %v14546_v21 }
 0x342   : > { %9585 = vmatprep.mubr.msk.f32.mxu1 %vm389_vm1, %v14557_v5  ;;  %10691 = vmatpush1.bf16.msra.mxu1 %v10690_v57  ;;  %v9571_v57 = vld [vmem:[%s19090_s2 + $0x8d8] sm:$0xff] }
 0x343   : > { %10693 = vmatprep.subr.bf16.mxu1 %v10692_v20  ;;  %v14580_v20 = vsel %vm3230_vm4, %v3271_v13, %v3275_v1  ;;  %v10700_v22 = vpack.c.bf16 %v9575_v35, %v9571_v57  ;;  %v14592_v13 = vsel %vm3230_vm4, %v3269_v42, %v3273_v25  ;;  %v3111_v57 = vrot.slane %v3101_v53, 1 }
 0x344   : > { %v10702_v42 = vpack.c.bf16 %v9574_v44, %v9570_v45  ;;  %v3098_v44 = vld [vmem:[#allocation3 + $0x108] sm:$0xf]  ;;  %v14622_v25 = vsel %vm3230_vm4, %v3277_v61, %v3281_v24  ;;  %v3285_v45 = vrot.slane %v13665_v54, 4 }
 0x345   : > { %3464 = vmatmul.mubr.f32.gmra.mrb[18].mxu1 %v14569_v29  ;;  %v3112_v53 = vsel %vm1912_vm2, %v13611_v26, %v3111_v57 }
 0x346   : > { %9586 = vmatprep.mubr.msk.f32.mxu1 %vm389_vm1, %v14580_v20  ;;  %10695 = vmatpush1.bf16.msra.mxu1 %v10694_v6  ;;  %v9609_v6 = vld [vmem:[%s19090_s2 + $0x908] sm:$0xff]  ;;  %v14638_v61 = vsel %vm3230_vm4, %v3281_v24, %v3285_v45 }
 0x347   : > { %10697 = vmatprep.subr.bf16.mxu1 %v10696_v10  ;;  %v14603_v10 = vsel %vm3230_vm4, %v3275_v1, %v3279_v15  ;;  %v10704_v35 = vpack.c.bf16 %v9613_v46, %v9609_v6  ;;  %v14614_v1 = vsel %vm3230_vm4, %v3279_v15, %v3283_v33  ;;  %v3291_v6 = vrot.slane %v13720_v38, 4 }
 0x348   : > { %v19303_v46 = vrot.slane %v13683_v37, 1 }
 0x349   : > { %3470 = vmatmul.mubr.f32.gmra.mrb[20].mxu1 %v14592_v13 }
 0x34a   : > { %9587 = vmatprep.mubr.msk.f32.mxu1 %vm389_vm1, %v14603_v10  ;;  %10699 = vmatpush1.bf16.msra.mxu1 %v10698_v32  ;;  %v14625_v32 = vld [vmem:[#allocation3 + $0xf0] sm:$0xff] }
 0x34b   : > { %10701 = vmatprep.subr.bf16.mxu1 %v10700_v22  ;;  %v3123_v15 = vadd.f32 %v14625_v32, %v3112_v53  ;;  %v14630_v22 = vsel %vm3230_vm4, %v3283_v33, %v3287_v47  ;;  %v14642_v53 = vsel %vm3230_vm4, %v3287_v47, %v3291_v6  ;;  %v9608_v47 = vld [vmem:[%s19090_s2 + $0x900] sm:$0xff] }
 0x34d   : > { %3476 = vmatmul.mubr.f32.gmra.mrb[22].mxu1 %v14609_v51  ;;  %v3289_v54 = vrot.slane %v3123_v15, 4 }
 0x34e   : > { %9588 = vmatprep.mubr.msk.f32.mxu1 %vm389_vm1, %v14614_v1  ;;  %10703 = vmatpush1.bf16.msra.mxu1 %v10702_v42  ;;  %v3126_v42 = vadd.f32 %v19303_v46, %v3098_v44  ;;  %v9620_v46 = vld [vmem:[%s19090_s2 + $0x960] sm:$0xff] }
 0x34f   : > { %10705 = vmatprep.subr.bf16.mxu1 %v10704_v35  ;;  %v3097_v35 = vld [vmem:[#allocation3 + $0x100] sm:$0xf]  ;;  %v14647_v37 = vsel %vm3230_vm4, %v3285_v45, %v3289_v54  ;;  %v9621_v45 = vld [vmem:[%s19090_s2 + $0x968] sm:$0xff] }
 0x350   : > { %v3125_v26 = vadd.f32 %v3111_v57, %v3097_v35  ;;  %v3295_v33 = vrot.slane %v3126_v42, 4  ;;  %v9612_v57 = vld [vmem:[%s19090_s2 + $0x920] sm:$0xff]  ;;  %v9625_v42 = vld [vmem:[%s19090_s2 + $0x988] sm:$0xff] }
 0x351   : > { %3482 = vmatmul.mubr.f32.gmra.mrb[24].mxu1 %v14622_v25  ;;  %v10706_v15 = vpack.c.bf16 %v9612_v57, %v9608_v47  ;;  %v9629_v35 = vld [vmem:[%s19090_s2 + $0x9a8] sm:$0xff]  ;;  %v9628_v47 = vld [vmem:[%s19090_s2 + $0x9a0] sm:$0xff] }
 0x352   : > { %9589 = vmatprep.mubr.msk.f32.mxu1 %vm389_vm1, %v14630_v22  ;;  %v3293_v38 = vrot.slane %v3125_v26, 4  ;;  %v14651_v24 = vsel %vm3230_vm4, %v3291_v6, %v3295_v33  ;;  %v9617_v26 = vld [vmem:[%s19090_s2 + $0x948] sm:$0xff]  ;;  %v10712_v33 = vpack.c.bf16 %v9629_v35, %v9625_v42  ;;  %v9644_v42 = vld [vmem:[%s19090_s2 + $0xa20] sm:$0xff] }
 0x353   : > { %v10708_v6 = vpack.c.bf16 %v9621_v45, %v9617_v26  ;;  %v9633_v57 = vld [vmem:[%s19090_s2 + $0x9c8] sm:$0xff]  ;;  %v9632_v45 = vld [vmem:[%s19090_s2 + $0x9c0] sm:$0xff] }
 0x354   : > { %v14662_v44 = vsel %vm3230_vm4, %v3289_v54, %v3293_v38  ;;  %v9616_v54 = vld [vmem:[%s19090_s2 + $0x940] sm:$0xff]  ;;  %v9649_v35 = vld [vmem:[%s19090_s2 + $0xa48] sm:$0xff] }
 0x355   : > { %3488 = vmatmul.mubr.f32.gmra.mrb[26].mxu1 %v14638_v61  ;;  %v9624_v38 = vld [vmem:[%s19090_s2 + $0x980] sm:$0xff] }
 0x356   : > { %9590 = vmatprep.mubr.msk.f32.mxu1 %vm389_vm1, %v14642_v53 }
 0x359   : > { %3494 = vmatmul.mubr.f32.gmra.mrb[28].mxu1 %v14647_v37 }
 0x35a   : > { %9591 = vmatprep.mubr.msk.f32.mxu1 %vm389_vm1, %v14651_v24 }
 0x35d   : > { %3500 = vmatmul.mubr.f32.gmra.mrb[30].mxu1 %v14662_v44 }
 0x35e   : > { %9592 = vmatprep.mubr.msk.f32.mxu1 %vm389_vm1, %v14350_v0  ;;  %v10710_v0 = vpack.c.bf16 %v9620_v46, %v9616_v54  ;;  %v9640_v46 = vld [vmem:[%s19090_s2 + $0xa00] sm:$0xff] }
 0x361   : > { %3571 = vmatmul.mubr.f32.vlgmr.msra.gmra.mrb[32].mxu1 %v14362_v4  ;;  %v9637_v4 = vld [vmem:[%s19090_s2 + $0x9e8] sm:$0xff] }
 0x362   : > { %9593 = vmatprep.mubr.msk.f32.mxu1 %vm389_vm1, %v14373_v41  ;;  %10707 = vmatpush1.bf16.msra.mxu1 %v10706_v15  ;;  %v10714_v41 = vpack.c.bf16 %v9628_v47, %v9624_v38  ;;  %v10716_v26 = vpack.c.bf16 %v9637_v4, %v9633_v57  ;;  %v9636_v15 = vld [vmem:[%s19090_s2 + $0x9e0] sm:$0xff]  ;;  %v9657_v47 = vld [vmem:[%s19090_s2 + $0xa88] sm:$0xff] }
 0x363   : > { %10709 = vmatprep.subr.bf16.mxu1 %v10708_v6  ;;  %v9641_v6 = vld [vmem:[%s19090_s2 + $0xa08] sm:$0xff]  ;;  %v9652_v38 = vld [vmem:[%s19090_s2 + $0xa60] sm:$0xff] }
 0x364   : > { %v9656_v4 = vld [vmem:[%s19090_s2 + $0xa80] sm:$0xff] }
 0x365   : > { %3577 = vmatmul.mubr.f32.gmra.mrb[34].mxu1 %v14385_v36  ;;  %v9645_v36 = vld [vmem:[%s19090_s2 + $0xa28] sm:$0xff] }
 0x366   : > { %9594 = vmatprep.mubr.msk.f32.mxu1 %vm389_vm1, %v14396_v27  ;;  %10711 = vmatpush1.bf16.msra.mxu1 %v10710_v0  ;;  %v10718_v27 = vpack.c.bf16 %v9636_v15, %v9632_v45  ;;  %v10720_v54 = vpack.c.bf16 %v9645_v36, %v9641_v6  ;;  %v9664_v15 = vld [vmem:[%s19090_s2 + $0xac0] sm:$0xff]  ;;  %v9673_v36 = vld [vmem:[%s19090_s2 + $0xb08] sm:$0xff] }
 0x367   : > { %10713 = vmatprep.subr.bf16.mxu1 %v10712_v33  ;;  %v9648_v33 = vld [vmem:[%s19090_s2 + $0xa40] sm:$0xff] }
 0x368   : > { %v9668_v6 = vld [vmem:[%s19090_s2 + $0xae0] sm:$0xff] }
 0x369   : > { %3583 = vmatmul.mubr.f32.gmra.mrb[36].mxu1 %v14408_v14  ;;  %v9653_v14 = vld [vmem:[%s19090_s2 + $0xa68] sm:$0xff] }
 0x36a   : > { %9595 = vmatprep.mubr.msk.f32.mxu1 %vm389_vm1, %v14419_v49  ;;  %10715 = vmatpush1.bf16.msra.mxu1 %v10714_v41  ;;  %v10722_v49 = vpack.c.bf16 %v9644_v42, %v9640_v46  ;;  %v10724_v0 = vpack.c.bf16 %v9653_v14, %v9649_v35  ;;  %v9660_v41 = vld [vmem:[%s19090_s2 + $0xaa0] sm:$0xff]  ;;  %v9681_v42 = vld [vmem:[%s19090_s2 + $0xb48] sm:$0xff] }
 0x36b   : > { %10717 = vmatprep.subr.bf16.mxu1 %v10716_v26  ;;  %v9665_v26 = vld [vmem:[%s19090_s2 + $0xac8] sm:$0xff]  ;;  %v9676_v46 = vld [vmem:[%s19090_s2 + $0xb20] sm:$0xff] }
 0x36c   : > { %v9680_v14 = vld [vmem:[%s19090_s2 + $0xb40] sm:$0xff] }
 0x36d   : > { %3589 = vmatmul.mubr.f32.gmra.mrb[38].mxu1 %v14431_v50  ;;  %v9661_v50 = vld [vmem:[%s19090_s2 + $0xaa8] sm:$0xff] }
 0x36e   : > { %9596 = vmatprep.mubr.msk.f32.mxu1 %vm389_vm1, %v14442_v52  ;;  %10719 = vmatpush1.bf16.msra.mxu1 %v10718_v27  ;;  %v10726_v52 = vpack.c.bf16 %v9652_v38, %v9648_v33  ;;  %v10728_v57 = vpack.c.bf16 %v9661_v50, %v9657_v47  ;;  %v9688_v38 = vld [vmem:[%s19090_s2 + $0xb80] sm:$0xff]  ;;  %v9697_v50 = vld [vmem:[%s19090_s2 + $0xbc8] sm:$0xff] }
 0x36f   : > { %10721 = vmatprep.subr.bf16.mxu1 %v10720_v54  ;;  %v9672_v54 = vld [vmem:[%s19090_s2 + $0xb00] sm:$0xff] }
 0x370   : > { %v9692_v47 = vld [vmem:[%s19090_s2 + $0xba0] sm:$0xff] }
 0x371   : > { %3595 = vmatmul.mubr.f32.gmra.mrb[40].mxu1 %v14454_v18  ;;  %v9669_v18 = vld [vmem:[%s19090_s2 + $0xae8] sm:$0xff] }
 0x372   : > { %9597 = vmatprep.mubr.msk.f32.mxu1 %vm389_vm1, %v14465_v60  ;;  %10723 = vmatpush1.bf16.msra.mxu1 %v10722_v49  ;;  %v10730_v60 = vpack.c.bf16 %v9660_v41, %v9656_v4  ;;  %v10732_v45 = vpack.c.bf16 %v9669_v18, %v9665_v26  ;;  %v9684_v49 = vld [vmem:[%s19090_s2 + $0xb60] sm:$0xff]  ;;  %v9611_v41 = vld [vmem:[%s19090_s2 + $0x918] sm:$0xff]  ;;  %v3735_v18 = vld [vmem:[#allocation3] sm:$0x80] }
 0x373   : > { %10725 = vmatprep.subr.bf16.mxu1 %v10724_v0  ;;  %v9689_v0 = vld [vmem:[%s19090_s2 + $0xb88] sm:$0xff]  ;;  %v9700_v4 = vld [vmem:[%s19090_s2 + $0xbe0] sm:$0xff] }
 0x375   : > { %3601 = vmatmul.mubr.f32.gmra.mrb[42].mxu1 %v14477_v30  ;;  %v9677_v30 = vld [vmem:[%s19090_s2 + $0xb28] sm:$0xff] }
 0x376   : > { %9598 = vmatprep.mubr.msk.f32.mxu1 %vm389_vm1, %v14488_v34  ;;  %10727 = vmatpush1.bf16.msra.mxu1 %v10726_v52  ;;  %v10734_v34 = vpack.c.bf16 %v9668_v6, %v9664_v15  ;;  %v10736_v27 = vpack.c.bf16 %v9677_v30, %v9673_v36  ;;  %v3731_v6 = vld [vmem:[#allocation3] sm:$0xc0]  ;;  %v3868_v36 = vrot.slane %v13231_v12, 6  ;;  %v3875_v30 = vrot.slane %v13268_v40, 6  ;;  %v9627_v40 = vld [vmem:[%s19090_s2 + $0x998] sm:$0xff] }
 0x377   : > { %10729 = vmatprep.subr.bf16.mxu1 %v10728_v57  ;;  %v9696_v57 = vld [vmem:[%s19090_s2 + $0xbc0] sm:$0xff] }
 0x379   : > { %3607 = vmatmul.mubr.f32.gmra.mrb[44].mxu1 %v14500_v58  ;;  %v9685_v58 = vld [vmem:[%s19090_s2 + $0xb68] sm:$0xff] }
 0x37a   : > { %9599 = vmatprep.mubr.msk.f32.mxu1 %vm389_vm1, %v14511_v16  ;;  %10731 = vmatpush1.bf16.msra.mxu1 %v10730_v60  ;;  %v10738_v16 = vpack.c.bf16 %v9676_v46, %v9672_v54  ;;  %v10740_v35 = vpack.c.bf16 %v9685_v58, %v9681_v42  ;;  %v3736_v60 = vld [vmem:[#allocation3 + $0x8] sm:$0x80]  ;;  %v9622_v54 = vld [vmem:[%s19090_s2 + $0x970] sm:$0xff]  ;;  %v3873_v46 = vrot.slane %v13250_v28, 6 }
 0x37b   : > { %10733 = vmatprep.subr.bf16.mxu1 %v10732_v45  ;;  %v3743_v45 = vrot.slane %v3735_v18, 1  ;;  %v9631_v42 = vld [vmem:[%s19090_s2 + $0x9b8] sm:$0xff] }
 0x37d   : > { %3613 = vmatmul.mubr.f32.gmra.mrb[46].mxu1 %v14523_v62  ;;  %v9693_v62 = vld [vmem:[%s19090_s2 + $0xba8] sm:$0xff] }
 0x37e   : > { %9600 = vmatprep.mubr.msk.f32.mxu1 %vm389_vm1, %v14534_v55  ;;  %10735 = vmatpush1.bf16.msra.mxu1 %v10734_v34  ;;  %v10742_v55 = vpack.c.bf16 %v9684_v49, %v9680_v14  ;;  %v10744_v33 = vpack.c.bf16 %v9693_v62, %v9689_v0  ;;  %v9626_v14 = vld [vmem:[%s19090_s2 + $0x990] sm:$0xff]  ;;  %v14905_v0 = vsel %vm3866_vm5, %v3868_v36, %v3873_v46  ;;  %v9635_v62 = vld [vmem:[%s19090_s2 + $0x9d8] sm:$0xff] }
 0x37f   : > { %10737 = vmatprep.subr.bf16.mxu1 %v10736_v27  ;;  %v9618_v27 = vld [vmem:[%s19090_s2 + $0x950] sm:$0xff] }
 0x380   : > { %v10758_v28 = vpack.c.bf16 %v9622_v54, %v9618_v27  ;;  %v9630_v49 = vld [vmem:[%s19090_s2 + $0x9b0] sm:$0xff] }
 0x381   : > { %3619 = vmatmul.mubr.f32.gmra.mrb[48].mxu1 %v14546_v21  ;;  %v9701_v21 = vld [vmem:[%s19090_s2 + $0xbe8] sm:$0xff]  ;;  %v9666_v54 = vld [vmem:[%s19090_s2 + $0xad0] sm:$0xff] }
 0x382   : > { %9601 = vmatprep.mubr.msk.f32.mxu1 %vm389_vm1, %v14557_v5  ;;  %10739 = vmatpush1.bf16.msra.mxu1 %v10738_v16  ;;  %v10746_v5 = vpack.c.bf16 %v9692_v47, %v9688_v38  ;;  %v10748_v52 = vpack.c.bf16 %v9701_v21, %v9697_v50  ;;  %v3879_v16 = vrot.slane %v13303_v63, 6  ;;  %v3877_v63 = vrot.slane %v13284_v48, 6  ;;  %v9634_v50 = vld [vmem:[%s19090_s2 + $0x9d0] sm:$0xff] }
 0x383   : > { %10741 = vmatprep.subr.bf16.mxu1 %v10740_v35  ;;  %v10760_v35 = vpack.c.bf16 %v9631_v42, %v9627_v40  ;;  %v3883_v38 = vrot.slane %v13338_v23, 6  ;;  %v10762_v48 = vpack.c.bf16 %v9630_v49, %v9626_v14  ;;  %v9638_v21 = vld [vmem:[%s19090_s2 + $0x9f0] sm:$0xff]  ;;  %v3881_v23 = vrot.slane %v13319_v9, 6  ;;  %v19304_v42 = vld [vmem:[#allocation16_spill] sm:$0xff]  ;;  %v19305_v14 = vld [vmem:[#allocation19_spill] sm:$0xff] }
 0x384   : > { %v10766_v9 = vpack.c.bf16 %v9638_v21, %v9634_v50  ;;  %v3903_v49 = vrot.slane %v19305_v14, 6  ;;  %v9683_v21 = vld [vmem:[%s19090_s2 + $0xb58] sm:$0xff]  ;;  %v9737_v14 = vld [vmem:[%s19090_s2 + $0xc08] sm:$0xff] }
 0x385   : > { %3625 = vmatmul.mubr.f32.gmra.mrb[50].mxu1 %v14569_v29  ;;  %v9615_v29 = vld [vmem:[%s19090_s2 + $0x938] sm:$0xff]  ;;  %v14951_v18 = vsel %vm3866_vm5, %v3877_v63, %v3881_v23 }
 0x386   : > { %9602 = vmatprep.mubr.msk.f32.mxu1 %vm389_vm1, %v14580_v20  ;;  %10743 = vmatpush1.bf16.msra.mxu1 %v10742_v55  ;;  %v10750_v20 = vpack.c.bf16 %v9700_v4, %v9696_v57  ;;  %v10752_v26 = vpack.c.bf16 %v9615_v29, %v9611_v41  ;;  %v9639_v55 = vld [vmem:[%s19090_s2 + $0x9f8] sm:$0xff]  ;;  %v14939_v4 = vsel %vm3866_vm5, %v3879_v16, %v3883_v38  ;;  %v3887_v41 = vrot.slane %v19287_v39, 6 }
 0x387   : > { %10745 = vmatprep.subr.bf16.mxu1 %v10744_v33  ;;  %v14916_v33 = vsel %vm3866_vm5, %v3875_v30, %v3879_v16  ;;  %v10764_v47 = vpack.c.bf16 %v9639_v55, %v9635_v62  ;;  %v9647_v57 = vld [vmem:[%s19090_s2 + $0xa38] sm:$0xff]  ;;  %v3885_v39 = vrot.slane %v19288_v31, 6  ;;  %v9674_v55 = vld [vmem:[%s19090_s2 + $0xb10] sm:$0xff] }
 0x388   : > { %v9675_v16 = vld [vmem:[%s19090_s2 + $0xb18] sm:$0xff] }
 0x389   : > { %3631 = vmatmul.mubr.f32.gmra.mrb[52].mxu1 %v14592_v13  ;;  %v3745_v13 = vrot.slane %v3736_v60, 1  ;;  %v9651_v60 = vld [vmem:[%s19090_s2 + $0xa58] sm:$0xff] }
 0x38a   : > { %9603 = vmatprep.mubr.msk.f32.mxu1 %vm389_vm1, %v14603_v10  ;;  %10747 = vmatpush1.bf16.msra.mxu1 %v10746_v5  ;;  %v14928_v5 = vsel %vm3866_vm5, %v3873_v46, %v3877_v63  ;;  %v9670_v46 = vld [vmem:[%s19090_s2 + $0xaf0] sm:$0xff] }
 0x38b   : > { %10749 = vmatprep.subr.bf16.mxu1 %v10748_v52  ;;  %v3746_v10 = vsel %vm1912_vm2, %v3745_v13, %v13218_v59  ;;  %v9643_v52 = vld [vmem:[%s19090_s2 + $0xa18] sm:$0xff]  ;;  %v14962_v13 = vsel %vm3866_vm5, %v3883_v38, %v3887_v41  ;;  %v10782_v63 = vpack.c.bf16 %v9670_v46, %v9666_v54  ;;  %v9678_v38 = vld [vmem:[%s19090_s2 + $0xb30] sm:$0xff] }
 0x38c   : > { %v10768_v29 = vpack.c.bf16 %v9647_v57, %v9643_v52  ;;  %v19307_v57 = vld [vmem:[#allocation21_spill] sm:$0xff] }
 0x38d   : > { %3637 = vmatmul.mubr.f32.gmra.mrb[54].mxu1 %v14609_v51  ;;  %v3744_v51 = vsel %vm1912_vm2, %v3743_v45, %v13214_v56  ;;  %v9614_v56 = vld [vmem:[%s19090_s2 + $0x930] sm:$0xff]  ;;  %v9655_v45 = vld [vmem:[%s19090_s2 + $0xa78] sm:$0xff] }
 0x38e   : > { %9604 = vmatprep.mubr.msk.f32.mxu1 %vm389_vm1, %v14614_v1  ;;  %10751 = vmatpush1.bf16.msra.mxu1 %v10750_v20  ;;  %v3732_v1 = vld [vmem:[#allocation3 + $0x8] sm:$0xc0]  ;;  %v9642_v20 = vld [vmem:[%s19090_s2 + $0xa10] sm:$0xff] }
 0x38f   : > { %10753 = vmatprep.subr.bf16.mxu1 %v10752_v26  ;;  %v3758_v15 = vadd.f32 %v3746_v10, %v3732_v1  ;;  %v9646_v26 = vld [vmem:[%s19090_s2 + $0xa30] sm:$0xff]  ;;  %v3891_v10 = vrot.slane %v19289_v3, 6  ;;  %v3889_v3 = vrot.slane %v19290_v17, 6 }
 0x390   : > { %v10770_v31 = vpack.c.bf16 %v9646_v26, %v9642_v20  ;;  %v9650_v1 = vld [vmem:[%s19090_s2 + $0xa50] sm:$0xff] }
 0x391   : > { %3643 = vmatmul.mubr.f32.gmra.mrb[56].mxu1 %v14622_v25  ;;  %v3757_v25 = vadd.f32 %v3744_v51, %v3731_v6  ;;  %v3870_v59 = vrot.slane %v3758_v15, 6  ;;  %v10772_v51 = vpack.c.bf16 %v9655_v45, %v9651_v60  ;;  %v9654_v15 = vld [vmem:[%s19090_s2 + $0xa70] sm:$0xff]  ;;  %v14974_v6 = vsel %vm3866_vm5, %v3881_v23, %v3885_v39  ;;  %v9687_v23 = vld [vmem:[%s19090_s2 + $0xb78] sm:$0xff]  ;;  %v19308_v60 = vld [vmem:[#allocation20_spill] sm:$0xff] }
 0x392   : > { %9605 = vmatprep.mubr.msk.f32.mxu1 %vm389_vm1, %v14630_v22  ;;  %v3871_v22 = vrot.slane %v13240_v19, 6  ;;  %v9619_v19 = vld [vmem:[%s19090_s2 + $0x958] sm:$0xff]  ;;  %v10774_v17 = vpack.c.bf16 %v9654_v15, %v9650_v1  ;;  %v9682_v20 = vld [vmem:[%s19090_s2 + $0xb50] sm:$0xff]  ;;  %v3905_v45 = vrot.slane %v19308_v60, 6  ;;  %v19309_v1 = vld [vmem:[#allocation23_spill] sm:$0xff] }
 0x393   : > { %v9686_v26 = vld [vmem:[%s19090_s2 + $0xb70] sm:$0xff]  ;;  %v3911_v15 = vrot.slane %v19309_v1, 6 }
 0x394   : > { %v14893_v58 = vsel %vm3866_vm5, %v3871_v22, %v3875_v30  ;;  %v9671_v30 = vld [vmem:[%s19090_s2 + $0xaf8] sm:$0xff]  ;;  %v9698_v46 = vld [vmem:[%s19090_s2 + $0xbd0] sm:$0xff] }
 0x395   : > { %3649 = vmatmul.mubr.f32.gmra.mrb[58].mxu1 %v14638_v61  ;;  %v9610_v61 = vld [vmem:[%s19090_s2 + $0x910] sm:$0xff] }
 0x396   : > { %9606 = vmatprep.mubr.msk.f32.mxu1 %vm389_vm1, %v14642_v53  ;;  %v3867_v53 = vrot.slane %v3757_v25, 6  ;;  %v10754_v34 = vpack.c.bf16 %v9614_v56, %v9610_v61  ;;  %v9659_v25 = vld [vmem:[%s19090_s2 + $0xa98] sm:$0xff]  ;;  %v3895_v61 = vrot.slane %v19291_v8, 6  ;;  %v3893_v8 = vrot.slane %v19292_v43, 6  ;;  %v19317_v1 = vld [vmem:[#allocation29_spill] sm:$0xff] }
 0x398   : > { %v15020_v40 = vsel %vm3866_vm5, %v3889_v3, %v3893_v8 }
 0x399   : > { %3655 = vmatmul.mubr.f32.gmra.mrb[60].mxu1 %v14647_v37  ;;  %v9623_v37 = vld [vmem:[%s19090_s2 + $0x978] sm:$0xff] }
 0x39a   : > { %9607 = vmatprep.mubr.msk.f32.mxu1 %vm389_vm1, %v14651_v24  ;;  %v14870_v24 = vsel %vm3866_vm5, %v3870_v59, %v3871_v22  ;;  %v10756_v12 = vpack.c.bf16 %v9623_v37, %v9619_v19  ;;  %v9663_v22 = vld [vmem:[%s19090_s2 + $0xab8] sm:$0xff]  ;;  %v14985_v59 = vsel %vm3866_vm5, %v3887_v41, %v3891_v10  ;;  %v14997_v19 = vsel %vm3866_vm5, %v3885_v39, %v3889_v3 }
 0x39b   : > { %v10776_v56 = vpack.c.bf16 %v9663_v22, %v9659_v25  ;;  %v9667_v37 = vld [vmem:[%s19090_s2 + $0xad8] sm:$0xff]  ;;  %v3907_v41 = vrot.slane %v19307_v57, 6  ;;  %v10790_v3 = vpack.c.bf16 %v9686_v26, %v9682_v20  ;;  %v9690_v22 = vld [vmem:[%s19090_s2 + $0xb90] sm:$0xff] }
 0x39c   : > { %v10780_v27 = vpack.c.bf16 %v9671_v30, %v9667_v37  ;;  %v19311_v30 = vld [vmem:[#allocation26_spill] sm:$0xff] }
 0x39d   : > { %3661 = vmatmul.mubr.f32.gmra.mrb[62].mxu1 %v14662_v44  ;;  %v14882_v44 = vsel %vm3866_vm5, %v3867_v53, %v3868_v36  ;;  %v9658_v53 = vld [vmem:[%s19090_s2 + $0xa90] sm:$0xff]  ;;  %v15100_v37 = vsel %vm3866_vm5, %v3907_v41, %v3911_v15  ;;  %v3734_v20 = vld [vmem:[#allocation3 + $0x108] sm:$0x3f] }
 0x39e   : > { %9704 = vmatprep.mubr.msk.f32.mxu1 %vm389_vm1, %v14870_v24  ;;  %v9662_v36 = vld [vmem:[%s19090_s2 + $0xab0] sm:$0xff] }
 0x39f   : > { %v10778_v43 = vpack.c.bf16 %v9662_v36, %v9658_v53  ;;  %v9699_v36 = vld [vmem:[%s19090_s2 + $0xbd8] sm:$0xff] }
 0x3a1   : > { %4046 = vmatmul.mubr.f32.vlgmr.msra.gmra.mrb[0].mxu1 %v14882_v44 }
 0x3a2   : > { %9705 = vmatprep.mubr.msk.f32.mxu1 %vm389_vm1, %v14893_v58  ;;  %10755 = vmatpush1.bf16.msra.mxu1 %v10754_v34  ;;  %v15008_v34 = vsel %vm3866_vm5, %v3891_v10, %v3895_v61  ;;  %v9691_v10 = vld [vmem:[%s19090_s2 + $0xb98] sm:$0xff] }
 0x3a3   : > { %10757 = vmatprep.subr.bf16.mxu1 %v10756_v12  ;;  %v3899_v12 = vrot.slane %v19293_v11, 6  ;;  %v3897_v11 = vrot.slane %v19304_v42, 6  ;;  %v9702_v42 = vld [vmem:[%s19090_s2 + $0xbf0] sm:$0xff] }
 0x3a5   : > { %4052 = vmatmul.mubr.f32.gmra.mrb[2].mxu1 %v14905_v0  ;;  %v15054_v52 = vsel %vm3866_vm5, %v3899_v12, %v3903_v49 }
 0x3a6   : > { %9706 = vmatprep.mubr.msk.f32.mxu1 %vm389_vm1, %v14916_v33  ;;  %10759 = vmatpush1.bf16.msra.mxu1 %v10758_v28  ;;  %v9679_v28 = vld [vmem:[%s19090_s2 + $0xb38] sm:$0xff] }
 0x3a7   : > { %10761 = vmatprep.subr.bf16.mxu1 %v10760_v35  ;;  %v15031_v35 = vsel %vm3866_vm5, %v3895_v61, %v3899_v12  ;;  %v10784_v62 = vpack.c.bf16 %v9679_v28, %v9675_v16  ;;  %v9694_v61 = vld [vmem:[%s19090_s2 + $0xbb0] sm:$0xff]  ;;  %v3915_v12 = vrot.slane %v19311_v30, 6  ;;  %v19312_v16 = vld [vmem:[#allocation24_spill] sm:$0xff] }
 0x3a8   : > { %v3913_v28 = vrot.slane %v19312_v16, 6 }
 0x3a9   : > { %4058 = vmatmul.mubr.f32.gmra.mrb[4].mxu1 %v14928_v5 }
 0x3aa   : > { %9707 = vmatprep.mubr.msk.f32.mxu1 %vm389_vm1, %v14939_v4  ;;  %10763 = vmatpush1.bf16.msra.mxu1 %v10762_v48  ;;  %v15043_v48 = vsel %vm3866_vm5, %v3893_v8, %v3897_v11  ;;  %v9703_v8 = vld [vmem:[%s19090_s2 + $0xbf8] sm:$0xff] }
 0x3ab   : > { %10765 = vmatprep.subr.bf16.mxu1 %v10764_v47  ;;  %v19306_v47 = vld [vmem:[#allocation18_spill] sm:$0xff]  ;;  %v10796_v54 = vpack.c.bf16 %v9703_v8, %v9699_v36 }
 0x3ac   : > { %v3901_v50 = vrot.slane %v19306_v47, 6  ;;  %v10798_v47 = vpack.c.bf16 %v9702_v42, %v9698_v46  ;;  %v9749_v46 = vld [vmem:[%s19090_s2 + $0xc68] sm:$0xff] }
 0x3ad   : > { %4064 = vmatmul.mubr.f32.gmra.mrb[6].mxu1 %v14951_v18 }
 0x3ae   : > { %9708 = vmatprep.mubr.msk.f32.mxu1 %vm389_vm1, %v14962_v13  ;;  %10767 = vmatpush1.bf16.msra.mxu1 %v10766_v9  ;;  %v10786_v9 = vpack.c.bf16 %v9678_v38, %v9674_v55  ;;  %v15066_v39 = vsel %vm3866_vm5, %v3897_v11, %v3901_v50 }
 0x3af   : > { %10769 = vmatprep.subr.bf16.mxu1 %v10768_v29  ;;  %v10788_v29 = vpack.c.bf16 %v9687_v23, %v9683_v21  ;;  %v3917_v23 = vrot.slane %v13634_v7, 6  ;;  %v19315_v7 = vld [vmem:[#allocation28_spill] sm:$0xff] }
 0x3b0   : > { %v3921_v60 = vrot.slane %v19315_v7, 6  ;;  %v9768_v7 = vld [vmem:[%s19090_s2 + $0xd00] sm:$0xff] }
 0x3b1   : > { %4070 = vmatmul.mubr.f32.gmra.mrb[8].mxu1 %v14974_v6  ;;  %v15142_v26 = vsel %vm3866_vm5, %v3913_v28, %v3917_v23 }
 0x3b2   : > { %9709 = vmatprep.mubr.msk.f32.mxu1 %vm389_vm1, %v14985_v59  ;;  %10771 = vmatpush1.bf16.msra.mxu1 %v10770_v31  ;;  %v9695_v31 = vld [vmem:[%s19090_s2 + $0xbb8] sm:$0xff] }
 0x3b3   : > { %10773 = vmatprep.subr.bf16.mxu1 %v10772_v51  ;;  %v15077_v51 = vsel %vm3866_vm5, %v3903_v49, %v3907_v41  ;;  %v10792_v25 = vpack.c.bf16 %v9695_v31, %v9691_v10  ;;  %v9741_v49 = vld [vmem:[%s19090_s2 + $0xc28] sm:$0xff]  ;;  %v3923_v41 = vrot.slane %v13680_v2, 6  ;;  %v19316_v10 = vld [vmem:[#allocation30_spill] sm:$0xff] }
 0x3b4   : > { %v3927_v31 = vrot.slane %v19316_v10, 6 }
 0x3b5   : > { %4076 = vmatmul.mubr.f32.gmra.mrb[10].mxu1 %v14997_v19 }
 0x3b6   : > { %9710 = vmatprep.mubr.msk.f32.mxu1 %vm389_vm1, %v15008_v34  ;;  %10775 = vmatpush1.bf16.msra.mxu1 %v10774_v17  ;;  %v15089_v17 = vsel %vm3866_vm5, %v3901_v50, %v3905_v45  ;;  %v10800_v50 = vpack.c.bf16 %v9741_v49, %v9737_v14  ;;  %v9748_v14 = vld [vmem:[%s19090_s2 + $0xc60] sm:$0xff]  ;;  %v9753_v49 = vld [vmem:[%s19090_s2 + $0xc88] sm:$0xff] }
 0x3b7   : > { %10777 = vmatprep.subr.bf16.mxu1 %v10776_v56  ;;  %v19310_v56 = vld [vmem:[#allocation22_spill] sm:$0xff] }
 0x3b8   : > { %v3909_v53 = vrot.slane %v19310_v56, 6 }
 0x3b9   : > { %4082 = vmatmul.mubr.f32.gmra.mrb[12].mxu1 %v15020_v40 }
 0x3ba   : > { %9711 = vmatprep.mubr.msk.f32.mxu1 %vm389_vm1, %v15031_v35  ;;  %10779 = vmatpush1.bf16.msra.mxu1 %v10778_v43  ;;  %v3737_v43 = vld [vmem:[#allocation3 + $0x100] sm:$0x7f]  ;;  %v15112_v11 = vsel %vm3866_vm5, %v3905_v45, %v3909_v53  ;;  %v15129_v21 = vsel %vm3866_vm5, %v3909_v53, %v3913_v28  ;;  %v9744_v28 = vld [vmem:[%s19090_s2 + $0xc40] sm:$0xff] }
 0x3bb   : > { %10781 = vmatprep.subr.bf16.mxu1 %v10780_v27  ;;  %v10794_v27 = vpack.c.bf16 %v9694_v61, %v9690_v22  ;;  %v3747_v38 = vrot.slane %v3737_v43, 1  ;;  %v15156_v22 = vsel %vm3866_vm5, %v3917_v23, %v3921_v60  ;;  %v9740_v43 = vld [vmem:[%s19090_s2 + $0xc20] sm:$0xff] }
 0x3bd   : > { %4088 = vmatmul.mubr.f32.gmra.mrb[14].mxu1 %v15043_v48 }
 0x3be   : > { %9712 = vmatprep.mubr.msk.f32.mxu1 %vm389_vm1, %v15054_v52  ;;  %10783 = vmatpush1.bf16.msra.mxu1 %v10782_v63  ;;  %v15123_v63 = vsel %vm3866_vm5, %v3911_v15, %v3915_v12  ;;  %v19318_v15 = vrot.slane %v19317_v1, 1  ;;  %v9780_v1 = vld [vmem:[%s19090_s2 + $0xd60] sm:$0xff] }
 0x3bf   : > { %10785 = vmatprep.subr.bf16.mxu1 %v10784_v62  ;;  %v19313_v62 = vld [vmem:[#allocation27_spill] sm:$0xff] }
 0x3c0   : > { %v3919_v55 = vrot.slane %v19313_v62, 6  ;;  %v9757_v62 = vld [vmem:[%s19090_s2 + $0xca8] sm:$0xff] }
 0x3c1   : > { %4094 = vmatmul.mubr.f32.gmra.mrb[16].mxu1 %v15066_v39 }
 0x3c2   : > { %9713 = vmatprep.mubr.msk.f32.mxu1 %vm389_vm1, %v15077_v51  ;;  %10787 = vmatpush1.bf16.msra.mxu1 %v10786_v9  ;;  %v15134_v57 = vsel %vm3866_vm5, %v3915_v12, %v3919_v55  ;;  %v19314_v9 = vld [vmem:[#allocation25_spill] sm:$0xff]  ;;  %v15148_v2 = vsel %vm3866_vm5, %v3919_v55, %v3923_v41  ;;  %v9736_v12 = vld [vmem:[%s19090_s2 + $0xc00] sm:$0xff]  ;;  %v10808_v55 = vpack.c.bf16 %v9757_v62, %v9753_v49  ;;  %v9817_v62 = vld [vmem:[%s19090_s2 + $0xe88] sm:$0xff] }
 0x3c3   : > { %10789 = vmatprep.subr.bf16.mxu1 %v10788_v29  ;;  %v3748_v29 = vsel %vm1912_vm2, %v19314_v9, %v3747_v38  ;;  %v10802_v42 = vpack.c.bf16 %v9740_v43, %v9736_v12  ;;  %v9764_v9 = vld [vmem:[%s19090_s2 + $0xce0] sm:$0xff]  ;;  %v9801_v43 = vld [vmem:[%s19090_s2 + $0xe08] sm:$0xff] }
 0x3c4   : > { %v3759_v45 = vadd.f32 %v14625_v32, %v3748_v29  ;;  %v15160_v32 = vsel %vm3866_vm5, %v3923_v41, %v3927_v31  ;;  %v9760_v41 = vld [vmem:[%s19090_s2 + $0xcc0] sm:$0xff]  ;;  %v9769_v29 = vld [vmem:[%s19090_s2 + $0xd08] sm:$0xff] }
 0x3c5   : > { %4100 = vmatmul.mubr.f32.gmra.mrb[18].mxu1 %v15089_v17  ;;  %v9796_v12 = vld [vmem:[%s19090_s2 + $0xde0] sm:$0xff] }
 0x3c6   : > { %9714 = vmatprep.mubr.msk.f32.mxu1 %vm389_vm1, %v15100_v37  ;;  %10791 = vmatpush1.bf16.msra.mxu1 %v10790_v3  ;;  %v3762_v3 = vadd.f32 %v19318_v15, %v3734_v20  ;;  %v3925_v61 = vrot.slane %v3759_v45, 6  ;;  %v9777_v45 = vld [vmem:[%s19090_s2 + $0xd48] sm:$0xff]  ;;  %v9812_v49 = vld [vmem:[%s19090_s2 + $0xe60] sm:$0xff] }
 0x3c7   : > { %10793 = vmatprep.subr.bf16.mxu1 %v10792_v25  ;;  %v3733_v25 = vld [vmem:[#allocation3 + $0x100] sm:$0x3f]  ;;  %v9785_v15 = vld [vmem:[%s19090_s2 + $0xd88] sm:$0xff] }
 0x3c8   : > { %v3761_v56 = vadd.f32 %v3747_v38, %v3733_v25  ;;  %v3931_v53 = vrot.slane %v3762_v3, 6  ;;  %v15165_v36 = vsel %vm3866_vm5, %v3921_v60, %v3925_v61  ;;  %v9752_v38 = vld [vmem:[%s19090_s2 + $0xc80] sm:$0xff] }
 0x3c9   : > { %4106 = vmatmul.mubr.f32.gmra.mrb[20].mxu1 %v15112_v11  ;;  %v9772_v60 = vld [vmem:[%s19090_s2 + $0xd20] sm:$0xff] }
 0x3ca   : > { %9715 = vmatprep.mubr.msk.f32.mxu1 %vm389_vm1, %v15123_v63  ;;  %10795 = vmatpush1.bf16.msra.mxu1 %v10794_v27  ;;  %v3929_v8 = vrot.slane %v3761_v56, 6  ;;  %v15169_v30 = vsel %vm3866_vm5, %v3927_v31, %v3931_v53  ;;  %v9776_v31 = vld [vmem:[%s19090_s2 + $0xd40] sm:$0xff]  ;;  %v9793_v56 = vld [vmem:[%s19090_s2 + $0xdc8] sm:$0xff] }
 0x3cb   : > { %10797 = vmatprep.subr.bf16.mxu1 %v10796_v54  ;;  %v9745_v54 = vld [vmem:[%s19090_s2 + $0xc48] sm:$0xff]  ;;  %v9784_v25 = vld [vmem:[%s19090_s2 + $0xd80] sm:$0xff] }
 0x3cc   : > { %v15180_v27 = vsel %vm3866_vm5, %v3925_v61, %v3929_v8  ;;  %v10804_v16 = vpack.c.bf16 %v9749_v46, %v9745_v54  ;;  %v9788_v61 = vld [vmem:[%s19090_s2 + $0xda0] sm:$0xff] }
 0x3cd   : > { %4112 = vmatmul.mubr.f32.gmra.mrb[22].mxu1 %v15129_v21  ;;  %v9792_v8 = vld [vmem:[%s19090_s2 + $0xdc0] sm:$0xff] }
 0x3ce   : > { %9716 = vmatprep.mubr.msk.f32.mxu1 %vm389_vm1, %v15134_v57  ;;  %10799 = vmatpush1.bf16.msra.mxu1 %v10798_v47  ;;  %v9756_v47 = vld [vmem:[%s19090_s2 + $0xca0] sm:$0xff] }
 0x3cf   : > { %10801 = vmatprep.subr.bf16.mxu1 %v10800_v50  ;;  %v9761_v50 = vld [vmem:[%s19090_s2 + $0xcc8] sm:$0xff]  ;;  %v9800_v46 = vld [vmem:[%s19090_s2 + $0xe00] sm:$0xff] }
 0x3d1   : > { %4118 = vmatmul.mubr.f32.gmra.mrb[24].mxu1 %v15142_v26 }
 0x3d2   : > { %9717 = vmatprep.mubr.msk.f32.mxu1 %vm389_vm1, %v15148_v2 }
 0x3d5   : > { %4124 = vmatmul.mubr.f32.gmra.mrb[26].mxu1 %v15156_v22 }
 0x3d6   : > { %9718 = vmatprep.mubr.msk.f32.mxu1 %vm389_vm1, %v15160_v32 }
 0x3d9   : > { %4130 = vmatmul.mubr.f32.gmra.mrb[28].mxu1 %v15165_v36 }
 0x3da   : > { %9719 = vmatprep.mubr.msk.f32.mxu1 %vm389_vm1, %v15169_v30 }
 0x3dd   : > { %4136 = vmatmul.mubr.f32.gmra.mrb[30].mxu1 %v15180_v27 }
 0x3de   : > { %9720 = vmatprep.mubr.msk.f32.mxu1 %vm389_vm1, %v14870_v24  ;;  %v10806_v24 = vpack.c.bf16 %v9748_v14, %v9744_v28  ;;  %v9808_v14 = vld [vmem:[%s19090_s2 + $0xe40] sm:$0xff] }
 0x3e1   : > { %4207 = vmatmul.mubr.f32.vlgmr.msra.gmra.mrb[32].mxu1 %v14882_v44  ;;  %v9765_v44 = vld [vmem:[%s19090_s2 + $0xce8] sm:$0xff] }
 0x3e2   : > { %9721 = vmatprep.mubr.msk.f32.mxu1 %vm389_vm1, %v14893_v58  ;;  %10803 = vmatpush1.bf16.msra.mxu1 %v10802_v42  ;;  %v10810_v58 = vpack.c.bf16 %v9756_v47, %v9752_v38  ;;  %v10812_v23 = vpack.c.bf16 %v9765_v44, %v9761_v50  ;;  %v9804_v42 = vld [vmem:[%s19090_s2 + $0xe20] sm:$0xff]  ;;  %v9825_v47 = vld [vmem:[%s19090_s2 + $0xec8] sm:$0xff] }
 0x3e3   : > { %10805 = vmatprep.subr.bf16.mxu1 %v10804_v16  ;;  %v9809_v16 = vld [vmem:[%s19090_s2 + $0xe48] sm:$0xff]  ;;  %v9820_v38 = vld [vmem:[%s19090_s2 + $0xea0] sm:$0xff] }
 0x3e4   : > { %v9824_v44 = vld [vmem:[%s19090_s2 + $0xec0] sm:$0xff] }
 0x3e5   : > { %4213 = vmatmul.mubr.f32.gmra.mrb[34].mxu1 %v14905_v0  ;;  %v9773_v0 = vld [vmem:[%s19090_s2 + $0xd28] sm:$0xff] }
 0x3e6   : > { %9722 = vmatprep.mubr.msk.f32.mxu1 %vm389_vm1, %v14916_v33  ;;  %10807 = vmatpush1.bf16.msra.mxu1 %v10806_v24  ;;  %v10814_v33 = vpack.c.bf16 %v9764_v9, %v9760_v41  ;;  %v10816_v20 = vpack.c.bf16 %v9773_v0, %v9769_v29  ;;  %v4370_v9 = vld [vmem:[#allocation3 + $0x18] sm:$0xfe]  ;;  %v4371_v29 = vld [vmem:[#allocation3 + $0x20] sm:$0xff] }
 0x3e7   : > { %10809 = vmatprep.subr.bf16.mxu1 %v10808_v55  ;;  %v9816_v55 = vld [vmem:[%s19090_s2 + $0xe80] sm:$0xff]  ;;  %v4438_v0 = vrot.slane %v4370_v9, 1  ;;  %v12233_v9 = vld [vmem:[#allocation3 + $0x38] sm:$0xff] }
 0x3e9   : > { %4219 = vmatmul.mubr.f32.gmra.mrb[36].mxu1 %v14928_v5  ;;  %v9781_v5 = vld [vmem:[%s19090_s2 + $0xd68] sm:$0xff] }
 0x3ea   : > { %9723 = vmatprep.mubr.msk.f32.mxu1 %vm389_vm1, %v14939_v4  ;;  %10811 = vmatpush1.bf16.msra.mxu1 %v10810_v58  ;;  %v10818_v4 = vpack.c.bf16 %v9772_v60, %v9768_v7  ;;  %v10820_v10 = vpack.c.bf16 %v9781_v5, %v9777_v45  ;;  %v9828_v58 = vld [vmem:[%s19090_s2 + $0xee0] sm:$0xff]  ;;  %v9742_v60 = vld [vmem:[%s19090_s2 + $0xc30] sm:$0xff]  ;;  %v12229_v45 = vld [vmem:[#allocation3 + $0x18] sm:$0xff] }
 0x3eb   : > { %10813 = vmatprep.subr.bf16.mxu1 %v10812_v23  ;;  %v9739_v23 = vld [vmem:[%s19090_s2 + $0xc18] sm:$0xff]  ;;  %v15367_v7 = vld [vmem:[#allocation3 + $0x30] sm:$0xff] }
 0x3ed   : > { %4225 = vmatmul.mubr.f32.gmra.mrb[38].mxu1 %v14951_v18  ;;  %v9789_v18 = vld [vmem:[%s19090_s2 + $0xda8] sm:$0xff] }
 0x3ee   : > { %9724 = vmatprep.mubr.msk.f32.mxu1 %vm389_vm1, %v14962_v13  ;;  %10815 = vmatpush1.bf16.msra.mxu1 %v10814_v33  ;;  %v10822_v13 = vpack.c.bf16 %v9780_v1, %v9776_v31  ;;  %v10824_v3 = vpack.c.bf16 %v9789_v18, %v9785_v15  ;;  %v4369_v33 = vld [vmem:[#allocation3 + $0x10] sm:$0xfe]  ;;  %v9747_v31 = vld [vmem:[%s19090_s2 + $0xc58] sm:$0xff] }
 0x3ef   : > { %10817 = vmatprep.subr.bf16.mxu1 %v10816_v20  ;;  %v9751_v1 = vld [vmem:[%s19090_s2 + $0xc78] sm:$0xff] }
 0x3f1   : > { %4231 = vmatmul.mubr.f32.gmra.mrb[40].mxu1 %v14974_v6  ;;  %v9797_v6 = vld [vmem:[%s19090_s2 + $0xde8] sm:$0xff] }
 0x3f2   : > { %9725 = vmatprep.mubr.msk.f32.mxu1 %vm389_vm1, %v14985_v59  ;;  %10819 = vmatpush1.bf16.msra.mxu1 %v10818_v4  ;;  %v10826_v59 = vpack.c.bf16 %v9788_v61, %v9784_v25  ;;  %v10828_v53 = vpack.c.bf16 %v9797_v6, %v9793_v56  ;;  %v9865_v25 = vld [vmem:[%s19091_s3 + $0x408] sm:$0xff]  ;;  %v9864_v61 = vld [vmem:[%s19091_s3 + $0x400] sm:$0xff] }
 0x3f3   : > { %10821 = vmatprep.subr.bf16.mxu1 %v10820_v10  ;;  %v15385_v10 = vld [vmem:[#allocation3 + $0x58] sm:$0xff] }
 0x3f5   : > { %4237 = vmatmul.mubr.f32.gmra.mrb[42].mxu1 %v14997_v19  ;;  %v9805_v19 = vld [vmem:[%s19090_s2 + $0xe28] sm:$0xff] }
 0x3f6   : > { %9726 = vmatprep.mubr.msk.f32.mxu1 %vm389_vm1, %v15008_v34  ;;  %10823 = vmatpush1.bf16.msra.mxu1 %v10822_v13  ;;  %v10830_v34 = vpack.c.bf16 %v9796_v12, %v9792_v8  ;;  %v10832_v54 = vpack.c.bf16 %v9805_v19, %v9801_v43  ;;  %v9746_v13 = vld [vmem:[%s19090_s2 + $0xc50] sm:$0xff]  ;;  %v9871_v8 = vld [vmem:[%s19091_s3 + $0x438] sm:$0xff]  ;;  %v12230_v12 = vld [vmem:[#allocation3 + $0x10] sm:$0xff]  ;;  %v10852_v19 = vpack.c.bf16 %v9751_v1, %v9747_v31 }
 0x3f7   : > { %10825 = vmatprep.subr.bf16.mxu1 %v10824_v3  ;;  %v9750_v3 = vld [vmem:[%s19090_s2 + $0xc70] sm:$0xff]  ;;  %v9771_v1 = vld [vmem:[%s19090_s2 + $0xd18] sm:$0xff] }
 0x3f8   : > { %v9766_v31 = vld [vmem:[%s19090_s2 + $0xcf0] sm:$0xff] }
 0x3f9   : > { %4243 = vmatmul.mubr.f32.gmra.mrb[44].mxu1 %v15020_v40  ;;  %v9813_v40 = vld [vmem:[%s19090_s2 + $0xe68] sm:$0xff] }
 0x3fa   : > { %9727 = vmatprep.mubr.msk.f32.mxu1 %vm389_vm1, %v15031_v35  ;;  %10827 = vmatpush1.bf16.msra.mxu1 %v10826_v59  ;;  %v10834_v35 = vpack.c.bf16 %v9804_v42, %v9800_v46  ;;  %v10836_v28 = vpack.c.bf16 %v9813_v40, %v9809_v16  ;;  %v9866_v59 = vld [vmem:[%s19091_s3 + $0x410] sm:$0xff]  ;;  %v9868_v42 = vld [vmem:[%s19091_s3 + $0x420] sm:$0xff]  ;;  %v12231_v40 = vld [vmem:[#allocation3 + $0x28] sm:$0xff] }
 0x3fb   : > { %10829 = vmatprep.subr.bf16.mxu1 %v10828_v53  ;;  %v9869_v53 = vld [vmem:[%s19091_s3 + $0x428] sm:$0xff]  ;;  %v9870_v16 = vld [vmem:[%s19091_s3 + $0x430] sm:$0xff] }
 0x3fc   : > { %v10900_v46 = vpack.c.bf16 %v9871_v8, %v9869_v53  ;;  %v15527_v53 = vld [vmem:[#allocation3 + $0x70] sm:$0xff] }
 0x3fd   : > { %4249 = vmatmul.mubr.f32.gmra.mrb[46].mxu1 %v15043_v48  ;;  %v9821_v48 = vld [vmem:[%s19090_s2 + $0xea8] sm:$0xff] }
 0x3fe   : > { %9728 = vmatprep.mubr.msk.f32.mxu1 %vm389_vm1, %v15054_v52  ;;  %10831 = vmatpush1.bf16.msra.mxu1 %v10830_v34  ;;  %v10838_v52 = vpack.c.bf16 %v9812_v49, %v9808_v14  ;;  %v10840_v24 = vpack.c.bf16 %v9821_v48, %v9817_v62  ;;  %v9755_v34 = vld [vmem:[%s19090_s2 + $0xc98] sm:$0xff]  ;;  %v9873_v62 = vld [vmem:[%s19091_s3 + $0x448] sm:$0xff] }
 0x3ff   : > { %10833 = vmatprep.subr.bf16.mxu1 %v10832_v54  ;;  %v10898_v54 = vpack.c.bf16 %v9866_v59, %v9864_v61  ;;  %v9759_v49 = vld [vmem:[%s19090_s2 + $0xcb8] sm:$0xff]  ;;  %v9881_v61 = vld [vmem:[%s19091_s3 + $0x488] sm:$0xff] }
 0x400   : > { %v9875_v48 = vld [vmem:[%s19091_s3 + $0x458] sm:$0xff] }
 0x401   : > { %4255 = vmatmul.mubr.f32.gmra.mrb[48].mxu1 %v15066_v39  ;;  %v9829_v39 = vld [vmem:[%s19090_s2 + $0xee8] sm:$0xff] }
 0x402   : > { %9729 = vmatprep.mubr.msk.f32.mxu1 %vm389_vm1, %v15077_v51  ;;  %10835 = vmatpush1.bf16.msra.mxu1 %v10834_v35  ;;  %v10842_v51 = vpack.c.bf16 %v9820_v38, %v9816_v55  ;;  %v10844_v50 = vpack.c.bf16 %v9829_v39, %v9825_v47  ;;  %v15449_v55 = vld [vmem:[#allocation3 + $0x50] sm:$0xff]  ;;  %v10902_v38 = vpack.c.bf16 %v9870_v16, %v9868_v42  ;;  %v15453_v39 = vld [vmem:[#allocation3 + $0x68] sm:$0xff] }
 0x403   : > { %10837 = vmatprep.subr.bf16.mxu1 %v10836_v28  ;;  %v10854_v47 = vpack.c.bf16 %v9750_v3, %v9746_v13 }
 0x405   : > { %4261 = vmatmul.mubr.f32.gmra.mrb[50].mxu1 %v15089_v17  ;;  %v9743_v17 = vld [vmem:[%s19090_s2 + $0xc38] sm:$0xff] }
 0x406   : > { %9730 = vmatprep.mubr.msk.f32.mxu1 %vm389_vm1, %v15100_v37  ;;  %10839 = vmatpush1.bf16.msra.mxu1 %v10838_v52  ;;  %v10846_v37 = vpack.c.bf16 %v9828_v58, %v9824_v44  ;;  %v10848_v41 = vpack.c.bf16 %v9743_v17, %v9739_v23  ;;  %v12232_v44 = vld [vmem:[#allocation3 + $0x20] sm:$0xff]  ;;  %v10856_v23 = vpack.c.bf16 %v9759_v49, %v9755_v34  ;;  %v9880_v34 = vld [vmem:[%s19091_s3 + $0x480] sm:$0xff] }
 0x407   : > { %10841 = vmatprep.subr.bf16.mxu1 %v10840_v24  ;;  %v4451_v24 = vrot.slane %v15385_v10, 1  ;;  %v9754_v17 = vld [vmem:[%s19090_s2 + $0xc90] sm:$0xff] }
 0x408   : > { %v9762_v10 = vld [vmem:[%s19090_s2 + $0xcd0] sm:$0xff] }
 0x409   : > { %4267 = vmatmul.mubr.f32.gmra.mrb[52].mxu1 %v15112_v11  ;;  %v4372_v11 = vld [vmem:[#allocation3 + $0x28] sm:$0xff] }
 0x40a   : > { %9731 = vmatprep.mubr.msk.f32.mxu1 %vm389_vm1, %v15123_v63  ;;  %10843 = vmatpush1.bf16.msra.mxu1 %v10842_v51  ;;  %v4439_v63 = vrot.slane %v4372_v11, 1  ;;  %v9872_v51 = vld [vmem:[%s19091_s3 + $0x440] sm:$0xff]  ;;  %v10904_v11 = vpack.c.bf16 %v9875_v48, %v9873_v62  ;;  %v12237_v62 = vld [vmem:[#allocation3 + $0x58] sm:$0xff] }
 0x40b   : > { %10845 = vmatprep.subr.bf16.mxu1 %v10844_v50  ;;  %v9874_v50 = vld [vmem:[%s19091_s3 + $0x450] sm:$0xff] }
 0x40d   : > { %4273 = vmatmul.mubr.f32.gmra.mrb[54].mxu1 %v15129_v21  ;;  %v4374_v21 = vld [vmem:[#allocation3 + $0x38] sm:$0xff] }
 0x40e   : > { %9732 = vmatprep.mubr.msk.f32.mxu1 %vm389_vm1, %v15134_v57  ;;  %10847 = vmatpush1.bf16.msra.mxu1 %v10846_v37  ;;  %v4436_v57 = vrot.slane %v4371_v29, 1  ;;  %v4443_v20 = vrot.slane %v4374_v21, 1  ;;  %v9758_v37 = vld [vmem:[%s19090_s2 + $0xcb0] sm:$0xff]  ;;  %v4449_v21 = vrot.slane %v15449_v55, 1  ;;  %v9783_v55 = vld [vmem:[%s19090_s2 + $0xd78] sm:$0xff] }
 0x40f   : > { %10849 = vmatprep.subr.bf16.mxu1 %v10848_v41  ;;  %v9763_v41 = vld [vmem:[%s19090_s2 + $0xcd8] sm:$0xff] }
 0x410   : > { %v4444_v15 = vsel %vm1912_vm2, %v4439_v63, %v4443_v20 }
 0x411   : > { %4279 = vmatmul.mubr.f32.gmra.mrb[56].mxu1 %v15142_v26  ;;  %v4440_v26 = vsel %vm1912_vm2, %v4438_v0, %v4439_v63  ;;  %v15433_v35 = vadd.f32 %v12231_v40, %v4444_v15  ;;  %v9767_v0 = vld [vmem:[%s19090_s2 + $0xcf8] sm:$0xff]  ;;  %v9770_v40 = vld [vmem:[%s19090_s2 + $0xd10] sm:$0xff] }
 0x412   : > { %9733 = vmatprep.mubr.msk.f32.mxu1 %vm389_vm1, %v15148_v2  ;;  %v4435_v2 = vrot.slane %v4369_v33, 1  ;;  %v15381_v5 = vadd.f32 %v12229_v45, %v4440_v26  ;;  %v9877_v33 = vld [vmem:[%s19091_s3 + $0x468] sm:$0xff]  ;;  %v12234_v45 = vld [vmem:[#allocation3 + $0x30] sm:$0xff] }
 0x414   : > { %v4437_v4 = vsel %vm1912_vm2, %v4435_v2, %v4436_v57  ;;  %v10906_v2 = vpack.c.bf16 %v9874_v50, %v9872_v51  ;;  %v15566_v50 = vld [vmem:[#allocation3 + $0x80] sm:$0xff] }
 0x415   : > { %4285 = vmatmul.mubr.f32.gmra.mrb[58].mxu1 %v15156_v22  ;;  %v15371_v22 = vld [vmem:[#allocation3 + $0x48] sm:$0xff]  ;;  %v15422_v43 = vadd.f32 %v12230_v12, %v4437_v4  ;;  %v10862_v12 = vpack.c.bf16 %v9766_v31, %v9762_v10 }
 0x416   : > { %9734 = vmatprep.mubr.msk.f32.mxu1 %vm389_vm1, %v15160_v32  ;;  %v9738_v32 = vld [vmem:[%s19090_s2 + $0xc10] sm:$0xff]  ;;  %v4447_v18 = vrot.slane %v15371_v22, 1  ;;  %v10858_v22 = vpack.c.bf16 %v9758_v37, %v9754_v17  ;;  %v9884_v37 = vld [vmem:[%s19091_s3 + $0x4a0] sm:$0xff]  ;;  %v15609_v31 = vld [vmem:[#allocation3 + $0xa8] sm:$0xff] }
 0x417   : > { %v10850_v56 = vpack.c.bf16 %v9742_v60, %v9738_v32  ;;  %v15492_v32 = vld [vmem:[#allocation3 + $0x78] sm:$0xff]  ;;  %v9876_v60 = vld [vmem:[%s19091_s3 + $0x460] sm:$0xff] }
 0x418   : > { %v4448_v52 = vsel %vm1912_vm2, %v4443_v20, %v4447_v18  ;;  %v4452_v26 = vsel %vm1912_vm2, %v4447_v18, %v4451_v24  ;;  %v4455_v20 = vrot.slane %v15453_v39, 1  ;;  %v12235_v18 = vld [vmem:[#allocation3 + $0x48] sm:$0xff]  ;;  %v4459_v59 = vrot.slane %v15492_v32, 1  ;;  %v9889_v32 = vld [vmem:[%s19091_s3 + $0x4c8] sm:$0xff] }
 0x419   : > { %4291 = vmatmul.mubr.f32.gmra.mrb[60].mxu1 %v15165_v36  ;;  %v15379_v36 = vld [vmem:[#allocation3 + $0x40] sm:$0xff]  ;;  %v15472_v63 = vadd.f32 %v12233_v9, %v4448_v52  ;;  %v15511_v13 = vadd.f32 %v12235_v18, %v4452_v26  ;;  %v12239_v26 = vld [vmem:[#allocation3 + $0x68] sm:$0xff] }
 0x41a   : > { %9735 = vmatprep.mubr.msk.f32.mxu1 %vm389_vm1, %v15169_v30  ;;  %v4441_v30 = vrot.slane %v15367_v7, 1  ;;  %v4445_v14 = vrot.slane %v15379_v36, 1  ;;  %v15488_v7 = vld [vmem:[#allocation3 + $0x60] sm:$0xff]  ;;  %v4460_v39 = vsel %vm1912_vm2, %v4455_v20, %v4459_v59 }
 0x41b   : > { %v9878_v36 = vld [vmem:[%s19091_s3 + $0x470] sm:$0xff] }
 0x41c   : > { %v4442_v28 = vsel %vm1912_vm2, %v4436_v57, %v4441_v30  ;;  %v4446_v29 = vsel %vm1912_vm2, %v4441_v30, %v4445_v14  ;;  %v9879_v57 = vld [vmem:[%s19091_s3 + $0x478] sm:$0xff]  ;;  %v10860_v30 = vpack.c.bf16 %v9767_v0, %v9763_v41  ;;  %v4450_v3 = vsel %vm1912_vm2, %v4445_v14, %v4449_v21  ;;  %v9886_v41 = vld [vmem:[%s19091_s3 + $0x4b0] sm:$0xff] }
 0x41d   : > { %4297 = vmatmul.mubr.f32.gmra.mrb[62].mxu1 %v15180_v27  ;;  %v9867_v27 = vld [vmem:[%s19091_s3 + $0x418] sm:$0xff]  ;;  %v15461_v58 = vadd.f32 %v12232_v44, %v4442_v28  ;;  %v15500_v4 = vadd.f32 %v12234_v45, %v4446_v29  ;;  %v10908_v15 = vpack.c.bf16 %v9879_v57, %v9877_v33  ;;  %v10910_v8 = vpack.c.bf16 %v9878_v36, %v9876_v60  ;;  %v9774_v28 = vld [vmem:[%s19090_s2 + $0xd30] sm:$0xff] }
 0x41e   : > { %9832 = vmatprep.mubr.msk.f32.mxu1 %vm389_vm1, %v15381_v5  ;;  %v10896_v6 = vpack.c.bf16 %v9867_v27, %v9865_v25  ;;  %v4453_v25 = vrot.slane %v15488_v7, 1  ;;  %v9775_v27 = vld [vmem:[%s19090_s2 + $0xd38] sm:$0xff]  ;;  %v10866_v17 = vpack.c.bf16 %v9774_v28, %v9770_v40  ;;  %v9782_v0 = vld [vmem:[%s19090_s2 + $0xd70] sm:$0xff]  ;;  %v10918_v10 = vpack.c.bf16 %v9886_v41, %v9884_v37 }
 0x41f   : > { %v10864_v16 = vpack.c.bf16 %v9775_v27, %v9771_v1  ;;  %v9779_v14 = vld [vmem:[%s19090_s2 + $0xd58] sm:$0xff]  ;;  %v9890_v18 = vld [vmem:[%s19091_s3 + $0x4d0] sm:$0xff]  ;;  %v4471_v40 = vrot.slane %v15609_v31, 1 }
 0x420   : > { %10897 = vmatprep.subr.bf16.mxu0 %v10896_v6  ;;  %v4456_v6 = vsel %vm1912_vm2, %v4451_v24, %v4455_v20  ;;  %v4454_v52 = vsel %vm1912_vm2, %v4449_v21, %v4453_v25  ;;  %v4457_v24 = vrot.slane %v15527_v53, 1  ;;  %v10868_v29 = vpack.c.bf16 %v9783_v55, %v9779_v14  ;;  %v9778_v21 = vld [vmem:[%s19090_s2 + $0xd50] sm:$0xff]  ;;  %v9787_v33 = vld [vmem:[%s19090_s2 + $0xd98] sm:$0xff]  ;;  %v12241_v53 = vld [vmem:[#allocation3 + $0x78] sm:$0xff] }
 0x421   : > { %4775 = vmatmul.mubr.f32.vlgmr.msra.gmra.mrb[0].mxu1 %v15422_v43  ;;  %10899 = vmatpush1.bf16.msra.mxu0 %v10898_v54  ;;  %v9882_v54 = vld [vmem:[%s19091_s3 + $0x490] sm:$0xff]  ;;  %v15550_v48 = vadd.f32 %v12237_v62, %v4456_v6  ;;  %v15589_v20 = vadd.f32 %v12239_v26, %v4460_v39  ;;  %v9891_v60 = vld [vmem:[%s19091_s3 + $0x4d8] sm:$0xff]  ;;  %v10870_v1 = vpack.c.bf16 %v9782_v0, %v9778_v21  ;;  %v12242_v55 = vld [vmem:[#allocation3 + $0x70] sm:$0xff] }
 0x422   : > { %9833 = vmatprep.mubr.msk.f32.mxu1 %vm389_vm1, %v15433_v35  ;;  %10851 = vmatpush1.bf16.msra.mxu1 %v10850_v56  ;;  %v9883_v56 = vld [vmem:[%s19091_s3 + $0x498] sm:$0xff]  ;;  %v10914_v44 = vpack.c.bf16 %v9882_v54, %v9880_v34  ;;  %v4458_v7 = vsel %vm1912_vm2, %v4453_v25, %v4457_v24  ;;  %v9893_v54 = vld [vmem:[%s19091_s3 + $0x4e8] sm:$0xff]  ;;  %v15644_v28 = vld [vmem:[#allocation3 + $0xa0] sm:$0xff] }
 0x423   : > { %10853 = vmatprep.subr.bf16.mxu1 %v10852_v19  ;;  %10901 = vmatprep.subr.bf16.mxu0 %v10900_v46  ;;  %v15531_v19 = vld [vmem:[#allocation3 + $0x88] sm:$0xff]  ;;  %v12236_v46 = vld [vmem:[#allocation3 + $0x40] sm:$0xff]  ;;  %v10912_v49 = vpack.c.bf16 %v9883_v56, %v9881_v61  ;;  %v4469_v41 = vrot.slane %v15644_v28, 1 }
 0x424   : > { %v15539_v42 = vadd.f32 %v12236_v46, %v4450_v3  ;;  %v4463_v51 = vrot.slane %v15531_v19, 1  ;;  %v12240_v3 = vld [vmem:[#allocation3 + $0x60] sm:$0xff]  ;;  %v9795_v6 = vld [vmem:[%s19090_s2 + $0xdd8] sm:$0xff] }
 0x425   : > { %4781 = vmatmul.mubr.f32.gmra.mrb[2].mxu1 %v15461_v58  ;;  %10903 = vmatpush1.bf16.msra.mxu0 %v10902_v38  ;;  %v9885_v38 = vld [vmem:[%s19091_s3 + $0x4a8] sm:$0xff]  ;;  %v15617_v25 = vadd.f32 %v12240_v3, %v4458_v7  ;;  %v9786_v61 = vld [vmem:[%s19090_s2 + $0xd90] sm:$0xff]  ;;  %v9799_v34 = vld [vmem:[%s19090_s2 + $0xdf8] sm:$0xff] }
 0x426   : > { %9834 = vmatprep.mubr.msk.f32.mxu1 %vm389_vm1, %v15472_v63  ;;  %10855 = vmatpush1.bf16.msra.mxu1 %v10854_v47  ;;  %v9887_v47 = vld [vmem:[%s19091_s3 + $0x4b8] sm:$0xff]  ;;  %v4464_v36 = vsel %vm1912_vm2, %v4459_v59, %v4463_v51  ;;  %v9790_v56 = vld [vmem:[%s19090_s2 + $0xdb0] sm:$0xff]  ;;  %v10920_v59 = vpack.c.bf16 %v9891_v60, %v9889_v32 }
 0x427   : > { %10857 = vmatprep.subr.bf16.mxu1 %v10856_v23  ;;  %10905 = vmatprep.subr.bf16.mxu0 %v10904_v11  ;;  %v15570_v23 = vld [vmem:[#allocation3 + $0x98] sm:$0xff]  ;;  %v12238_v11 = vld [vmem:[#allocation3 + $0x50] sm:$0xff]  ;;  %v10916_v57 = vpack.c.bf16 %v9887_v47, %v9885_v38  ;;  %v9895_v46 = vld [vmem:[%s19091_s3 + $0x4f8] sm:$0xff]  ;;  %v10874_v62 = vpack.c.bf16 %v9790_v56, %v9786_v61  ;;  %v10876_v47 = vpack.c.bf16 %v9799_v34, %v9795_v6 }
 0x428   : > { %v15578_v9 = vadd.f32 %v12238_v11, %v4454_v52  ;;  %v4467_v45 = vrot.slane %v15570_v23, 1  ;;  %v9892_v52 = vld [vmem:[%s19091_s3 + $0x4e0] sm:$0xff]  ;;  %v9794_v39 = vld [vmem:[%s19090_s2 + $0xdd0] sm:$0xff]  ;;  %v12243_v23 = vld [vmem:[#allocation3 + $0x88] sm:$0xff] }
 0x429   : > { %4787 = vmatmul.mubr.f32.gmra.mrb[4].mxu1 %v15500_v4  ;;  %10907 = vmatpush1.bf16.msra.mxu0 %v10906_v2  ;;  %v4461_v2 = vrot.slane %v15566_v50, 1  ;;  %v9803_v50 = vld [vmem:[%s19090_s2 + $0xe18] sm:$0xff]  ;;  %v9898_v32 = vld [vmem:[%s19091_s3 + $0x510] sm:$0xff]  ;;  %v12246_v34 = vld [vmem:[#allocation3 + $0x90] sm:$0xff] }
 0x42a   : > { %9835 = vmatprep.mubr.msk.f32.mxu1 %vm389_vm1, %v15511_v13  ;;  %10859 = vmatpush1.bf16.msra.mxu1 %v10858_v22  ;;  %v9791_v22 = vld [vmem:[%s19090_s2 + $0xdb8] sm:$0xff]  ;;  %v4472_v0 = vsel %vm1912_vm2, %v4467_v45, %v4471_v40  ;;  %v12244_v60 = vld [vmem:[#allocation3 + $0x80] sm:$0xff] }
 0x42b   : > { %10861 = vmatprep.subr.bf16.mxu1 %v10860_v30  ;;  %10909 = vmatprep.subr.bf16.mxu0 %v10908_v15  ;;  %v15605_v30 = vld [vmem:[#allocation3 + $0x90] sm:$0xff]  ;;  %v10872_v27 = vpack.c.bf16 %v9791_v22, %v9787_v33  ;;  %v9807_v11 = vld [vmem:[%s19090_s2 + $0xe38] sm:$0xff] }
 0x42c   : > { %v9888_v15 = vld [vmem:[%s19091_s3 + $0x4c0] sm:$0xff]  ;;  %v4465_v19 = vrot.slane %v15605_v30, 1  ;;  %v9899_v21 = vld [vmem:[%s19091_s3 + $0x518] sm:$0xff]  ;;  %v9802_v30 = vld [vmem:[%s19090_s2 + $0xe10] sm:$0xff] }
 0x42d   : > { %4793 = vmatmul.mubr.f32.gmra.mrb[6].mxu1 %v15539_v42  ;;  %10911 = vmatpush1.bf16.msra.mxu0 %v10910_v8  ;;  %v15628_v8 = vadd.f32 %v12241_v53, %v4464_v36  ;;  %v10922_v14 = vpack.c.bf16 %v9890_v18, %v9888_v15  ;;  %v15687_v7 = vld [vmem:[#allocation3 + $0xc8] sm:$0xff]  ;;  %v9896_v22 = vld [vmem:[%s19091_s3 + $0x500] sm:$0xff] }
 0x42e   : > { %9836 = vmatprep.mubr.msk.f32.mxu1 %vm389_vm1, %v15550_v48  ;;  %10863 = vmatpush1.bf16.msra.mxu1 %v10862_v12  ;;  %v4462_v12 = vsel %vm1912_vm2, %v4457_v24, %v4461_v2  ;;  %v9894_v24 = vld [vmem:[%s19091_s3 + $0x4f0] sm:$0xff]  ;;  %v4466_v37 = vsel %vm1912_vm2, %v4461_v2, %v4465_v19  ;;  %v4470_v18 = vsel %vm1912_vm2, %v4465_v19, %v4469_v41  ;;  %v9815_v61 = vld [vmem:[%s19090_s2 + $0xe78] sm:$0xff]  ;;  %v4479_v6 = vrot.slane %v15687_v7, 1 }
 0x42f   : > { %10865 = vmatprep.subr.bf16.mxu1 %v10864_v16  ;;  %10913 = vmatprep.subr.bf16.mxu0 %v10912_v49  ;;  %v4468_v16 = vsel %vm1912_vm2, %v4463_v51, %v4467_v45  ;;  %v15648_v49 = vld [vmem:[#allocation3 + $0xb8] sm:$0xff]  ;;  %v15656_v38 = vadd.f32 %v12242_v55, %v4462_v12  ;;  %v9798_v51 = vld [vmem:[%s19090_s2 + $0xdf0] sm:$0xff]  ;;  %v10926_v26 = vpack.c.bf16 %v9894_v24, %v9892_v52  ;;  %v12247_v28 = vld [vmem:[#allocation3 + $0xa8] sm:$0xff] }
 0x430   : > { %v4475_v33 = vrot.slane %v15648_v49, 1  ;;  %v10878_v2 = vpack.c.bf16 %v9798_v51, %v9794_v39  ;;  %v15695_v36 = vadd.f32 %v12244_v60, %v4466_v37  ;;  %v10880_v45 = vpack.c.bf16 %v9807_v11, %v9803_v50  ;;  %v4394_v12 = vld [vmem:[#allocation3 + $0xd8] sm:$0xff]  ;;  %v9819_v52 = vld [vmem:[%s19090_s2 + $0xe98] sm:$0xff]  ;;  %v4393_v39 = vld [vmem:[#allocation3 + $0xd0] sm:$0xff] }
 0x431   : > { %4799 = vmatmul.mubr.f32.gmra.mrb[8].mxu1 %v15578_v9  ;;  %10915 = vmatpush1.bf16.msra.mxu0 %v10914_v44  ;;  %v10924_v44 = vpack.c.bf16 %v9895_v46, %v9893_v54  ;;  %v10930_v53 = vpack.c.bf16 %v9898_v32, %v9896_v22  ;;  %v15718_v54 = vadd.f32 %v12246_v34, %v4470_v18  ;;  %v9823_v24 = vld [vmem:[%s19090_s2 + $0xeb8] sm:$0xff]  ;;  %v9822_v11 = vld [vmem:[%s19090_s2 + $0xeb0] sm:$0xff]  ;;  %v4398_v32 = vld [vmem:[#allocation3 + $0xf8] sm:$0xff] }
 0x432   : > { %9837 = vmatprep.mubr.msk.f32.mxu1 %vm389_vm1, %v15589_v20  ;;  %10867 = vmatpush1.bf16.msra.mxu1 %v10866_v17  ;;  %v15667_v17 = vadd.f32 %v12243_v23, %v4468_v16  ;;  %v4476_v56 = vsel %vm1912_vm2, %v4471_v40, %v4475_v33  ;;  %v9810_v16 = vld [vmem:[%s19090_s2 + $0xe50] sm:$0xff]  ;;  %v4480_v55 = vsel %vm1912_vm2, %v4475_v33, %v4479_v6  ;;  %v4396_v51 = vld [vmem:[#allocation3 + $0xe8] sm:$0xff]  ;;  %v4481_v33 = vrot.slane %v4393_v39, 1  ;;  %v4399_v39 = vld [vmem:[#allocation3 + $0x110] sm:$0x1] }
 0x433   : > { %10869 = vmatprep.subr.bf16.mxu1 %v10868_v29  ;;  %10917 = vmatprep.subr.bf16.mxu0 %v10916_v57  ;;  %v9897_v29 = vld [vmem:[%s19091_s3 + $0x508] sm:$0xff]  ;;  %v15683_v57 = vld [vmem:[#allocation3 + $0xb0] sm:$0xff]  ;;  %v9814_v40 = vld [vmem:[%s19090_s2 + $0xe70] sm:$0xff]  ;;  %v10888_v37 = vpack.c.bf16 %v9823_v24, %v9819_v52 }
 0x434   : > { %v10928_v31 = vpack.c.bf16 %v9899_v21, %v9897_v29  ;;  %v4473_v3 = vrot.slane %v15683_v57, 1  ;;  %v10886_v50 = vpack.c.bf16 %v9814_v40, %v9810_v16  ;;  %v12249_v29 = vld [vmem:[#allocation3 + $0xb8] sm:$0xff]  ;;  %v9827_v57 = vld [vmem:[%s19090_s2 + $0xed8] sm:$0xff]  ;;  %v4395_v22 = vld [vmem:[#allocation3 + $0xe0] sm:$0xff] }
 0x435   : > { %4805 = vmatmul.mubr.f32.gmra.mrb[10].mxu1 %v15617_v25  ;;  %10919 = vmatpush1.bf16.msra.mxu0 %v10918_v10  ;;  %v9806_v10 = vld [vmem:[%s19090_s2 + $0xe30] sm:$0xff]  ;;  %v15747_v21 = vadd.f32 %v12249_v29, %v4480_v55  ;;  %v12251_v18 = vld [vmem:[#allocation3 + $0xc8] sm:$0xff]  ;;  %v12254_v24 = vld [vmem:[#allocation3 + $0xd0] sm:$0xff]  ;;  %v4497_v29 = vrot.slane %v4399_v39, 1 }
 0x436   : > { %9838 = vmatprep.mubr.msk.f32.mxu1 %vm389_vm1, %v15628_v8  ;;  %10871 = vmatpush1.bf16.msra.mxu1 %v10870_v1  ;;  %v12245_v1 = vld [vmem:[#allocation3 + $0x98] sm:$0xff]  ;;  %v10882_v19 = vpack.c.bf16 %v9806_v10, %v9802_v30  ;;  %v4474_v49 = vsel %vm1912_vm2, %v4469_v41, %v4473_v3  ;;  %v9818_v41 = vld [vmem:[%s19090_s2 + $0xe90] sm:$0xff] }
 0x437   : > { %10873 = vmatprep.subr.bf16.mxu1 %v10872_v27  ;;  %10921 = vmatprep.subr.bf16.mxu0 %v10920_v59  ;;  %v15703_v15 = vadd.f32 %v12245_v1, %v4472_v0  ;;  %v9811_v27 = vld [vmem:[%s19090_s2 + $0xe58] sm:$0xff]  ;;  %v4391_v59 = vld [vmem:[#allocation3 + $0xc0] sm:$0xff]  ;;  %v10890_v60 = vpack.c.bf16 %v9822_v11, %v9818_v41 }
 0x438   : > { %v10884_v46 = vpack.c.bf16 %v9815_v61, %v9811_v27  ;;  %v9830_v1 = vld [vmem:[%s19090_s2 + $0xef0] sm:$0xff]  ;;  %v4485_v61 = vrot.slane %v4395_v22, 1 }
 0x439   : > { %4811 = vmatmul.mubr.f32.gmra.mrb[12].mxu1 %v15656_v38  ;;  %10923 = vmatpush1.bf16.msra.mxu0 %v10922_v14  ;;  %v15726_v14 = vadd.f32 %v12247_v28, %v4476_v56 }
 0x43a   : > { %9839 = vmatprep.mubr.msk.f32.mxu1 %vm389_vm1, %v15667_v17  ;;  %10875 = vmatpush1.bf16.msra.mxu1 %v10874_v62  ;;  %v4477_v62 = vrot.slane %v4391_v59, 1  ;;  %v4397_v59 = vld [vmem:[#allocation3 + $0xf0] sm:$0xff]  ;;  %v4486_v40 = vsel %vm1912_vm2, %v4481_v33, %v4485_v61 }
 0x43b   : > { %10877 = vmatprep.subr.bf16.mxu1 %v10876_v47  ;;  %10925 = vmatprep.subr.bf16.mxu0 %v10924_v44  ;;  %v4483_v47 = vrot.slane %v4394_v12, 1  ;;  %v12248_v44 = vld [vmem:[#allocation3 + $0xa0] sm:$0xff]  ;;  %v4489_v28 = vrot.slane %v4397_v59, 1  ;;  %v15784_v55 = vadd.f32 %v12254_v24, %v4486_v40  ;;  %v9929_v24 = vld [vmem:[%s19091_s3 + $0x608] sm:$0xff] }
 0x43c   : > { %v15739_v23 = vadd.f32 %v12248_v44, %v4474_v49  ;;  %v4478_v0 = vsel %vm1912_vm2, %v4473_v3, %v4477_v62  ;;  %v4482_v27 = vsel %vm1912_vm2, %v4477_v62, %v4481_v33  ;;  %v4400_v49 = vld [vmem:[#allocation3 + $0x118] sm:$0x1] }
 0x43d   : > { %4817 = vmatmul.mubr.f32.gmra.mrb[14].mxu1 %v15695_v36  ;;  %10927 = vmatpush1.bf16.msra.mxu0 %v10926_v26  ;;  %v9831_v26 = vld [vmem:[%s19090_s2 + $0xef8] sm:$0xff]  ;;  %v4484_v7 = vsel %vm1912_vm2, %v4479_v6, %v4483_v47  ;;  %v4491_v6 = vrot.slane %v4398_v32, 1  ;;  %v4490_v44 = vsel %vm1912_vm2, %v4485_v61, %v4489_v28 }
 0x43e   : > { %9840 = vmatprep.mubr.msk.f32.mxu1 %vm389_vm1, %v15703_v15  ;;  %10879 = vmatpush1.bf16.msra.mxu1 %v10878_v2  ;;  %v4487_v2 = vrot.slane %v4396_v51, 1  ;;  %v10892_v10 = vpack.c.bf16 %v9831_v26, %v9827_v57  ;;  %v15768_v3 = vadd.f32 %v12251_v18, %v4484_v7  ;;  %v12255_v51 = vld [vmem:[#allocation3 + $0xe8] sm:$0xff]  ;;  %v12258_v26 = vld [vmem:[#allocation3 + $0xf8] sm:$0xff] }
 0x43f   : > { %10881 = vmatprep.subr.bf16.mxu1 %v10880_v45  ;;  %10929 = vmatprep.subr.bf16.mxu0 %v10928_v31  ;;  %v12250_v45 = vld [vmem:[#allocation3 + $0xb0] sm:$0xff]  ;;  %v9826_v31 = vld [vmem:[%s19090_s2 + $0xed0] sm:$0xff]  ;;  %v9915_v18 = vld [vmem:[%s19091_s3 + $0x598] sm:$0xff] }
 0x440   : > { %v15760_v30 = vadd.f32 %v12250_v45, %v4478_v0  ;;  %v4488_v56 = vsel %vm1912_vm2, %v4483_v47, %v4487_v2  ;;  %v10894_v12 = vpack.c.bf16 %v9830_v1, %v9826_v31  ;;  %v4492_v62 = vsel %vm1912_vm2, %v4487_v2, %v4491_v6  ;;  %v12257_v0 = vld [vmem:[#allocation3 + $0xe0] sm:$0xff]  ;;  %v9913_v1 = vld [vmem:[%s19091_s3 + $0x588] sm:$0xff] }
 0x441   : > { %4823 = vmatmul.mubr.f32.gmra.mrb[16].mxu1 %v15718_v54  ;;  %10931 = vmatpush1.bf16.msra.mxu0 %v10930_v53  ;;  %v4368_v53 = vld [vmem:[#allocation3 + $0x108] sm:$0xff]  ;;  %v4499_v47 = vrot.slane %v4400_v49, 1  ;;  %v15796_v33 = vadd.f32 %v12257_v0, %v4490_v44 }
 0x442   : > { %9841 = vmatprep.mubr.msk.f32.mxu1 %vm389_vm1, %v15726_v14  ;;  %10883 = vmatpush1.bf16.msra.mxu1 %v10882_v19  ;;  %v12252_v19 = vld [vmem:[#allocation3 + $0xc0] sm:$0xff]  ;;  %v4495_v52 = vrot.slane %v4368_v53, 1  ;;  %v9927_v49 = vld [vmem:[%s19091_s3 + $0x5f8] sm:$0xff] }
 0x443   : > { %10885 = vmatprep.subr.bf16.mxu1 %v10884_v46  ;;  %v15775_v34 = vadd.f32 %v12252_v19, %v4482_v27  ;;  %v12253_v46 = vld [vmem:[#allocation3 + $0xd8] sm:$0xff]  ;;  %v10944_v27 = vpack.c.bf16 %v9915_v18, %v9913_v1  ;;  %v9923_v19 = vld [vmem:[%s19091_s3 + $0x5d8] sm:$0xff] }
 0x444   : > { %v15777_v16 = vadd.f32 %v12253_v46, %v4488_v56  ;;  %v4496_v11 = vsel %vm1912_vm2, %v4491_v6, %v4495_v52  ;;  %v4500_v57 = vsel %vm1912_vm2, %v4495_v52, %v4499_v47  ;;  %v9917_v56 = vld [vmem:[%s19091_s3 + $0x5a8] sm:$0xff]  ;;  %v9919_v6 = vld [vmem:[%s19091_s3 + $0x5b8] sm:$0xff] }
 0x445   : > { %4829 = vmatmul.mubr.f32.gmra.mrb[18].mxu1 %v15739_v23  ;;  %v15799_v7 = vadd.f32 %v12258_v26, %v4496_v11  ;;  %v15805_v22 = vadd.f32 %v4500_v57, %v4368_v53  ;;  %v10948_v59 = vpack.c.bf16 %v9919_v6, %v9917_v56  ;;  %v9931_v47 = vld [vmem:[%s19091_s3 + $0x618] sm:$0xff] }
 0x446   : > { %9842 = vmatprep.mubr.msk.f32.mxu1 %vm389_vm1, %v15747_v21  ;;  %10887 = vmatpush1.bf16.msra.mxu1 %v10886_v50  ;;  %v15786_v50 = vadd.f32 %v12255_v51, %v4492_v62 }
 0x447   : > { %10889 = vmatprep.subr.bf16.mxu1 %v10888_v37  ;;  %v15789_v37 = vld [vmem:[#allocation3 + $0x100] sm:$0xff] }
 0x448   : > { %v4493_v41 = vrot.slane %v15789_v37, 1 }
 0x449   : > { %4835 = vmatmul.mubr.f32.gmra.mrb[20].mxu1 %v15760_v30 }
 0x44a   : > { %9843 = vmatprep.mubr.msk.f32.mxu1 %vm389_vm1, %v15768_v3  ;;  %10891 = vmatpush1.bf16.msra.mxu1 %v10890_v60  ;;  %v4494_v2 = vsel %vm1912_vm2, %v4489_v28, %v4493_v41  ;;  %v4498_v32 = vsel %vm1912_vm2, %v4493_v41, %v4497_v29  ;;  %v12259_v60 = vld [vmem:[#allocation3 + $0xf0] sm:$0xff]  ;;  %v9925_v28 = vld [vmem:[%s19091_s3 + $0x5e8] sm:$0xff] }
 0x44b   : > { %10893 = vmatprep.subr.bf16.mxu1 %v10892_v10  ;;  %v15808_v45 = vadd.f32 %v12259_v60, %v4494_v2  ;;  %v15812_v10 = vadd.f32 %v15789_v37, %v4498_v32  ;;  %v10956_v62 = vpack.c.bf16 %v9927_v49, %v9925_v28  ;;  %v9932_v28 = vld [vmem:[%s19091_s3 + $0x620] sm:$0xff]  ;;  %v9934_v49 = vld [vmem:[%s19091_s3 + $0x630] sm:$0xff] }
 0x44d   : > { %4841 = vmatmul.mubr.f32.gmra.mrb[22].mxu1 %v15775_v34 }
 0x44e   : > { %9844 = vmatprep.mubr.msk.f32.mxu1 %vm389_vm1, %v15777_v16  ;;  %10895 = vmatpush1.bf16.msra.mxu1 %v10894_v12  ;;  %v9921_v12 = vld [vmem:[%s19091_s3 + $0x5c8] sm:$0xff] }
 0x44f   : > { %v10952_v46 = vpack.c.bf16 %v9923_v19, %v9921_v12 }
 0x451   : > { %4847 = vmatmul.mubr.f32.gmra.mrb[24].mxu1 %v15784_v55 }
 0x452   : > { %9845 = vmatprep.mubr.msk.f32.mxu1 %vm389_vm1, %v15786_v50 }
 0x455   : > { %4853 = vmatmul.mubr.f32.gmra.mrb[26].mxu1 %v15796_v33 }
 0x456   : > { %9846 = vmatprep.mubr.msk.f32.mxu1 %vm389_vm1, %v15799_v7 }
 0x459   : > { %4859 = vmatmul.mubr.f32.gmra.mrb[28].mxu1 %v15808_v45 }
 0x45a   : > { %9847 = vmatprep.mubr.msk.f32.mxu1 %vm389_vm1, %v15805_v22 }
 0x45d   : > { %4865 = vmatmul.mubr.f32.gmra.mrb[30].mxu1 %v15812_v10 }
 0x45e   : > { %9848 = vmatprep.mubr.msk.f32.mxu1 %vm389_vm1, %v15381_v5  ;;  %v9901_v5 = vld [vmem:[%s19091_s3 + $0x528] sm:$0xff] }
 0x461   : > { %4936 = vmatmul.mubr.f32.vlgmr.msra.gmra.mrb[32].mxu1 %v15422_v43  ;;  %v9903_v43 = vld [vmem:[%s19091_s3 + $0x538] sm:$0xff] }
 0x462   : > { %9849 = vmatprep.mubr.msk.f32.mxu1 %vm389_vm1, %v15433_v35  ;;  %v9900_v35 = vld [vmem:[%s19091_s3 + $0x520] sm:$0xff] }
 0x465   : > { %4942 = vmatmul.mubr.f32.gmra.mrb[34].mxu1 %v15461_v58  ;;  %v10932_v58 = vpack.c.bf16 %v9903_v43, %v9901_v5 }
 0x466   : > { %9850 = vmatprep.mubr.msk.f32.mxu1 %vm389_vm1, %v15472_v63  ;;  %v9902_v63 = vld [vmem:[%s19091_s3 + $0x530] sm:$0xff] }
 0x467   : > { %10933 = vmatprep.subr.bf16.mxu0 %v10932_v58 }
 0x469   : > { %4948 = vmatmul.mubr.f32.gmra.mrb[36].mxu1 %v15500_v4  ;;  %v10934_v4 = vpack.c.bf16 %v9902_v63, %v9900_v35 }
 0x46a   : > { %9851 = vmatprep.mubr.msk.f32.mxu1 %vm389_vm1, %v15511_v13  ;;  %v9905_v13 = vld [vmem:[%s19091_s3 + $0x548] sm:$0xff] }
 0x46b   : > { %10935 = vmatpush1.bf16.msra.mxu0 %v10934_v4 }
 0x46d   : > { %4954 = vmatmul.mubr.f32.gmra.mrb[38].mxu1 %v15539_v42  ;;  %v9907_v42 = vld [vmem:[%s19091_s3 + $0x558] sm:$0xff] }
 0x46e   : > { %9852 = vmatprep.mubr.msk.f32.mxu1 %vm389_vm1, %v15550_v48  ;;  %v9904_v48 = vld [vmem:[%s19091_s3 + $0x540] sm:$0xff] }
 0x471   : > { %4960 = vmatmul.mubr.f32.gmra.mrb[40].mxu1 %v15578_v9  ;;  %v10936_v9 = vpack.c.bf16 %v9907_v42, %v9905_v13 }
 0x472   : > { %9853 = vmatprep.mubr.msk.f32.mxu1 %vm389_vm1, %v15589_v20  ;;  %v9906_v20 = vld [vmem:[%s19091_s3 + $0x550] sm:$0xff] }
 0x473   : > { %10937 = vmatprep.subr.bf16.mxu0 %v10936_v9 }
 0x475   : > { %4966 = vmatmul.mubr.f32.gmra.mrb[42].mxu1 %v15617_v25  ;;  %v10938_v25 = vpack.c.bf16 %v9906_v20, %v9904_v48 }
 0x476   : > { %9854 = vmatprep.mubr.msk.f32.mxu1 %vm389_vm1, %v15628_v8  ;;  %v9909_v8 = vld [vmem:[%s19091_s3 + $0x568] sm:$0xff] }
 0x477   : > { %10939 = vmatpush1.bf16.msra.mxu0 %v10938_v25 }
 0x479   : > { %4972 = vmatmul.mubr.f32.gmra.mrb[44].mxu1 %v15656_v38  ;;  %v9911_v38 = vld [vmem:[%s19091_s3 + $0x578] sm:$0xff] }
 0x47a   : > { %9855 = vmatprep.mubr.msk.f32.mxu1 %vm389_vm1, %v15667_v17  ;;  %v9908_v17 = vld [vmem:[%s19091_s3 + $0x560] sm:$0xff] }
 0x47d   : > { %4978 = vmatmul.mubr.f32.gmra.mrb[46].mxu1 %v15695_v36  ;;  %v10940_v36 = vpack.c.bf16 %v9911_v38, %v9909_v8 }
 0x47e   : > { %9856 = vmatprep.mubr.msk.f32.mxu1 %vm389_vm1, %v15703_v15  ;;  %v9910_v15 = vld [vmem:[%s19091_s3 + $0x570] sm:$0xff] }
 0x47f   : > { %v10942_v31 = vpack.c.bf16 %v9910_v15, %v9908_v17  ;;  %10941 = vmatprep.subr.bf16.mxu0 %v10940_v36  ;;  %v9928_v36 = vld [vmem:[%s19091_s3 + $0x600] sm:$0xff]  ;;  %v9930_v15 = vld [vmem:[%s19091_s3 + $0x610] sm:$0xff] }
 0x481   : > { %4984 = vmatmul.mubr.f32.gmra.mrb[48].mxu1 %v15718_v54  ;;  %10943 = vmatpush1.bf16.msra.mxu0 %v10942_v31  ;;  %v9912_v54 = vld [vmem:[%s19091_s3 + $0x580] sm:$0xff] }
 0x482   : > { %9857 = vmatprep.mubr.msk.f32.mxu1 %vm389_vm1, %v15726_v14  ;;  %v9914_v14 = vld [vmem:[%s19091_s3 + $0x590] sm:$0xff]  ;;  %10945 = vmatprep.subr.bf16.mxu0 %v10944_v27  ;;  %v9933_v27 = vld [vmem:[%s19091_s3 + $0x628] sm:$0xff] }
 0x483   : > { %v10946_v61 = vpack.c.bf16 %v9914_v14, %v9912_v54  ;;  %v9935_v14 = vld [vmem:[%s19091_s3 + $0x638] sm:$0xff] }
 0x485   : > { %4990 = vmatmul.mubr.f32.gmra.mrb[50].mxu1 %v15739_v23  ;;  %10947 = vmatpush1.bf16.msra.mxu0 %v10946_v61  ;;  %v9916_v23 = vld [vmem:[%s19091_s3 + $0x5a0] sm:$0xff] }
 0x486   : > { %9858 = vmatprep.mubr.msk.f32.mxu1 %vm389_vm1, %v15747_v21  ;;  %v9918_v21 = vld [vmem:[%s19091_s3 + $0x5b0] sm:$0xff]  ;;  %10949 = vmatprep.subr.bf16.mxu0 %v10948_v59 }
 0x487   : > { %v10950_v53 = vpack.c.bf16 %v9918_v21, %v9916_v23 }
 0x489   : > { %4996 = vmatmul.mubr.f32.gmra.mrb[52].mxu1 %v15760_v30  ;;  %10951 = vmatpush1.bf16.msra.mxu0 %v10950_v53  ;;  %v9920_v30 = vld [vmem:[%s19091_s3 + $0x5c0] sm:$0xff]  ;;  %v10962_v53 = vpack.c.bf16 %v9930_v15, %v9928_v36 }
 0x48a   : > { %9859 = vmatprep.mubr.msk.f32.mxu1 %vm389_vm1, %v15768_v3  ;;  %v9922_v3 = vld [vmem:[%s19091_s3 + $0x5d0] sm:$0xff]  ;;  %10953 = vmatprep.subr.bf16.mxu0 %v10952_v46  ;;  %v9940_v15 = vld [vmem:[%s19091_s3 + $0x660] sm:$0xff] }
 0x48b   : > { %v10954_v40 = vpack.c.bf16 %v9922_v3, %v9920_v30 }
 0x48d   : > { %5002 = vmatmul.mubr.f32.gmra.mrb[54].mxu1 %v15775_v34  ;;  %10955 = vmatpush1.bf16.msra.mxu0 %v10954_v40  ;;  %v9924_v34 = vld [vmem:[%s19091_s3 + $0x5e0] sm:$0xff]  ;;  %v10964_v40 = vpack.c.bf16 %v9935_v14, %v9933_v27  ;;  %v9945_v14 = vld [vmem:[%s19091_s3 + $0x688] sm:$0xff] }
 0x48e   : > { %9860 = vmatprep.mubr.msk.f32.mxu1 %vm389_vm1, %v15777_v16  ;;  %v9926_v16 = vld [vmem:[%s19091_s3 + $0x5f0] sm:$0xff]  ;;  %10957 = vmatprep.subr.bf16.mxu0 %v10956_v62 }
 0x48f   : > { %v10958_v52 = vpack.c.bf16 %v9926_v16, %v9924_v34 }
 0x491   : > { %5008 = vmatmul.mubr.f32.gmra.mrb[56].mxu1 %v15784_v55  ;;  %10959 = vmatpush1.bf16.msra.mxu0 %v10958_v52  ;;  %v10960_v55 = vpack.c.bf16 %v9931_v47, %v9929_v24  ;;  %v9937_v24 = vld [vmem:[%s19091_s3 + $0x648] sm:$0xff]  ;;  %v9939_v47 = vld [vmem:[%s19091_s3 + $0x658] sm:$0xff] }
 0x492   : > { %9861 = vmatprep.mubr.msk.f32.mxu1 %vm389_vm1, %v15786_v50 }
 0x493   : > { %10961 = vmatprep.subr.bf16.mxu0 %v10960_v55 }
 0x495   : > { %5014 = vmatmul.mubr.f32.gmra.mrb[58].mxu1 %v15796_v33 }
 0x496   : > { %9862 = vmatprep.mubr.msk.f32.mxu1 %vm389_vm1, %v15799_v7 }
 0x499   : > { %5020 = vmatmul.mubr.f32.gmra.mrb[60].mxu1 %v15808_v45 }
 0x49a   : > { %9863 = vmatprep.mubr.msk.f32.mxu1 %vm389_vm1, %v15805_v22 }
 0x49d   : > { %5026 = vmatmul.mubr.f32.gmra.mrb[62].mxu1 %v15812_v10 }
 0x49e   : > { %8668 = vmatprep.mubr.f32.mxu1 %v15789_v37 }
 0x4f4   : > { %v4776_v39 = vpop.f32.mrb[0].mxu1 }
 0x4f5   : > { %v5096_v51 = vmax.f32 %v4776_v39, 0.0  ;;  %v4778_v50 = vpop.f32.mrb[1].mxu1 }
 0x4f6   : > { %v5097_v44 = vmax.f32 %v4778_v50, 0.0 }
 0x4f7   : > { %5160 = vst [vmem:[#allocation4] sm:$0xff] %v5096_v51 }
 0x4f8   : > { %5161 = vst [vmem:[#allocation4 + $0x8] sm:$0xff] %v5097_v44  ;;  %v4782_v41 = vpop.f32.mrb[2].mxu1 }
 0x4f9   : > { %v5100_v11 = vmax.f32 %v4782_v41, 0.0  ;;  %v4784_v29 = vpop.f32.mrb[3].mxu1  ;;  %v10966_v41 = vpack.c.bf16 %v9934_v49, %v9932_v28 }
 0x4fa   : > { %v5101_v0 = vmax.f32 %v4784_v29, 0.0 }
 0x4fb   : > { %5164 = vst [vmem:[#allocation4 + $0x20] sm:$0xff] %v5100_v11  ;;  %v15956_v37 = vrot.slane %v5100_v11, 2 }
 0x4fc   : > { %5165 = vst [vmem:[#allocation4 + $0x28] sm:$0xff] %v5101_v0  ;;  %v4788_v33 = vpop.f32.mrb[4].mxu1  ;;  %v15958_v10 = vrot.slane %v5101_v0, 2 }
 0x4fd   : > { %v5104_v57 = vmax.f32 %v4788_v33, 0.0  ;;  %v4790_v26 = vpop.f32.mrb[5].mxu1 }
 0x4fe   : > { %v5105_v7 = vmax.f32 %v4790_v26, 0.0  ;;  %v5760_v2 = vld [vmem:[#allocation4] sm:$0xc0]  ;;  %v10968_v26 = vpack.c.bf16 %v9939_v47, %v9937_v24 }
 0x4ff   : > { %5168 = vst [vmem:[#allocation4 + $0x40] sm:$0xff] %v5104_v57  ;;  %v5761_v22 = vld [vmem:[#allocation4 + $0x8] sm:$0xc0]  ;;  %v5376_v32 = vrot.slane %v5104_v57, 2  ;;  %v5776_v60 = vrot.slane %v5760_v2, 2  ;;  %v9938_v2 = vld [vmem:[%s19091_s3 + $0x650] sm:$0xff] }
 0x500   : > { %5169 = vst [vmem:[#allocation4 + $0x48] sm:$0xff] %v5105_v7  ;;  %v4794_v45 = vpop.f32.mrb[6].mxu1  ;;  %v5378_v5 = vrot.slane %v5105_v7, 2  ;;  %v5778_v43 = vrot.slane %v5761_v22, 2  ;;  %v5753_v48 = vld [vmem:[#allocation4 + $0x8] sm:$0xf0] }
 0x501   : > { %v5108_v35 = vmax.f32 %v4794_v45, 0.0  ;;  %v4796_v58 = vpop.f32.mrb[7].mxu1  ;;  %v5377_v63 = vsel %vm2302_vm3, %v15956_v37, %v5376_v32  ;;  %v5777_v4 = vsel %vm2302_vm3, %v5776_v60, %v15956_v37  ;;  %v5752_v25 = vld [vmem:[#allocation4] sm:$0xf0] }
 0x502   : > { %v5109_v13 = vmax.f32 %v4796_v58, 0.0  ;;  %v5379_v42 = vsel %vm2302_vm3, %v15958_v10, %v5378_v5  ;;  %v5779_v9 = vsel %vm2302_vm3, %v5778_v43, %v15958_v10  ;;  %v15968_v20 = vadd.f32 %v5377_v63, %v5100_v11  ;;  %v9943_v43 = vld [vmem:[%s19091_s3 + $0x678] sm:$0xff] }
 0x503   : > { %5172 = vst [vmem:[#allocation4 + $0x60] sm:$0xff] %v5108_v35  ;;  %v15970_v8 = vadd.f32 %v5379_v42, %v5101_v0  ;;  %v5805_v38 = vadd.f32 %v5779_v9, %v5753_v48  ;;  %v5804_v17 = vadd.f32 %v5777_v4, %v5752_v25  ;;  %v5384_v31 = vrot.slane %v5108_v35, 2 }
 0x504   : > { %5173 = vst [vmem:[#allocation4 + $0x68] sm:$0xff] %v5109_v13  ;;  %v4800_v1 = vpop.f32.mrb[8].mxu1  ;;  %v6014_v18 = vrot.slane %v15968_v20, 4  ;;  %v5386_v54 = vrot.slane %v5109_v13, 2 }
 0x505   : > { %v15985_v61 = vmax.f32 %v4800_v1, 0.0  ;;  %v4802_v56 = vpop.f32.mrb[9].mxu1  ;;  %v6016_v6 = vrot.slane %v5805_v38, 4  ;;  %v6017_v23 = vrot.slane %v15970_v8, 4  ;;  %v6013_v59 = vrot.slane %v5804_v17, 4 }
 0x506   : > { %v5113_v21 = vmax.f32 %v4802_v56, 0.0  ;;  %v5387_v12 = vsel %vm2302_vm3, %v5378_v5, %v5386_v54  ;;  %v5385_v19 = vsel %vm2302_vm3, %v5376_v32, %v5384_v31  ;;  %v9941_v5 = vld [vmem:[%s19091_s3 + $0x668] sm:$0xff] }
 0x507   : > { %5176 = vst [vmem:[#allocation4 + $0x80] sm:$0xff] %v15985_v61  ;;  %v6018_v30 = vsel %vm3230_vm4, %v6016_v6, %v6017_v23  ;;  %v15992_v46 = vadd.f32 %v5387_v12, %v5105_v7  ;;  %v15994_v3 = vadd.f32 %v5385_v19, %v5104_v57  ;;  %v6015_v62 = vsel %vm3230_vm4, %v6013_v59, %v6014_v18  ;;  %v9936_v7 = vld [vmem:[%s19091_s3 + $0x640] sm:$0xff] }
 0x508   : > { %5177 = vst [vmem:[#allocation4 + $0x88] sm:$0xff] %v5113_v21  ;;  %v4806_v34 = vpop.f32.mrb[10].mxu1  ;;  %6273 = vmatprep.mubr.f32.mxu0 %v6018_v30  ;;  %v5394_v16 = vrot.slane %v5113_v21, 2  ;;  %v5392_v52 = vrot.slane %v15985_v61, 2  ;;  %v10970_v42 = vpack.c.bf16 %v9938_v2, %v9936_v7  ;;  %v10972_v36 = vpack.c.bf16 %v9943_v43, %v9941_v5 }
 0x509   : > { %v16010_v55 = vmax.f32 %v4806_v34, 0.0  ;;  %v4808_v39 = vpop.f32.mrb[11].mxu1  ;;  %6274 = vmatmul.mubr.f32.vlgmr.msra.gmra.mrb[32].mxu0 %v6015_v62  ;;  %v6027_v51 = vrot.slane %v15992_v46, 4  ;;  %v6025_v50 = vrot.slane %v15994_v3, 4  ;;  %v9944_v34 = vld [vmem:[%s19091_s3 + $0x680] sm:$0xff]  ;;  %v9946_v62 = vld [vmem:[%s19091_s3 + $0x690] sm:$0xff] }
 0x50a   : > { %v5117_v44 = vmax.f32 %v4808_v39, 0.0  ;;  %10963 = vmatpush1.bf16.msra.mxu0 %v10962_v53  ;;  %v5395_v11 = vsel %vm2302_vm3, %v5386_v54, %v5394_v16  ;;  %v5393_v29 = vsel %vm2302_vm3, %v5384_v31, %v5392_v52  ;;  %v9942_v31 = vld [vmem:[%s19091_s3 + $0x670] sm:$0xff]  ;;  %v9951_v39 = vld [vmem:[%s19091_s3 + $0x6b8] sm:$0xff] }
 0x50b   : > { %5180 = vst [vmem:[#allocation4 + $0xa0] sm:$0xff] %v16010_v55  ;;  %v6028_v0 = vsel %vm3230_vm4, %v6017_v23, %v6027_v51  ;;  %10965 = vmatprep.subr.bf16.mxu0 %v10964_v40  ;;  %v16018_v33 = vadd.f32 %v5395_v11, %v5109_v13  ;;  %v16020_v57 = vadd.f32 %v5393_v29, %v5108_v35  ;;  %v5400_v45 = vrot.slane %v16010_v55, 2 }
 0x50c   : > { %5181 = vst [vmem:[#allocation4 + $0xa8] sm:$0xff] %v5117_v44  ;;  %v4812_v22 = vpop.f32.mrb[12].mxu1  ;;  %6279 = vmatprep.mubr.f32.mxu0 %v6028_v0  ;;  %v6026_v32 = vsel %vm3230_vm4, %v6014_v18, %v6025_v50  ;;  %v5402_v60 = vrot.slane %v5117_v44, 2  ;;  %v10974_v53 = vpack.c.bf16 %v9942_v31, %v9940_v15  ;;  %v10978_v29 = vpack.c.bf16 %v9946_v62, %v9944_v34 }
 0x50d   : > { %v16036_v35 = vmax.f32 %v4812_v22, 0.0  ;;  %v4814_v58 = vpop.f32.mrb[13].mxu1  ;;  %6280 = vmatmul.mubr.f32.gmra.mrb[34].mxu0 %v6026_v32  ;;  %v6035_v63 = vrot.slane %v16018_v33, 4  ;;  %v6033_v4 = vrot.slane %v16020_v57, 4  ;;  %v5401_v9 = vsel %vm2302_vm3, %v5392_v52, %v5400_v45 }
 0x50e   : > { %v5121_v13 = vmax.f32 %v4814_v58, 0.0  ;;  %10967 = vmatpush1.bf16.msra.mxu0 %v10966_v41  ;;  %v5403_v48 = vsel %vm2302_vm3, %v5394_v16, %v5402_v60  ;;  %v16047_v17 = vadd.f32 %v5401_v9, %v15985_v61  ;;  %v9947_v61 = vld [vmem:[%s19091_s3 + $0x698] sm:$0xff] }
 0x50f   : > { %5184 = vst [vmem:[#allocation4 + $0xc0] sm:$0xff] %v16036_v35  ;;  %v6036_v25 = vsel %vm3230_vm4, %v6027_v51, %v6035_v63  ;;  %10969 = vmatprep.subr.bf16.mxu0 %v10968_v26  ;;  %v16044_v38 = vadd.f32 %v5403_v48, %v5113_v21  ;;  %v6034_v18 = vsel %vm3230_vm4, %v6025_v50, %v6033_v4  ;;  %v5408_v27 = vrot.slane %v16036_v35, 2 }
 0x510   : > { %5185 = vst [vmem:[#allocation4 + $0xc8] sm:$0xff] %v5121_v13  ;;  %v4818_v1 = vpop.f32.mrb[14].mxu1  ;;  %6285 = vmatprep.mubr.f32.mxu0 %v6036_v25  ;;  %v5410_v54 = vrot.slane %v5121_v13, 2  ;;  %v6041_v59 = vrot.slane %v16047_v17, 4  ;;  %v10976_v49 = vpack.c.bf16 %v9947_v61, %v9945_v14  ;;  %v9952_v14 = vld [vmem:[%s19091_s3 + $0x6c0] sm:$0xff]  ;;  %v9954_v61 = vld [vmem:[%s19091_s3 + $0x6d0] sm:$0xff] }
 0x511   : > { %v16063_v56 = vmax.f32 %v4818_v1, 0.0  ;;  %v4820_v6 = vpop.f32.mrb[15].mxu1  ;;  %6286 = vmatmul.mubr.f32.gmra.mrb[36].mxu0 %v6034_v18  ;;  %v6043_v23 = vrot.slane %v16044_v38, 4  ;;  %v5409_v19 = vsel %vm2302_vm3, %v5400_v45, %v5408_v27  ;;  %v9950_v45 = vld [vmem:[%s19091_s3 + $0x6b0] sm:$0xff]  ;;  %v10986_v62 = vpack.c.bf16 %v9954_v61, %v9952_v14 }
 0x512   : > { %v5125_v21 = vmax.f32 %v4820_v6, 0.0  ;;  %10971 = vmatpush1.bf16.msra.mxu0 %v10970_v42  ;;  %v5411_v12 = vsel %vm2302_vm3, %v5402_v60, %v5410_v54  ;;  %v16074_v28 = vadd.f32 %v5409_v19, %v16010_v55  ;;  %v6042_v52 = vsel %vm3230_vm4, %v6033_v4, %v6041_v59  ;;  %v9949_v55 = vld [vmem:[%s19091_s3 + $0x6a8] sm:$0xff]  ;;  %v9948_v60 = vld [vmem:[%s19091_s3 + $0x6a0] sm:$0xff]  ;;  %v9955_v4 = vld [vmem:[%s19091_s3 + $0x6d8] sm:$0xff] }
 0x513   : > { %5188 = vst [vmem:[#allocation4 + $0xe0] sm:$0xff] %v16063_v56  ;;  %v6044_v30 = vsel %vm3230_vm4, %v6035_v63, %v6043_v23  ;;  %10973 = vmatprep.subr.bf16.mxu0 %v10972_v36  ;;  %v16071_v40 = vadd.f32 %v5411_v12, %v5117_v44  ;;  %v5416_v47 = vrot.slane %v16063_v56, 2  ;;  %v10980_v32 = vpack.c.bf16 %v9951_v39, %v9949_v55 }
 0x514   : > { %5189 = vst [vmem:[#allocation4 + $0xe8] sm:$0xff] %v5125_v21  ;;  %v4824_v16 = vpop.f32.mrb[16].mxu1  ;;  %6291 = vmatprep.mubr.f32.mxu0 %v6044_v30  ;;  %v5418_v24 = vrot.slane %v5125_v21, 2  ;;  %v6049_v41 = vrot.slane %v16074_v28, 4  ;;  %v10982_v36 = vpack.c.bf16 %v9950_v45, %v9948_v60 }
 0x515   : > { %v16090_v51 = vmax.f32 %v4824_v16, 0.0  ;;  %v4826_v50 = vpop.f32.mrb[17].mxu1  ;;  %6292 = vmatmul.mubr.f32.gmra.mrb[38].mxu0 %v6042_v52  ;;  %v6051_v44 = vrot.slane %v16071_v40, 4  ;;  %v5417_v26 = vsel %vm2302_vm3, %v5408_v27, %v5416_v47 }
 0x516   : > { %v5129_v11 = vmax.f32 %v4826_v50, 0.0  ;;  %10975 = vmatpush1.bf16.msra.mxu0 %v10974_v53  ;;  %v5419_v0 = vsel %vm2302_vm3, %v5410_v54, %v5418_v24  ;;  %v16101_v22 = vadd.f32 %v5417_v26, %v16036_v35  ;;  %v6050_v43 = vsel %vm3230_vm4, %v6041_v59, %v6049_v41  ;;  %v9953_v35 = vld [vmem:[%s19091_s3 + $0x6c8] sm:$0xff]  ;;  %v9959_v53 = vld [vmem:[%s19091_s3 + $0x6f8] sm:$0xff]  ;;  %v9956_v50 = vld [vmem:[%s19091_s3 + $0x6e0] sm:$0xff] }
 0x517   : > { %5192 = vst [vmem:[#allocation4 + $0x100] sm:$0xff] %v16090_v51  ;;  %v6052_v7 = vsel %vm3230_vm4, %v6043_v23, %v6051_v44  ;;  %10977 = vmatprep.subr.bf16.mxu0 %v10976_v49  ;;  %v16098_v2 = vadd.f32 %v5419_v0, %v5121_v13  ;;  %v5424_v63 = vrot.slane %v16090_v51, 2  ;;  %v10984_v27 = vpack.c.bf16 %v9955_v4, %v9953_v35  ;;  %v9963_v26 = vld [vmem:[%s19091_s3 + $0x718] sm:$0xff] }
 0x518   : > { %5193 = vst [vmem:[#allocation4 + $0x108] sm:$0xff] %v5129_v11  ;;  %v4830_v5 = vpop.f32.mrb[18].mxu1  ;;  %6297 = vmatprep.mubr.f32.mxu0 %v6052_v7  ;;  %v5426_v58 = vrot.slane %v5129_v11, 2  ;;  %v6057_v9 = vrot.slane %v16101_v22, 4 }
 0x519   : > { %v16117_v13 = vmax.f32 %v4830_v5, 0.0  ;;  %v4832_v42 = vpop.f32.mrb[19].mxu1  ;;  %6298 = vmatmul.mubr.f32.gmra.mrb[40].mxu0 %v6050_v43  ;;  %v6059_v48 = vrot.slane %v16098_v2, 4  ;;  %v5425_v31 = vsel %vm2302_vm3, %v5416_v47, %v5424_v63 }
 0x51a   : > { %v5133_v25 = vmax.f32 %v4832_v42, 0.0  ;;  %10979 = vmatpush1.bf16.msra.mxu0 %v10978_v29  ;;  %v5427_v15 = vsel %vm2302_vm3, %v5418_v24, %v5426_v58  ;;  %v16128_v54 = vadd.f32 %v5425_v31, %v16063_v56  ;;  %v6058_v23 = vsel %vm3230_vm4, %v6049_v41, %v6057_v9  ;;  %v9957_v56 = vld [vmem:[%s19091_s3 + $0x6e8] sm:$0xff] }
 0x51b   : > { %5196 = vst [vmem:[#allocation4 + $0x120] sm:$0xff] %v16117_v13  ;;  %v6060_v1 = vsel %vm3230_vm4, %v6051_v44, %v6059_v48  ;;  %10981 = vmatprep.subr.bf16.mxu0 %v10980_v32  ;;  %v16125_v18 = vadd.f32 %v5427_v15, %v5125_v21  ;;  %v5432_v21 = vrot.slane %v16117_v13, 2  ;;  %v10988_v39 = vpack.c.bf16 %v9959_v53, %v9957_v56  ;;  %v9958_v44 = vld [vmem:[%s19091_s3 + $0x6f0] sm:$0xff] }
 0x51c   : > { %5197 = vst [vmem:[#allocation4 + $0x128] sm:$0xff] %v5133_v25  ;;  %v4836_v6 = vpop.f32.mrb[20].mxu1  ;;  %6303 = vmatprep.mubr.f32.mxu0 %v6060_v1  ;;  %v5434_v59 = vrot.slane %v5133_v25, 2  ;;  %v6065_v49 = vrot.slane %v16128_v54, 4  ;;  %v10990_v43 = vpack.c.bf16 %v9958_v44, %v9956_v50  ;;  %v9971_v44 = vld [vmem:[%s19091_s3 + $0x758] sm:$0xff] }
 0x51d   : > { %v16144_v12 = vmax.f32 %v4836_v6, 0.0  ;;  %v4838_v19 = vpop.f32.mrb[21].mxu1  ;;  %6304 = vmatmul.mubr.f32.gmra.mrb[42].mxu0 %v6058_v23  ;;  %v6067_v30 = vrot.slane %v16125_v18, 4  ;;  %v5433_v52 = vsel %vm2302_vm3, %v5424_v63, %v5432_v21 }
 0x51e   : > { %v5137_v34 = vmax.f32 %v4838_v19, 0.0  ;;  %10983 = vmatpush1.bf16.msra.mxu0 %v10982_v36  ;;  %v5435_v16 = vsel %vm2302_vm3, %v5426_v58, %v5434_v59  ;;  %v16155_v55 = vadd.f32 %v5433_v52, %v16090_v51  ;;  %v6066_v29 = vsel %vm3230_vm4, %v6057_v9, %v6065_v49  ;;  %v9961_v51 = vld [vmem:[%s19091_s3 + $0x708] sm:$0xff]  ;;  %v9960_v9 = vld [vmem:[%s19091_s3 + $0x700] sm:$0xff]  ;;  %v9962_v36 = vld [vmem:[%s19091_s3 + $0x710] sm:$0xff] }
 0x51f   : > { %5200 = vst [vmem:[#allocation4 + $0x140] sm:$0xff] %v16144_v12  ;;  %v6068_v24 = vsel %vm3230_vm4, %v6059_v48, %v6067_v30  ;;  %10985 = vmatprep.subr.bf16.mxu0 %v10984_v27  ;;  %v16152_v47 = vadd.f32 %v5435_v16, %v5129_v11  ;;  %v5440_v11 = vrot.slane %v16144_v12, 2  ;;  %v10992_v48 = vpack.c.bf16 %v9963_v26, %v9961_v51  ;;  %v9967_v27 = vld [vmem:[%s19091_s3 + $0x738] sm:$0xff]  ;;  %v9964_v16 = vld [vmem:[%s19091_s3 + $0x720] sm:$0xff]  ;;  %v9966_v52 = vld [vmem:[%s19091_s3 + $0x730] sm:$0xff] }
 0x520   : > { %5201 = vst [vmem:[#allocation4 + $0x148] sm:$0xff] %v5137_v34  ;;  %v4842_v41 = vpop.f32.mrb[22].mxu1  ;;  %6309 = vmatprep.mubr.f32.mxu0 %v6068_v24  ;;  %v5442_v0 = vrot.slane %v5137_v34, 2  ;;  %v6073_v45 = vrot.slane %v16155_v55, 4  ;;  %v10998_v26 = vpack.c.bf16 %v9966_v52, %v9964_v16 }
 0x521   : > { %v16171_v7 = vmax.f32 %v4842_v41, 0.0  ;;  %v4844_v32 = vpop.f32.mrb[23].mxu1  ;;  %6310 = vmatmul.mubr.f32.gmra.mrb[44].mxu0 %v6066_v29  ;;  %v6075_v60 = vrot.slane %v16152_v47, 4  ;;  %v5441_v63 = vsel %vm2302_vm3, %v5432_v21, %v5440_v11  ;;  %v10994_v21 = vpack.c.bf16 %v9962_v36, %v9960_v9 }
 0x522   : > { %v5141_v5 = vmax.f32 %v4844_v32, 0.0  ;;  %10987 = vmatpush1.bf16.msra.mxu0 %v10986_v62  ;;  %v5443_v58 = vsel %vm2302_vm3, %v5434_v59, %v5442_v0  ;;  %v16182_v42 = vadd.f32 %v5441_v63, %v16117_v13  ;;  %v6074_v31 = vsel %vm3230_vm4, %v6065_v49, %v6073_v45  ;;  %v9965_v13 = vld [vmem:[%s19091_s3 + $0x728] sm:$0xff] }
 0x523   : > { %5204 = vst [vmem:[#allocation4 + $0x160] sm:$0xff] %v16171_v7  ;;  %v6076_v35 = vsel %vm3230_vm4, %v6067_v30, %v6075_v60  ;;  %10989 = vmatprep.subr.bf16.mxu0 %v10988_v39  ;;  %v16179_v4 = vadd.f32 %v5443_v58, %v5133_v25  ;;  %v5448_v25 = vrot.slane %v16171_v7, 2  ;;  %v10996_v62 = vpack.c.bf16 %v9967_v27, %v9965_v13 }
 0x524   : > { %5205 = vst [vmem:[#allocation4 + $0x168] sm:$0xff] %v5141_v5  ;;  %v4848_v15 = vpop.f32.mrb[24].mxu1  ;;  %6315 = vmatprep.mubr.f32.mxu0 %v6076_v35  ;;  %v5450_v1 = vrot.slane %v5141_v5, 2  ;;  %v6081_v23 = vrot.slane %v16182_v42, 4  ;;  %v9968_v35 = vld [vmem:[%s19091_s3 + $0x740] sm:$0xff] }
 0x525   : > { %v16198_v14 = vmax.f32 %v4848_v15, 0.0  ;;  %v4850_v61 = vpop.f32.mrb[25].mxu1  ;;  %6316 = vmatmul.mubr.f32.gmra.mrb[46].mxu0 %v6074_v31  ;;  %v6083_v6 = vrot.slane %v16179_v4, 4  ;;  %v5449_v53 = vsel %vm2302_vm3, %v5440_v11, %v5448_v25  ;;  %v9973_v15 = vld [vmem:[%s19091_s3 + $0x768] sm:$0xff]  ;;  %v9975_v31 = vld [vmem:[%s19091_s3 + $0x778] sm:$0xff] }
 0x526   : > { %v5145_v59 = vmax.f32 %v4850_v61, 0.0  ;;  %10991 = vmatpush1.bf16.msra.mxu0 %v10990_v43  ;;  %v5451_v56 = vsel %vm2302_vm3, %v5442_v0, %v5450_v1  ;;  %v16209_v49 = vadd.f32 %v5449_v53, %v16144_v12  ;;  %v6082_v39 = vsel %vm3230_vm4, %v6073_v45, %v6081_v23  ;;  %v9969_v12 = vld [vmem:[%s19091_s3 + $0x748] sm:$0xff]  ;;  %v9974_v53 = vld [vmem:[%s19091_s3 + $0x770] sm:$0xff] }
 0x527   : > { %5208 = vst [vmem:[#allocation4 + $0x180] sm:$0xff] %v16198_v14  ;;  %v6084_v19 = vsel %vm3230_vm4, %v6075_v60, %v6083_v6  ;;  %10993 = vmatprep.subr.bf16.mxu0 %v10992_v48  ;;  %v16206_v30 = vadd.f32 %v5451_v56, %v5137_v34  ;;  %v5456_v34 = vrot.slane %v16198_v14, 2  ;;  %v11000_v63 = vpack.c.bf16 %v9971_v44, %v9969_v12  ;;  %v9970_v48 = vld [vmem:[%s19091_s3 + $0x750] sm:$0xff]  ;;  %v9972_v56 = vld [vmem:[%s19091_s3 + $0x760] sm:$0xff] }
 0x528   : > { %5209 = vst [vmem:[#allocation4 + $0x188] sm:$0xff] %v5145_v59  ;;  %v4854_v24 = vpop.f32.mrb[26].mxu1  ;;  %6321 = vmatprep.mubr.f32.mxu0 %v6084_v19  ;;  %v5458_v50 = vrot.slane %v5145_v59, 2  ;;  %v6089_v11 = vrot.slane %v16209_v49, 4  ;;  %v11004_v52 = vpack.c.bf16 %v9975_v31, %v9973_v15 }
 0x529   : > { %v16225_v41 = vmax.f32 %v4854_v24, 0.0  ;;  %v4856_v29 = vpop.f32.mrb[27].mxu1  ;;  %6322 = vmatmul.mubr.f32.gmra.mrb[48].mxu0 %v6082_v39  ;;  %v6091_v0 = vrot.slane %v16206_v30, 4  ;;  %v5457_v60 = vsel %vm2302_vm3, %v5448_v25, %v5456_v34  ;;  %v16277_v24 = vld [vmem:[#allocation4 + $0x208] sm:$0x3f] }
 0x52a   : > { %v16229_v51 = vmax.f32 %v4856_v29, 0.0  ;;  %10995 = vmatpush1.bf16.msra.mxu0 %v10994_v21  ;;  %v5459_v32 = vsel %vm2302_vm3, %v5450_v1, %v5458_v50  ;;  %v16238_v58 = vadd.f32 %v5457_v60, %v16171_v7  ;;  %v6090_v36 = vsel %vm3230_vm4, %v6081_v23, %v6089_v11 }
 0x52b   : > { %5212 = vst [vmem:[#allocation4 + $0x1a0] sm:$0xff] %v16225_v41  ;;  %v6092_v45 = vsel %vm3230_vm4, %v6083_v6, %v6091_v0  ;;  %10997 = vmatprep.subr.bf16.mxu0 %v10996_v62  ;;  %v16235_v43 = vadd.f32 %v5459_v32, %v5141_v5  ;;  %v5464_v7 = vrot.slane %v16225_v41, 2  ;;  %v11002_v6 = vpack.c.bf16 %v9970_v48, %v9968_v35  ;;  %v16293_v32 = vld [vmem:[#allocation4 + $0x200] sm:$0x3f]  ;;  %v9976_v35 = vld [vmem:[%s19091_s3 + $0x780] sm:$0xff] }
 0x52c   : > { %5213 = vst [vmem:[#allocation4 + $0x1a8] sm:$0xff] %v16229_v51  ;;  %v4860_v9 = vpop.f32.mrb[28].mxu1  ;;  %6327 = vmatprep.mubr.f32.mxu0 %v6092_v45  ;;  %v5466_v5 = vrot.slane %v16229_v51, 2  ;;  %v6097_v27 = vrot.slane %v16238_v58, 4  ;;  %v9978_v48 = vld [vmem:[%s19091_s3 + $0x790] sm:$0xff] }
 0x52d   : > { %v16256_v1 = vmax.f32 %v4860_v9, 0.0  ;;  %v4862_v25 = vpop.f32.mrb[29].mxu1  ;;  %6328 = vmatmul.mubr.f32.gmra.mrb[50].mxu0 %v6090_v36  ;;  %v6099_v13 = vrot.slane %v16235_v43, 4  ;;  %v5465_v21 = vsel %vm2302_vm3, %v5456_v34, %v5464_v7  ;;  %v5786_v9 = vrot.slane %v16277_v24, 2 }
 0x52e   : > { %v16260_v61 = vmax.f32 %v4862_v25, 0.0  ;;  %10999 = vmatpush1.bf16.msra.mxu0 %v10998_v26  ;;  %v5467_v23 = vsel %vm2302_vm3, %v5458_v50, %v5466_v5  ;;  %v16275_v16 = vadd.f32 %v5465_v21, %v16198_v14  ;;  %v6098_v50 = vsel %vm3230_vm4, %v6089_v11, %v6097_v27  ;;  %v9979_v14 = vld [vmem:[%s19091_s3 + $0x798] sm:$0xff] }
 0x52f   : > { %5216 = vst [vmem:[#allocation4 + $0x1c0] sm:$0xff] %v16256_v1  ;;  %v6100_v19 = vsel %vm3230_vm4, %v6091_v0, %v6099_v13  ;;  %11001 = vmatprep.subr.bf16.mxu0 %v11000_v63  ;;  %v16272_v62 = vadd.f32 %v5467_v23, %v5145_v59  ;;  %v5472_v12 = vrot.slane %v16256_v1, 2  ;;  %v9977_v59 = vld [vmem:[%s19091_s3 + $0x788] sm:$0xff]  ;;  %v11006_v26 = vpack.c.bf16 %v9974_v53, %v9972_v56 }
 0x530   : > { %5217 = vst [vmem:[#allocation4 + $0x1c8] sm:$0xff] %v16260_v61  ;;  %v4866_v39 = vpop.f32.mrb[30].mxu1  ;;  %6333 = vmatprep.mubr.f32.mxu0 %v6100_v19  ;;  %v5474_v34 = vrot.slane %v16260_v61, 2  ;;  %v6105_v11 = vrot.slane %v16275_v16, 4  ;;  %v11010_v19 = vpack.c.bf16 %v9978_v48, %v9976_v35  ;;  %v9985_v35 = vld [vmem:[%s19091_s3 + $0x7c8] sm:$0xff]  ;;  %v9987_v48 = vld [vmem:[%s19091_s3 + $0x7d8] sm:$0xff] }
 0x531   : > { %v16289_v44 = vmax.f32 %v4866_v39, 0.0  ;;  %v4868_v29 = vpop.f32.mrb[31].mxu1  ;;  %6334 = vmatmul.mubr.f32.gmra.mrb[52].mxu0 %v6098_v50  ;;  %v6107_v0 = vrot.slane %v16272_v62, 4  ;;  %v5473_v63 = vsel %vm2302_vm3, %v5464_v7, %v5472_v12  ;;  %v11008_v7 = vpack.c.bf16 %v9979_v14, %v9977_v59 }
 0x532   : > { %v5157_v60 = vmax.f32 %v4868_v29, 0.0  ;;  %11003 = vmatpush1.bf16.msra.mxu0 %v11002_v6  ;;  %v5475_v45 = vsel %vm2302_vm3, %v5466_v5, %v5474_v34  ;;  %v16310_v5 = vadd.f32 %v5473_v63, %v16225_v41  ;;  %v6106_v25 = vsel %vm3230_vm4, %v6097_v27, %v6105_v11  ;;  %v9983_v41 = vld [vmem:[%s19091_s3 + $0x7b8] sm:$0xff] }
 0x533   : > { %5220 = vst [vmem:[#allocation4 + $0x1e0] sm:$0xff] %v16289_v44  ;;  %v6108_v36 = vsel %vm3230_vm4, %v6099_v13, %v6107_v0  ;;  %11005 = vmatprep.subr.bf16.mxu0 %v11004_v52  ;;  %v16307_v15 = vadd.f32 %v5475_v45, %v16229_v51  ;;  %v16316_v23 = vrot.slane %v16289_v44, 2  ;;  %v9981_v13 = vld [vmem:[%s19091_s3 + $0x7a8] sm:$0xff]  ;;  %v5784_v51 = vrot.slane %v16293_v32, 2  ;;  %v5757_v52 = vld [vmem:[#allocation4 + $0x208] sm:$0xf] }
 0x534   : > { %19319 = vst [vmem:[#allocation11_spill] sm:$0xff] %v16310_v5  ;;  %5221 = vst [vmem:[#allocation4 + $0x1e8] sm:$0xff] %v5157_v60  ;;  %v4937_v31 = vpop.f32.mrb[32].mxu1  ;;  %6339 = vmatprep.mubr.f32.mxu0 %v6108_v36  ;;  %v16313_v6 = vrot.slane %v5157_v60, 2  ;;  %v6113_v53 = vrot.slane %v16310_v5, 4  ;;  %v5813_v36 = vadd.f32 %v5786_v9, %v5757_v52 }
 0x535   : > { %19321 = vst [vmem:[#allocation13_spill] sm:$0xff] %v16316_v23  ;;  %v5098_v21 = vmax.f32 %v4937_v31, 0.0  ;;  %v4939_v56 = vpop.f32.mrb[33].mxu1  ;;  %6340 = vmatmul.mubr.f32.gmra.mrb[54].mxu0 %v6106_v25  ;;  %v6115_v27 = vrot.slane %v16307_v15, 4  ;;  %v5481_v50 = vsel %vm2302_vm3, %v5472_v12, %v16316_v23  ;;  %v9982_v12 = vld [vmem:[%s19091_s3 + $0x7b0] sm:$0xff] }
 0x536   : > { %19320 = vst [vmem:[#allocation10_spill] sm:$0xff] %v16313_v6  ;;  %v5099_v24 = vmax.f32 %v4939_v56, 0.0  ;;  %11007 = vmatpush1.bf16.msra.mxu0 %v11006_v26  ;;  %v5483_v39 = vsel %vm2302_vm3, %v5474_v34, %v16313_v6  ;;  %v5787_v59 = vsel %vm2302_vm3, %v16313_v6, %v5786_v9  ;;  %v16338_v32 = vadd.f32 %v5481_v50, %v16256_v1  ;;  %v9980_v34 = vld [vmem:[%s19091_s3 + $0x7a0] sm:$0xff]  ;;  %v5756_v45 = vld [vmem:[#allocation4 + $0x200] sm:$0xf] }
 0x537   : > { %5162 = vst [vmem:[#allocation4 + $0x10] sm:$0xff] %v5098_v21  ;;  %v6116_v14 = vsel %vm3230_vm4, %v6107_v0, %v6115_v27  ;;  %11009 = vmatprep.subr.bf16.mxu0 %v11008_v7  ;;  %v16335_v29 = vadd.f32 %v5483_v39, %v16260_v61  ;;  %v11012_v26 = vpack.c.bf16 %v9983_v41, %v9981_v13  ;;  %v9984_v9 = vld [vmem:[%s19091_s3 + $0x7c0] sm:$0xff]  ;;  %v9986_v56 = vld [vmem:[%s19091_s3 + $0x7d0] sm:$0xff]  ;;  %v9991_v39 = vld [vmem:[%s19091_s3 + $0x7f8] sm:$0xff] }
 0x538   : > { %19323 = vst [vmem:[#allocation15_spill] sm:$0xff] %v16338_v32  ;;  %5163 = vst [vmem:[#allocation4 + $0x18] sm:$0xff] %v5099_v24  ;;  %v4943_v63 = vpop.f32.mrb[34].mxu1  ;;  %6345 = vmatprep.mubr.f32.mxu0 %v6116_v14  ;;  %v6114_v0 = vsel %vm3230_vm4, %v6105_v11, %v6113_v53  ;;  %v16347_v61 = vadd.f32 %v5787_v59, %v5157_v60  ;;  %v5785_v1 = vsel %vm2302_vm3, %v16316_v23, %v5784_v51  ;;  %v16386_v50 = vld [vmem:[%s19091_s3 + $0x7e0] sm:$0xff]  ;;  %v6881_v6 = vld [vmem:[#allocation4 + $0xe0] sm:$0xff] }
 0x539   : > { %19322 = vst [vmem:[#allocation12_spill] sm:$0xff] %v16335_v29  ;;  %v16357_v7 = vmax.f32 %v4943_v63, 0.0  ;;  %v4945_v31 = vpop.f32.mrb[35].mxu1  ;;  %6346 = vmatmul.mubr.f32.gmra.mrb[56].mxu0 %v6114_v0  ;;  %v6123_v11 = vrot.slane %v16335_v29, 4  ;;  %v6121_v60 = vrot.slane %v16338_v32, 4  ;;  %v16362_v25 = vadd.f32 %v5785_v1, %v16289_v44  ;;  %v9989_v44 = vld [vmem:[%s19091_s3 + $0x7e8] sm:$0xff] }
 0x53a   : > { %v16364_v13 = vmax.f32 %v4945_v31, 0.0  ;;  %11011 = vmatpush1.bf16.msra.mxu0 %v11010_v19  ;;  %v6131_v41 = vrot.slane %v16347_v61, 4  ;;  %v11014_v21 = vpack.c.bf16 %v9982_v12, %v9980_v34  ;;  %v16373_v52 = vadd.f32 %v5784_v51, %v5756_v45  ;;  %v16391_v51 = vld [vmem:[%s19091_s3 + $0x7f0] sm:$0xff]  ;;  %v16404_v34 = vld [vmem:[%s19091_s3 + $0x18] sm:$0xff] }
 0x53b   : > { %5166 = vst [vmem:[#allocation4 + $0x30] sm:$0xff] %v16357_v7  ;;  %v6124_v19 = vsel %vm3230_vm4, %v6115_v27, %v6123_v11  ;;  %11013 = vmatprep.subr.bf16.mxu0 %v11012_v26  ;;  %v11016_v24 = vpack.c.bf16 %v9987_v48, %v9985_v35  ;;  %v6122_v27 = vsel %vm3230_vm4, %v6113_v53, %v6121_v60  ;;  %v6129_v14 = vrot.slane %v16362_v25, 4  ;;  %v16399_v26 = vld [vmem:[%s19091_s3 + $0x8] sm:$0xff] }
 0x53c   : > { %5167 = vst [vmem:[#allocation4 + $0x38] sm:$0xff] %v16364_v13  ;;  %v4949_v59 = vpop.f32.mrb[36].mxu1  ;;  %6351 = vmatprep.mubr.f32.mxu0 %v6124_v19  ;;  %v6132_v63 = vsel %vm3230_vm4, %v6123_v11, %v6131_v41  ;;  %v6139_v0 = vrot.slane %v5813_v36, 4  ;;  %v11018_v53 = vpack.c.bf16 %v9986_v56, %v9984_v9  ;;  %v6137_v1 = vrot.slane %v16373_v52, 4 }
 0x53d   : > { %v16406_v12 = vmax.f32 %v4949_v59, 0.0  ;;  %v4951_v45 = vpop.f32.mrb[37].mxu1  ;;  %6352 = vmatmul.mubr.f32.gmra.mrb[58].mxu0 %v6122_v27  ;;  %v11020_v35 = vpack.c.bf16 %v9991_v39, %v9989_v44  ;;  %v11022_v48 = vpack.c.bf16 %v16391_v51, %v16386_v50  ;;  %v16416_v19 = vrot.slane %v16357_v7, 2 }
 0x53e   : > { %v16409_v61 = vmax.f32 %v4951_v45, 0.0  ;;  %6357 = vmatprep.mubr.f32.mxu0 %v6132_v63  ;;  %11015 = vmatpush1.bf16.msra.mxu0 %v11014_v21  ;;  %v5762_v31 = vld [vmem:[#allocation4 + $0x10] sm:$0xc0]  ;;  %v11024_v21 = vpack.c.bf16 %v16404_v34, %v16399_v26  ;;  %v6130_v56 = vsel %vm3230_vm4, %v6121_v60, %v6129_v14  ;;  %v16424_v52 = vrot.slane %v16364_v13, 2 }
 0x53f   : > { %5170 = vst [vmem:[#allocation4 + $0x50] sm:$0xff] %v16406_v12  ;;  %11017 = vmatprep.subr.bf16.mxu0 %v11016_v24  ;;  %v5763_v25 = vld [vmem:[#allocation4 + $0x18] sm:$0xc0]  ;;  %19324 = vst [vmem:[#allocation14_spill] sm:$0xff] %v16416_v19  ;;  %v5380_v36 = vrot.slane %v16406_v12, 2  ;;  %v5780_v11 = vrot.slane %v5762_v31, 2  ;;  %v6140_v51 = vsel %vm3230_vm4, %v6131_v41, %v6139_v0 }
 0x540   : > { %5171 = vst [vmem:[#allocation4 + $0x58] sm:$0xff] %v16409_v61  ;;  %v4955_v9 = vpop.f32.mrb[38].mxu1  ;;  %19325 = vst [vmem:[#allocation17_spill] sm:$0xff] %v16424_v52  ;;  %v5382_v44 = vrot.slane %v16409_v61, 2  ;;  %v5782_v24 = vrot.slane %v5763_v25, 2 }
 0x541   : > { %v16427_v39 = vmax.f32 %v4955_v9, 0.0  ;;  %v4957_v50 = vpop.f32.mrb[39].mxu1  ;;  %6358 = vmatmul.mubr.f32.gmra.mrb[60].mxu0 %v6130_v56  ;;  %v5381_v59 = vsel %vm2302_vm3, %v16416_v19, %v5380_v36  ;;  %v5781_v27 = vsel %vm2302_vm3, %v5780_v11, %v16416_v19  ;;  %v5755_v34 = vld [vmem:[#allocation4 + $0x18] sm:$0xf0]  ;;  %v5754_v41 = vld [vmem:[#allocation4 + $0x10] sm:$0xf0] }
 0x542   : > { %v16434_v26 = vmax.f32 %v4957_v50, 0.0  ;;  %6363 = vmatprep.mubr.f32.mxu0 %v6140_v51  ;;  %11019 = vmatpush1.bf16.msra.mxu0 %v11018_v53  ;;  %v5383_v60 = vsel %vm2302_vm3, %v16424_v52, %v5382_v44  ;;  %v5783_v45 = vsel %vm2302_vm3, %v5782_v24, %v16424_v52  ;;  %v16441_v63 = vadd.f32 %v5381_v59, %v16357_v7  ;;  %v5624_v53 = vld [vmem:[%s19091_s3] sm:$0xff]  ;;  %v5626_v11 = vld [vmem:[%s19091_s3 + $0x10] sm:$0xff]  ;;  %v5629_v24 = vld [vmem:[%s19091_s3 + $0x28] sm:$0xff] }
 0x543   : > { %5174 = vst [vmem:[#allocation4 + $0x70] sm:$0xff] %v16427_v39  ;;  %11021 = vmatprep.subr.bf16.mxu0 %v11020_v35  ;;  %v16445_v0 = vadd.f32 %v5383_v60, %v16364_v13  ;;  %v5807_v31 = vadd.f32 %v5783_v45, %v5755_v34  ;;  %v5806_v25 = vadd.f32 %v5781_v27, %v5754_v41  ;;  %v5388_v7 = vrot.slane %v16427_v39, 2  ;;  %v5631_v50 = vld [vmem:[%s19091_s3 + $0x38] sm:$0xff] }
 0x544   : > { %19326 = vst [vmem:[#allocation16_spill] sm:$0xff] %v16441_v63  ;;  %5175 = vst [vmem:[#allocation4 + $0x78] sm:$0xff] %v16434_v26  ;;  %v4961_v9 = vpop.f32.mrb[40].mxu1  ;;  %v6138_v35 = vsel %vm3230_vm4, %v6129_v14, %v6137_v1  ;;  %v6020_v13 = vrot.slane %v16441_v63, 4  ;;  %v5390_v56 = vrot.slane %v16434_v26, 2  ;;  %v11026_v34 = vpack.c.bf16 %v5626_v11, %v5624_v53  ;;  %v5635_v53 = vld [vmem:[%s19091_s3 + $0x58] sm:$0xff] }
 0x545   : > { %19327 = vst [vmem:[#allocation19_spill] sm:$0xff] %v16445_v0  ;;  %v16464_v51 = vmax.f32 %v4961_v9, 0.0  ;;  %v4963_v59 = vpop.f32.mrb[41].mxu1  ;;  %6364 = vmatmul.mubr.f32.gmra.mrb[62].mxu0 %v6138_v35  ;;  %v6022_v27 = vrot.slane %v5807_v31, 4  ;;  %v6023_v60 = vrot.slane %v16445_v0, 4  ;;  %v6019_v14 = vrot.slane %v5806_v25, 4 }
 0x546   : > { %v5115_v1 = vmax.f32 %v4963_v59, 0.0  ;;  %11023 = vmatpush1.bf16.msra.mxu0 %v11022_v48  ;;  %v5391_v45 = vsel %vm2302_vm3, %v5382_v44, %v5390_v56  ;;  %v5389_v41 = vsel %vm2302_vm3, %v5380_v36, %v5388_v7  ;;  %v11028_v35 = vpack.c.bf16 %v5631_v50, %v5629_v24  ;;  %v5628_v48 = vld [vmem:[%s19091_s3 + $0x20] sm:$0xff]  ;;  %v5630_v36 = vld [vmem:[%s19091_s3 + $0x30] sm:$0xff] }
 0x547   : > { %5178 = vst [vmem:[#allocation4 + $0x90] sm:$0xff] %v16464_v51  ;;  %v6024_v63 = vsel %vm3230_vm4, %v6022_v27, %v6023_v60  ;;  %11025 = vmatprep.subr.bf16.mxu0 %v11024_v21  ;;  %v16472_v9 = vadd.f32 %v5391_v45, %v16409_v61  ;;  %v16475_v31 = vadd.f32 %v5389_v41, %v16406_v12  ;;  %v5396_v61 = vrot.slane %v16464_v51, 2  ;;  %v5633_v12 = vld [vmem:[%s19091_s3 + $0x48] sm:$0xff] }
 0x548   : > { %5179 = vst [vmem:[#allocation4 + $0x98] sm:$0xff] %v5115_v1  ;;  %v4967_v44 = vpop.f32.mrb[42].mxu1  ;;  %6434 = vmatprep.mubr.f32.mxu0 %v6024_v63  ;;  %v6021_v21 = vsel %vm3230_vm4, %v6019_v14, %v6020_v13  ;;  %v5398_v25 = vrot.slane %v5115_v1, 2  ;;  %v11030_v27 = vpack.c.bf16 %v5630_v36, %v5628_v48  ;;  %v5639_v48 = vld [vmem:[%s19091_s3 + $0x78] sm:$0xff] }
 0x549   : > { %19328 = vst [vmem:[#allocation18_spill] sm:$0xff] %v16472_v9  ;;  %19329 = vst [vmem:[#allocation21_spill] sm:$0xff] %v16475_v31  ;;  %v16491_v11 = vmax.f32 %v4967_v44, 0.0  ;;  %v4969_v24 = vpop.f32.mrb[43].mxu1  ;;  %6435 = vmatmul.mubr.f32.vlgmr.msra.gmra.mrb[32].mxu0 %v6021_v21  ;;  %v6031_v50 = vrot.slane %v16472_v9, 4  ;;  %v6029_v63 = vrot.slane %v16475_v31, 4  ;;  %v5397_v45 = vsel %vm2302_vm3, %v5388_v7, %v5396_v61 }
 0x54a   : > { %v5119_v59 = vmax.f32 %v4969_v24, 0.0  ;;  %11027 = vmatpush1.bf16.msra.mxu0 %v11026_v34  ;;  %v5399_v14 = vsel %vm2302_vm3, %v5390_v56, %v5398_v25  ;;  %v16503_v21 = vadd.f32 %v5397_v45, %v16427_v39  ;;  %v11032_v9 = vpack.c.bf16 %v5635_v53, %v5633_v12  ;;  %v5632_v34 = vld [vmem:[%s19091_s3 + $0x40] sm:$0xff]  ;;  %v5634_v7 = vld [vmem:[%s19091_s3 + $0x50] sm:$0xff]  ;;  %v5637_v39 = vld [vmem:[%s19091_s3 + $0x68] sm:$0xff] }
 0x54b   : > { %5182 = vst [vmem:[#allocation4 + $0xb0] sm:$0xff] %v16491_v11  ;;  %v6032_v41 = vsel %vm3230_vm4, %v6023_v60, %v6031_v50  ;;  %11029 = vmatprep.subr.bf16.mxu0 %v11028_v35  ;;  %v16500_v44 = vadd.f32 %v5399_v14, %v16434_v26  ;;  %v6030_v60 = vsel %vm3230_vm4, %v6020_v13, %v6029_v63  ;;  %v5404_v26 = vrot.slane %v16491_v11, 2 }
 0x54c   : > { %19331 = vst [vmem:[#allocation23_spill] sm:$0xff] %v16503_v21  ;;  %5183 = vst [vmem:[#allocation4 + $0xb8] sm:$0xff] %v5119_v59  ;;  %v4973_v56 = vpop.f32.mrb[44].mxu1  ;;  %6440 = vmatprep.mubr.f32.mxu0 %v6032_v41  ;;  %v5406_v35 = vrot.slane %v5119_v59, 2  ;;  %v6037_v24 = vrot.slane %v16503_v21, 4  ;;  %v11034_v14 = vpack.c.bf16 %v5634_v7, %v5632_v34  ;;  %v5643_v34 = vld [vmem:[%s19091_s3 + $0x98] sm:$0xff] }
 0x54d   : > { %19330 = vst [vmem:[#allocation20_spill] sm:$0xff] %v16500_v44  ;;  %v16519_v36 = vmax.f32 %v4973_v56, 0.0  ;;  %v4975_v12 = vpop.f32.mrb[45].mxu1  ;;  %6441 = vmatmul.mubr.f32.gmra.mrb[34].mxu0 %v6030_v60  ;;  %v6039_v53 = vrot.slane %v16500_v44, 4  ;;  %v5405_v41 = vsel %vm2302_vm3, %v5396_v61, %v5404_v26  ;;  %v11036_v44 = vpack.c.bf16 %v5639_v48, %v5637_v39 }
 0x54e   : > { %v5123_v13 = vmax.f32 %v4975_v12, 0.0  ;;  %11031 = vmatpush1.bf16.msra.mxu0 %v11030_v27  ;;  %v5407_v45 = vsel %vm2302_vm3, %v5398_v25, %v5406_v35  ;;  %v16530_v60 = vadd.f32 %v5405_v41, %v16464_v51  ;;  %v5636_v27 = vld [vmem:[%s19091_s3 + $0x60] sm:$0xff]  ;;  %v5638_v25 = vld [vmem:[%s19091_s3 + $0x70] sm:$0xff]  ;;  %v5641_v51 = vld [vmem:[%s19091_s3 + $0x88] sm:$0xff] }
 0x54f   : > { %5186 = vst [vmem:[#allocation4 + $0xd0] sm:$0xff] %v16519_v36  ;;  %v6040_v31 = vsel %vm3230_vm4, %v6031_v50, %v6039_v53  ;;  %11033 = vmatprep.subr.bf16.mxu0 %v11032_v9  ;;  %v16527_v56 = vadd.f32 %v5407_v45, %v5115_v1  ;;  %v6038_v50 = vsel %vm3230_vm4, %v6029_v63, %v6037_v24  ;;  %v5412_v1 = vrot.slane %v16519_v36, 2 }
 0x550   : > { %19333 = vst [vmem:[#allocation26_spill] sm:$0xff] %v16530_v60  ;;  %5187 = vst [vmem:[#allocation4 + $0xd8] sm:$0xff] %v5123_v13  ;;  %v4979_v61 = vpop.f32.mrb[46].mxu1  ;;  %6446 = vmatprep.mubr.f32.mxu0 %v6040_v31  ;;  %v5414_v9 = vrot.slane %v5123_v13, 2  ;;  %v6045_v31 = vrot.slane %v16530_v60, 4  ;;  %v11038_v12 = vpack.c.bf16 %v5638_v25, %v5636_v27  ;;  %v5647_v27 = vld [vmem:[%s19091_s3 + $0xb8] sm:$0xff] }
 0x551   : > { %19332 = vst [vmem:[#allocation22_spill] sm:$0xff] %v16527_v56  ;;  %v16546_v7 = vmax.f32 %v4979_v61, 0.0  ;;  %v4981_v39 = vpop.f32.mrb[47].mxu1  ;;  %6447 = vmatmul.mubr.f32.gmra.mrb[36].mxu0 %v6038_v50  ;;  %v6047_v48 = vrot.slane %v16527_v56, 4  ;;  %v5413_v41 = vsel %vm2302_vm3, %v5404_v26, %v5412_v1  ;;  %v11040_v56 = vpack.c.bf16 %v5643_v34, %v5641_v51 }
 0x552   : > { %v5127_v63 = vmax.f32 %v4981_v39, 0.0  ;;  %11035 = vmatpush1.bf16.msra.mxu0 %v11034_v14  ;;  %v5415_v45 = vsel %vm2302_vm3, %v5406_v35, %v5414_v9  ;;  %v16557_v50 = vadd.f32 %v5413_v41, %v16491_v11  ;;  %v5640_v14 = vld [vmem:[%s19091_s3 + $0x80] sm:$0xff]  ;;  %v5642_v35 = vld [vmem:[%s19091_s3 + $0x90] sm:$0xff]  ;;  %v5645_v11 = vld [vmem:[%s19091_s3 + $0xa8] sm:$0xff] }
 0x553   : > { %5190 = vst [vmem:[#allocation4 + $0xf0] sm:$0xff] %v16546_v7  ;;  %v6048_v21 = vsel %vm3230_vm4, %v6039_v53, %v6047_v48  ;;  %11037 = vmatprep.subr.bf16.mxu0 %v11036_v44  ;;  %v16554_v61 = vadd.f32 %v5415_v45, %v5119_v59  ;;  %v6046_v53 = vsel %vm3230_vm4, %v6037_v24, %v6045_v31  ;;  %v5420_v59 = vrot.slane %v16546_v7, 2 }
 0x554   : > { %19335 = vst [vmem:[#allocation27_spill] sm:$0xff] %v16557_v50  ;;  %5191 = vst [vmem:[#allocation4 + $0xf8] sm:$0xff] %v5127_v63  ;;  %v4985_v26 = vpop.f32.mrb[48].mxu1  ;;  %6452 = vmatprep.mubr.f32.mxu0 %v6048_v21  ;;  %v5422_v44 = vrot.slane %v5127_v63, 2  ;;  %v6053_v21 = vrot.slane %v16557_v50, 4  ;;  %v11042_v39 = vpack.c.bf16 %v5642_v35, %v5640_v14  ;;  %v5651_v14 = vld [vmem:[%s19091_s3 + $0xd8] sm:$0xff] }
 0x555   : > { %19334 = vst [vmem:[#allocation24_spill] sm:$0xff] %v16554_v61  ;;  %v16573_v25 = vmax.f32 %v4985_v26, 0.0  ;;  %v4987_v51 = vpop.f32.mrb[49].mxu1  ;;  %6453 = vmatmul.mubr.f32.gmra.mrb[38].mxu0 %v6046_v53  ;;  %v6055_v34 = vrot.slane %v16554_v61, 4  ;;  %v5421_v41 = vsel %vm2302_vm3, %v5412_v1, %v5420_v59  ;;  %v11044_v61 = vpack.c.bf16 %v5647_v27, %v5645_v11 }
 0x556   : > { %v5131_v24 = vmax.f32 %v4987_v51, 0.0  ;;  %11039 = vmatpush1.bf16.msra.mxu0 %v11038_v12  ;;  %v5423_v45 = vsel %vm2302_vm3, %v5414_v9, %v5422_v44  ;;  %v16584_v53 = vadd.f32 %v5421_v41, %v16519_v36  ;;  %v5644_v12 = vld [vmem:[%s19091_s3 + $0xa0] sm:$0xff]  ;;  %v5646_v9 = vld [vmem:[%s19091_s3 + $0xb0] sm:$0xff]  ;;  %v5649_v36 = vld [vmem:[%s19091_s3 + $0xc8] sm:$0xff] }
 0x557   : > { %5194 = vst [vmem:[#allocation4 + $0x110] sm:$0xff] %v16573_v25  ;;  %v6056_v60 = vsel %vm3230_vm4, %v6047_v48, %v6055_v34  ;;  %11041 = vmatprep.subr.bf16.mxu0 %v11040_v56  ;;  %v16581_v26 = vadd.f32 %v5423_v45, %v5123_v13  ;;  %v6054_v48 = vsel %vm3230_vm4, %v6045_v31, %v6053_v21  ;;  %v5428_v13 = vrot.slane %v16573_v25, 2 }
 0x558   : > { %19337 = vst [vmem:[#allocation28_spill] sm:$0xff] %v16584_v53  ;;  %5195 = vst [vmem:[#allocation4 + $0x118] sm:$0xff] %v5131_v24  ;;  %v4991_v1 = vpop.f32.mrb[50].mxu1  ;;  %6458 = vmatprep.mubr.f32.mxu0 %v6056_v60  ;;  %v5430_v56 = vrot.slane %v5131_v24, 2  ;;  %v6061_v60 = vrot.slane %v16584_v53, 4  ;;  %v11046_v51 = vpack.c.bf16 %v5646_v9, %v5644_v12  ;;  %v5655_v12 = vld [vmem:[%s19091_s3 + $0xf8] sm:$0xff] }
 0x559   : > { %19336 = vst [vmem:[#allocation25_spill] sm:$0xff] %v16581_v26  ;;  %v16600_v35 = vmax.f32 %v4991_v1, 0.0  ;;  %v4993_v11 = vpop.f32.mrb[51].mxu1  ;;  %6459 = vmatmul.mubr.f32.gmra.mrb[40].mxu0 %v6054_v48  ;;  %v6063_v27 = vrot.slane %v16581_v26, 4  ;;  %v5429_v41 = vsel %vm2302_vm3, %v5420_v59, %v5428_v13  ;;  %v11048_v26 = vpack.c.bf16 %v5651_v14, %v5649_v36  ;;  %v5652_v53 = vld [vmem:[%s19091_s3 + $0xe0] sm:$0xff] }
 0x55a   : > { %v16604_v31 = vmax.f32 %v4993_v11, 0.0  ;;  %11043 = vmatpush1.bf16.msra.mxu0 %v11042_v39  ;;  %v5431_v45 = vsel %vm2302_vm3, %v5422_v44, %v5430_v56  ;;  %v16613_v48 = vadd.f32 %v5429_v41, %v16546_v7  ;;  %v5648_v39 = vld [vmem:[%s19091_s3 + $0xc0] sm:$0xff]  ;;  %v5650_v44 = vld [vmem:[%s19091_s3 + $0xd0] sm:$0xff] }
 0x55b   : > { %5198 = vst [vmem:[#allocation4 + $0x130] sm:$0xff] %v16600_v35  ;;  %v6064_v50 = vsel %vm3230_vm4, %v6055_v34, %v6063_v27  ;;  %11045 = vmatprep.subr.bf16.mxu0 %v11044_v61  ;;  %v16610_v1 = vadd.f32 %v5431_v45, %v5127_v63  ;;  %v6062_v61 = vsel %vm3230_vm4, %v6053_v21, %v6061_v60  ;;  %v5436_v7 = vrot.slane %v16600_v35, 2  ;;  %v5653_v34 = vld [vmem:[%s19091_s3 + $0xe8] sm:$0xff] }
 0x55c   : > { %19339 = vst [vmem:[#allocation29_spill] sm:$0xff] %v16613_v48  ;;  %5199 = vst [vmem:[#allocation4 + $0x138] sm:$0xff] %v16604_v31  ;;  %v4997_v59 = vpop.f32.mrb[52].mxu1  ;;  %6464 = vmatprep.mubr.f32.mxu0 %v6064_v50  ;;  %v5438_v63 = vrot.slane %v16604_v31, 2  ;;  %v6069_v21 = vrot.slane %v16613_v48, 4  ;;  %v11050_v11 = vpack.c.bf16 %v5650_v44, %v5648_v39  ;;  %v5659_v39 = vld [vmem:[%s19091_s3 + $0x118] sm:$0xff] }
 0x55d   : > { %19338 = vst [vmem:[#allocation30_spill] sm:$0xff] %v16610_v1  ;;  %v16631_v9 = vmax.f32 %v4997_v59, 0.0  ;;  %v4999_v36 = vpop.f32.mrb[53].mxu1  ;;  %6465 = vmatmul.mubr.f32.gmra.mrb[42].mxu0 %v6062_v61  ;;  %v6071_v50 = vrot.slane %v16610_v1, 4  ;;  %v5437_v41 = vsel %vm2302_vm3, %v5428_v13, %v5436_v7  ;;  %v5654_v59 = vld [vmem:[%s19091_s3 + $0xf0] sm:$0xff]  ;;  %v5657_v13 = vld [vmem:[%s19091_s3 + $0x108] sm:$0xff] }
 0x55e   : > { %v16635_v14 = vmax.f32 %v4999_v36, 0.0  ;;  %11047 = vmatpush1.bf16.msra.mxu0 %v11046_v51  ;;  %v5439_v45 = vsel %vm2302_vm3, %v5430_v56, %v5438_v63  ;;  %v16650_v51 = vadd.f32 %v5437_v41, %v16573_v25  ;;  %v11052_v56 = vpack.c.bf16 %v5655_v12, %v5653_v34  ;;  %v16670_v34 = vld [vmem:[%s19091_s3 + $0x110] sm:$0xff]  ;;  %v16679_v48 = vld [vmem:[%s19091_s3 + $0x128] sm:$0xff]  ;;  %v16684_v1 = vld [vmem:[%s19091_s3 + $0x138] sm:$0xff] }
 0x55f   : > { %5202 = vst [vmem:[#allocation4 + $0x150] sm:$0xff] %v16631_v9  ;;  %v6072_v61 = vsel %vm3230_vm4, %v6063_v27, %v6071_v50  ;;  %11049 = vmatprep.subr.bf16.mxu0 %v11048_v26  ;;  %v16647_v36 = vadd.f32 %v5439_v45, %v5131_v24  ;;  %v6070_v26 = vsel %vm3230_vm4, %v6061_v60, %v6069_v21  ;;  %v5444_v25 = vrot.slane %v16631_v9, 2  ;;  %v16665_v27 = vld [vmem:[%s19091_s3 + $0x100] sm:$0xff] }
 0x560   : > { %19341 = vst [vmem:[#allocation32_spill] sm:$0xff] %v16650_v51  ;;  %5203 = vst [vmem:[#allocation4 + $0x158] sm:$0xff] %v16635_v14  ;;  %v5003_v44 = vpop.f32.mrb[54].mxu1  ;;  %6470 = vmatprep.mubr.f32.mxu0 %v6072_v61  ;;  %v5446_v24 = vrot.slane %v16635_v14, 2  ;;  %v6077_v41 = vrot.slane %v16650_v51, 4  ;;  %v11054_v61 = vpack.c.bf16 %v5654_v59, %v5652_v53  ;;  %v16690_v51 = vld [vmem:[#allocation4 + $0x68] sm:$0xff] }
 0x561   : > { %19340 = vst [vmem:[#allocation31_spill] sm:$0xff] %v16647_v36  ;;  %v16672_v12 = vmax.f32 %v5003_v44, 0.0  ;;  %v5005_v45 = vpop.f32.mrb[55].mxu1  ;;  %6471 = vmatmul.mubr.f32.gmra.mrb[44].mxu0 %v6070_v26  ;;  %v6079_v60 = vrot.slane %v16647_v36, 4  ;;  %v5445_v26 = vsel %vm2302_vm3, %v5436_v7, %v5444_v25  ;;  %v11056_v36 = vpack.c.bf16 %v5659_v39, %v5657_v13  ;;  %v16710_v7 = vld [vmem:[%s19091_s3 + $0x130] sm:$0xff]  ;;  %v16721_v39 = vld [vmem:[%s19091_s3 + $0x148] sm:$0xff] }
 0x562   : > { %v16686_v0 = vmax.f32 %v5005_v45, 0.0  ;;  %11051 = vmatpush1.bf16.msra.mxu0 %v11050_v11  ;;  %v5447_v44 = vsel %vm2302_vm3, %v5438_v63, %v5446_v24  ;;  %v16698_v19 = vadd.f32 %v5445_v26, %v16600_v35  ;;  %v11058_v11 = vpack.c.bf16 %v16670_v34, %v16665_v27  ;;  %v16705_v63 = vld [vmem:[%s19091_s3 + $0x120] sm:$0xff]  ;;  %v6862_v27 = vld [vmem:[#allocation4 + $0x48] sm:$0xff] }
 0x563   : > { %5206 = vst [vmem:[#allocation4 + $0x170] sm:$0xff] %v16672_v12  ;;  %v6080_v53 = vsel %vm3230_vm4, %v6071_v50, %v6079_v60  ;;  %11053 = vmatprep.subr.bf16.mxu0 %v11052_v56  ;;  %v16695_v59 = vadd.f32 %v5447_v44, %v16604_v31  ;;  %v6078_v35 = vsel %vm3230_vm4, %v6069_v21, %v6077_v41  ;;  %v5452_v56 = vrot.slane %v16672_v12, 2  ;;  %v16730_v26 = vld [vmem:[%s19091_s3 + $0x158] sm:$0xff] }
 0x564   : > { %19343 = vst [vmem:[#allocation34_spill] sm:$0xff] %v16698_v19  ;;  %5207 = vst [vmem:[#allocation4 + $0x178] sm:$0xff] %v16686_v0  ;;  %v5009_v31 = vpop.f32.mrb[56].mxu1  ;;  %6476 = vmatprep.mubr.f32.mxu0 %v6080_v53  ;;  %v5454_v50 = vrot.slane %v16686_v0, 2  ;;  %v11060_v13 = vpack.c.bf16 %v16684_v1, %v16679_v48  ;;  %v6085_v21 = vrot.slane %v16698_v19, 4 }
 0x565   : > { %19342 = vst [vmem:[#allocation33_spill] sm:$0xff] %v16695_v59  ;;  %v16723_v34 = vmax.f32 %v5009_v31, 0.0  ;;  %v5011_v45 = vpop.f32.mrb[57].mxu1  ;;  %6477 = vmatmul.mubr.f32.gmra.mrb[46].mxu0 %v6078_v35  ;;  %v6087_v44 = vrot.slane %v16695_v59, 4  ;;  %v5453_v31 = vsel %vm2302_vm3, %v5444_v25, %v5452_v56  ;;  %v11062_v35 = vpack.c.bf16 %v16710_v7, %v16705_v63  ;;  %v16755_v25 = vld [vmem:[%s19091_s3 + $0x150] sm:$0xff]  ;;  %v16768_v7 = vld [vmem:[%s19091_s3 + $0x168] sm:$0xff] }
 0x566   : > { %v16733_v48 = vmax.f32 %v5011_v45, 0.0  ;;  %11055 = vmatpush1.bf16.msra.mxu0 %v11054_v61  ;;  %v5455_v53 = vsel %vm2302_vm3, %v5446_v24, %v5454_v50  ;;  %v16745_v1 = vadd.f32 %v5453_v31, %v16631_v9  ;;  %v16750_v24 = vld [vmem:[%s19091_s3 + $0x140] sm:$0xff]  ;;  %v16757_v61 = vrot.slane %v6862_v27, 2  ;;  %v16773_v45 = vld [vmem:[%s19091_s3 + $0x178] sm:$0xff] }
 0x567   : > { %5210 = vst [vmem:[#allocation4 + $0x190] sm:$0xff] %v16723_v34  ;;  %v6088_v19 = vsel %vm3230_vm4, %v6079_v60, %v6087_v44  ;;  %11057 = vmatprep.subr.bf16.mxu0 %v11056_v36  ;;  %v16742_v59 = vadd.f32 %v5455_v53, %v16635_v14  ;;  %v6086_v14 = vsel %vm3230_vm4, %v6077_v41, %v6085_v21  ;;  %v5460_v60 = vrot.slane %v16723_v34, 2 }
 0x568   : > { %19345 = vst [vmem:[#allocation36_spill] sm:$0xff] %v16745_v1  ;;  %19346 = vst [vmem:[#allocation37_spill] sm:$0xff] %v16757_v61  ;;  %v5015_v36 = vpop.f32.mrb[58].mxu1  ;;  %6482 = vmatprep.mubr.f32.mxu0 %v6088_v19  ;;  %v5462_v9 = vrot.slane %v16733_v48, 2  ;;  %v11064_v63 = vpack.c.bf16 %v16730_v26, %v16721_v39  ;;  %v6093_v31 = vrot.slane %v16745_v1, 4  ;;  %v19347_v39 = vrot.slane %v16690_v51, 2 }
 0x569   : > { %19344 = vst [vmem:[#allocation35_spill] sm:$0xff] %v16742_v59  ;;  %5211 = vst [vmem:[#allocation4 + $0x198] sm:$0xff] %v16733_v48  ;;  %v16775_v19 = vmax.f32 %v5015_v36, 0.0  ;;  %v5017_v41 = vpop.f32.mrb[59].mxu1  ;;  %6483 = vmatmul.mubr.f32.gmra.mrb[48].mxu0 %v6086_v14  ;;  %v6095_v53 = vrot.slane %v16742_v59, 4  ;;  %v5461_v36 = vsel %vm2302_vm3, %v5452_v56, %v5460_v60  ;;  %v11066_v14 = vpack.c.bf16 %v16755_v25, %v16750_v24  ;;  %v16794_v1 = vld [vmem:[%s19091_s3 + $0x160] sm:$0xff] }
 0x56a   : > { %v16783_v26 = vsel %vm2302_vm3, %v16757_v61, %v19347_v39  ;;  %v16785_v52 = vmax.f32 %v5017_v41, 0.0  ;;  %11059 = vmatpush1.bf16.msra.mxu0 %v11058_v11  ;;  %v5463_v32 = vsel %vm2302_vm3, %v5454_v50, %v5462_v9  ;;  %v16799_v39 = vld [vmem:[%s19091_s3 + $0x170] sm:$0xff]  ;;  %v16807_v56 = vadd.f32 %v5461_v36, %v16672_v12  ;;  %v16814_v25 = vld [vmem:[%s19091_s3 + $0x188] sm:$0xff]  ;;  %v16819_v41 = vld [vmem:[%s19091_s3 + $0x198] sm:$0xff] }
 0x56b   : > { %19348 = vst [vmem:[#allocation38_spill] sm:$0xff] %v16783_v26  ;;  %5214 = vst [vmem:[#allocation4 + $0x1b0] sm:$0xff] %v16775_v19  ;;  %v6096_v11 = vsel %vm3230_vm4, %v6087_v44, %v6095_v53  ;;  %11061 = vmatprep.subr.bf16.mxu0 %v11060_v13  ;;  %v16804_v50 = vadd.f32 %v5463_v32, %v16686_v0  ;;  %v11068_v24 = vpack.c.bf16 %v16773_v45, %v16768_v7  ;;  %v16825_v44 = vld [vmem:[#allocation4 + $0x218] sm:$0x3f] }
 0x56c   : > { %19350 = vst [vmem:[#allocation40_spill] sm:$0xff] %v16807_v56  ;;  %5215 = vst [vmem:[#allocation4 + $0x1b8] sm:$0xff] %v16785_v52  ;;  %v5021_v32 = vpop.f32.mrb[60].mxu1  ;;  %6488 = vmatprep.mubr.f32.mxu0 %v6096_v11  ;;  %v6094_v0 = vsel %vm3230_vm4, %v6085_v21, %v6093_v31  ;;  %v5470_v12 = vrot.slane %v16785_v52, 2  ;;  %v5468_v13 = vrot.slane %v16775_v19, 2  ;;  %v16828_v7 = vadd.f32 %v16783_v26, %v6862_v27  ;;  %v16836_v11 = vld [vmem:[#allocation4 + $0x60] sm:$0xff] }
 0x56d   : > { %19349 = vst [vmem:[#allocation39_spill] sm:$0xff] %v16804_v50  ;;  %v16830_v45 = vmax.f32 %v5021_v32, 0.0  ;;  %v5023_v36 = vpop.f32.mrb[61].mxu1  ;;  %6489 = vmatmul.mubr.f32.gmra.mrb[50].mxu0 %v6094_v0  ;;  %v6103_v61 = vrot.slane %v16804_v50, 4  ;;  %v6101_v59 = vrot.slane %v16807_v56, 4  ;;  %v11070_v21 = vpack.c.bf16 %v16799_v39, %v16794_v1 }
 0x56e   : > { %19351 = vst [vmem:[#allocation41_spill] sm:$0xff] %v16828_v7  ;;  %v5155_v23 = vmax.f32 %v5023_v36, 0.0  ;;  %11063 = vmatpush1.bf16.msra.mxu0 %v11062_v35  ;;  %v5471_v29 = vsel %vm2302_vm3, %v5462_v9, %v5470_v12  ;;  %v5469_v27 = vsel %vm2302_vm3, %v5460_v60, %v5468_v13  ;;  %v11072_v32 = vpack.c.bf16 %v16819_v41, %v16814_v25  ;;  %v16842_v26 = vld [vmem:[#allocation4 + $0x210] sm:$0x3f]  ;;  %v6861_v9 = vld [vmem:[#allocation4 + $0x40] sm:$0xff]  ;;  %v5677_v7 = vld [vmem:[%s19091_s3 + $0x1a8] sm:$0xff] }
 0x56f   : > { %5218 = vst [vmem:[#allocation4 + $0x1d0] sm:$0xff] %v16830_v45  ;;  %v6104_v0 = vsel %vm3230_vm4, %v6095_v53, %v6103_v61  ;;  %11065 = vmatprep.subr.bf16.mxu0 %v11064_v63  ;;  %v16847_v1 = vadd.f32 %v5471_v29, %v16733_v48  ;;  %v16850_v39 = vadd.f32 %v5469_v27, %v16723_v34  ;;  %v5790_v35 = vrot.slane %v16825_v44, 2  ;;  %v5672_v63 = vld [vmem:[%s19091_s3 + $0x180] sm:$0xff]  ;;  %v5674_v29 = vld [vmem:[%s19091_s3 + $0x190] sm:$0xff] }
 0x570   : > { %5219 = vst [vmem:[#allocation4 + $0x1d8] sm:$0xff] %v5155_v23  ;;  %v5027_v60 = vpop.f32.mrb[62].mxu1  ;;  %6494 = vmatprep.mubr.f32.mxu0 %v6104_v0  ;;  %v6102_v25 = vsel %vm3230_vm4, %v6093_v31, %v6101_v59  ;;  %v5478_v41 = vrot.slane %v5155_v23, 2  ;;  %v5476_v36 = vrot.slane %v16830_v45, 2  ;;  %v5788_v27 = vrot.slane %v16842_v26, 2 }
 0x571   : > { %19352 = vst [vmem:[#allocation42_spill] sm:$0xff] %v16847_v1  ;;  %19353 = vst [vmem:[#allocation43_spill] sm:$0xff] %v16850_v39  ;;  %v5158_v48 = vmax.f32 %v5027_v60, 0.0  ;;  %v5029_v53 = vpop.f32.mrb[63].mxu1  ;;  %6495 = vmatmul.mubr.f32.gmra.mrb[52].mxu0 %v6102_v25  ;;  %v6111_v44 = vrot.slane %v16847_v1, 4  ;;  %v6109_v31 = vrot.slane %v16850_v39, 4 }
 0x572   : > { %v5159_v0 = vmax.f32 %v5029_v53, 0.0  ;;  %11067 = vmatpush1.bf16.msra.mxu0 %v11066_v14  ;;  %v5479_v56 = vsel %vm2302_vm3, %v5470_v12, %v5478_v41  ;;  %v5477_v50 = vsel %vm2302_vm3, %v5468_v13, %v5476_v36  ;;  %v5679_v60 = vld [vmem:[%s19091_s3 + $0x1b8] sm:$0xff]  ;;  %v16873_v25 = vrot.slane %v6861_v9, 2  ;;  %v5759_v1 = vld [vmem:[#allocation4 + $0x218] sm:$0xf] }
 0x573   : > { %5222 = vst [vmem:[#allocation4 + $0x1f0] sm:$0xff] %v5158_v48  ;;  %v6112_v34 = vsel %vm3230_vm4, %v6103_v61, %v6111_v44  ;;  %11069 = vmatprep.subr.bf16.mxu0 %v11068_v24  ;;  %v16877_v26 = vadd.f32 %v5479_v56, %v16785_v52  ;;  %v16880_v14 = vadd.f32 %v5477_v50, %v16775_v19  ;;  %v16885_v39 = vrot.slane %v5158_v48, 2 }
 0x574   : > { %19354 = vst [vmem:[#allocation44_spill] sm:$0xff] %v16873_v25  ;;  %v11074_v12 = vpack.c.bf16 %v5674_v29, %v5672_v63  ;;  %5223 = vst [vmem:[#allocation4 + $0x1f8] sm:$0xff] %v5159_v0  ;;  %6500 = vmatprep.mubr.f32.mxu0 %v6112_v34  ;;  %v6110_v13 = vsel %vm3230_vm4, %v6101_v59, %v6109_v31  ;;  %v16883_v53 = vrot.slane %v5159_v0, 2  ;;  %v19359_v5 = vrot.slane %v16836_v11, 2  ;;  %v5676_v63 = vld [vmem:[%s19091_s3 + $0x1a0] sm:$0xff]  ;;  %v5681_v29 = vld [vmem:[%s19091_s3 + $0x1c8] sm:$0xff] }
 0x575   : > { %19355 = vst [vmem:[#allocation45_spill] sm:$0xff] %v16877_v26  ;;  %19356 = vst [vmem:[#allocation46_spill] sm:$0xff] %v16880_v14  ;;  %6501 = vmatmul.mubr.f32.gmra.mrb[54].mxu0 %v6110_v13  ;;  %v6119_v52 = vrot.slane %v16877_v26, 4  ;;  %v6117_v19 = vrot.slane %v16880_v14, 4  ;;  %v11076_v50 = vpack.c.bf16 %v5679_v60, %v5677_v7  ;;  %v5485_v24 = vsel %vm2302_vm3, %v5476_v36, %v16885_v39  ;;  %v5678_v36 = vld [vmem:[%s19091_s3 + $0x1b0] sm:$0xff]  ;;  %v5680_v13 = vld [vmem:[%s19091_s3 + $0x1c0] sm:$0xff] }
 0x576   : > { %19357 = vst [vmem:[#allocation47_spill] sm:$0xff] %v16883_v53  ;;  %19358 = vst [vmem:[#allocation48_spill] sm:$0xff] %v16885_v39  ;;  %v16891_v61 = vsel %vm2302_vm3, %v16873_v25, %v19359_v5  ;;  %11071 = vmatpush1.bf16.msra.mxu0 %v11070_v21  ;;  %v5487_v59 = vsel %vm2302_vm3, %v5478_v41, %v16883_v53  ;;  %v5791_v5 = vsel %vm2302_vm3, %v16883_v53, %v5790_v35  ;;  %v5758_v60 = vld [vmem:[#allocation4 + $0x210] sm:$0xf]  ;;  %v5288_v53 = vld [vmem:[#allocation4] sm:$0xfc] }
 0x577   : > { %19360 = vst [vmem:[#allocation49_spill] sm:$0xff] %v16891_v61  ;;  %v16896_v56 = vadd.f32 %v16891_v61, %v6861_v9  ;;  %v5789_v7 = vsel %vm2302_vm3, %v16885_v39, %v5788_v27  ;;  %v6120_v9 = vsel %vm3230_vm4, %v6111_v44, %v6119_v52  ;;  %11073 = vmatprep.subr.bf16.mxu0 %v11072_v32  ;;  %v6874_v61 = vld [vmem:[#allocation4 + $0xa8] sm:$0xff]  ;;  %v6873_v14 = vld [vmem:[#allocation4 + $0xa0] sm:$0xff] }
 0x578   : > { %v16910_v21 = vadd.f32 %v5487_v59, %v5155_v23  ;;  %v16913_v41 = vadd.f32 %v5485_v24, %v16830_v45  ;;  %v16921_v34 = vadd.f32 %v5790_v35, %v5759_v1  ;;  %6506 = vmatprep.mubr.f32.mxu0 %v6120_v9  ;;  %v6118_v44 = vsel %vm3230_vm4, %v6109_v31, %v6117_v19  ;;  %v5683_v45 = vld [vmem:[%s19091_s3 + $0x1d8] sm:$0xff]  ;;  %v5682_v1 = vld [vmem:[%s19091_s3 + $0x1d0] sm:$0xff] }
 0x579   : > { %19361 = vst [vmem:[#allocation50_spill] sm:$0xff] %v16896_v56  ;;  %v5811_v32 = vadd.f32 %v5791_v5, %v5159_v0  ;;  %v16924_v23 = vadd.f32 %v5789_v7, %v5158_v48  ;;  %6507 = vmatmul.mubr.f32.gmra.mrb[56].mxu0 %v6118_v44  ;;  %v16940_v48 = vld [vmem:[%s19091_s3 + $0x1e8] sm:$0xff]  ;;  %v16945_v0 = vld [vmem:[%s19091_s3 + $0x1f8] sm:$0xff]  ;;  %v11078_v5 = vpack.c.bf16 %v5678_v36, %v5676_v63  ;;  %v6869_v44 = vld [vmem:[#allocation4 + $0x80] sm:$0xff] }
 0x57a   : > { %19362 = vst [vmem:[#allocation51_spill] sm:$0xff] %v16910_v21  ;;  %19363 = vst [vmem:[#allocation52_spill] sm:$0xff] %v16913_v41  ;;  %v6127_v35 = vrot.slane %v16910_v21, 4  ;;  %v6125_v31 = vrot.slane %v16913_v41, 4  ;;  %v5289_v59 = vld [vmem:[#allocation4 + $0x8] sm:$0xfc]  ;;  %11075 = vmatpush1.bf16.msra.mxu0 %v11074_v12  ;;  %v16947_v7 = vadd.f32 %v5788_v27, %v5758_v60  ;;  %v11080_v41 = vpack.c.bf16 %v5683_v45, %v5681_v29 }
 0x57b   : > { %v6135_v24 = vrot.slane %v5811_v32, 4  ;;  %v6870_v9 = vld [vmem:[#allocation4 + $0x88] sm:$0xff]  ;;  %11077 = vmatprep.subr.bf16.mxu0 %v11076_v50  ;;  %v6143_v39 = vrot.slane %v16921_v34, 4  ;;  %v11082_v21 = vpack.c.bf16 %v5682_v1, %v5680_v13  ;;  %v6133_v27 = vrot.slane %v16924_v23, 4  ;;  %v16957_v60 = vld [vmem:[#allocation4 + $0xc0] sm:$0xff]  ;;  %v5684_v45 = vld [vmem:[%s19091_s3 + $0x1e0] sm:$0xff] }
 0x57c   : > { %v6128_v25 = vsel %vm3230_vm4, %v6119_v52, %v6127_v35  ;;  %v16951_v26 = vld [vmem:[#allocation4 + $0xc8] sm:$0xff]  ;;  %v6126_v12 = vsel %vm3230_vm4, %v6117_v19, %v6125_v31  ;;  %v11084_v63 = vpack.c.bf16 %v16945_v0, %v16940_v48  ;;  %v5367_v36 = vrot.slane %v5289_v59, 2  ;;  %v5686_v13 = vld [vmem:[%s19091_s3 + $0x1f0] sm:$0xff] }
 0x57d   : > { %6512 = vmatprep.mubr.f32.mxu0 %v6128_v25  ;;  %v6136_v52 = vsel %vm3230_vm4, %v6127_v35, %v6135_v24  ;;  %v7015_v50 = vrot.slane %v6870_v9, 2  ;;  %v7013_v29 = vrot.slane %v6869_v44, 2  ;;  %v7023_v34 = vrot.slane %v6874_v61, 2  ;;  %v6882_v59 = vld [vmem:[#allocation4 + $0xe8] sm:$0xff] }
 0x57e   : > { %6513 = vmatmul.mubr.f32.gmra.mrb[58].mxu0 %v6126_v12  ;;  %v6141_v25 = vrot.slane %v16947_v7, 4  ;;  %v5364_v32 = vrot.slane %v5288_v53, 2  ;;  %v7021_v19 = vrot.slane %v6873_v14, 2  ;;  %v7031_v23 = vrot.slane %v16951_v26, 2  ;;  %v5689_v12 = vld [vmem:[%s19091_s3 + $0x208] sm:$0xff] }
 0x57f   : > { %6518 = vmatprep.mubr.f32.mxu0 %v6136_v52  ;;  %11079 = vmatpush1.bf16.msra.mxu0 %v11078_v5  ;;  %v19364_v1 = vrot.slane %v16690_v51, 2  ;;  %v19366_v48 = vrot.slane %v16836_v11, 2  ;;  %v7029_v0 = vrot.slane %v16957_v60, 2  ;;  %v6134_v5 = vsel %vm3230_vm4, %v6125_v31, %v6133_v27  ;;  %v5691_v52 = vld [vmem:[%s19091_s3 + $0x218] sm:$0xff] }
 0x580   : > { %11081 = vmatprep.subr.bf16.mxu0 %v11080_v41  ;;  %v16979_v41 = vsel %vm2302_vm3, %v7015_v50, %v7023_v34  ;;  %v5369_v7 = vsel %vm2302_vm3, %v5367_v36, %v15958_v10  ;;  %v6144_v31 = vsel %vm3230_vm4, %v6135_v24, %v6143_v39  ;;  %v5225_v10 = vld [vmem:[#allocation4 + $0x8] sm:$0xff]  ;;  %v17007_v56 = vsel %vm2302_vm3, %v7023_v34, %v7031_v23  ;;  %v5688_v39 = vld [vmem:[%s19091_s3 + $0x200] sm:$0xff] }
 0x581   : > { %v16971_v35 = vsel %vm2302_vm3, %v19364_v1, %v7015_v50  ;;  %v16976_v53 = vsel %vm2302_vm3, %v19366_v48, %v7013_v29  ;;  %19368 = vst [vmem:[#allocation55_spill] sm:$0xff] %v16979_v41  ;;  %v17001_v36 = vadd.f32 %v16979_v41, %v6870_v9  ;;  %v17004_v48 = vsel %vm2302_vm3, %v7013_v29, %v7021_v19  ;;  %v6886_v29 = vld [vmem:[#allocation4 + $0x108] sm:$0xff] }
 0x582   : > { %19365 = vst [vmem:[#allocation53_spill] sm:$0xff] %v16971_v35  ;;  %19367 = vst [vmem:[#allocation54_spill] sm:$0xff] %v16976_v53  ;;  %v16993_v50 = vadd.f32 %v16971_v35, %v16690_v51  ;;  %v16997_v1 = vadd.f32 %v16976_v53, %v16836_v11  ;;  %6519 = vmatmul.mubr.f32.gmra.mrb[60].mxu0 %v6134_v5  ;;  %v11086_v51 = vpack.c.bf16 %v5686_v13, %v5684_v45  ;;  %v6885_v5 = vld [vmem:[#allocation4 + $0x100] sm:$0xff]  ;;  %v6914_v35 = vld [vmem:[#allocation4 + $0x1e8] sm:$0xff] }
 0x583   : > { %19369 = vst [vmem:[#allocation56_spill] sm:$0xff] %v17004_v48  ;;  %19370 = vst [vmem:[#allocation57_spill] sm:$0xff] %v17007_v56  ;;  %6524 = vmatprep.mubr.f32.mxu0 %v6144_v31  ;;  %11083 = vmatpush1.bf16.msra.mxu0 %v11082_v21  ;;  %v5366_v11 = vsel %vm2302_vm3, %v5364_v32, %v15956_v37  ;;  %v17015_v24 = vadd.f32 %v17004_v48, %v6869_v44  ;;  %v7039_v9 = vrot.slane %v6882_v59, 2  ;;  %v5690_v21 = vld [vmem:[%s19091_s3 + $0x210] sm:$0xff]  ;;  %v6890_v32 = vld [vmem:[#allocation4 + $0x128] sm:$0xff] }
 0x584   : > { %11085 = vmatprep.subr.bf16.mxu0 %v11084_v63  ;;  %v5561_v34 = vadd.f32 %v5369_v7, %v5225_v10  ;;  %v11088_v41 = vpack.c.bf16 %v5691_v52, %v5689_v12  ;;  %v17021_v45 = vadd.f32 %v17007_v56, %v6874_v61  ;;  %v17024_v37 = vsel %vm2302_vm3, %v7021_v19, %v7029_v0  ;;  %v6889_v13 = vld [vmem:[#allocation4 + $0x120] sm:$0xff]  ;;  %v5693_v63 = vld [vmem:[%s19091_s3 + $0x228] sm:$0xff]  ;;  %v5695_v7 = vld [vmem:[%s19091_s3 + $0x238] sm:$0xff] }
 0x585   : > { %19371 = vst [vmem:[#allocation58_spill] sm:$0xff] %v17024_v37  ;;  %v6142_v44 = vsel %vm3230_vm4, %v6133_v27, %v6141_v25  ;;  %v17034_v12 = vadd.f32 %v17024_v37, %v6873_v14  ;;  %v17037_v61 = vsel %vm2302_vm3, %v7031_v23, %v7039_v9  ;;  %v7037_v19 = vrot.slane %v6881_v6, 2  ;;  %v5224_v31 = vld [vmem:[#allocation4] sm:$0xff]  ;;  %v5692_v14 = vld [vmem:[%s19091_s3 + $0x220] sm:$0xff] }
 0x586   : > { %19372 = vst [vmem:[#allocation59_spill] sm:$0xff] %v17037_v61  ;;  %6525 = vmatmul.mubr.f32.gmra.mrb[62].mxu0 %v6142_v44  ;;  %v17041_v52 = vadd.f32 %v17037_v61, %v16951_v26  ;;  %v7047_v27 = vrot.slane %v6886_v29, 2  ;;  %v7045_v25 = vrot.slane %v6885_v5, 2  ;;  %v11090_v10 = vpack.c.bf16 %v5690_v21, %v5688_v39  ;;  %v5694_v26 = vld [vmem:[%s19091_s3 + $0x230] sm:$0xff]  ;;  %v6902_v61 = vld [vmem:[#allocation4 + $0x188] sm:$0xff] }
 0x587   : > { %11087 = vmatpush1.bf16.msra.mxu0 %v11086_v51  ;;  %6595 = vmatprep.mubr.f32.mxu0 %v5561_v34  ;;  %v17047_v37 = vsel %vm2302_vm3, %v7029_v0, %v7037_v19  ;;  %v7055_v23 = vrot.slane %v6890_v32, 2  ;;  %v7053_v56 = vrot.slane %v6889_v13, 2  ;;  %v5560_v44 = vadd.f32 %v5366_v11, %v5224_v31  ;;  %v6894_v34 = vld [vmem:[#allocation4 + $0x148] sm:$0xff]  ;;  %v6893_v21 = vld [vmem:[#allocation4 + $0x140] sm:$0xff]  ;;  %v5697_v0 = vld [vmem:[%s19091_s3 + $0x248] sm:$0xff] }
 0x588   : > { %19373 = vst [vmem:[#allocation60_spill] sm:$0xff] %v17047_v37  ;;  %11089 = vmatprep.subr.bf16.mxu0 %v11088_v41  ;;  %v11092_v48 = vpack.c.bf16 %v5695_v7, %v5693_v63  ;;  %v17054_v51 = vadd.f32 %v17047_v37, %v16957_v60  ;;  %v17057_v39 = vsel %vm2302_vm3, %v7039_v9, %v7047_v27  ;;  %v5699_v41 = vld [vmem:[%s19091_s3 + $0x258] sm:$0xff]  ;;  %v6897_v37 = vld [vmem:[#allocation4 + $0x160] sm:$0xff] }
 0x589   : > { %19374 = vst [vmem:[#allocation61_spill] sm:$0xff] %v17057_v39  ;;  %v17066_v11 = vadd.f32 %v17057_v39, %v6882_v59  ;;  %v17069_v63 = vsel %vm2302_vm3, %v7037_v19, %v7045_v25  ;;  %v17072_v60 = vsel %vm2302_vm3, %v7047_v27, %v7055_v23  ;;  %v6898_v9 = vld [vmem:[#allocation4 + $0x168] sm:$0xff]  ;;  %v11094_v59 = vpack.c.bf16 %v5694_v26, %v5692_v14 }
 0x58a   : > { %19375 = vst [vmem:[#allocation62_spill] sm:$0xff] %v17069_v63  ;;  %19376 = vst [vmem:[#allocation63_spill] sm:$0xff] %v17072_v60  ;;  %6596 = vmatmul.mubr.f32.vlgmr.msra.gmra.mrb[32].mxu0 %v5560_v44  ;;  %v17075_v7 = vadd.f32 %v17069_v63, %v6881_v6  ;;  %v17078_v31 = vadd.f32 %v17072_v60, %v6886_v29  ;;  %v17082_v19 = vsel %vm2302_vm3, %v7045_v25, %v7053_v56  ;;  %v5696_v6 = vld [vmem:[%s19091_s3 + $0x240] sm:$0xff]  ;;  %v5698_v29 = vld [vmem:[%s19091_s3 + $0x250] sm:$0xff] }
 0x58b   : > { %6601 = vmatprep.mubr.f32.mxu0 %v15970_v8  ;;  %11091 = vmatpush1.bf16.msra.mxu0 %v11090_v10  ;;  %19377 = vst [vmem:[#allocation64_spill] sm:$0xff] %v17082_v19  ;;  %v7063_v39 = vrot.slane %v6894_v34, 2  ;;  %v7061_v27 = vrot.slane %v6893_v21, 2  ;;  %v11096_v53 = vpack.c.bf16 %v5699_v41, %v5697_v0  ;;  %v17091_v44 = vadd.f32 %v17082_v19, %v6885_v5  ;;  %v6901_v10 = vld [vmem:[#allocation4 + $0x180] sm:$0xff]  ;;  %v5701_v25 = vld [vmem:[%s19091_s3 + $0x268] sm:$0xff]  ;;  %v6906_v60 = vld [vmem:[#allocation4 + $0x1a8] sm:$0xff] }
 0x58c   : > { %11093 = vmatprep.subr.bf16.mxu0 %v11092_v48  ;;  %v7071_v8 = vrot.slane %v6898_v9, 2  ;;  %v5703_v48 = vld [vmem:[%s19091_s3 + $0x278] sm:$0xff]  ;;  %v7069_v0 = vrot.slane %v6897_v37, 2  ;;  %v7079_v41 = vrot.slane %v6902_v61, 2  ;;  %v11098_v63 = vpack.c.bf16 %v5698_v29, %v5696_v6 }
 0x58d   : > { %v17100_v14 = vsel %vm2302_vm3, %v7055_v23, %v7063_v39  ;;  %v17103_v26 = vsel %vm2302_vm3, %v7053_v56, %v7061_v27  ;;  %v5700_v56 = vld [vmem:[%s19091_s3 + $0x260] sm:$0xff]  ;;  %v6910_v6 = vld [vmem:[#allocation4 + $0x1c8] sm:$0xff] }
 0x58e   : > { %19378 = vst [vmem:[#allocation65_spill] sm:$0xff] %v17100_v14  ;;  %19379 = vst [vmem:[#allocation66_spill] sm:$0xff] %v17103_v26  ;;  %6602 = vmatmul.mubr.f32.gmra.mrb[34].mxu0 %v15968_v20  ;;  %v17107_v5 = vadd.f32 %v17100_v14, %v6890_v32  ;;  %v17110_v19 = vadd.f32 %v17103_v26, %v6889_v13  ;;  %v17117_v23 = vsel %vm2302_vm3, %v7063_v39, %v7071_v8  ;;  %v5702_v13 = vld [vmem:[%s19091_s3 + $0x270] sm:$0xff]  ;;  %v5705_v39 = vld [vmem:[%s19091_s3 + $0x288] sm:$0xff] }
 0x58f   : > { %6607 = vmatprep.mubr.f32.mxu0 %v15992_v46  ;;  %11095 = vmatpush1.bf16.msra.mxu0 %v11094_v59  ;;  %19380 = vst [vmem:[#allocation67_spill] sm:$0xff] %v17117_v23  ;;  %v17120_v20 = vsel %vm2302_vm3, %v7061_v27, %v7069_v0  ;;  %v7077_v32 = vrot.slane %v6901_v10, 2  ;;  %v11100_v14 = vpack.c.bf16 %v5703_v48, %v5701_v25  ;;  %v6905_v59 = vld [vmem:[#allocation4 + $0x1a0] sm:$0xff]  ;;  %v5707_v27 = vld [vmem:[%s19091_s3 + $0x298] sm:$0xff] }
 0x590   : > { %19381 = vst [vmem:[#allocation68_spill] sm:$0xff] %v17120_v20  ;;  %11097 = vmatprep.subr.bf16.mxu0 %v11096_v53  ;;  %v17126_v46 = vadd.f32 %v17117_v23, %v6894_v34  ;;  %v17135_v53 = vadd.f32 %v17120_v20, %v6893_v21  ;;  %v17138_v29 = vsel %vm2302_vm3, %v7071_v8, %v7079_v41  ;;  %v7087_v34 = vrot.slane %v6906_v60, 2  ;;  %v6909_v48 = vld [vmem:[#allocation4 + $0x1c0] sm:$0xff] }
 0x591   : > { %19384 = vst [vmem:[#allocation71_spill] sm:$0xff] %v17138_v29  ;;  %v17141_v25 = vsel %vm2302_vm3, %v7069_v0, %v7077_v32  ;;  %v17145_v23 = vadd.f32 %v17138_v29, %v6898_v9  ;;  %v11102_v21 = vpack.c.bf16 %v5702_v13, %v5700_v56  ;;  %v7085_v0 = vrot.slane %v6905_v59, 2 }
 0x592   : > { %19382 = vst [vmem:[#allocation69_spill] sm:$0xff] %v17126_v46  ;;  %19383 = vst [vmem:[#allocation70_spill] sm:$0xff] %v17135_v53  ;;  %6608 = vmatmul.mubr.f32.gmra.mrb[36].mxu0 %v15994_v3  ;;  %v17148_v26 = vadd.f32 %v17141_v25, %v6897_v37  ;;  %v6913_v46 = vld [vmem:[#allocation4 + $0x1e0] sm:$0xff]  ;;  %v17152_v8 = vsel %vm2302_vm3, %v7079_v41, %v7087_v34  ;;  %v7095_v20 = vrot.slane %v6910_v6, 2  ;;  %v5704_v3 = vld [vmem:[%s19091_s3 + $0x280] sm:$0xff]  ;;  %v7103_v13 = vrot.slane %v6914_v35, 2 }
 0x593   : > { %19385 = vst [vmem:[#allocation72_spill] sm:$0xff] %v17141_v25  ;;  %6613 = vmatprep.mubr.f32.mxu0 %v16018_v33  ;;  %11099 = vmatpush1.bf16.msra.mxu0 %v11098_v63  ;;  %19386 = vst [vmem:[#allocation73_spill] sm:$0xff] %v17152_v8  ;;  %v11104_v53 = vpack.c.bf16 %v5707_v27, %v5705_v39  ;;  %v5706_v37 = vld [vmem:[%s19091_s3 + $0x290] sm:$0xff]  ;;  %v17161_v9 = vadd.f32 %v17152_v8, %v6902_v61  ;;  %v7093_v33 = vrot.slane %v6909_v48, 2  ;;  %v5709_v63 = vld [vmem:[%s19091_s3 + $0x2a8] sm:$0xff] }
 0x594   : > { %11101 = vmatprep.subr.bf16.mxu0 %v11100_v14  ;;  %v5711_v14 = vld [vmem:[%s19091_s3 + $0x2b8] sm:$0xff]  ;;  %v17170_v41 = vsel %vm2302_vm3, %v7077_v32, %v7085_v0  ;;  %v17173_v56 = vsel %vm2302_vm3, %v7087_v34, %v7095_v20  ;;  %v7101_v39 = vrot.slane %v6913_v46, 2  ;;  %v11106_v8 = vpack.c.bf16 %v5706_v37, %v5704_v3  ;;  %v12260_v25 = vld [vmem:[#allocation3 + $0x100] sm:$0xff]  ;;  %v6864_v3 = vld [vmem:[#allocation4 + $0x58] sm:$0xff] }
 0x595   : > { %19387 = vst [vmem:[#allocation74_spill] sm:$0xff] %v17170_v41  ;;  %19388 = vst [vmem:[#allocation75_spill] sm:$0xff] %v17173_v56  ;;  %v17177_v61 = vadd.f32 %v17170_v41, %v6901_v10  ;;  %v17180_v27 = vadd.f32 %v17173_v56, %v6906_v60  ;;  %v17184_v32 = vsel %vm2302_vm3, %v7085_v0, %v7093_v33  ;;  %v17189_v29 = vrot.slane %v12260_v25, 2  ;;  %v5708_v60 = vld [vmem:[%s19091_s3 + $0x2a0] sm:$0xff]  ;;  %v6876_v56 = vld [vmem:[#allocation4 + $0xb8] sm:$0xff] }
 0x596   : > { %6614 = vmatmul.mubr.f32.gmra.mrb[38].mxu0 %v16020_v57  ;;  %19389 = vst [vmem:[#allocation76_spill] sm:$0xff] %v17184_v32  ;;  %v17187_v34 = vsel %vm2302_vm3, %v7095_v20, %v7103_v13  ;;  %v11108_v57 = vpack.c.bf16 %v5711_v14, %v5709_v63  ;;  %v17198_v10 = vadd.f32 %v17184_v32, %v6905_v59  ;;  %v5713_v20 = vld [vmem:[%s19091_s3 + $0x2c8] sm:$0xff]  ;;  %v5712_v37 = vld [vmem:[%s19091_s3 + $0x2c0] sm:$0xff] }
 0x597   : > { %6619 = vmatprep.mubr.f32.mxu0 %v16044_v38  ;;  %11103 = vmatpush1.bf16.msra.mxu0 %v11102_v21  ;;  %19390 = vst [vmem:[#allocation77_spill] sm:$0xff] %v17187_v34  ;;  %v5710_v38 = vld [vmem:[%s19091_s3 + $0x2b0] sm:$0xff]  ;;  %v17207_v25 = vadd.f32 %v17187_v34, %v6910_v6  ;;  %v17210_v21 = vsel %vm2302_vm3, %v7093_v33, %v7101_v39  ;;  %v6868_v63 = vld [vmem:[#allocation4 + $0x78] sm:$0xff]  ;;  %v6867_v14 = vld [vmem:[#allocation4 + $0x70] sm:$0xff] }
 0x598   : > { %11105 = vmatprep.subr.bf16.mxu0 %v11104_v53  ;;  %19391 = vst [vmem:[#allocation78_spill] sm:$0xff] %v17198_v10  ;;  %v5715_v53 = vld [vmem:[%s19091_s3 + $0x2d8] sm:$0xff]  ;;  %19393 = vst [vmem:[#allocation80_spill] sm:$0xff] %v17210_v21  ;;  %v17214_v0 = vsel %vm2302_vm3, %v7103_v13, %v17189_v29  ;;  %v17218_v59 = vsel %vm2302_vm3, %v7101_v39, %v17189_v29  ;;  %v17225_v6 = vadd.f32 %v17210_v21, %v6909_v48  ;;  %v6872_v13 = vld [vmem:[#allocation4 + $0x98] sm:$0xff] }
 0x599   : > { %19392 = vst [vmem:[#allocation79_spill] sm:$0xff] %v17207_v25  ;;  %19394 = vst [vmem:[#allocation81_spill] sm:$0xff] %v17214_v0  ;;  %v17228_v33 = vadd.f32 %v17214_v0, %v6914_v35  ;;  %v11110_v39 = vpack.c.bf16 %v5710_v38, %v5708_v60  ;;  %v17232_v34 = vadd.f32 %v17218_v59, %v6913_v46  ;;  %v6871_v32 = vld [vmem:[#allocation4 + $0x90] sm:$0xff]  ;;  %v5714_v35 = vld [vmem:[%s19091_s3 + $0x2d0] sm:$0xff]  ;;  %v7009_v46 = vrot.slane %v6867_v14, 2 }
 0x59a   : > { %19395 = vst [vmem:[#allocation82_spill] sm:$0xff] %v17218_v59  ;;  %6620 = vmatmul.mubr.f32.gmra.mrb[40].mxu0 %v16047_v17  ;;  %19396 = vst [vmem:[#allocation83_spill] sm:$0xff] %v17225_v6  ;;  %v6863_v17 = vld [vmem:[#allocation4 + $0x50] sm:$0xff]  ;;  %v11112_v41 = vpack.c.bf16 %v5715_v53, %v5713_v20  ;;  %v5717_v48 = vld [vmem:[%s19091_s3 + $0x2e8] sm:$0xff]  ;;  %v7019_v60 = vrot.slane %v6872_v13, 2  ;;  %v7017_v53 = vrot.slane %v6871_v32, 2  ;;  %v11114_v21 = vpack.c.bf16 %v5714_v35, %v5712_v37 }
 0x59b   : > { %19397 = vst [vmem:[#allocation84_spill] sm:$0xff] %v17228_v33  ;;  %6625 = vmatprep.mubr.f32.mxu0 %v16071_v40  ;;  %11107 = vmatpush1.bf16.msra.mxu0 %v11106_v8  ;;  %19398 = vst [vmem:[#allocation85_spill] sm:$0xff] %v17232_v34  ;;  %v5719_v40 = vld [vmem:[%s19091_s3 + $0x2f8] sm:$0xff]  ;;  %v7011_v8 = vrot.slane %v6868_v63, 2  ;;  %v6875_v38 = vld [vmem:[#allocation4 + $0xb0] sm:$0xff]  ;;  %v17246_v20 = vrot.slane %v6863_v17, 2 }
 0x59c   : > { %11109 = vmatprep.subr.bf16.mxu0 %v11108_v57  ;;  %v17244_v57 = vrot.slane %v6864_v3, 2  ;;  %v7027_v59 = vrot.slane %v6876_v56, 2  ;;  %v6880_v0 = vld [vmem:[#allocation4 + $0xd8] sm:$0xff]  ;;  %v11116_v34 = vpack.c.bf16 %v5719_v40, %v5717_v48  ;;  %v5716_v33 = vld [vmem:[%s19091_s3 + $0x2e0] sm:$0xff] }
 0x59d   : > { %19400 = vst [vmem:[#allocation87_spill] sm:$0xff] %v17246_v20  ;;  %v17261_v25 = vsel %vm2302_vm3, %v17246_v20, %v7009_v46  ;;  %v5721_v37 = vld [vmem:[%s19091_s3 + $0x308] sm:$0xff]  ;;  %v7035_v40 = vrot.slane %v6880_v0, 2  ;;  %v17283_v20 = vsel %vm2302_vm3, %v7009_v46, %v7017_v53  ;;  %v6879_v10 = vld [vmem:[#allocation4 + $0xd0] sm:$0xff] }
 0x59e   : > { %6626 = vmatmul.mubr.f32.gmra.mrb[42].mxu0 %v16074_v28  ;;  %19399 = vst [vmem:[#allocation86_spill] sm:$0xff] %v17244_v57  ;;  %v5718_v28 = vld [vmem:[%s19091_s3 + $0x2f0] sm:$0xff]  ;;  %v17257_v6 = vsel %vm2302_vm3, %v17244_v57, %v7011_v8  ;;  %19402 = vst [vmem:[#allocation89_spill] sm:$0xff] %v17261_v25  ;;  %v17276_v48 = vadd.f32 %v17261_v25, %v6863_v17  ;;  %v17286_v57 = vsel %vm2302_vm3, %v7019_v60, %v7027_v59  ;;  %v5720_v17 = vld [vmem:[%s19091_s3 + $0x300] sm:$0xff] }
 0x59f   : > { %6631 = vmatprep.mubr.f32.mxu0 %v16098_v2  ;;  %11111 = vmatpush1.bf16.msra.mxu0 %v11110_v39  ;;  %19401 = vst [vmem:[#allocation88_spill] sm:$0xff] %v17257_v6  ;;  %v17264_v2 = vsel %vm2302_vm3, %v7011_v8, %v7019_v60  ;;  %v5723_v39 = vld [vmem:[%s19091_s3 + $0x318] sm:$0xff]  ;;  %v17273_v35 = vadd.f32 %v17257_v6, %v6864_v3  ;;  %19404 = vst [vmem:[#allocation91_spill] sm:$0xff] %v17283_v20  ;;  %v5722_v60 = vld [vmem:[%s19091_s3 + $0x310] sm:$0xff] }
 0x5a0   : > { %11113 = vmatprep.subr.bf16.mxu0 %v11112_v41  ;;  %19403 = vst [vmem:[#allocation90_spill] sm:$0xff] %v17264_v2  ;;  %v7025_v41 = vrot.slane %v6875_v38, 2  ;;  %v17280_v8 = vadd.f32 %v17264_v2, %v6868_v63  ;;  %19405 = vst [vmem:[#allocation92_spill] sm:$0xff] %v17286_v57  ;;  %v11118_v3 = vpack.c.bf16 %v5718_v28, %v5716_v33  ;;  %v6884_v63 = vld [vmem:[#allocation4 + $0xf8] sm:$0xff]  ;;  %v6883_v2 = vld [vmem:[#allocation4 + $0xf0] sm:$0xff] }
 0x5a1   : > { %v11120_v46 = vpack.c.bf16 %v5723_v39, %v5721_v37  ;;  %v17299_v25 = vadd.f32 %v17286_v57, %v6872_v13  ;;  %v6887_v33 = vld [vmem:[#allocation4 + $0x110] sm:$0xff]  ;;  %v17314_v37 = vsel %vm2302_vm3, %v7027_v59, %v7035_v40  ;;  %v7033_v13 = vrot.slane %v6879_v10, 2 }
 0x5a2   : > { %6632 = vmatmul.mubr.f32.gmra.mrb[44].mxu0 %v16101_v22  ;;  %v17293_v22 = vadd.f32 %v17283_v20, %v6867_v14  ;;  %v5725_v14 = vld [vmem:[%s19091_s3 + $0x328] sm:$0xff]  ;;  %19407 = vst [vmem:[#allocation94_spill] sm:$0xff] %v17314_v37  ;;  %v7043_v39 = vrot.slane %v6884_v63, 2  ;;  %v7041_v57 = vrot.slane %v6883_v2, 2  ;;  %v11122_v20 = vpack.c.bf16 %v5722_v60, %v5720_v17  ;;  %v6891_v17 = vld [vmem:[#allocation4 + $0x130] sm:$0xff] }
 0x5a3   : > { %6637 = vmatprep.mubr.f32.mxu0 %v16125_v18  ;;  %11115 = vmatpush1.bf16.msra.mxu0 %v11114_v21  ;;  %v17302_v18 = vsel %vm2302_vm3, %v7017_v53, %v7025_v41  ;;  %v6888_v21 = vld [vmem:[#allocation4 + $0x118] sm:$0xff]  ;;  %v17318_v53 = vadd.f32 %v17314_v37, %v6876_v56  ;;  %v7049_v6 = vrot.slane %v6887_v33, 2  ;;  %v5726_v56 = vld [vmem:[%s19091_s3 + $0x330] sm:$0xff] }
 0x5a4   : > { %11117 = vmatprep.subr.bf16.mxu0 %v11116_v34  ;;  %19406 = vst [vmem:[#allocation93_spill] sm:$0xff] %v17302_v18  ;;  %v5727_v34 = vld [vmem:[%s19091_s3 + $0x338] sm:$0xff]  ;;  %v17311_v28 = vadd.f32 %v17302_v18, %v6871_v32  ;;  %v5724_v32 = vld [vmem:[%s19091_s3 + $0x320] sm:$0xff]  ;;  %v17325_v18 = vsel %vm2302_vm3, %v7025_v41, %v7033_v13  ;;  %v7051_v59 = vrot.slane %v6888_v21, 2  ;;  %v5729_v41 = vld [vmem:[%s19091_s3 + $0x348] sm:$0xff] }
 0x5a5   : > { %19408 = vst [vmem:[#allocation95_spill] sm:$0xff] %v17318_v53  ;;  %19409 = vst [vmem:[#allocation96_spill] sm:$0xff] %v17325_v18  ;;  %v17331_v37 = vadd.f32 %v17325_v18, %v6875_v38  ;;  %v6900_v53 = vld [vmem:[#allocation4 + $0x178] sm:$0xff] }
 0x5a6   : > { %6638 = vmatmul.mubr.f32.gmra.mrb[46].mxu0 %v16128_v54  ;;  %v11124_v54 = vpack.c.bf16 %v5727_v34, %v5725_v14  ;;  %v17346_v14 = vsel %vm2302_vm3, %v7033_v13, %v7041_v57  ;;  %v17349_v38 = vsel %vm2302_vm3, %v7043_v39, %v7051_v59  ;;  %v17360_v13 = vsel %vm2302_vm3, %v7041_v57, %v7049_v6  ;;  %v5733_v57 = vld [vmem:[%s19091_s3 + $0x368] sm:$0xff] }
 0x5a7   : > { %6643 = vmatprep.mubr.f32.mxu0 %v16152_v47  ;;  %11119 = vmatpush1.bf16.msra.mxu0 %v11118_v3  ;;  %19410 = vst [vmem:[#allocation97_spill] sm:$0xff] %v17331_v37  ;;  %v17334_v47 = vsel %vm2302_vm3, %v7035_v40, %v7043_v39  ;;  %v6892_v3 = vld [vmem:[#allocation4 + $0x138] sm:$0xff]  ;;  %19413 = vst [vmem:[#allocation100_spill] sm:$0xff] %v17346_v14  ;;  %v17353_v34 = vadd.f32 %v17346_v14, %v6879_v10  ;;  %v6895_v37 = vld [vmem:[#allocation4 + $0x150] sm:$0xff] }
 0x5a8   : > { %11121 = vmatprep.subr.bf16.mxu0 %v11120_v46  ;;  %19411 = vst [vmem:[#allocation98_spill] sm:$0xff] %v17334_v47  ;;  %v5731_v46 = vld [vmem:[%s19091_s3 + $0x358] sm:$0xff]  ;;  %v17343_v60 = vadd.f32 %v17334_v47, %v6880_v0  ;;  %19414 = vst [vmem:[#allocation101_spill] sm:$0xff] %v17349_v38  ;;  %v6896_v40 = vld [vmem:[#allocation4 + $0x158] sm:$0xff]  ;;  %v17356_v18 = vadd.f32 %v17349_v38, %v6884_v63  ;;  %v11126_v0 = vpack.c.bf16 %v5726_v56, %v5724_v32 }
 0x5a9   : > { %19415 = vst [vmem:[#allocation102_spill] sm:$0xff] %v17360_v13  ;;  %v7059_v39 = vrot.slane %v6892_v3, 2  ;;  %v7057_v47 = vrot.slane %v6891_v17, 2  ;;  %v5730_v10 = vld [vmem:[%s19091_s3 + $0x350] sm:$0xff]  ;;  %v17369_v63 = vadd.f32 %v17360_v13, %v6883_v2  ;;  %v5735_v32 = vld [vmem:[%s19091_s3 + $0x378] sm:$0xff]  ;;  %v6904_v38 = vld [vmem:[#allocation4 + $0x198] sm:$0xff] }
 0x5aa   : > { %19412 = vst [vmem:[#allocation99_spill] sm:$0xff] %v17343_v60  ;;  %6644 = vmatmul.mubr.f32.gmra.mrb[48].mxu0 %v16155_v55  ;;  %v11128_v60 = vpack.c.bf16 %v5731_v46, %v5729_v41  ;;  %v5728_v55 = vld [vmem:[%s19091_s3 + $0x340] sm:$0xff]  ;;  %v7065_v41 = vrot.slane %v6895_v37, 2  ;;  %v7075_v46 = vrot.slane %v6900_v53, 2 }
 0x5ab   : > { %6649 = vmatprep.mubr.f32.mxu0 %v16179_v4  ;;  %11123 = vmatpush1.bf16.msra.mxu0 %v11122_v20  ;;  %v7067_v4 = vrot.slane %v6896_v40, 2  ;;  %v6899_v20 = vld [vmem:[#allocation4 + $0x170] sm:$0xff]  ;;  %v17381_v56 = vsel %vm2302_vm3, %v7049_v6, %v7057_v47  ;;  %v11130_v14 = vpack.c.bf16 %v5730_v10, %v5728_v55  ;;  %v6908_v55 = vld [vmem:[#allocation4 + $0x1b8] sm:$0xff] }
 0x5ac   : > { %11125 = vmatprep.subr.bf16.mxu0 %v11124_v54  ;;  %v17378_v54 = vsel %vm2302_vm3, %v7051_v59, %v7059_v39  ;;  %19417 = vst [vmem:[#allocation104_spill] sm:$0xff] %v17381_v56  ;;  %v17388_v13 = vadd.f32 %v17381_v56, %v6887_v33  ;;  %v5732_v6 = vld [vmem:[%s19091_s3 + $0x360] sm:$0xff]  ;;  %v5734_v33 = vld [vmem:[%s19091_s3 + $0x370] sm:$0xff] }
 0x5ad   : > { %19416 = vst [vmem:[#allocation103_spill] sm:$0xff] %v17378_v54  ;;  %v17385_v2 = vadd.f32 %v17378_v54, %v6888_v21  ;;  %v17395_v59 = vsel %vm2302_vm3, %v7059_v39, %v7067_v4  ;;  %v7073_v21 = vrot.slane %v6899_v20, 2  ;;  %v11132_v54 = vpack.c.bf16 %v5735_v32, %v5733_v57  ;;  %v5737_v39 = vld [vmem:[%s19091_s3 + $0x388] sm:$0xff]  ;;  %v6907_v32 = vld [vmem:[#allocation4 + $0x1b0] sm:$0xff] }
 0x5ae   : > { %6650 = vmatmul.mubr.f32.gmra.mrb[50].mxu0 %v16182_v42  ;;  %19418 = vst [vmem:[#allocation105_spill] sm:$0xff] %v17388_v13  ;;  %19419 = vst [vmem:[#allocation106_spill] sm:$0xff] %v17395_v59  ;;  %v17398_v42 = vsel %vm2302_vm3, %v7057_v47, %v7065_v41  ;;  %v5739_v47 = vld [vmem:[%s19091_s3 + $0x398] sm:$0xff]  ;;  %v17416_v10 = vsel %vm2302_vm3, %v7067_v4, %v7075_v46  ;;  %v6911_v13 = vld [vmem:[#allocation4 + $0x1d0] sm:$0xff] }
 0x5af   : > { %6655 = vmatprep.mubr.f32.mxu0 %v16206_v30  ;;  %11127 = vmatpush1.bf16.msra.mxu0 %v11126_v0  ;;  %19420 = vst [vmem:[#allocation107_spill] sm:$0xff] %v17398_v42  ;;  %v17404_v30 = vadd.f32 %v17395_v59, %v6892_v3  ;;  %v6903_v0 = vld [vmem:[#allocation4 + $0x190] sm:$0xff]  ;;  %19423 = vst [vmem:[#allocation110_spill] sm:$0xff] %v17416_v10  ;;  %v17419_v57 = vsel %vm2302_vm3, %v7065_v41, %v7073_v21  ;;  %v7083_v3 = vrot.slane %v6904_v38, 2 }
 0x5b0   : > { %11129 = vmatprep.subr.bf16.mxu0 %v11128_v60  ;;  %v17413_v60 = vadd.f32 %v17398_v42, %v6891_v17  ;;  %19424 = vst [vmem:[#allocation111_spill] sm:$0xff] %v17419_v57  ;;  %v17423_v59 = vadd.f32 %v17416_v10, %v6896_v40  ;;  %v17426_v56 = vadd.f32 %v17419_v57, %v6895_v37  ;;  %v7081_v41 = vrot.slane %v6903_v0, 2  ;;  %v5738_v37 = vld [vmem:[%s19091_s3 + $0x390] sm:$0xff]  ;;  %v6915_v10 = vld [vmem:[#allocation4 + $0x1f0] sm:$0xff] }
 0x5b1   : > { %19421 = vst [vmem:[#allocation108_spill] sm:$0xff] %v17404_v30  ;;  %v6912_v30 = vld [vmem:[#allocation4 + $0x1d8] sm:$0xff]  ;;  %v11134_v17 = vpack.c.bf16 %v5734_v33, %v5732_v6  ;;  %v17430_v4 = vsel %vm2302_vm3, %v7075_v46, %v7083_v3  ;;  %v7091_v42 = vrot.slane %v6908_v55, 2  ;;  %v5293_v6 = vld [vmem:[#allocation4 + $0x208] sm:$0x3] }
 0x5b2   : > { %19422 = vst [vmem:[#allocation109_spill] sm:$0xff] %v17413_v60  ;;  %6656 = vmatmul.mubr.f32.gmra.mrb[52].mxu0 %v16209_v49  ;;  %19425 = vst [vmem:[#allocation112_spill] sm:$0xff] %v17426_v56  ;;  %v11136_v60 = vpack.c.bf16 %v5739_v47, %v5737_v39  ;;  %v5736_v49 = vld [vmem:[%s19091_s3 + $0x380] sm:$0xff]  ;;  %v17439_v40 = vadd.f32 %v17430_v4, %v6900_v53  ;;  %v5741_v46 = vld [vmem:[%s19091_s3 + $0x3a8] sm:$0xff]  ;;  %v17448_v33 = vsel %vm2302_vm3, %v7073_v21, %v7081_v41 }
 0x5b3   : > { %6661 = vmatprep.mubr.f32.mxu0 %v16235_v43  ;;  %11131 = vmatpush1.bf16.msra.mxu0 %v11130_v14  ;;  %19426 = vst [vmem:[#allocation113_spill] sm:$0xff] %v17430_v4  ;;  %v7089_v43 = vrot.slane %v6907_v32, 2  ;;  %v6916_v14 = vld [vmem:[#allocation4 + $0x1f8] sm:$0xff]  ;;  %v17451_v39 = vsel %vm2302_vm3, %v7083_v3, %v7091_v42  ;;  %v7099_v47 = vrot.slane %v6912_v30, 2  ;;  %v7097_v53 = vrot.slane %v6911_v13, 2 }
 0x5b4   : > { %11133 = vmatprep.subr.bf16.mxu0 %v11132_v54  ;;  %19427 = vst [vmem:[#allocation114_spill] sm:$0xff] %v17439_v40  ;;  %v5743_v54 = vld [vmem:[%s19091_s3 + $0x3b8] sm:$0xff]  ;;  %19428 = vst [vmem:[#allocation115_spill] sm:$0xff] %v17451_v39  ;;  %v17455_v4 = vadd.f32 %v17448_v33, %v6899_v20  ;;  %v17458_v57 = vadd.f32 %v17451_v39, %v6904_v38  ;;  %v11138_v40 = vpack.c.bf16 %v5738_v37, %v5736_v49  ;;  %v5740_v20 = vld [vmem:[%s19091_s3 + $0x3a0] sm:$0xff] }
 0x5b5   : > { %v17462_v21 = vsel %vm2302_vm3, %v7081_v41, %v7089_v43  ;;  %v17465_v3 = vsel %vm2302_vm3, %v7091_v42, %v7099_v47  ;;  %v7107_v56 = vrot.slane %v6916_v14, 2  ;;  %v5742_v38 = vld [vmem:[%s19091_s3 + $0x3b0] sm:$0xff]  ;;  %v5745_v42 = vld [vmem:[%s19091_s3 + $0x3c8] sm:$0xff]  ;;  %v17486_v49 = vsel %vm2302_vm3, %v7089_v43, %v7097_v53  ;;  %v5744_v43 = vld [vmem:[%s19091_s3 + $0x3c0] sm:$0xff] }
 0x5b6   : > { %6662 = vmatmul.mubr.f32.gmra.mrb[54].mxu0 %v16238_v58  ;;  %19429 = vst [vmem:[#allocation116_spill] sm:$0xff] %v17462_v21  ;;  %19430 = vst [vmem:[#allocation117_spill] sm:$0xff] %v17465_v3  ;;  %v11140_v58 = vpack.c.bf16 %v5743_v54, %v5741_v46  ;;  %v17483_v41 = vadd.f32 %v17465_v3, %v6908_v55  ;;  %v7105_v46 = vrot.slane %v6915_v10, 2 }
 0x5b7   : > { %6667 = vmatprep.mubr.f32.mxu0 %v16272_v62  ;;  %11135 = vmatpush1.bf16.msra.mxu0 %v11134_v17  ;;  %v5490_v62 = vrot.slane %v5293_v6, 2  ;;  %v17474_v17 = vadd.f32 %v17462_v21, %v6903_v0  ;;  %19431 = vst [vmem:[#allocation118_spill] sm:$0xff] %v17486_v49  ;;  %v17489_v37 = vsel %vm2302_vm3, %v7099_v47, %v7107_v56  ;;  %v5292_v0 = vld [vmem:[#allocation4 + $0x200] sm:$0x3] }
 0x5b8   : > { %11137 = vmatprep.subr.bf16.mxu0 %v11136_v60  ;;  %v5747_v60 = vld [vmem:[%s19091_s3 + $0x3d8] sm:$0xff]  ;;  %19432 = vst [vmem:[#allocation119_spill] sm:$0xff] %v17489_v37  ;;  %v17493_v54 = vadd.f32 %v17486_v49, %v6907_v32  ;;  %v17496_v6 = vadd.f32 %v17489_v37, %v6912_v30  ;;  %v11142_v55 = vpack.c.bf16 %v5742_v38, %v5740_v20  ;;  %v5746_v47 = vld [vmem:[%s19091_s3 + $0x3d0] sm:$0xff]  ;;  %v5488_v38 = vrot.slane %v5292_v0, 2  ;;  %v5749_v37 = vld [vmem:[%s19091_s3 + $0x3e8] sm:$0xff] }
 0x5b9   : > { %v17506_v3 = vsel %vm2302_vm3, %v7097_v53, %v7105_v46  ;;  %v17510_v30 = vsel %vm2302_vm3, %v7107_v56, %v17189_v29  ;;  %v5751_v53 = vld [vmem:[%s19091_s3 + $0x3f8] sm:$0xff]  ;;  %v5290_v49 = vld [vmem:[#allocation4 + $0x10] sm:$0xfc]  ;;  %v19441_v21 = vld [vmem:[#allocation41_spill] sm:$0xff] }
 0x5ba   : > { %6668 = vmatmul.mubr.f32.gmra.mrb[56].mxu0 %v16275_v16  ;;  %v5291_v16 = vld [vmem:[#allocation4 + $0x18] sm:$0xfc]  ;;  %19433 = vst [vmem:[#allocation120_spill] sm:$0xff] %v17506_v3  ;;  %19434 = vst [vmem:[#allocation121_spill] sm:$0xff] %v17510_v30  ;;  %v17513_v32 = vadd.f32 %v17506_v3, %v6911_v13  ;;  %v17524_v56 = vadd.f32 %v17510_v30, %v6916_v14  ;;  %v17528_v13 = vsel %vm2302_vm3, %v7105_v46, %v17189_v29 }
 0x5bb   : > { %6673 = vmatprep.mubr.f32.mxu0 %v16307_v15  ;;  %11139 = vmatpush1.bf16.msra.mxu0 %v11138_v40  ;;  %v11144_v15 = vpack.c.bf16 %v5747_v60, %v5745_v42  ;;  %v19435_v40 = vld [vmem:[#allocation10_spill] sm:$0xff]  ;;  %v5373_v42 = vrot.slane %v5291_v16, 2  ;;  %v19440_v3 = vld [vmem:[#allocation12_spill] sm:$0xff]  ;;  %v19252_v39 = vrot.slane %v19441_v21, 4  ;;  %v8067_v14 = vrot.slane %v16993_v50, 4 }
 0x5bc   : > { %11141 = vmatprep.subr.bf16.mxu0 %v11140_v58  ;;  %v5491_v20 = vsel %vm2302_vm3, %v19435_v40, %v5490_v62  ;;  %19436 = vst [vmem:[#allocation10_spill] sm:$0xff] %v17524_v56  ;;  %v19437_v58 = vld [vmem:[#allocation11_spill] sm:$0xff]  ;;  %v11146_v62 = vpack.c.bf16 %v5746_v47, %v5744_v43  ;;  %v19438_v60 = vld [vmem:[#allocation50_spill] sm:$0xff]  ;;  %v17533_v40 = vadd.f32 %v17528_v13, %v6915_v10  ;;  %v8065_v30 = vrot.slane %v16997_v1, 4  ;;  %v19442_v1 = vld [vmem:[#allocation13_spill] sm:$0xff] }
 0x5bd   : > { %v19253_v0 = vrot.slane %v19438_v60, 4  ;;  %v8075_v46 = vrot.slane %v17001_v36, 4  ;;  %v11148_v47 = vpack.c.bf16 %v5751_v53, %v5749_v37  ;;  %v5748_v10 = vld [vmem:[%s19091_s3 + $0x3e0] sm:$0xff]  ;;  %v8073_v50 = vrot.slane %v17015_v24, 4  ;;  %v9993_v16 = vld [vmem:[%s19091_s3 + $0x808] sm:$0xff]  ;;  %v9995_v37 = vld [vmem:[%s19091_s3 + $0x818] sm:$0xff] }
 0x5be   : > { %6674 = vmatmul.mubr.f32.gmra.mrb[58].mxu0 %v19437_v58  ;;  %19439 = vst [vmem:[#allocation11_spill] sm:$0xff] %v17533_v40  ;;  %v17540_v58 = vld [vmem:[#allocation4 + $0x1e8] sm:$0xff]  ;;  %v5489_v36 = vsel %vm2302_vm3, %v19442_v1, %v5488_v38  ;;  %v19447_v38 = vld [vmem:[#allocation17_spill] sm:$0xff]  ;;  %v8083_v21 = vrot.slane %v17021_v45, 4 }
 0x5bf   : > { %6679 = vmatprep.mubr.f32.mxu0 %v19440_v3  ;;  %11143 = vmatpush1.bf16.msra.mxu0 %v11142_v55  ;;  %v5621_v43 = vadd.f32 %v17540_v58, %v5491_v20  ;;  %v5750_v3 = vld [vmem:[%s19091_s3 + $0x3f0] sm:$0xff]  ;;  %v5370_v55 = vrot.slane %v5290_v49, 2  ;;  %v17566_v24 = vsel %vm3230_vm4, %v19253_v0, %v8065_v30  ;;  %v17569_v49 = vsel %vm3230_vm4, %v8067_v14, %v8075_v46  ;;  %v19446_v20 = vld [vmem:[#allocation15_spill] sm:$0xff] }
 0x5c0   : > { %11145 = vmatprep.subr.bf16.mxu0 %v11144_v15  ;;  %v17561_v15 = vsel %vm3230_vm4, %v19252_v39, %v8067_v14  ;;  %19444 = vst [vmem:[#allocation12_spill] sm:$0xff] %v17566_v24  ;;  %19445 = vst [vmem:[#allocation13_spill] sm:$0xff] %v17569_v49  ;;  %v5375_v53 = vsel %vm2302_vm3, %v5373_v42, %v19447_v38  ;;  %v17575_v1 = vsel %vm3230_vm4, %v8065_v30, %v8073_v50  ;;  %v17579_v0 = vld [vmem:[#allocation4 + $0x1e0] sm:$0xff]  ;;  %v5227_v49 = vld [vmem:[#allocation4 + $0x18] sm:$0xff] }
 0x5c1   : > { %19443 = vst [vmem:[#allocation50_spill] sm:$0xff] %v17561_v15  ;;  %v8081_v39 = vrot.slane %v17034_v12, 4  ;;  %v11150_v15 = vpack.c.bf16 %v5750_v3, %v5748_v10  ;;  %v5620_v14 = vadd.f32 %v17579_v0, %v5489_v36  ;;  %v11152_v42 = vpack.c.bf16 %v9995_v37, %v9993_v16  ;;  %v9992_v30 = vld [vmem:[%s19091_s3 + $0x800] sm:$0xff]  ;;  %v9994_v45 = vld [vmem:[%s19091_s3 + $0x810] sm:$0xff] }
 0x5c2   : > { %6680 = vmatmul.mubr.f32.gmra.mrb[60].mxu0 %v19446_v20  ;;  %v19448_v20 = vld [vmem:[#allocation14_spill] sm:$0xff]  ;;  %v17591_v12 = vsel %vm3230_vm4, %v8075_v46, %v8083_v21  ;;  %v8091_v3 = vrot.slane %v17041_v52, 4  ;;  %v5226_v36 = vld [vmem:[#allocation4 + $0x10] sm:$0xff]  ;;  %v8099_v46 = vrot.slane %v17066_v11, 4  ;;  %v8097_v16 = vrot.slane %v17075_v7, 4 }
 0x5c3   : > { %6685 = vmatprep.mubr.f32.mxu0 %v5621_v43  ;;  %11147 = vmatpush1.bf16.msra.mxu0 %v11146_v62  ;;  %v5372_v24 = vsel %vm2302_vm3, %v5370_v55, %v19448_v20  ;;  %v5563_v62 = vadd.f32 %v5375_v53, %v5227_v49  ;;  %v9997_v43 = vld [vmem:[%s19091_s3 + $0x828] sm:$0xff]  ;;  %v17600_v10 = vsel %vm3230_vm4, %v8073_v50, %v8081_v39  ;;  %v8089_v55 = vrot.slane %v17054_v51, 4  ;;  %v9996_v52 = vld [vmem:[%s19091_s3 + $0x820] sm:$0xff]  ;;  %v9998_v51 = vld [vmem:[%s19091_s3 + $0x830] sm:$0xff] }
 0x5c4   : > { %11149 = vmatprep.subr.bf16.mxu0 %v11148_v47  ;;  %v9999_v47 = vld [vmem:[%s19091_s3 + $0x838] sm:$0xff]  ;;  %v5562_v37 = vadd.f32 %v5372_v24, %v5226_v36  ;;  %v11154_v49 = vpack.c.bf16 %v9994_v45, %v9992_v30  ;;  %v8107_v38 = vrot.slane %v17078_v31, 4  ;;  %v17614_v11 = vsel %vm3230_vm4, %v8083_v21, %v8091_v3  ;;  %v10001_v31 = vld [vmem:[%s19091_s3 + $0x848] sm:$0xff]  ;;  %v10000_v36 = vld [vmem:[%s19091_s3 + $0x840] sm:$0xff] }
 0x5c5   : > { %v11156_v53 = vpack.c.bf16 %v9999_v47, %v9997_v43  ;;  %v17617_v7 = vsel %vm3230_vm4, %v8081_v39, %v8089_v55  ;;  %v17620_v50 = vsel %vm3230_vm4, %v8091_v3, %v8099_v46  ;;  %v17629_v24 = vsel %vm3230_vm4, %v8089_v55, %v8097_v16  ;;  %v19450_v45 = vld [vmem:[#allocation70_spill] sm:$0xff]  ;;  %v19451_v47 = vld [vmem:[#allocation19_spill] sm:$0xff] }
 0x5c6   : > { %6686 = vmatmul.mubr.f32.gmra.mrb[62].mxu0 %v5620_v14  ;;  %v17632_v21 = vsel %vm3230_vm4, %v8099_v46, %v8107_v38  ;;  %v8105_v39 = vrot.slane %v17091_v44, 4  ;;  %v8115_v14 = vrot.slane %v17107_v5, 4  ;;  %v8113_v20 = vrot.slane %v17110_v19, 4 }
 0x5c7   : > { %11151 = vmatpush1.bf16.msra.mxu0 %v11150_v15  ;;  %6756 = vmatprep.mubr.f32.mxu0 %v5563_v62  ;;  %v10003_v15 = vld [vmem:[%s19091_s3 + $0x858] sm:$0xff]  ;;  %v8121_v62 = vrot.slane %v19450_v45, 4  ;;  %v8131_v43 = vrot.slane %v17145_v23, 4  ;;  %v11158_v3 = vpack.c.bf16 %v9998_v51, %v9996_v52  ;;  %v8129_v5 = vrot.slane %v17148_v26, 4  ;;  %v10002_v23 = vld [vmem:[%s19091_s3 + $0x850] sm:$0xff]  ;;  %v10005_v26 = vld [vmem:[%s19091_s3 + $0x868] sm:$0xff] }
 0x5c8   : > { %11153 = vmatprep.subr.bf16.mxu0 %v11152_v42  ;;  %v19449_v42 = vld [vmem:[#allocation69_spill] sm:$0xff]  ;;  %v17642_v55 = vsel %vm3230_vm4, %v8097_v16, %v8105_v39  ;;  %v17645_v44 = vsel %vm3230_vm4, %v8107_v38, %v8115_v14  ;;  %v11160_v19 = vpack.c.bf16 %v10003_v15, %v10001_v31  ;;  %v17655_v46 = vsel %vm3230_vm4, %v8105_v39, %v8113_v20  ;;  %v19453_v31 = vld [vmem:[#allocation16_spill] sm:$0xff]  ;;  %v19454_v39 = vld [vmem:[#allocation78_spill] sm:$0xff] }
 0x5c9   : > { %v8123_v30 = vrot.slane %v19449_v42, 4  ;;  %v8139_v52 = vrot.slane %v17161_v9, 4  ;;  %v8137_v51 = vrot.slane %v17177_v61, 4  ;;  %v8147_v15 = vrot.slane %v17180_v27, 4  ;;  %v19456_v45 = vld [vmem:[#allocation83_spill] sm:$0xff]  ;;  %v10006_v61 = vld [vmem:[%s19091_s3 + $0x870] sm:$0xff] }
 0x5ca   : > { %6757 = vmatmul.mubr.f32.vlgmr.msra.gmra.mrb[32].mxu0 %v5562_v37  ;;  %v17661_v37 = vsel %vm3230_vm4, %v8113_v20, %v8121_v62  ;;  %v19455_v20 = vld [vmem:[#allocation79_spill] sm:$0xff] }
 0x5cb   : > { %6762 = vmatprep.mubr.f32.mxu0 %v19451_v47  ;;  %11155 = vmatpush1.bf16.msra.mxu0 %v11154_v49  ;;  %v17658_v16 = vsel %vm3230_vm4, %v8115_v14, %v8123_v30  ;;  %19452 = vst [vmem:[#allocation15_spill] sm:$0xff] %v17661_v37  ;;  %v10007_v49 = vld [vmem:[%s19091_s3 + $0x878] sm:$0xff]  ;;  %v17670_v38 = vsel %vm3230_vm4, %v8123_v30, %v8131_v43  ;;  %v8145_v14 = vrot.slane %v19454_v39, 4  ;;  %v8155_v42 = vrot.slane %v19455_v20, 4  ;;  %v10004_v9 = vld [vmem:[%s19091_s3 + $0x860] sm:$0xff] }
 0x5cc   : > { %11157 = vmatprep.subr.bf16.mxu0 %v11156_v53  ;;  %v17673_v53 = vsel %vm3230_vm4, %v8121_v62, %v8129_v5  ;;  %v8153_v47 = vrot.slane %v19456_v45, 4  ;;  %v19457_v37 = vld [vmem:[#allocation18_spill] sm:$0xff]  ;;  %v11162_v30 = vpack.c.bf16 %v10002_v23, %v10000_v36  ;;  %v17690_v27 = vsel %vm3230_vm4, %v8131_v43, %v8139_v52  ;;  %v7747_v20 = vld [vmem:[#allocation4 + $0x38] sm:$0xc0]  ;;  %v7746_v45 = vld [vmem:[#allocation4 + $0x30] sm:$0xc0] }
 0x5cd   : > { %v17693_v62 = vsel %vm3230_vm4, %v8129_v5, %v8137_v51  ;;  %v17697_v36 = vsel %vm3230_vm4, %v8139_v52, %v8147_v15  ;;  %v17700_v23 = vsel %vm3230_vm4, %v8137_v51, %v8145_v14  ;;  %v10009_v43 = vld [vmem:[%s19091_s3 + $0x888] sm:$0xff]  ;;  %v10011_v5 = vld [vmem:[%s19091_s3 + $0x898] sm:$0xff]  ;;  %v19465_v51 = vld [vmem:[#allocation21_spill] sm:$0xff] }
 0x5ce   : > { %6763 = vmatmul.mubr.f32.gmra.mrb[34].mxu0 %v19453_v31  ;;  %v19458_v31 = vld [vmem:[#allocation84_spill] sm:$0xff]  ;;  %19459 = vst [vmem:[#allocation17_spill] sm:$0xff] %v17697_v36  ;;  %19460 = vst [vmem:[#allocation14_spill] sm:$0xff] %v17700_v23 }
 0x5cf   : > { %6768 = vmatprep.mubr.f32.mxu0 %v19457_v37  ;;  %11159 = vmatpush1.bf16.msra.mxu0 %v11158_v3  ;;  %v19255_v39 = vrot.slane %v19458_v31, 4  ;;  %v11164_v3 = vpack.c.bf16 %v10007_v49, %v10005_v26  ;;  %v17703_v37 = vsel %vm3230_vm4, %v8147_v15, %v8155_v42  ;;  %v19464_v49 = vld [vmem:[#allocation85_spill] sm:$0xff]  ;;  %v11166_v15 = vpack.c.bf16 %v10006_v61, %v10004_v9  ;;  %v19466_v23 = vld [vmem:[#allocation20_spill] sm:$0xff]  ;;  %v10008_v9 = vld [vmem:[%s19091_s3 + $0x880] sm:$0xff] }
 0x5d0   : > { %11161 = vmatprep.subr.bf16.mxu0 %v11160_v19  ;;  %19461 = vst [vmem:[#allocation69_spill] sm:$0xff] %v17703_v37  ;;  %v17712_v19 = vsel %vm3230_vm4, %v8145_v14, %v8153_v47  ;;  %v19256_v52 = vrot.slane %v19464_v49, 4  ;;  %v7766_v37 = vrot.slane %v7747_v20, 2  ;;  %v8063_v14 = vrot.slane %v17273_v35, 4  ;;  %v7739_v61 = vld [vmem:[#allocation4 + $0x38] sm:$0xf0] }
 0x5d1   : > { %19462 = vst [vmem:[#allocation70_spill] sm:$0xff] %v17712_v19  ;;  %v17717_v26 = vsel %vm3230_vm4, %v8155_v42, %v19255_v39  ;;  %v7764_v31 = vrot.slane %v7746_v45, 2  ;;  %v8071_v42 = vrot.slane %v17280_v8, 4  ;;  %v11168_v39 = vpack.c.bf16 %v10011_v5, %v10009_v43  ;;  %v19468_v20 = vld [vmem:[#allocation86_spill] sm:$0xff]  ;;  %v10013_v35 = vld [vmem:[%s19091_s3 + $0x8a8] sm:$0xff]  ;;  %v19469_v45 = vld [vmem:[#allocation87_spill] sm:$0xff] }
 0x5d2   : > { %19463 = vst [vmem:[#allocation19_spill] sm:$0xff] %v17717_v26  ;;  %6769 = vmatmul.mubr.f32.gmra.mrb[36].mxu0 %v19465_v51  ;;  %v17725_v36 = vsel %vm3230_vm4, %v8153_v47, %v19256_v52  ;;  %v7767_v47 = vsel %vm2302_vm3, %v7766_v37, %v19468_v20  ;;  %v10015_v8 = vld [vmem:[%s19091_s3 + $0x8b8] sm:$0xff]  ;;  %v19471_v51 = vld [vmem:[#allocation23_spill] sm:$0xff]  ;;  %v8060_v37 = vrot.slane %v17276_v48, 4  ;;  %v8069_v49 = vrot.slane %v17293_v22, 4  ;;  %v10014_v48 = vld [vmem:[%s19091_s3 + $0x8b0] sm:$0xff] }
 0x5d3   : > { %6774 = vmatprep.mubr.f32.mxu0 %v19466_v23  ;;  %11163 = vmatpush1.bf16.msra.mxu0 %v11162_v30  ;;  %19467 = vst [vmem:[#allocation16_spill] sm:$0xff] %v17725_v36  ;;  %v10010_v30 = vld [vmem:[%s19091_s3 + $0x890] sm:$0xff]  ;;  %v7738_v23 = vld [vmem:[#allocation4 + $0x30] sm:$0xf0]  ;;  %v7765_v43 = vsel %vm2302_vm3, %v7764_v31, %v19469_v45  ;;  %v17746_v5 = vsel %vm3230_vm4, %v8063_v14, %v8071_v42  ;;  %v8079_v36 = vrot.slane %v17299_v25, 4  ;;  %v19472_v26 = vld [vmem:[#allocation22_spill] sm:$0xff] }
 0x5d4   : > { %11165 = vmatprep.subr.bf16.mxu0 %v11164_v3  ;;  %v7791_v3 = vadd.f32 %v7767_v47, %v7739_v61  ;;  %19470 = vst [vmem:[#allocation78_spill] sm:$0xff] %v17746_v5  ;;  %v7790_v52 = vadd.f32 %v7765_v43, %v7738_v23  ;;  %v11170_v61 = vpack.c.bf16 %v10010_v30, %v10008_v9  ;;  %v8077_v19 = vrot.slane %v17311_v28, 4  ;;  %v10019_v28 = vld [vmem:[%s19091_s3 + $0x8d8] sm:$0xff]  ;;  %v19477_v43 = vld [vmem:[#allocation99_spill] sm:$0xff]  ;;  %v19478_v5 = vld [vmem:[#allocation24_spill] sm:$0xff] }
 0x5d5   : > { %v11172_v31 = vpack.c.bf16 %v10015_v8, %v10013_v35  ;;  %v17761_v25 = vsel %vm3230_vm4, %v8060_v37, %v8069_v49  ;;  %v19475_v35 = vld [vmem:[#allocation95_spill] sm:$0xff] }
 0x5d6   : > { %6775 = vmatmul.mubr.f32.gmra.mrb[38].mxu0 %v19471_v51  ;;  %v8062_v47 = vrot.slane %v7791_v3, 4  ;;  %v10012_v51 = vld [vmem:[%s19091_s3 + $0x8a0] sm:$0xff]  ;;  %v8059_v22 = vrot.slane %v7790_v52, 4  ;;  %19473 = vst [vmem:[#allocation79_spill] sm:$0xff] %v17761_v25  ;;  %v17776_v9 = vsel %vm3230_vm4, %v8069_v49, %v8077_v19  ;;  %v19474_v52 = vld [vmem:[#allocation26_spill] sm:$0xff]  ;;  %v8087_v8 = vrot.slane %v19475_v35, 4 }
 0x5d7   : > { %6780 = vmatprep.mubr.f32.mxu0 %v19472_v26  ;;  %11167 = vmatpush1.bf16.msra.mxu0 %v11166_v15  ;;  %v10017_v26 = vld [vmem:[%s19091_s3 + $0x8c8] sm:$0xff]  ;;  %v17773_v15 = vsel %vm3230_vm4, %v8071_v42, %v8079_v36  ;;  %v19476_v3 = vld [vmem:[#allocation97_spill] sm:$0xff]  ;;  %v8095_v25 = vrot.slane %v19477_v43, 4  ;;  %v8093_v42 = vrot.slane %v17353_v34, 4  ;;  %v8103_v49 = vrot.slane %v17356_v18, 4 }
 0x5d8   : > { %11169 = vmatprep.subr.bf16.mxu0 %v11168_v39  ;;  %v17770_v39 = vsel %vm3230_vm4, %v8062_v47, %v8063_v14  ;;  %v17780_v30 = vsel %vm3230_vm4, %v8059_v22, %v8060_v37  ;;  %v8085_v23 = vrot.slane %v19476_v3, 4  ;;  %v11174_v14 = vpack.c.bf16 %v10014_v48, %v10012_v51  ;;  %v10016_v37 = vld [vmem:[%s19091_s3 + $0x8c0] sm:$0xff]  ;;  %v10018_v22 = vld [vmem:[%s19091_s3 + $0x8d0] sm:$0xff]  ;;  %v10021_v34 = vld [vmem:[%s19091_s3 + $0x8e8] sm:$0xff] }
 0x5d9   : > { %v8101_v47 = vrot.slane %v17369_v63, 4  ;;  %v17802_v18 = vsel %vm3230_vm4, %v8087_v8, %v8095_v25  ;;  %v10023_v63 = vld [vmem:[%s19091_s3 + $0x8f8] sm:$0xff]  ;;  %v8111_v51 = vrot.slane %v17385_v2, 4  ;;  %v19483_v48 = vld [vmem:[#allocation27_spill] sm:$0xff]  ;;  %v19485_v35 = vld [vmem:[#allocation108_spill] sm:$0xff] }
 0x5da   : > { %6781 = vmatmul.mubr.f32.gmra.mrb[40].mxu0 %v19474_v52  ;;  %v11176_v52 = vpack.c.bf16 %v10019_v28, %v10017_v26  ;;  %19479 = vst [vmem:[#allocation83_spill] sm:$0xff] %v17802_v18  ;;  %v19484_v26 = vld [vmem:[#allocation105_spill] sm:$0xff]  ;;  %v8127_v18 = vrot.slane %v17423_v59, 4  ;;  %v19489_v2 = vld [vmem:[#allocation114_spill] sm:$0xff] }
 0x5db   : > { %6786 = vmatprep.mubr.f32.mxu0 %v19478_v5  ;;  %11171 = vmatpush1.bf16.msra.mxu0 %v11170_v61  ;;  %v17796_v5 = vsel %vm3230_vm4, %v8079_v36, %v8087_v8  ;;  %v17799_v61 = vsel %vm3230_vm4, %v8077_v19, %v8085_v23  ;;  %v17814_v36 = vsel %vm3230_vm4, %v8095_v25, %v8103_v49  ;;  %v8109_v28 = vrot.slane %v19484_v26, 4  ;;  %v19486_v3 = vld [vmem:[#allocation109_spill] sm:$0xff]  ;;  %v10020_v26 = vld [vmem:[%s19091_s3 + $0x8e0] sm:$0xff] }
 0x5dc   : > { %11173 = vmatprep.subr.bf16.mxu0 %v11172_v31  ;;  %v17811_v31 = vsel %vm3230_vm4, %v8085_v23, %v8093_v42  ;;  %19481 = vst [vmem:[#allocation21_spill] sm:$0xff] %v17814_v36  ;;  %v17817_v19 = vsel %vm3230_vm4, %v8093_v42, %v8101_v47  ;;  %v8119_v8 = vrot.slane %v19485_v35, 4  ;;  %v8117_v43 = vrot.slane %v19486_v3, 4  ;;  %v19487_v23 = vld [vmem:[#allocation25_spill] sm:$0xff]  ;;  %v19488_v42 = vld [vmem:[#allocation112_spill] sm:$0xff] }
 0x5dd   : > { %19480 = vst [vmem:[#allocation18_spill] sm:$0xff] %v17811_v31  ;;  %19482 = vst [vmem:[#allocation20_spill] sm:$0xff] %v17817_v19  ;;  %v11178_v25 = vpack.c.bf16 %v10018_v22, %v10016_v37  ;;  %v17827_v36 = vsel %vm3230_vm4, %v8103_v49, %v8111_v51  ;;  %v8125_v19 = vrot.slane %v19488_v42, 4  ;;  %v8135_v31 = vrot.slane %v19489_v2, 4  ;;  %v10022_v59 = vld [vmem:[%s19091_s3 + $0x8f0] sm:$0xff]  ;;  %v10027_v22 = vld [vmem:[%s19091_s3 + $0x918] sm:$0xff] }
 0x5de   : > { %6787 = vmatmul.mubr.f32.gmra.mrb[42].mxu0 %v19483_v48  ;;  %v11180_v48 = vpack.c.bf16 %v10023_v63, %v10021_v34  ;;  %v17841_v49 = vsel %vm3230_vm4, %v8111_v51, %v8119_v8  ;;  %v17844_v37 = vsel %vm3230_vm4, %v8109_v28, %v8117_v43  ;;  %v17853_v34 = vsel %vm3230_vm4, %v8119_v8, %v8127_v18  ;;  %v19491_v8 = vld [vmem:[#allocation30_spill] sm:$0xff] }
 0x5df   : > { %6792 = vmatprep.mubr.f32.mxu0 %v19487_v23  ;;  %11175 = vmatpush1.bf16.msra.mxu0 %v11174_v14  ;;  %v17838_v14 = vsel %vm3230_vm4, %v8101_v47, %v8109_v28  ;;  %v17856_v47 = vsel %vm3230_vm4, %v8117_v43, %v8125_v19  ;;  %v17859_v63 = vsel %vm3230_vm4, %v8127_v18, %v8135_v31  ;;  %v8133_v51 = vrot.slane %v17455_v4, 4  ;;  %v19490_v28 = vld [vmem:[#allocation28_spill] sm:$0xff] }
 0x5e0   : > { %11177 = vmatprep.subr.bf16.mxu0 %v11176_v52  ;;  %v10025_v52 = vld [vmem:[%s19091_s3 + $0x908] sm:$0xff]  ;;  %v8143_v35 = vrot.slane %v17458_v57, 4  ;;  %v8141_v3 = vrot.slane %v17474_v17, 4  ;;  %v8151_v23 = vrot.slane %v17483_v41, 4  ;;  %v8149_v42 = vrot.slane %v17493_v54, 4  ;;  %v10024_v57 = vld [vmem:[%s19091_s3 + $0x900] sm:$0xff] }
 0x5e1   : > { %v11182_v43 = vpack.c.bf16 %v10022_v59, %v10020_v26  ;;  %v17869_v2 = vsel %vm3230_vm4, %v8125_v19, %v8133_v51  ;;  %v8159_v18 = vrot.slane %v17496_v6, 4  ;;  %v8157_v4 = vrot.slane %v17513_v32, 4  ;;  %v10026_v17 = vld [vmem:[%s19091_s3 + $0x910] sm:$0xff]  ;;  %v10029_v32 = vld [vmem:[%s19091_s3 + $0x928] sm:$0xff]  ;;  %v10031_v19 = vld [vmem:[%s19091_s3 + $0x938] sm:$0xff] }
 0x5e2   : > { %6793 = vmatmul.mubr.f32.gmra.mrb[44].mxu0 %v19490_v28  ;;  %v11184_v28 = vpack.c.bf16 %v10027_v22, %v10025_v52  ;;  %v17880_v41 = vsel %vm3230_vm4, %v8135_v31, %v8143_v35  ;;  %v17883_v54 = vsel %vm3230_vm4, %v8133_v51, %v8141_v3  ;;  %v17886_v6 = vsel %vm3230_vm4, %v8143_v35, %v8151_v23  ;;  %v19495_v59 = vld [vmem:[#allocation29_spill] sm:$0xff]  ;;  %v19496_v22 = vld [vmem:[#allocation31_spill] sm:$0xff] }
 0x5e3   : > { %6798 = vmatprep.mubr.f32.mxu0 %v19491_v8  ;;  %11179 = vmatpush1.bf16.msra.mxu0 %v11178_v25  ;;  %v17895_v25 = vsel %vm3230_vm4, %v8141_v3, %v8149_v42  ;;  %v17898_v31 = vsel %vm3230_vm4, %v8151_v23, %v8159_v18  ;;  %v19259_v26 = vrot.slane %v17524_v56, 4  ;;  %v19258_v52 = vrot.slane %v17533_v40, 4  ;;  %v10028_v23 = vld [vmem:[%s19091_s3 + $0x920] sm:$0xff]  ;;  %v10054_v40 = vld [vmem:[%s19091_s3 + $0x9f0] sm:$0xff] }
 0x5e4   : > { %11181 = vmatprep.subr.bf16.mxu0 %v11180_v48  ;;  %19492 = vst [vmem:[#allocation86_spill] sm:$0xff] %v17895_v25  ;;  %19493 = vst [vmem:[#allocation87_spill] sm:$0xff] %v17898_v31  ;;  %v17901_v48 = vsel %vm3230_vm4, %v8149_v42, %v8157_v4  ;;  %v11186_v51 = vpack.c.bf16 %v10026_v17, %v10024_v57  ;;  %v11188_v3 = vpack.c.bf16 %v10031_v19, %v10029_v32  ;;  %v10030_v42 = vld [vmem:[%s19091_s3 + $0x930] sm:$0xff]  ;;  %v12291_v25 = vld [vmem:[#allocation4 + $0x1c8] sm:$0xff] }
 0x5e5   : > { %19494 = vst [vmem:[#allocation23_spill] sm:$0xff] %v17901_v48  ;;  %v17910_v35 = vsel %vm3230_vm4, %v8159_v18, %v19259_v26  ;;  %v17921_v8 = vsel %vm3230_vm4, %v8157_v4, %v19258_v52  ;;  %v10035_v18 = vld [vmem:[%s19091_s3 + $0x958] sm:$0xff]  ;;  %v19500_v57 = vld [vmem:[#allocation33_spill] sm:$0xff]  ;;  %v11190_v17 = vpack.c.bf16 %v10030_v42, %v10028_v23  ;;  %v10032_v4 = vld [vmem:[%s19091_s3 + $0x940] sm:$0xff] }
 0x5e6   : > { %6799 = vmatmul.mubr.f32.gmra.mrb[46].mxu0 %v19495_v59  ;;  %19497 = vst [vmem:[#allocation22_spill] sm:$0xff] %v17910_v35  ;;  %19498 = vst [vmem:[#allocation26_spill] sm:$0xff] %v17921_v8  ;;  %v10034_v19 = vld [vmem:[%s19091_s3 + $0x950] sm:$0xff]  ;;  %v10037_v59 = vld [vmem:[%s19091_s3 + $0x968] sm:$0xff] }
 0x5e7   : > { %6804 = vmatprep.mubr.f32.mxu0 %v19496_v22  ;;  %11183 = vmatpush1.bf16.msra.mxu0 %v11182_v43  ;;  %v10033_v43 = vld [vmem:[%s19091_s3 + $0x948] sm:$0xff]  ;;  %v10039_v22 = vld [vmem:[%s19091_s3 + $0x978] sm:$0xff]  ;;  %v11194_v23 = vpack.c.bf16 %v10034_v19, %v10032_v4  ;;  %v10050_v52 = vld [vmem:[%s19091_s3 + $0x9d0] sm:$0xff] }
 0x5e8   : > { %11185 = vmatprep.subr.bf16.mxu0 %v11184_v28  ;;  %v19499_v28 = vld [vmem:[#allocation32_spill] sm:$0xff]  ;;  %v11192_v32 = vpack.c.bf16 %v10035_v18, %v10033_v43  ;;  %v11196_v42 = vpack.c.bf16 %v10039_v22, %v10037_v59  ;;  %v10036_v43 = vld [vmem:[%s19091_s3 + $0x960] sm:$0xff]  ;;  %v10038_v18 = vld [vmem:[%s19091_s3 + $0x970] sm:$0xff] }
 0x5e9   : > { %v11198_v4 = vpack.c.bf16 %v10038_v18, %v10036_v43  ;;  %v10040_v59 = vld [vmem:[%s19091_s3 + $0x980] sm:$0xff]  ;;  %v10042_v22 = vld [vmem:[%s19091_s3 + $0x990] sm:$0xff]  ;;  %v5295_v18 = vld [vmem:[#allocation4 + $0x218] sm:$0x3] }
 0x5ea   : > { %6805 = vmatmul.mubr.f32.gmra.mrb[48].mxu0 %v19499_v28  ;;  %v10041_v28 = vld [vmem:[%s19091_s3 + $0x988] sm:$0xff]  ;;  %v11202_v43 = vpack.c.bf16 %v10042_v22, %v10040_v59  ;;  %v19507_v59 = vld [vmem:[#allocation43_spill] sm:$0xff]  ;;  %v6857_v8 = vld [vmem:[#allocation4 + $0x20] sm:$0xfc] }
 0x5eb   : > { %6810 = vmatprep.mubr.f32.mxu0 %v19500_v57  ;;  %11187 = vmatpush1.bf16.msra.mxu0 %v11186_v51  ;;  %v19501_v51 = vld [vmem:[#allocation34_spill] sm:$0xff]  ;;  %v5294_v22 = vld [vmem:[#allocation4 + $0x210] sm:$0x3] }
 0x5ec   : > { %11189 = vmatprep.subr.bf16.mxu0 %v11188_v3  ;;  %v19502_v3 = vld [vmem:[#allocation35_spill] sm:$0xff]  ;;  %v10043_v57 = vld [vmem:[%s19091_s3 + $0x998] sm:$0xff]  ;;  %v5492_v26 = vrot.slane %v5294_v22, 2 }
 0x5ed   : > { %v11200_v19 = vpack.c.bf16 %v10043_v57, %v10041_v28  ;;  %v10044_v57 = vld [vmem:[%s19091_s3 + $0x9a0] sm:$0xff]  ;;  %v12265_v48 = vld [vmem:[#allocation4 + $0x28] sm:$0xff] }
 0x5ee   : > { %6811 = vmatmul.mubr.f32.gmra.mrb[50].mxu0 %v19501_v51  ;;  %v10045_v51 = vld [vmem:[%s19091_s3 + $0x9a8] sm:$0xff]  ;;  %v10056_v35 = vld [vmem:[%s19091_s3 + $0xa00] sm:$0xff] }
 0x5ef   : > { %6816 = vmatprep.mubr.f32.mxu0 %v19502_v3  ;;  %11191 = vmatpush1.bf16.msra.mxu0 %v11190_v17  ;;  %v19503_v17 = vld [vmem:[#allocation36_spill] sm:$0xff]  ;;  %v10047_v3 = vld [vmem:[%s19091_s3 + $0x9b8] sm:$0xff] }
 0x5f0   : > { %11193 = vmatprep.subr.bf16.mxu0 %v11192_v32  ;;  %v19504_v32 = vld [vmem:[#allocation39_spill] sm:$0xff]  ;;  %v11204_v28 = vpack.c.bf16 %v10047_v3, %v10045_v51  ;;  %v19508_v51 = vld [vmem:[#allocation45_spill] sm:$0xff] }
 0x5f2   : > { %6817 = vmatmul.mubr.f32.gmra.mrb[52].mxu0 %v19503_v17  ;;  %v10046_v17 = vld [vmem:[%s19091_s3 + $0x9b0] sm:$0xff] }
 0x5f3   : > { %6822 = vmatprep.mubr.f32.mxu0 %v19504_v32  ;;  %11195 = vmatpush1.bf16.msra.mxu0 %v11194_v23  ;;  %v19505_v23 = vld [vmem:[#allocation40_spill] sm:$0xff]  ;;  %v11206_v3 = vpack.c.bf16 %v10046_v17, %v10044_v57  ;;  %v6858_v57 = vld [vmem:[#allocation4 + $0x28] sm:$0xfc]  ;;  %v19510_v17 = vld [vmem:[#allocation47_spill] sm:$0xff] }
 0x5f4   : > { %11197 = vmatprep.subr.bf16.mxu0 %v11196_v42  ;;  %v19506_v42 = vld [vmem:[#allocation42_spill] sm:$0xff]  ;;  %v10049_v32 = vld [vmem:[%s19091_s3 + $0x9c8] sm:$0xff]  ;;  %v6996_v56 = vrot.slane %v6858_v57, 2 }
 0x5f6   : > { %6823 = vmatmul.mubr.f32.gmra.mrb[54].mxu0 %v19505_v23 }
 0x5f7   : > { %6828 = vmatprep.mubr.f32.mxu0 %v19506_v42  ;;  %11199 = vmatpush1.bf16.msra.mxu0 %v11198_v4  ;;  %v10051_v4 = vld [vmem:[%s19091_s3 + $0x9d8] sm:$0xff]  ;;  %v10048_v42 = vld [vmem:[%s19091_s3 + $0x9c0] sm:$0xff] }
 0x5f8   : > { %11201 = vmatprep.subr.bf16.mxu0 %v11200_v19  ;;  %v5494_v19 = vrot.slane %v5295_v18, 2  ;;  %v11208_v23 = vpack.c.bf16 %v10051_v4, %v10049_v32  ;;  %v10053_v18 = vld [vmem:[%s19091_s3 + $0x9e8] sm:$0xff]  ;;  %v19511_v4 = vld [vmem:[#allocation51_spill] sm:$0xff] }
 0x5fa   : > { %6829 = vmatmul.mubr.f32.gmra.mrb[56].mxu0 %v19507_v59  ;;  %v5495_v32 = vsel %vm2302_vm3, %v19510_v17, %v5494_v19  ;;  %v11210_v59 = vpack.c.bf16 %v10050_v52, %v10048_v42  ;;  %v19512_v17 = vld [vmem:[#allocation48_spill] sm:$0xff] }
 0x5fb   : > { %6834 = vmatprep.mubr.f32.mxu0 %v19508_v51  ;;  %11203 = vmatpush1.bf16.msra.mxu0 %v11202_v43  ;;  %v10055_v43 = vld [vmem:[%s19091_s3 + $0x9f8] sm:$0xff]  ;;  %v10052_v51 = vld [vmem:[%s19091_s3 + $0x9e0] sm:$0xff]  ;;  %v10057_v52 = vld [vmem:[%s19091_s3 + $0xa08] sm:$0xff] }
 0x5fc   : > { %11205 = vmatprep.subr.bf16.mxu0 %v11204_v28  ;;  %v19509_v28 = vld [vmem:[#allocation46_spill] sm:$0xff]  ;;  %v11212_v22 = vpack.c.bf16 %v10055_v43, %v10053_v18  ;;  %v19513_v42 = vld [vmem:[#allocation52_spill] sm:$0xff]  ;;  %v19514_v18 = vld [vmem:[#allocation37_spill] sm:$0xff]  ;;  %v11214_v57 = vpack.c.bf16 %v10054_v40, %v10052_v51 }
 0x5fd   : > { %v6998_v43 = vsel %vm2302_vm3, %v6996_v56, %v19514_v18  ;;  %v12266_v51 = vld [vmem:[#allocation4 + $0x20] sm:$0xff] }
 0x5fe   : > { %6835 = vmatmul.mubr.f32.gmra.mrb[58].mxu0 %v19509_v28  ;;  %v18009_v28 = vld [vmem:[#allocation4 + $0x1f8] sm:$0xff]  ;;  %v7190_v56 = vadd.f32 %v12265_v48, %v6998_v43  ;;  %v10060_v48 = vld [vmem:[%s19091_s3 + $0xa20] sm:$0xff]  ;;  %v12267_v43 = vld [vmem:[#allocation4 + $0x48] sm:$0xff] }
 0x5ff   : > { %6840 = vmatprep.mubr.f32.mxu0 %v19511_v4  ;;  %11207 = vmatpush1.bf16.msra.mxu0 %v11206_v3  ;;  %v5623_v19 = vadd.f32 %v18009_v28, %v5495_v32  ;;  %v5493_v3 = vsel %vm2302_vm3, %v19512_v17, %v5492_v26  ;;  %v6993_v32 = vrot.slane %v6857_v8, 2  ;;  %v18023_v4 = vld [vmem:[#allocation4 + $0x1f0] sm:$0xff]  ;;  %v10061_v8 = vld [vmem:[%s19091_s3 + $0xa28] sm:$0xff] }
 0x600   : > { %11209 = vmatprep.subr.bf16.mxu0 %v11208_v23  ;;  %v10059_v23 = vld [vmem:[%s19091_s3 + $0xa18] sm:$0xff]  ;;  %v5622_v26 = vadd.f32 %v18023_v4, %v5493_v3 }
 0x601   : > { %v11216_v17 = vpack.c.bf16 %v10059_v23, %v10057_v52  ;;  %v10062_v23 = vld [vmem:[%s19091_s3 + $0xa30] sm:$0xff] }
 0x602   : > { %6841 = vmatmul.mubr.f32.gmra.mrb[60].mxu0 %v19513_v42  ;;  %v10058_v42 = vld [vmem:[%s19091_s3 + $0xa10] sm:$0xff] }
 0x603   : > { %6846 = vmatprep.mubr.f32.mxu0 %v5623_v19  ;;  %11211 = vmatpush1.bf16.msra.mxu0 %v11210_v59  ;;  %v19515_v19 = vld [vmem:[#allocation44_spill] sm:$0xff]  ;;  %v10063_v59 = vld [vmem:[%s19091_s3 + $0xa38] sm:$0xff] }
 0x604   : > { %11213 = vmatprep.subr.bf16.mxu0 %v11212_v22  ;;  %v6995_v40 = vsel %vm2302_vm3, %v6993_v32, %v19515_v19  ;;  %v11218_v22 = vpack.c.bf16 %v10058_v42, %v10056_v35  ;;  %v11220_v52 = vpack.c.bf16 %v10063_v59, %v10061_v8  ;;  %v19516_v32 = vld [vmem:[#allocation38_spill] sm:$0xff]  ;;  %v19517_v42 = vld [vmem:[#allocation49_spill] sm:$0xff]  ;;  %v10064_v8 = vld [vmem:[%s19091_s3 + $0xa40] sm:$0xff] }
 0x605   : > { %v7189_v3 = vadd.f32 %v12266_v51, %v6995_v40  ;;  %v7194_v31 = vadd.f32 %v12267_v43, %v19516_v32  ;;  %v10067_v35 = vld [vmem:[%s19091_s3 + $0xa58] sm:$0xff]  ;;  %v10066_v59 = vld [vmem:[%s19091_s3 + $0xa50] sm:$0xff] }
 0x606   : > { %6847 = vmatmul.mubr.f32.gmra.mrb[62].mxu0 %v5622_v26  ;;  %v11222_v26 = vpack.c.bf16 %v10062_v23, %v10060_v48  ;;  %v12269_v51 = vld [vmem:[#allocation4 + $0x68] sm:$0xff]  ;;  %v19518_v43 = vld [vmem:[#allocation53_spill] sm:$0xff] }
 0x607   : > { %11215 = vmatpush1.bf16.msra.mxu0 %v11214_v57  ;;  %7446 = vmatprep.mubr.f32.mxu0 %v7190_v56  ;;  %v10065_v57 = vld [vmem:[%s19091_s3 + $0xa48] sm:$0xff]  ;;  %v7198_v32 = vadd.f32 %v12269_v51, %v19518_v43  ;;  %v19519_v48 = vld [vmem:[#allocation54_spill] sm:$0xff]  ;;  %v19520_v51 = vld [vmem:[#allocation55_spill] sm:$0xff] }
 0x608   : > { %11217 = vmatprep.subr.bf16.mxu0 %v11216_v17  ;;  %v12268_v17 = vld [vmem:[#allocation4 + $0x40] sm:$0xff]  ;;  %v11224_v40 = vpack.c.bf16 %v10067_v35, %v10065_v57  ;;  %v10068_v35 = vld [vmem:[%s19091_s3 + $0xa60] sm:$0xff] }
 0x609   : > { %v7193_v56 = vadd.f32 %v12268_v17, %v19517_v42  ;;  %v10070_v17 = vld [vmem:[%s19091_s3 + $0xa70] sm:$0xff]  ;;  %v12271_v42 = vld [vmem:[#allocation4 + $0x88] sm:$0xff] }
 0x60a   : > { %7447 = vmatmul.mubr.f32.vlgmr.msra.gmra.mrb[32].mxu0 %v7189_v3  ;;  %v11226_v3 = vpack.c.bf16 %v10066_v59, %v10064_v8  ;;  %v7202_v43 = vadd.f32 %v12271_v42, %v19520_v51  ;;  %v12272_v8 = vld [vmem:[#allocation4 + $0x80] sm:$0xff]  ;;  %v19521_v59 = vld [vmem:[#allocation56_spill] sm:$0xff] }
 0x60b   : > { %7452 = vmatprep.mubr.f32.mxu0 %v7194_v31  ;;  %11219 = vmatpush1.bf16.msra.mxu0 %v11218_v22  ;;  %v10069_v31 = vld [vmem:[%s19091_s3 + $0xa68] sm:$0xff]  ;;  %v10071_v22 = vld [vmem:[%s19091_s3 + $0xa78] sm:$0xff]  ;;  %v19522_v42 = vld [vmem:[#allocation57_spill] sm:$0xff] }
 0x60c   : > { %11221 = vmatprep.subr.bf16.mxu0 %v11220_v52  ;;  %v12270_v52 = vld [vmem:[#allocation4 + $0x60] sm:$0xff]  ;;  %v11228_v57 = vpack.c.bf16 %v10071_v22, %v10069_v31  ;;  %v10072_v22 = vld [vmem:[%s19091_s3 + $0xa80] sm:$0xff] }
 0x60d   : > { %v7197_v23 = vadd.f32 %v12270_v52, %v19519_v48  ;;  %v10074_v52 = vld [vmem:[%s19091_s3 + $0xa90] sm:$0xff]  ;;  %v12273_v48 = vld [vmem:[#allocation4 + $0xa8] sm:$0xff] }
 0x60e   : > { %7453 = vmatmul.mubr.f32.gmra.mrb[34].mxu0 %v7193_v56  ;;  %v10075_v56 = vld [vmem:[%s19091_s3 + $0xa98] sm:$0xff]  ;;  %v7206_v51 = vadd.f32 %v12273_v48, %v19522_v42  ;;  %v19524_v48 = vld [vmem:[#allocation59_spill] sm:$0xff] }
 0x60f   : > { %7458 = vmatprep.mubr.f32.mxu0 %v7198_v32  ;;  %11223 = vmatpush1.bf16.msra.mxu0 %v11222_v26  ;;  %v10073_v26 = vld [vmem:[%s19091_s3 + $0xa88] sm:$0xff]  ;;  %v7201_v32 = vadd.f32 %v12272_v8, %v19521_v59  ;;  %v10078_v8 = vld [vmem:[%s19091_s3 + $0xab0] sm:$0xff]  ;;  %v12275_v59 = vld [vmem:[#allocation4 + $0xc8] sm:$0xff] }
 0x610   : > { %11225 = vmatprep.subr.bf16.mxu0 %v11224_v40  ;;  %v11230_v40 = vpack.c.bf16 %v10070_v17, %v10068_v35  ;;  %v11232_v31 = vpack.c.bf16 %v10075_v56, %v10073_v26  ;;  %v12274_v35 = vld [vmem:[#allocation4 + $0xa0] sm:$0xff]  ;;  %v19523_v17 = vld [vmem:[#allocation58_spill] sm:$0xff]  ;;  %v10076_v56 = vld [vmem:[%s19091_s3 + $0xaa0] sm:$0xff]  ;;  %v7210_v42 = vadd.f32 %v12275_v59, %v19524_v48 }
 0x611   : > { %v19526_v59 = vld [vmem:[#allocation61_spill] sm:$0xff] }
 0x612   : > { %7459 = vmatmul.mubr.f32.gmra.mrb[36].mxu0 %v7197_v23  ;;  %v10079_v23 = vld [vmem:[%s19091_s3 + $0xab8] sm:$0xff] }
 0x613   : > { %7464 = vmatprep.mubr.f32.mxu0 %v7202_v43  ;;  %11227 = vmatpush1.bf16.msra.mxu0 %v11226_v3  ;;  %v10077_v3 = vld [vmem:[%s19091_s3 + $0xaa8] sm:$0xff]  ;;  %v7205_v43 = vadd.f32 %v12274_v35, %v19523_v17  ;;  %v10082_v35 = vld [vmem:[%s19091_s3 + $0xad0] sm:$0xff]  ;;  %v12277_v17 = vld [vmem:[#allocation4 + $0xe8] sm:$0xff] }
 0x614   : > { %11229 = vmatprep.subr.bf16.mxu0 %v11228_v57  ;;  %v11234_v57 = vpack.c.bf16 %v10074_v52, %v10072_v22  ;;  %v11236_v26 = vpack.c.bf16 %v10079_v23, %v10077_v3  ;;  %v12276_v22 = vld [vmem:[#allocation4 + $0xc0] sm:$0xff]  ;;  %v19525_v52 = vld [vmem:[#allocation60_spill] sm:$0xff]  ;;  %v10080_v23 = vld [vmem:[%s19091_s3 + $0xac0] sm:$0xff]  ;;  %v7214_v48 = vadd.f32 %v12277_v17, %v19526_v59 }
 0x615   : > { %v19528_v17 = vld [vmem:[#allocation63_spill] sm:$0xff] }
 0x616   : > { %7465 = vmatmul.mubr.f32.gmra.mrb[38].mxu0 %v7201_v32  ;;  %v10083_v32 = vld [vmem:[%s19091_s3 + $0xad8] sm:$0xff] }
 0x617   : > { %7470 = vmatprep.mubr.f32.mxu0 %v7206_v51  ;;  %11231 = vmatpush1.bf16.msra.mxu0 %v11230_v40  ;;  %v10081_v40 = vld [vmem:[%s19091_s3 + $0xac8] sm:$0xff]  ;;  %v7209_v51 = vadd.f32 %v12276_v22, %v19525_v52  ;;  %v10086_v22 = vld [vmem:[%s19091_s3 + $0xaf0] sm:$0xff]  ;;  %v12279_v52 = vld [vmem:[#allocation4 + $0x108] sm:$0xff] }
 0x618   : > { %11233 = vmatprep.subr.bf16.mxu0 %v11232_v31  ;;  %v11238_v31 = vpack.c.bf16 %v10078_v8, %v10076_v56  ;;  %v11240_v3 = vpack.c.bf16 %v10083_v32, %v10081_v40  ;;  %v12278_v56 = vld [vmem:[#allocation4 + $0xe0] sm:$0xff]  ;;  %v19527_v8 = vld [vmem:[#allocation62_spill] sm:$0xff]  ;;  %v10084_v32 = vld [vmem:[%s19091_s3 + $0xae0] sm:$0xff]  ;;  %v7218_v59 = vadd.f32 %v12279_v52, %v19528_v17 }
 0x619   : > { %v19530_v52 = vld [vmem:[#allocation65_spill] sm:$0xff] }
 0x61a   : > { %7471 = vmatmul.mubr.f32.gmra.mrb[40].mxu0 %v7205_v43  ;;  %v10087_v43 = vld [vmem:[%s19091_s3 + $0xaf8] sm:$0xff] }
 0x61b   : > { %7476 = vmatprep.mubr.f32.mxu0 %v7210_v42  ;;  %11235 = vmatpush1.bf16.msra.mxu0 %v11234_v57  ;;  %v10085_v57 = vld [vmem:[%s19091_s3 + $0xae8] sm:$0xff]  ;;  %v7213_v42 = vadd.f32 %v12278_v56, %v19527_v8  ;;  %v10090_v56 = vld [vmem:[%s19091_s3 + $0xb10] sm:$0xff]  ;;  %v12281_v8 = vld [vmem:[#allocation4 + $0x128] sm:$0xff] }
 0x61c   : > { %11237 = vmatprep.subr.bf16.mxu0 %v11236_v26  ;;  %v11242_v26 = vpack.c.bf16 %v10082_v35, %v10080_v23  ;;  %v11244_v40 = vpack.c.bf16 %v10087_v43, %v10085_v57  ;;  %v12280_v23 = vld [vmem:[#allocation4 + $0x100] sm:$0xff]  ;;  %v19529_v35 = vld [vmem:[#allocation64_spill] sm:$0xff]  ;;  %v10088_v43 = vld [vmem:[%s19091_s3 + $0xb00] sm:$0xff]  ;;  %v7222_v17 = vadd.f32 %v12281_v8, %v19530_v52 }
 0x61d   : > { %v19532_v8 = vld [vmem:[#allocation67_spill] sm:$0xff] }
 0x61e   : > { %7477 = vmatmul.mubr.f32.gmra.mrb[42].mxu0 %v7209_v51  ;;  %v10091_v51 = vld [vmem:[%s19091_s3 + $0xb18] sm:$0xff] }
 0x61f   : > { %7482 = vmatprep.mubr.f32.mxu0 %v7214_v48  ;;  %11239 = vmatpush1.bf16.msra.mxu0 %v11238_v31  ;;  %v10089_v31 = vld [vmem:[%s19091_s3 + $0xb08] sm:$0xff]  ;;  %v7217_v48 = vadd.f32 %v12280_v23, %v19529_v35  ;;  %v10094_v23 = vld [vmem:[%s19091_s3 + $0xb30] sm:$0xff]  ;;  %v12283_v35 = vld [vmem:[#allocation4 + $0x148] sm:$0xff] }
 0x620   : > { %11241 = vmatprep.subr.bf16.mxu0 %v11240_v3  ;;  %v11246_v3 = vpack.c.bf16 %v10086_v22, %v10084_v32  ;;  %v11248_v57 = vpack.c.bf16 %v10091_v51, %v10089_v31  ;;  %v12282_v32 = vld [vmem:[#allocation4 + $0x120] sm:$0xff]  ;;  %v19531_v22 = vld [vmem:[#allocation66_spill] sm:$0xff]  ;;  %v10092_v51 = vld [vmem:[%s19091_s3 + $0xb20] sm:$0xff]  ;;  %v7226_v52 = vadd.f32 %v12283_v35, %v19532_v8 }
 0x621   : > { %v19534_v35 = vld [vmem:[#allocation71_spill] sm:$0xff] }
 0x622   : > { %7483 = vmatmul.mubr.f32.gmra.mrb[44].mxu0 %v7213_v42  ;;  %v10095_v42 = vld [vmem:[%s19091_s3 + $0xb38] sm:$0xff] }
 0x623   : > { %7488 = vmatprep.mubr.f32.mxu0 %v7218_v59  ;;  %11243 = vmatpush1.bf16.msra.mxu0 %v11242_v26  ;;  %v10093_v26 = vld [vmem:[%s19091_s3 + $0xb28] sm:$0xff]  ;;  %v7221_v59 = vadd.f32 %v12282_v32, %v19531_v22  ;;  %v10098_v32 = vld [vmem:[%s19091_s3 + $0xb50] sm:$0xff]  ;;  %v12285_v22 = vld [vmem:[#allocation4 + $0x168] sm:$0xff] }
 0x624   : > { %11245 = vmatprep.subr.bf16.mxu0 %v11244_v40  ;;  %v11250_v40 = vpack.c.bf16 %v10090_v56, %v10088_v43  ;;  %v11252_v31 = vpack.c.bf16 %v10095_v42, %v10093_v26  ;;  %v12284_v43 = vld [vmem:[#allocation4 + $0x140] sm:$0xff]  ;;  %v19533_v56 = vld [vmem:[#allocation68_spill] sm:$0xff]  ;;  %v10096_v42 = vld [vmem:[%s19091_s3 + $0xb40] sm:$0xff]  ;;  %v7230_v8 = vadd.f32 %v12285_v22, %v19534_v35 }
 0x625   : > { %v19536_v22 = vld [vmem:[#allocation73_spill] sm:$0xff] }
 0x626   : > { %7489 = vmatmul.mubr.f32.gmra.mrb[46].mxu0 %v7217_v48  ;;  %v10099_v48 = vld [vmem:[%s19091_s3 + $0xb58] sm:$0xff] }
 0x627   : > { %7494 = vmatprep.mubr.f32.mxu0 %v7222_v17  ;;  %11247 = vmatpush1.bf16.msra.mxu0 %v11246_v3  ;;  %v10097_v3 = vld [vmem:[%s19091_s3 + $0xb48] sm:$0xff]  ;;  %v7225_v17 = vadd.f32 %v12284_v43, %v19533_v56  ;;  %v10102_v43 = vld [vmem:[%s19091_s3 + $0xb70] sm:$0xff]  ;;  %v12287_v56 = vld [vmem:[#allocation4 + $0x188] sm:$0xff] }
 0x628   : > { %11249 = vmatprep.subr.bf16.mxu0 %v11248_v57  ;;  %v11254_v57 = vpack.c.bf16 %v10094_v23, %v10092_v51  ;;  %v11256_v26 = vpack.c.bf16 %v10099_v48, %v10097_v3  ;;  %v12286_v51 = vld [vmem:[#allocation4 + $0x160] sm:$0xff]  ;;  %v19535_v23 = vld [vmem:[#allocation72_spill] sm:$0xff]  ;;  %v10100_v48 = vld [vmem:[%s19091_s3 + $0xb60] sm:$0xff]  ;;  %v7234_v35 = vadd.f32 %v12287_v56, %v19536_v22 }
 0x629   : > { %v19538_v56 = vld [vmem:[#allocation75_spill] sm:$0xff] }
 0x62a   : > { %7495 = vmatmul.mubr.f32.gmra.mrb[48].mxu0 %v7221_v59  ;;  %v10103_v59 = vld [vmem:[%s19091_s3 + $0xb78] sm:$0xff] }
 0x62b   : > { %7500 = vmatprep.mubr.f32.mxu0 %v7226_v52  ;;  %11251 = vmatpush1.bf16.msra.mxu0 %v11250_v40  ;;  %v10101_v40 = vld [vmem:[%s19091_s3 + $0xb68] sm:$0xff]  ;;  %v7229_v52 = vadd.f32 %v12286_v51, %v19535_v23  ;;  %v10106_v51 = vld [vmem:[%s19091_s3 + $0xb90] sm:$0xff]  ;;  %v12289_v23 = vld [vmem:[#allocation4 + $0x1a8] sm:$0xff] }
 0x62c   : > { %11253 = vmatprep.subr.bf16.mxu0 %v11252_v31  ;;  %v11258_v31 = vpack.c.bf16 %v10098_v32, %v10096_v42  ;;  %v11260_v3 = vpack.c.bf16 %v10103_v59, %v10101_v40  ;;  %v12288_v42 = vld [vmem:[#allocation4 + $0x180] sm:$0xff]  ;;  %v19537_v32 = vld [vmem:[#allocation74_spill] sm:$0xff]  ;;  %v10104_v59 = vld [vmem:[%s19091_s3 + $0xb80] sm:$0xff]  ;;  %v7238_v22 = vadd.f32 %v12289_v23, %v19538_v56 }
 0x62d   : > { %v6921_v56 = vld [vmem:[#allocation4 + $0x220] sm:$0x3] }
 0x62e   : > { %7501 = vmatmul.mubr.f32.gmra.mrb[50].mxu0 %v7225_v17  ;;  %v10107_v17 = vld [vmem:[%s19091_s3 + $0xb98] sm:$0xff] }
 0x62f   : > { %7506 = vmatprep.mubr.f32.mxu0 %v7230_v8  ;;  %11255 = vmatpush1.bf16.msra.mxu0 %v11254_v57  ;;  %v10105_v57 = vld [vmem:[%s19091_s3 + $0xb88] sm:$0xff]  ;;  %v7233_v8 = vadd.f32 %v12288_v42, %v19537_v32  ;;  %v10108_v42 = vld [vmem:[%s19091_s3 + $0xba0] sm:$0xff]  ;;  %v10110_v32 = vld [vmem:[%s19091_s3 + $0xbb0] sm:$0xff] }
 0x630   : > { %11257 = vmatprep.subr.bf16.mxu0 %v11256_v26  ;;  %v11262_v26 = vpack.c.bf16 %v10102_v43, %v10100_v48  ;;  %v11264_v40 = vpack.c.bf16 %v10107_v17, %v10105_v57  ;;  %v11266_v48 = vpack.c.bf16 %v10106_v51, %v10104_v59  ;;  %v12290_v43 = vld [vmem:[#allocation4 + $0x1a0] sm:$0xff]  ;;  %v11270_v59 = vpack.c.bf16 %v10110_v32, %v10108_v42  ;;  %v10117_v42 = vld [vmem:[%s19091_s3 + $0xbe8] sm:$0xff] }
 0x631   : > { %v7117_v51 = vrot.slane %v6921_v56, 2  ;;  %v6860_v32 = vld [vmem:[#allocation4 + $0x38] sm:$0xfc] }
 0x632   : > { %7507 = vmatmul.mubr.f32.gmra.mrb[52].mxu0 %v7229_v52  ;;  %v10111_v52 = vld [vmem:[%s19091_s3 + $0xbb8] sm:$0xff] }
 0x633   : > { %7512 = vmatprep.mubr.f32.mxu0 %v7234_v35  ;;  %11259 = vmatpush1.bf16.msra.mxu0 %v11258_v31  ;;  %v10109_v31 = vld [vmem:[%s19091_s3 + $0xba8] sm:$0xff] }
 0x634   : > { %11261 = vmatprep.subr.bf16.mxu0 %v11260_v3  ;;  %v6922_v3 = vld [vmem:[#allocation4 + $0x228] sm:$0x3]  ;;  %v19539_v35 = vld [vmem:[#allocation76_spill] sm:$0xff]  ;;  %v11268_v17 = vpack.c.bf16 %v10111_v52, %v10109_v31  ;;  %v12292_v31 = vld [vmem:[#allocation4 + $0x1c0] sm:$0xff] }
 0x635   : > { %v7237_v57 = vadd.f32 %v12290_v43, %v19539_v35  ;;  %v7119_v23 = vrot.slane %v6922_v3, 2  ;;  %v19541_v52 = vld [vmem:[#allocation80_spill] sm:$0xff]  ;;  %v10114_v35 = vld [vmem:[%s19091_s3 + $0xbd0] sm:$0xff] }
 0x636   : > { %7513 = vmatmul.mubr.f32.gmra.mrb[54].mxu0 %v7233_v8  ;;  %v19540_v8 = vld [vmem:[#allocation77_spill] sm:$0xff]  ;;  %v7241_v3 = vadd.f32 %v12292_v31, %v19541_v52  ;;  %v10116_v52 = vld [vmem:[%s19091_s3 + $0xbe0] sm:$0xff] }
 0x637   : > { %7518 = vmatprep.mubr.f32.mxu0 %v7238_v22  ;;  %11263 = vmatpush1.bf16.msra.mxu0 %v11262_v26  ;;  %v7242_v22 = vadd.f32 %v12291_v25, %v19540_v8  ;;  %v10113_v26 = vld [vmem:[%s19091_s3 + $0xbc8] sm:$0xff]  ;;  %v10112_v25 = vld [vmem:[%s19091_s3 + $0xbc0] sm:$0xff]  ;;  %v19542_v8 = vld [vmem:[#allocation81_spill] sm:$0xff] }
 0x638   : > { %11265 = vmatprep.subr.bf16.mxu0 %v11264_v40  ;;  %v10115_v40 = vld [vmem:[%s19091_s3 + $0xbd8] sm:$0xff]  ;;  %v11274_v56 = vpack.c.bf16 %v10114_v35, %v10112_v25  ;;  %v6859_v25 = vld [vmem:[#allocation4 + $0x30] sm:$0xfc]  ;;  %v10121_v35 = vld [vmem:[%s19091_s3 + $0xc08] sm:$0xff] }
 0x639   : > { %v11272_v43 = vpack.c.bf16 %v10115_v40, %v10113_v26  ;;  %v19543_v26 = vld [vmem:[#allocation82_spill] sm:$0xff] }
 0x63a   : > { %7519 = vmatmul.mubr.f32.gmra.mrb[56].mxu0 %v7237_v57  ;;  %v7120_v57 = vsel %vm2302_vm3, %v17189_v29, %v7119_v23  ;;  %v7245_v40 = vadd.f32 %v17579_v0, %v19543_v26  ;;  %v10123_v0 = vld [vmem:[%s19091_s3 + $0xc18] sm:$0xff] }
 0x63b   : > { %7524 = vmatprep.mubr.f32.mxu0 %v7242_v22  ;;  %11267 = vmatpush1.bf16.msra.mxu0 %v11266_v48  ;;  %v7246_v48 = vadd.f32 %v17540_v58, %v19542_v8  ;;  %v18238_v22 = vld [vmem:[#allocation3 + $0x100] sm:$0xff]  ;;  %v7118_v58 = vsel %vm2302_vm3, %v17189_v29, %v7117_v51  ;;  %v6999_v8 = vrot.slane %v6859_v25, 2  ;;  %v19544_v25 = vld [vmem:[#allocation88_spill] sm:$0xff] }
 0x63c   : > { %11269 = vmatprep.subr.bf16.mxu0 %v11268_v17  ;;  %v10119_v17 = vld [vmem:[%s19091_s3 + $0xbf8] sm:$0xff]  ;;  %v7250_v23 = vadd.f32 %v18238_v22, %v7120_v57  ;;  %v7249_v51 = vadd.f32 %v18238_v22, %v7118_v58 }
 0x63d   : > { %v11276_v31 = vpack.c.bf16 %v10119_v17, %v10117_v42  ;;  %v10120_v42 = vld [vmem:[%s19091_s3 + $0xc00] sm:$0xff]  ;;  %v10122_v17 = vld [vmem:[%s19091_s3 + $0xc10] sm:$0xff]  ;;  %v7001_v58 = vsel %vm2302_vm3, %v6999_v8, %v19469_v45 }
 0x63e   : > { %7525 = vmatmul.mubr.f32.gmra.mrb[58].mxu0 %v7241_v3  ;;  %v7002_v3 = vrot.slane %v6860_v32, 2  ;;  %v12294_v32 = vld [vmem:[#allocation4 + $0x38] sm:$0xff]  ;;  %v10124_v45 = vld [vmem:[%s19091_s3 + $0xc20] sm:$0xff]  ;;  %v19545_v8 = vld [vmem:[#allocation89_spill] sm:$0xff] }
 0x63f   : > { %7530 = vmatprep.mubr.f32.mxu0 %v7246_v48  ;;  %11271 = vmatpush1.bf16.msra.mxu0 %v11270_v59  ;;  %v10118_v59 = vld [vmem:[%s19091_s3 + $0xbf0] sm:$0xff]  ;;  %v11280_v48 = vpack.c.bf16 %v10123_v0, %v10121_v35  ;;  %v10129_v0 = vld [vmem:[%s19091_s3 + $0xc48] sm:$0xff] }
 0x640   : > { %11273 = vmatprep.subr.bf16.mxu0 %v11272_v43  ;;  %v7004_v43 = vsel %vm2302_vm3, %v7002_v3, %v19468_v20  ;;  %v11278_v57 = vpack.c.bf16 %v10118_v59, %v10116_v52  ;;  %v10125_v20 = vld [vmem:[%s19091_s3 + $0xc28] sm:$0xff]  ;;  %v10126_v59 = vld [vmem:[%s19091_s3 + $0xc30] sm:$0xff] }
 0x641   : > { %v7192_v26 = vadd.f32 %v12294_v32, %v7004_v43  ;;  %v12296_v3 = vld [vmem:[#allocation4 + $0x58] sm:$0xff]  ;;  %v11286_v43 = vpack.c.bf16 %v10126_v59, %v10124_v45  ;;  %v10130_v32 = vld [vmem:[%s19091_s3 + $0xc50] sm:$0xff] }
 0x642   : > { %7531 = vmatmul.mubr.f32.gmra.mrb[60].mxu0 %v7245_v40  ;;  %v12295_v40 = vld [vmem:[#allocation4 + $0x30] sm:$0xff]  ;;  %v7196_v35 = vadd.f32 %v12296_v3, %v19544_v25  ;;  %v10134_v25 = vld [vmem:[%s19091_s3 + $0xc70] sm:$0xff] }
 0x643   : > { %11275 = vmatpush1.bf16.msra.mxu0 %v11274_v56  ;;  %7536 = vmatprep.mubr.f32.mxu0 %v7250_v23  ;;  %v10127_v56 = vld [vmem:[%s19091_s3 + $0xc38] sm:$0xff]  ;;  %v11282_v23 = vpack.c.bf16 %v10122_v17, %v10120_v42  ;;  %v10128_v17 = vld [vmem:[%s19091_s3 + $0xc40] sm:$0xff] }
 0x644   : > { %11277 = vmatprep.subr.bf16.mxu0 %v11276_v31  ;;  %v7191_v31 = vadd.f32 %v12295_v40, %v7001_v58  ;;  %v11284_v52 = vpack.c.bf16 %v10127_v56, %v10125_v20  ;;  %v19546_v58 = vld [vmem:[#allocation90_spill] sm:$0xff]  ;;  %v10133_v56 = vld [vmem:[%s19091_s3 + $0xc68] sm:$0xff]  ;;  %v11290_v40 = vpack.c.bf16 %v10130_v32, %v10128_v17  ;;  %v10132_v3 = vld [vmem:[%s19091_s3 + $0xc60] sm:$0xff] }
 0x646   : > { %7537 = vmatmul.mubr.f32.gmra.mrb[62].mxu0 %v7249_v51  ;;  %v10131_v51 = vld [vmem:[%s19091_s3 + $0xc58] sm:$0xff] }
 0x647   : > { %11279 = vmatpush1.bf16.msra.mxu0 %v11278_v57  ;;  %7607 = vmatprep.mubr.f32.mxu0 %v7192_v26  ;;  %v12297_v57 = vld [vmem:[#allocation4 + $0x50] sm:$0xff]  ;;  %v11288_v42 = vpack.c.bf16 %v10131_v51, %v10129_v0  ;;  %v12298_v26 = vld [vmem:[#allocation4 + $0x78] sm:$0xff] }
 0x648   : > { %11281 = vmatprep.subr.bf16.mxu0 %v11280_v48  ;;  %v7195_v48 = vadd.f32 %v12297_v57, %v19545_v8  ;;  %v7200_v20 = vadd.f32 %v12298_v26, %v19546_v58  ;;  %v19548_v0 = vld [vmem:[#allocation92_spill] sm:$0xff]  ;;  %v10139_v57 = vld [vmem:[%s19091_s3 + $0xc98] sm:$0xff]  ;;  %v11294_v8 = vpack.c.bf16 %v10134_v25, %v10132_v3  ;;  %v10136_v26 = vld [vmem:[%s19091_s3 + $0xc80] sm:$0xff] }
 0x649   : > { %v10138_v58 = vld [vmem:[%s19091_s3 + $0xc90] sm:$0xff] }
 0x64a   : > { %7608 = vmatmul.mubr.f32.vlgmr.msra.gmra.mrb[32].mxu0 %v7191_v31  ;;  %v12299_v31 = vld [vmem:[#allocation4 + $0x70] sm:$0xff] }
 0x64b   : > { %7613 = vmatprep.mubr.f32.mxu0 %v7196_v35  ;;  %11283 = vmatpush1.bf16.msra.mxu0 %v11282_v23  ;;  %v10135_v23 = vld [vmem:[%s19091_s3 + $0xc78] sm:$0xff]  ;;  %v12300_v35 = vld [vmem:[#allocation4 + $0x98] sm:$0xff] }
 0x64c   : > { %11285 = vmatprep.subr.bf16.mxu0 %v11284_v52  ;;  %v19547_v52 = vld [vmem:[#allocation91_spill] sm:$0xff]  ;;  %v11292_v59 = vpack.c.bf16 %v10135_v23, %v10133_v56  ;;  %v7204_v51 = vadd.f32 %v12300_v35, %v19548_v0  ;;  %v19550_v56 = vld [vmem:[#allocation94_spill] sm:$0xff]  ;;  %v10142_v0 = vld [vmem:[%s19091_s3 + $0xcb0] sm:$0xff] }
 0x64d   : > { %v7199_v45 = vadd.f32 %v12299_v31, %v19547_v52  ;;  %v10143_v31 = vld [vmem:[%s19091_s3 + $0xcb8] sm:$0xff]  ;;  %v11298_v52 = vpack.c.bf16 %v10138_v58, %v10136_v26  ;;  %v10140_v35 = vld [vmem:[%s19091_s3 + $0xca0] sm:$0xff] }
 0x64e   : > { %7614 = vmatmul.mubr.f32.gmra.mrb[34].mxu0 %v7195_v48  ;;  %v12301_v48 = vld [vmem:[#allocation4 + $0x90] sm:$0xff] }
 0x64f   : > { %7619 = vmatprep.mubr.f32.mxu0 %v7200_v20  ;;  %11287 = vmatpush1.bf16.msra.mxu0 %v11286_v43  ;;  %v10137_v43 = vld [vmem:[%s19091_s3 + $0xc88] sm:$0xff] }
 0x650   : > { %11289 = vmatprep.subr.bf16.mxu0 %v11288_v42  ;;  %v19549_v42 = vld [vmem:[#allocation93_spill] sm:$0xff]  ;;  %v11296_v32 = vpack.c.bf16 %v10139_v57, %v10137_v43  ;;  %v12302_v20 = vld [vmem:[#allocation4 + $0xb8] sm:$0xff]  ;;  %v19552_v43 = vld [vmem:[#allocation98_spill] sm:$0xff] }
 0x651   : > { %v7203_v17 = vadd.f32 %v12301_v48, %v19549_v42  ;;  %v7208_v23 = vadd.f32 %v12302_v20, %v19550_v56  ;;  %v10147_v48 = vld [vmem:[%s19091_s3 + $0xcd8] sm:$0xff]  ;;  %v11302_v42 = vpack.c.bf16 %v10142_v0, %v10140_v35  ;;  %v10144_v20 = vld [vmem:[%s19091_s3 + $0xcc0] sm:$0xff]  ;;  %v10146_v56 = vld [vmem:[%s19091_s3 + $0xcd0] sm:$0xff] }
 0x652   : > { %7620 = vmatmul.mubr.f32.gmra.mrb[36].mxu0 %v7199_v45  ;;  %v12303_v45 = vld [vmem:[#allocation4 + $0xb0] sm:$0xff] }
 0x653   : > { %7625 = vmatprep.mubr.f32.mxu0 %v7204_v51  ;;  %11291 = vmatpush1.bf16.msra.mxu0 %v11290_v40  ;;  %v10141_v40 = vld [vmem:[%s19091_s3 + $0xca8] sm:$0xff] }
 0x654   : > { %11293 = vmatprep.subr.bf16.mxu0 %v11292_v59  ;;  %v19551_v59 = vld [vmem:[#allocation96_spill] sm:$0xff]  ;;  %v11300_v25 = vpack.c.bf16 %v10143_v31, %v10141_v40  ;;  %v19554_v40 = vld [vmem:[#allocation101_spill] sm:$0xff] }
 0x655   : > { %v7207_v3 = vadd.f32 %v12303_v45, %v19551_v59  ;;  %v12304_v51 = vld [vmem:[#allocation4 + $0xd8] sm:$0xff]  ;;  %v10151_v45 = vld [vmem:[%s19091_s3 + $0xcf8] sm:$0xff]  ;;  %v11306_v59 = vpack.c.bf16 %v10146_v56, %v10144_v20 }
 0x656   : > { %7626 = vmatmul.mubr.f32.gmra.mrb[38].mxu0 %v7203_v17  ;;  %v7212_v57 = vadd.f32 %v12304_v51, %v19552_v43  ;;  %v12305_v17 = vld [vmem:[#allocation4 + $0xd0] sm:$0xff]  ;;  %v10150_v43 = vld [vmem:[%s19091_s3 + $0xcf0] sm:$0xff] }
 0x657   : > { %7631 = vmatprep.mubr.f32.mxu0 %v7208_v23  ;;  %11295 = vmatpush1.bf16.msra.mxu0 %v11294_v8  ;;  %v10145_v8 = vld [vmem:[%s19091_s3 + $0xcc8] sm:$0xff]  ;;  %v10148_v51 = vld [vmem:[%s19091_s3 + $0xce0] sm:$0xff] }
 0x658   : > { %11297 = vmatprep.subr.bf16.mxu0 %v11296_v32  ;;  %v19553_v32 = vld [vmem:[#allocation100_spill] sm:$0xff]  ;;  %v11304_v58 = vpack.c.bf16 %v10147_v48, %v10145_v8  ;;  %v19556_v8 = vld [vmem:[#allocation103_spill] sm:$0xff] }
 0x659   : > { %v7211_v26 = vadd.f32 %v12305_v17, %v19553_v32  ;;  %v12306_v23 = vld [vmem:[#allocation4 + $0xf8] sm:$0xff]  ;;  %v10155_v17 = vld [vmem:[%s19091_s3 + $0xd18] sm:$0xff]  ;;  %v11310_v32 = vpack.c.bf16 %v10150_v43, %v10148_v51 }
 0x65a   : > { %7632 = vmatmul.mubr.f32.gmra.mrb[40].mxu0 %v7207_v3  ;;  %v7216_v31 = vadd.f32 %v12306_v23, %v19554_v40  ;;  %v12307_v3 = vld [vmem:[#allocation4 + $0xf0] sm:$0xff]  ;;  %v10154_v40 = vld [vmem:[%s19091_s3 + $0xd10] sm:$0xff] }
 0x65b   : > { %7637 = vmatprep.mubr.f32.mxu0 %v7212_v57  ;;  %11299 = vmatpush1.bf16.msra.mxu0 %v11298_v52  ;;  %v10149_v52 = vld [vmem:[%s19091_s3 + $0xce8] sm:$0xff]  ;;  %v10152_v23 = vld [vmem:[%s19091_s3 + $0xd00] sm:$0xff] }
 0x65c   : > { %11301 = vmatprep.subr.bf16.mxu0 %v11300_v25  ;;  %v19555_v25 = vld [vmem:[#allocation102_spill] sm:$0xff]  ;;  %v11308_v0 = vpack.c.bf16 %v10151_v45, %v10149_v52  ;;  %v12308_v57 = vld [vmem:[#allocation4 + $0x118] sm:$0xff] }
 0x65d   : > { %v7215_v35 = vadd.f32 %v12307_v3, %v19555_v25  ;;  %v7220_v48 = vadd.f32 %v12308_v57, %v19556_v8  ;;  %v19558_v52 = vld [vmem:[#allocation106_spill] sm:$0xff]  ;;  %v11314_v25 = vpack.c.bf16 %v10154_v40, %v10152_v23  ;;  %v10156_v57 = vld [vmem:[%s19091_s3 + $0xd20] sm:$0xff]  ;;  %v10158_v8 = vld [vmem:[%s19091_s3 + $0xd30] sm:$0xff] }
 0x65e   : > { %7638 = vmatmul.mubr.f32.gmra.mrb[42].mxu0 %v7211_v26  ;;  %v12309_v26 = vld [vmem:[#allocation4 + $0x110] sm:$0xff]  ;;  %v10159_v3 = vld [vmem:[%s19091_s3 + $0xd38] sm:$0xff] }
 0x65f   : > { %7643 = vmatprep.mubr.f32.mxu0 %v7216_v31  ;;  %11303 = vmatpush1.bf16.msra.mxu0 %v11302_v42  ;;  %v10153_v42 = vld [vmem:[%s19091_s3 + $0xd08] sm:$0xff] }
 0x660   : > { %11305 = vmatprep.subr.bf16.mxu0 %v11304_v58  ;;  %v19557_v58 = vld [vmem:[#allocation104_spill] sm:$0xff]  ;;  %v11312_v56 = vpack.c.bf16 %v10155_v17, %v10153_v42  ;;  %v19560_v42 = vld [vmem:[#allocation110_spill] sm:$0xff] }
 0x661   : > { %v7219_v20 = vadd.f32 %v12309_v26, %v19557_v58  ;;  %v12310_v31 = vld [vmem:[#allocation4 + $0x138] sm:$0xff]  ;;  %v10163_v26 = vld [vmem:[%s19091_s3 + $0xd58] sm:$0xff]  ;;  %v11318_v58 = vpack.c.bf16 %v10158_v8, %v10156_v57  ;;  %v10164_v8 = vld [vmem:[%s19091_s3 + $0xd60] sm:$0xff] }
 0x662   : > { %7644 = vmatmul.mubr.f32.gmra.mrb[44].mxu0 %v7215_v35  ;;  %v7224_v45 = vadd.f32 %v12310_v31, %v19558_v52  ;;  %v12311_v35 = vld [vmem:[#allocation4 + $0x130] sm:$0xff]  ;;  %v10162_v52 = vld [vmem:[%s19091_s3 + $0xd50] sm:$0xff] }
 0x663   : > { %7649 = vmatprep.mubr.f32.mxu0 %v7220_v48  ;;  %11307 = vmatpush1.bf16.msra.mxu0 %v11306_v59  ;;  %v10157_v59 = vld [vmem:[%s19091_s3 + $0xd28] sm:$0xff]  ;;  %v10160_v31 = vld [vmem:[%s19091_s3 + $0xd40] sm:$0xff] }
 0x664   : > { %11309 = vmatprep.subr.bf16.mxu0 %v11308_v0  ;;  %v19559_v0 = vld [vmem:[#allocation107_spill] sm:$0xff]  ;;  %v11316_v43 = vpack.c.bf16 %v10159_v3, %v10157_v59  ;;  %v12312_v48 = vld [vmem:[#allocation4 + $0x158] sm:$0xff]  ;;  %v19562_v59 = vld [vmem:[#allocation113_spill] sm:$0xff] }
 0x665   : > { %v7223_v51 = vadd.f32 %v12311_v35, %v19559_v0  ;;  %v7228_v17 = vadd.f32 %v12312_v48, %v19560_v42  ;;  %v10167_v35 = vld [vmem:[%s19091_s3 + $0xd78] sm:$0xff]  ;;  %v11322_v0 = vpack.c.bf16 %v10162_v52, %v10160_v31  ;;  %v10166_v48 = vld [vmem:[%s19091_s3 + $0xd70] sm:$0xff]  ;;  %v12316_v42 = vld [vmem:[#allocation4 + $0x198] sm:$0xff] }
 0x666   : > { %7650 = vmatmul.mubr.f32.gmra.mrb[46].mxu0 %v7219_v20  ;;  %v12313_v20 = vld [vmem:[#allocation4 + $0x150] sm:$0xff]  ;;  %v10170_v52 = vld [vmem:[%s19091_s3 + $0xd90] sm:$0xff] }
 0x667   : > { %7655 = vmatprep.mubr.f32.mxu0 %v7224_v45  ;;  %11311 = vmatpush1.bf16.msra.mxu0 %v11310_v32  ;;  %v10161_v32 = vld [vmem:[%s19091_s3 + $0xd48] sm:$0xff]  ;;  %v10168_v31 = vld [vmem:[%s19091_s3 + $0xd80] sm:$0xff] }
 0x668   : > { %11313 = vmatprep.subr.bf16.mxu0 %v11312_v56  ;;  %v19561_v56 = vld [vmem:[#allocation111_spill] sm:$0xff]  ;;  %v11320_v40 = vpack.c.bf16 %v10163_v26, %v10161_v32  ;;  %v12314_v45 = vld [vmem:[#allocation4 + $0x178] sm:$0xff] }
 0x669   : > { %v7227_v23 = vadd.f32 %v12313_v20, %v19561_v56  ;;  %v7232_v3 = vadd.f32 %v12314_v45, %v19562_v59  ;;  %v10169_v26 = vld [vmem:[%s19091_s3 + $0xd88] sm:$0xff]  ;;  %v12317_v20 = vld [vmem:[#allocation4 + $0x190] sm:$0xff]  ;;  %v19565_v59 = vld [vmem:[#allocation117_spill] sm:$0xff] }
 0x66a   : > { %7656 = vmatmul.mubr.f32.gmra.mrb[48].mxu0 %v7223_v51  ;;  %v12315_v51 = vld [vmem:[#allocation4 + $0x170] sm:$0xff]  ;;  %v19564_v56 = vld [vmem:[#allocation116_spill] sm:$0xff] }
 0x66b   : > { %7661 = vmatprep.mubr.f32.mxu0 %v7228_v17  ;;  %11315 = vmatpush1.bf16.msra.mxu0 %v11314_v25  ;;  %v10165_v25 = vld [vmem:[%s19091_s3 + $0xd68] sm:$0xff]  ;;  %v19563_v17 = vld [vmem:[#allocation115_spill] sm:$0xff] }
 0x66c   : > { %11317 = vmatprep.subr.bf16.mxu0 %v11316_v43  ;;  %v7231_v43 = vadd.f32 %v12315_v51, %v17448_v33  ;;  %v11324_v57 = vpack.c.bf16 %v10167_v35, %v10165_v25  ;;  %v7236_v32 = vadd.f32 %v12316_v42, %v19563_v17  ;;  %v10171_v33 = vld [vmem:[%s19091_s3 + $0xd98] sm:$0xff]  ;;  %v12318_v45 = vld [vmem:[#allocation4 + $0x1b8] sm:$0xff]  ;;  %v11330_v51 = vpack.c.bf16 %v10170_v52, %v10168_v31  ;;  %v10172_v17 = vld [vmem:[%s19091_s3 + $0xda0] sm:$0xff] }
 0x66d   : > { %v10173_v25 = vld [vmem:[%s19091_s3 + $0xda8] sm:$0xff]  ;;  %v10175_v35 = vld [vmem:[%s19091_s3 + $0xdb8] sm:$0xff] }
 0x66e   : > { %7662 = vmatmul.mubr.f32.gmra.mrb[50].mxu0 %v7227_v23  ;;  %v7235_v23 = vadd.f32 %v12317_v20, %v19564_v56  ;;  %v11332_v42 = vpack.c.bf16 %v10175_v35, %v10173_v25  ;;  %v12320_v20 = vld [vmem:[#allocation4 + $0x1d8] sm:$0xff]  ;;  %v19567_v56 = vld [vmem:[#allocation119_spill] sm:$0xff] }
 0x66f   : > { %7667 = vmatprep.mubr.f32.mxu0 %v7232_v3  ;;  %11319 = vmatpush1.bf16.msra.mxu0 %v11318_v58  ;;  %v11326_v58 = vpack.c.bf16 %v10166_v48, %v10164_v8  ;;  %v7240_v3 = vadd.f32 %v12318_v45, %v19565_v59  ;;  %v19566_v8 = vld [vmem:[#allocation118_spill] sm:$0xff]  ;;  %v7744_v59 = vld [vmem:[#allocation4 + $0x20] sm:$0xc0]  ;;  %v19568_v25 = vld [vmem:[#allocation120_spill] sm:$0xff] }
 0x670   : > { %11321 = vmatprep.subr.bf16.mxu0 %v11320_v40  ;;  %v11328_v40 = vpack.c.bf16 %v10171_v33, %v10169_v26  ;;  %v6923_v33 = vld [vmem:[#allocation4 + $0x230] sm:$0x3] }
 0x671   : > { %v7121_v52 = vrot.slane %v6923_v33, 2  ;;  %v7760_v33 = vrot.slane %v7744_v59, 2  ;;  %v7736_v59 = vld [vmem:[#allocation4 + $0x20] sm:$0xf0] }
 0x672   : > { %7668 = vmatmul.mubr.f32.gmra.mrb[52].mxu0 %v7231_v43  ;;  %v7745_v43 = vld [vmem:[#allocation4 + $0x28] sm:$0xc0] }
 0x673   : > { %7673 = vmatprep.mubr.f32.mxu0 %v7236_v32  ;;  %11323 = vmatpush1.bf16.msra.mxu0 %v11322_v0  ;;  %v6924_v0 = vld [vmem:[#allocation4 + $0x238] sm:$0x3]  ;;  %v10174_v32 = vld [vmem:[%s19091_s3 + $0xdb0] sm:$0xff]  ;;  %v7762_v45 = vrot.slane %v7745_v43, 2 }
 0x674   : > { %11325 = vmatprep.subr.bf16.mxu0 %v11324_v57  ;;  %v12319_v57 = vld [vmem:[#allocation4 + $0x1b0] sm:$0xff]  ;;  %v7123_v26 = vrot.slane %v6924_v0, 2  ;;  %v11334_v31 = vpack.c.bf16 %v10174_v32, %v10172_v17  ;;  %v10181_v17 = vld [vmem:[%s19091_s3 + $0xde8] sm:$0xff] }
 0x675   : > { %v7239_v48 = vadd.f32 %v12319_v57, %v19566_v8  ;;  %v10176_v57 = vld [vmem:[%s19091_s3 + $0xdc0] sm:$0xff]  ;;  %v10178_v8 = vld [vmem:[%s19091_s3 + $0xdd0] sm:$0xff]  ;;  %v7763_v32 = vsel %vm2302_vm3, %v7762_v45, %v19514_v18  ;;  %v7761_v45 = vsel %vm2302_vm3, %v7760_v33, %v19515_v19 }
 0x676   : > { %7674 = vmatmul.mubr.f32.gmra.mrb[54].mxu0 %v7235_v23  ;;  %v10177_v23 = vld [vmem:[%s19091_s3 + $0xdc8] sm:$0xff]  ;;  %v10180_v18 = vld [vmem:[%s19091_s3 + $0xde0] sm:$0xff] }
 0x677   : > { %7679 = vmatprep.mubr.f32.mxu0 %v7240_v3  ;;  %11327 = vmatpush1.bf16.msra.mxu0 %v11326_v58  ;;  %v7244_v58 = vadd.f32 %v12320_v20, %v19567_v56  ;;  %v12321_v3 = vld [vmem:[#allocation4 + $0x1d0] sm:$0xff]  ;;  %v11338_v20 = vpack.c.bf16 %v10178_v8, %v10176_v57  ;;  %v7737_v56 = vld [vmem:[#allocation4 + $0x28] sm:$0xf0]  ;;  %v10186_v57 = vld [vmem:[%s19091_s3 + $0xe10] sm:$0xff] }
 0x678   : > { %11329 = vmatprep.subr.bf16.mxu0 %v11328_v40  ;;  %v10179_v40 = vld [vmem:[%s19091_s3 + $0xdd8] sm:$0xff]  ;;  %v7243_v35 = vadd.f32 %v12321_v3, %v19568_v25  ;;  %v7788_v25 = vadd.f32 %v7761_v45, %v7736_v59  ;;  %v10184_v19 = vld [vmem:[%s19091_s3 + $0xe00] sm:$0xff]  ;;  %v10189_v8 = vld [vmem:[%s19091_s3 + $0xe28] sm:$0xff] }
 0x679   : > { %v11336_v0 = vpack.c.bf16 %v10179_v40, %v10177_v23  ;;  %v10182_v40 = vld [vmem:[%s19091_s3 + $0xdf0] sm:$0xff] }
 0x67a   : > { %7680 = vmatmul.mubr.f32.gmra.mrb[56].mxu0 %v7239_v48  ;;  %v19569_v48 = vld [vmem:[#allocation121_spill] sm:$0xff]  ;;  %v11342_v3 = vpack.c.bf16 %v10182_v40, %v10180_v18  ;;  %v19573_v18 = vld [vmem:[#allocation50_spill] sm:$0xff] }
 0x67b   : > { %7685 = vmatprep.mubr.f32.mxu0 %v7244_v58  ;;  %11331 = vmatpush1.bf16.msra.mxu0 %v11330_v51  ;;  %v7124_v51 = vsel %vm2302_vm3, %v17189_v29, %v7123_v26  ;;  %v7248_v43 = vadd.f32 %v18009_v28, %v19569_v48  ;;  %v7122_v28 = vsel %vm2302_vm3, %v17189_v29, %v7121_v52  ;;  %v10185_v52 = vld [vmem:[%s19091_s3 + $0xe08] sm:$0xff]  ;;  %v19570_v48 = vld [vmem:[#allocation41_spill] sm:$0xff] }
 0x67c   : > { %11333 = vmatprep.subr.bf16.mxu0 %v11332_v42  ;;  %v10183_v42 = vld [vmem:[%s19091_s3 + $0xdf8] sm:$0xff]  ;;  %v7252_v26 = vadd.f32 %v18238_v22, %v7124_v51  ;;  %v7247_v58 = vadd.f32 %v18023_v4, %v17528_v13  ;;  %v7251_v4 = vadd.f32 %v18238_v22, %v7122_v28  ;;  %v19572_v28 = vrot.slane %v19438_v60, 4  ;;  %v10192_v60 = vld [vmem:[%s19091_s3 + $0xe40] sm:$0xff]  ;;  %v10194_v45 = vld [vmem:[%s19091_s3 + $0xe50] sm:$0xff] }
 0x67d   : > { %v11340_v23 = vpack.c.bf16 %v10183_v42, %v10181_v17  ;;  %v10187_v13 = vld [vmem:[%s19091_s3 + $0xe18] sm:$0xff]  ;;  %v8053_v42 = vrot.slane %v7788_v25, 4  ;;  %v19575_v59 = vld [vmem:[#allocation13_spill] sm:$0xff] }
 0x67e   : > { %7686 = vmatmul.mubr.f32.gmra.mrb[58].mxu0 %v7243_v35  ;;  %v10191_v51 = vld [vmem:[%s19091_s3 + $0xe38] sm:$0xff] }
 0x67f   : > { %7691 = vmatprep.mubr.f32.mxu0 %v7248_v43  ;;  %11335 = vmatpush1.bf16.msra.mxu0 %v11334_v31  ;;  %v7789_v31 = vadd.f32 %v7763_v32, %v7737_v56  ;;  %v19571_v43 = vrot.slane %v19570_v48, 4  ;;  %v11346_v32 = vpack.c.bf16 %v10186_v57, %v10184_v19  ;;  %v11348_v33 = vpack.c.bf16 %v10191_v51, %v10189_v8  ;;  %v10201_v19 = vld [vmem:[%s19091_s3 + $0xe88] sm:$0xff]  ;;  %v10203_v57 = vld [vmem:[%s19091_s3 + $0xe98] sm:$0xff]  ;;  %v10200_v48 = vld [vmem:[%s19091_s3 + $0xe80] sm:$0xff] }
 0x680   : > { %11337 = vmatprep.subr.bf16.mxu0 %v11336_v0  ;;  %v11344_v0 = vpack.c.bf16 %v10187_v13, %v10185_v52  ;;  %v8055_v56 = vsel %vm3230_vm4, %v8053_v42, %v19572_v28  ;;  %v10197_v52 = vld [vmem:[%s19091_s3 + $0xe68] sm:$0xff]  ;;  %v10199_v13 = vld [vmem:[%s19091_s3 + $0xe78] sm:$0xff]  ;;  %v11360_v51 = vpack.c.bf16 %v10203_v57, %v10201_v19  ;;  %v10208_v28 = vld [vmem:[%s19091_s3 + $0xec0] sm:$0xff] }
 0x681   : > { %v8056_v35 = vrot.slane %v7789_v31, 4  ;;  %v11356_v25 = vpack.c.bf16 %v10199_v13, %v10197_v52  ;;  %v10218_v52 = vld [vmem:[%s19091_s3 + $0xf10] sm:$0xff]  ;;  %v10221_v13 = vld [vmem:[%s19091_s3 + $0xf28] sm:$0xff]  ;;  %v10224_v19 = vld [vmem:[%s19091_s3 + $0xf40] sm:$0xff] }
 0x682   : > { %7692 = vmatmul.mubr.f32.gmra.mrb[60].mxu0 %v7247_v58  ;;  %v10193_v58 = vld [vmem:[%s19091_s3 + $0xe48] sm:$0xff]  ;;  %v10226_v57 = vld [vmem:[%s19091_s3 + $0xf50] sm:$0xff] }
 0x683   : > { %11339 = vmatpush1.bf16.msra.mxu0 %v11338_v20  ;;  %7697 = vmatprep.mubr.f32.mxu0 %v7252_v26  ;;  %v8058_v17 = vsel %vm3230_vm4, %v8056_v35, %v19571_v43  ;;  %v10188_v20 = vld [vmem:[%s19091_s3 + $0xe20] sm:$0xff]  ;;  %v10190_v26 = vld [vmem:[%s19091_s3 + $0xe30] sm:$0xff] }
 0x684   : > { %11341 = vmatprep.subr.bf16.mxu0 %v11340_v23  ;;  %v10195_v23 = vld [vmem:[%s19091_s3 + $0xe58] sm:$0xff]  ;;  %v11350_v40 = vpack.c.bf16 %v10190_v26, %v10188_v20  ;;  %v10196_v35 = vld [vmem:[%s19091_s3 + $0xe60] sm:$0xff]  ;;  %v10202_v43 = vld [vmem:[%s19091_s3 + $0xe90] sm:$0xff] }
 0x685   : > { %v11352_v31 = vpack.c.bf16 %v10195_v23, %v10193_v58  ;;  %v10209_v20 = vld [vmem:[%s19091_s3 + $0xec8] sm:$0xff] }
 0x686   : > { %7698 = vmatmul.mubr.f32.gmra.mrb[62].mxu0 %v7251_v4  ;;  %v19574_v4 = vld [vmem:[#allocation12_spill] sm:$0xff] }
 0x687   : > { %11343 = vmatpush1.bf16.msra.mxu0 %v11342_v3  ;;  %8313 = vmatprep.mubr.f32.mxu0 %v8058_v17  ;;  %v11354_v3 = vpack.c.bf16 %v10194_v45, %v10192_v60  ;;  %v10205_v17 = vld [vmem:[%s19091_s3 + $0xea8] sm:$0xff]  ;;  %v10216_v45 = vld [vmem:[%s19091_s3 + $0xf00] sm:$0xff] }
 0x688   : > { %11345 = vmatprep.subr.bf16.mxu0 %v11344_v0  ;;  %v10198_v0 = vld [vmem:[%s19091_s3 + $0xe70] sm:$0xff]  ;;  %v10213_v58 = vld [vmem:[%s19091_s3 + $0xee8] sm:$0xff] }
 0x689   : > { %v11358_v8 = vpack.c.bf16 %v10198_v0, %v10196_v35 }
 0x68a   : > { %8314 = vmatmul.mubr.f32.vlgmr.msra.gmra.mrb[32].mxu0 %v8055_v56  ;;  %v10210_v56 = vld [vmem:[%s19091_s3 + $0xed0] sm:$0xff] }
 0x68b   : > { %8319 = vmatprep.mubr.f32.mxu0 %v19573_v18  ;;  %11347 = vmatpush1.bf16.msra.mxu0 %v11346_v32  ;;  %v10204_v32 = vld [vmem:[%s19091_s3 + $0xea0] sm:$0xff] }
 0x68c   : > { %11349 = vmatprep.subr.bf16.mxu0 %v11348_v33  ;;  %v10206_v33 = vld [vmem:[%s19091_s3 + $0xeb0] sm:$0xff]  ;;  %v10212_v18 = vld [vmem:[%s19091_s3 + $0xee0] sm:$0xff] }
 0x68e   : > { %8320 = vmatmul.mubr.f32.gmra.mrb[34].mxu0 %v19574_v4 }
 0x68f   : > { %8325 = vmatprep.mubr.f32.mxu0 %v19575_v59  ;;  %11351 = vmatpush1.bf16.msra.mxu0 %v11350_v40  ;;  %v10214_v40 = vld [vmem:[%s19091_s3 + $0xef0] sm:$0xff]  ;;  %v10220_v59 = vld [vmem:[%s19091_s3 + $0xf20] sm:$0xff] }
 0x690   : > { %11353 = vmatprep.subr.bf16.mxu0 %v11352_v31  ;;  %v10217_v31 = vld [vmem:[%s19091_s3 + $0xf08] sm:$0xff] }
 0x692   : > { %8326 = vmatmul.mubr.f32.gmra.mrb[36].mxu0 %v17575_v1  ;;  %v10207_v1 = vld [vmem:[%s19091_s3 + $0xeb8] sm:$0xff] }
 0x693   : > { %8331 = vmatprep.mubr.f32.mxu0 %v17591_v12  ;;  %11355 = vmatpush1.bf16.msra.mxu0 %v11354_v3  ;;  %v11362_v12 = vpack.c.bf16 %v10202_v43, %v10200_v48  ;;  %v11364_v42 = vpack.c.bf16 %v10207_v1, %v10205_v17  ;;  %v10222_v3 = vld [vmem:[%s19091_s3 + $0xf30] sm:$0xff]  ;;  %v11386_v48 = vpack.c.bf16 %v10226_v57, %v10224_v19  ;;  %v10245_v57 = vld [vmem:[%s19091_s3 + $0xfe8] sm:$0xff] }
 0x694   : > { %11357 = vmatprep.subr.bf16.mxu0 %v11356_v25  ;;  %v10225_v25 = vld [vmem:[%s19091_s3 + $0xf48] sm:$0xff]  ;;  %v11382_v35 = vpack.c.bf16 %v10222_v3, %v10220_v59  ;;  %v7748_v17 = vld [vmem:[#allocation4 + $0x220] sm:$0x3f]  ;;  %v19581_v59 = vld [vmem:[#allocation19_spill] sm:$0xff] }
 0x696   : > { %8332 = vmatmul.mubr.f32.gmra.mrb[38].mxu0 %v17600_v10  ;;  %v10211_v10 = vld [vmem:[%s19091_s3 + $0xed8] sm:$0xff] }
 0x697   : > { %8337 = vmatprep.mubr.f32.mxu0 %v17614_v11  ;;  %11359 = vmatpush1.bf16.msra.mxu0 %v11358_v8  ;;  %v11366_v11 = vpack.c.bf16 %v10206_v33, %v10204_v32  ;;  %v11368_v26 = vpack.c.bf16 %v10211_v10, %v10209_v20  ;;  %v7749_v8 = vld [vmem:[#allocation4 + $0x228] sm:$0x3f]  ;;  %v7768_v32 = vrot.slane %v7748_v17, 2  ;;  %v19577_v33 = vld [vmem:[#allocation17_spill] sm:$0xff] }
 0x698   : > { %11361 = vmatprep.subr.bf16.mxu0 %v11360_v51  ;;  %v10229_v51 = vld [vmem:[%s19091_s3 + $0xf68] sm:$0xff]  ;;  %v7770_v43 = vrot.slane %v7749_v8, 2  ;;  %v10247_v8 = vld [vmem:[%s19091_s3 + $0xff8] sm:$0xff] }
 0x69a   : > { %8338 = vmatmul.mubr.f32.gmra.mrb[40].mxu0 %v17617_v7  ;;  %v10215_v7 = vld [vmem:[%s19091_s3 + $0xef8] sm:$0xff]  ;;  %v7771_v10 = vsel %vm2302_vm3, %v17189_v29, %v7770_v43 }
 0x69b   : > { %8343 = vmatprep.mubr.f32.mxu0 %v17620_v50  ;;  %11363 = vmatpush1.bf16.msra.mxu0 %v11362_v12  ;;  %v11370_v50 = vpack.c.bf16 %v10210_v56, %v10208_v28  ;;  %v11372_v23 = vpack.c.bf16 %v10215_v7, %v10213_v58  ;;  %v10228_v12 = vld [vmem:[%s19091_s3 + $0xf60] sm:$0xff]  ;;  %v10234_v28 = vld [vmem:[%s19091_s3 + $0xf90] sm:$0xff]  ;;  %v10239_v56 = vld [vmem:[%s19091_s3 + $0xfb8] sm:$0xff] }
 0x69c   : > { %11365 = vmatprep.subr.bf16.mxu0 %v11364_v42  ;;  %v10230_v42 = vld [vmem:[%s19091_s3 + $0xf70] sm:$0xff]  ;;  %v7741_v58 = vld [vmem:[#allocation4 + $0x228] sm:$0xf] }
 0x69d   : > { %v11390_v20 = vpack.c.bf16 %v10230_v42, %v10228_v12  ;;  %v19578_v7 = vld [vmem:[#allocation14_spill] sm:$0xff]  ;;  %v11404_v42 = vpack.c.bf16 %v10247_v8, %v10245_v57 }
 0x69e   : > { %8344 = vmatmul.mubr.f32.gmra.mrb[42].mxu0 %v17629_v24  ;;  %v10219_v24 = vld [vmem:[%s19091_s3 + $0xf18] sm:$0xff] }
 0x69f   : > { %8349 = vmatprep.mubr.f32.mxu0 %v17632_v21  ;;  %11367 = vmatpush1.bf16.msra.mxu0 %v11366_v11  ;;  %v11374_v21 = vpack.c.bf16 %v10214_v40, %v10212_v18  ;;  %v11376_v60 = vpack.c.bf16 %v10219_v24, %v10217_v31  ;;  %v19579_v18 = vld [vmem:[#allocation69_spill] sm:$0xff]  ;;  %v10236_v24 = vld [vmem:[%s19091_s3 + $0xfa0] sm:$0xff] }
 0x6a0   : > { %11369 = vmatprep.subr.bf16.mxu0 %v11368_v26  ;;  %v10232_v26 = vld [vmem:[%s19091_s3 + $0xf80] sm:$0xff] }
 0x6a1   : > { %v11394_v40 = vpack.c.bf16 %v10234_v28, %v10232_v26  ;;  %v19587_v26 = vld [vmem:[#allocation78_spill] sm:$0xff]  ;;  %v19588_v28 = vld [vmem:[#allocation79_spill] sm:$0xff] }
 0x6a2   : > { %8350 = vmatmul.mubr.f32.gmra.mrb[44].mxu0 %v17642_v55  ;;  %v10223_v55 = vld [vmem:[%s19091_s3 + $0xf38] sm:$0xff] }
 0x6a3   : > { %8355 = vmatprep.mubr.f32.mxu0 %v17645_v44  ;;  %11371 = vmatpush1.bf16.msra.mxu0 %v11370_v50  ;;  %v11378_v44 = vpack.c.bf16 %v10218_v52, %v10216_v45  ;;  %v11380_v4 = vpack.c.bf16 %v10223_v55, %v10221_v13  ;;  %v7849_v50 = vadd.f32 %v18238_v22, %v7771_v10  ;;  %v7740_v45 = vld [vmem:[#allocation4 + $0x220] sm:$0xf]  ;;  %v10241_v13 = vld [vmem:[%s19091_s3 + $0xfc8] sm:$0xff]  ;;  %v10243_v55 = vld [vmem:[%s19091_s3 + $0xfd8] sm:$0xff] }
 0x6a4   : > { %11373 = vmatprep.subr.bf16.mxu0 %v11372_v23  ;;  %v7769_v23 = vsel %vm2302_vm3, %v17189_v29, %v7768_v32 }
 0x6a5   : > { %v7848_v52 = vadd.f32 %v18238_v22, %v7769_v23 }
 0x6a6   : > { %8356 = vmatmul.mubr.f32.gmra.mrb[46].mxu0 %v17655_v46  ;;  %v10227_v46 = vld [vmem:[%s19091_s3 + $0xf58] sm:$0xff] }
 0x6a7   : > { %8361 = vmatprep.mubr.f32.mxu0 %v17658_v16  ;;  %11375 = vmatpush1.bf16.msra.mxu0 %v11374_v21  ;;  %v19576_v16 = vld [vmem:[#allocation15_spill] sm:$0xff]  ;;  %v11384_v0 = vpack.c.bf16 %v10227_v46, %v10225_v25  ;;  %v10238_v21 = vld [vmem:[%s19091_s3 + $0xfb0] sm:$0xff]  ;;  %v7852_v25 = vadd.f32 %v7768_v32, %v7740_v45  ;;  %v11400_v46 = vpack.c.bf16 %v10243_v55, %v10241_v13  ;;  %v8169_v19 = vrot.slane %v7848_v52, 4 }
 0x6a8   : > { %11377 = vmatprep.subr.bf16.mxu0 %v11376_v60  ;;  %v7853_v60 = vadd.f32 %v7770_v43, %v7741_v58  ;;  %v11398_v3 = vpack.c.bf16 %v10238_v21, %v10236_v24  ;;  %v19585_v32 = vld [vmem:[#allocation85_spill] sm:$0xff]  ;;  %v12388_v13 = vmov 0.0|0.0  }
 0x6a9   : > { %v19591_v58 = vld [vmem:[#allocation21_spill] sm:$0xff] }
 0x6aa   : > { %8362 = vmatmul.mubr.f32.gmra.mrb[48].mxu0 %v19576_v16  ;;  %v10240_v16 = vld [vmem:[%s19091_s3 + $0xfc0] sm:$0xff] }
 0x6ab   : > { %8367 = vmatprep.mubr.f32.mxu0 %v17670_v38  ;;  %11379 = vmatpush1.bf16.msra.mxu0 %v11378_v44  ;;  %v10231_v38 = vld [vmem:[%s19091_s3 + $0xf78] sm:$0xff] }
 0x6ac   : > { %11381 = vmatprep.subr.bf16.mxu0 %v11380_v4  ;;  %v11388_v1 = vpack.c.bf16 %v10231_v38, %v10229_v51  ;;  %v19580_v44 = vld [vmem:[#allocation70_spill] sm:$0xff]  ;;  %v8171_v4 = vrot.slane %v7849_v50, 4  ;;  %v19582_v51 = vld [vmem:[#allocation16_spill] sm:$0xff] }
 0x6ad   : > { %v19583_v38 = vld [vmem:[#allocation84_spill] sm:$0xff] }
 0x6ae   : > { %8368 = vmatmul.mubr.f32.gmra.mrb[50].mxu0 %v17673_v53  ;;  %v10233_v53 = vld [vmem:[%s19091_s3 + $0xf88] sm:$0xff] }
 0x6af   : > { %8373 = vmatprep.mubr.f32.mxu0 %v17690_v27  ;;  %11383 = vmatpush1.bf16.msra.mxu0 %v11382_v35  ;;  %v10235_v27 = vld [vmem:[%s19091_s3 + $0xf98] sm:$0xff]  ;;  %v10242_v35 = vld [vmem:[%s19091_s3 + $0xfd0] sm:$0xff] }
 0x6b0   : > { %11385 = vmatprep.subr.bf16.mxu0 %v11384_v0  ;;  %v11392_v11 = vpack.c.bf16 %v10235_v27, %v10233_v53  ;;  %v8179_v0 = vrot.slane %v7853_v60, 4  ;;  %v11402_v17 = vpack.c.bf16 %v10242_v35, %v10240_v16  ;;  %v10244_v53 = vld [vmem:[%s19091_s3 + $0xfe0] sm:$0xff]  ;;  %v10246_v27 = vld [vmem:[%s19091_s3 + $0xff0] sm:$0xff] }
 0x6b1   : > { %v19600_v60 = vld [vmem:[#allocation11_spill] sm:$0xff] }
 0x6b2   : > { %8374 = vmatmul.mubr.f32.gmra.mrb[52].mxu0 %v17693_v62  ;;  %v10237_v62 = vld [vmem:[%s19091_s3 + $0xfa8] sm:$0xff]  ;;  %v8180_v12 = vsel %vm3230_vm4, %v8171_v4, %v8179_v0 }
 0x6b3   : > { %8379 = vmatprep.mubr.f32.mxu0 %v19577_v33  ;;  %11387 = vmatpush1.bf16.msra.mxu0 %v11386_v48  ;;  %v11396_v31 = vpack.c.bf16 %v10239_v56, %v10237_v62  ;;  %v19584_v48 = vrot.slane %v19583_v38, 4  ;;  %v19586_v33 = vrot.slane %v19585_v32, 4  ;;  %v19589_v62 = vld [vmem:[#allocation83_spill] sm:$0xff]  ;;  %v19590_v56 = vld [vmem:[#allocation18_spill] sm:$0xff] }
 0x6b4   : > { %11389 = vmatprep.subr.bf16.mxu0 %v11388_v1  ;;  %v8177_v1 = vrot.slane %v7852_v25, 4 }
 0x6b5   : > { %v8172_v43 = vsel %vm3230_vm4, %v19584_v48, %v8171_v4 }
 0x6b6   : > { %8380 = vmatmul.mubr.f32.gmra.mrb[54].mxu0 %v19578_v7  ;;  %v8178_v10 = vsel %vm3230_vm4, %v8169_v19, %v8177_v1 }
 0x6b7   : > { %8385 = vmatprep.mubr.f32.mxu0 %v19579_v18  ;;  %11391 = vmatpush1.bf16.msra.mxu0 %v11390_v20  ;;  %v8170_v20 = vsel %vm3230_vm4, %v19586_v33, %v8169_v19  ;;  %v19597_v18 = vld [vmem:[#allocation26_spill] sm:$0xff] }
 0x6b8   : > { %11393 = vmatprep.subr.bf16.mxu0 %v11392_v11  ;;  %v11406_v11 = vpack.c.bf16 %v10246_v27, %v10244_v53 }
 0x6ba   : > { %8386 = vmatmul.mubr.f32.gmra.mrb[56].mxu0 %v19580_v44 }
 0x6bb   : > { %8391 = vmatprep.mubr.f32.mxu0 %v19581_v59  ;;  %11395 = vmatpush1.bf16.msra.mxu0 %v11394_v40  ;;  %v19598_v40 = vld [vmem:[#allocation10_spill] sm:$0xff] }
 0x6bc   : > { %11397 = vmatprep.subr.bf16.mxu0 %v11396_v31  ;;  %v19599_v31 = vrot.slane %v19598_v40, 4  ;;  %v8783_v40 = vld [vmem:[%s19095_s7 + $0x10] sm:$0xff] }
 0x6be   : > { %8392 = vmatmul.mubr.f32.gmra.mrb[58].mxu0 %v19582_v51 }
 0x6bf   : > { %8397 = vmatprep.mubr.f32.mxu0 %v8172_v43  ;;  %11399 = vmatpush1.bf16.msra.mxu0 %v11398_v3 }
 0x6c0   : > { %11401 = vmatprep.subr.bf16.mxu0 %v11400_v46 }
 0x6c2   : > { %8398 = vmatmul.mubr.f32.gmra.mrb[60].mxu0 %v8170_v20 }
 0x6c3   : > { %11403 = vmatpush1.bf16.msra.mxu0 %v11402_v17  ;;  %8403 = vmatprep.mubr.f32.mxu0 %v8180_v12 }
 0x6c4   : > { %11405 = vmatprep.subr.bf16.mxu0 %v11404_v42 }
 0x6c6   : > { %8404 = vmatmul.mubr.f32.gmra.mrb[62].mxu0 %v8178_v10 }
 0x6c7   : > { %11407 = vmatpush1.bf16.msra.mxu0 %v11406_v11  ;;  %8474 = vmatprep.mubr.f32.mxu0 %v17770_v39  ;;  %v19592_v39 = vld [vmem:[#allocation20_spill] sm:$0xff] }
 0x6c8   : > { %11562 = vmatprep.subr.bf16.mxu0 %v12388_v13 }
 0x6ca   : > { %8475 = vmatmul.mubr.f32.vlgmr.msra.gmra.mrb[32].mxu0 %v17780_v30  ;;  %v7750_v30 = vld [vmem:[#allocation4 + $0x230] sm:$0x3f] }
 0x6cb   : > { %8480 = vmatprep.mubr.f32.mxu0 %v19587_v26 }
 0x6ce   : > { %8481 = vmatmul.mubr.f32.gmra.mrb[34].mxu0 %v19588_v28 }
 0x6cf   : > { %8486 = vmatprep.mubr.f32.mxu0 %v17773_v15  ;;  %v7751_v15 = vld [vmem:[#allocation4 + $0x238] sm:$0x3f] }
 0x6d2   : > { %8487 = vmatmul.mubr.f32.gmra.mrb[36].mxu0 %v17776_v9  ;;  %v7774_v9 = vrot.slane %v7751_v15, 2 }
 0x6d3   : > { %8492 = vmatprep.mubr.f32.mxu0 %v17796_v5  ;;  %v7772_v5 = vrot.slane %v7750_v30, 2 }
 0x6d6   : > { %8493 = vmatmul.mubr.f32.gmra.mrb[38].mxu0 %v17799_v61  ;;  %v7775_v61 = vsel %vm2302_vm3, %v17189_v29, %v7774_v9 }
 0x6d7   : > { %8498 = vmatprep.mubr.f32.mxu0 %v19589_v62 }
 0x6da   : > { %8499 = vmatmul.mubr.f32.gmra.mrb[40].mxu0 %v19590_v56 }
 0x6db   : > { %8504 = vmatprep.mubr.f32.mxu0 %v19591_v58 }
 0x6de   : > { %8505 = vmatmul.mubr.f32.gmra.mrb[42].mxu0 %v19592_v39 }
 0x6df   : > { %8510 = vmatprep.mubr.f32.mxu0 %v17827_v36  ;;  %v7743_v36 = vld [vmem:[#allocation4 + $0x238] sm:$0xf] }
 0x6e2   : > { %8511 = vmatmul.mubr.f32.gmra.mrb[44].mxu0 %v17838_v14  ;;  %v19593_v14 = vld [vmem:[#allocation86_spill] sm:$0xff] }
 0x6e3   : > { %8516 = vmatprep.mubr.f32.mxu0 %v17841_v49  ;;  %v7851_v49 = vadd.f32 %v18238_v22, %v7775_v61 }
 0x6e6   : > { %8517 = vmatmul.mubr.f32.gmra.mrb[46].mxu0 %v17844_v37  ;;  %v7773_v37 = vsel %vm2302_vm3, %v17189_v29, %v7772_v5 }
 0x6e7   : > { %8522 = vmatprep.mubr.f32.mxu0 %v17853_v34  ;;  %v19594_v34 = vld [vmem:[#allocation87_spill] sm:$0xff] }
 0x6ea   : > { %8523 = vmatmul.mubr.f32.gmra.mrb[48].mxu0 %v17856_v47  ;;  %v7855_v47 = vadd.f32 %v7774_v9, %v7743_v36 }
 0x6eb   : > { %8528 = vmatprep.mubr.f32.mxu0 %v17859_v63  ;;  %v7742_v63 = vld [vmem:[#allocation4 + $0x230] sm:$0xf] }
 0x6ec   : > { %v7854_v7 = vadd.f32 %v7772_v5, %v7742_v63  ;;  %v8183_v50 = vrot.slane %v7855_v47, 4 }
 0x6ee   : > { %8529 = vmatmul.mubr.f32.gmra.mrb[50].mxu0 %v17869_v2  ;;  %v7850_v2 = vadd.f32 %v18238_v22, %v7773_v37  ;;  %v8181_v24 = vrot.slane %v7854_v7, 4  ;;  %v19601_v22 = vrot.slane %v19600_v60, 4  ;;  %v8781_v7 = vld [vmem:[%s19095_s7] sm:$0xff] }
 0x6ef   : > { %8534 = vmatprep.mubr.f32.mxu0 %v17880_v41  ;;  %v19595_v41 = vld [vmem:[#allocation23_spill] sm:$0xff] }
 0x6f0   : > { %v8173_v23 = vrot.slane %v7850_v2, 4 }
 0x6f2   : > { %8535 = vmatmul.mubr.f32.gmra.mrb[52].mxu0 %v17883_v54  ;;  %v8175_v54 = vrot.slane %v7851_v49, 4  ;;  %v8174_v45 = vsel %vm3230_vm4, %v19601_v22, %v8173_v23  ;;  %v8182_v52 = vsel %vm3230_vm4, %v8173_v23, %v8181_v24  ;;  %v8677_v23 = vld [vmem:[%s19093_s5] sm:$0xf]  ;;  %v8787_v22 = vld [vmem:[%s19095_s7 + $0x30] sm:$0xff] }
 0x6f3   : > { %8540 = vmatprep.mubr.f32.mxu0 %v17886_v6  ;;  %v19596_v6 = vld [vmem:[#allocation22_spill] sm:$0xff]  ;;  %v8785_v24 = vld [vmem:[%s19095_s7 + $0x20] sm:$0xff] }
 0x6f4   : > { %v8176_v29 = vsel %vm3230_vm4, %v19599_v31, %v8175_v54  ;;  %v8184_v21 = vsel %vm3230_vm4, %v8175_v54, %v8183_v50  ;;  %v8603_v54 = vld [vmem:[%s19092_s4] sm:$0xf]  ;;  %v8782_v50 = vld [vmem:[%s19095_s7 + $0x8] sm:$0xff]  ;;  %v8784_v31 = vld [vmem:[%s19095_s7 + $0x18] sm:$0xff] }
 0x6f6   : > { %8541 = vmatmul.mubr.f32.gmra.mrb[54].mxu0 %v19593_v14 }
 0x6f7   : > { %8546 = vmatprep.mubr.f32.mxu0 %v19594_v34 }
 0x6fa   : > { %8547 = vmatmul.mubr.f32.gmra.mrb[56].mxu0 %v19595_v41 }
 0x6fb   : > { %8552 = vmatprep.mubr.f32.mxu0 %v19596_v6  ;;  %v18776_v6 = vld [vmem:[#allocation3 + $0x100] sm:$0xff] }
 0x6fe   : > { %8553 = vmatmul.mubr.f32.gmra.mrb[58].mxu0 %v19597_v18  ;;  %v11473_v18 = vpack.c.bf16 %v8782_v50, %v8781_v7  ;;  %v8757_v7 = vld [vmem:[%s19094_s6 + $0x30] sm:$0xff]  ;;  %v8758_v50 = vld [vmem:[%s19094_s6 + $0x38] sm:$0xff] }
 0x6ff   : > { %8558 = vmatprep.mubr.f32.mxu0 %v8176_v29  ;;  %v11476_v29 = vpack.c.bf16 %v8784_v31, %v8783_v40  ;;  %v8760_v40 = vld [vmem:[%s19094_s6 + $0x48] sm:$0xff] }
 0x702   : > { %8559 = vmatmul.mubr.f32.gmra.mrb[60].mxu0 %v8174_v45  ;;  %v8788_v45 = vld [vmem:[%s19095_s7 + $0x38] sm:$0xff] }
 0x703   : > { %8564 = vmatprep.mubr.f32.mxu0 %v8184_v21  ;;  %v8786_v21 = vld [vmem:[%s19095_s7 + $0x28] sm:$0xff] }
 0x704   : > { %v11479_v60 = vpack.c.bf16 %v8786_v21, %v8785_v24  ;;  %v8762_v24 = vld [vmem:[%s19094_s6 + $0x58] sm:$0xff] }
 0x706   : > { %8565 = vmatmul.mubr.f32.gmra.mrb[62].mxu0 %v8182_v52  ;;  %v11482_v52 = vpack.c.bf16 %v8788_v45, %v8787_v22  ;;  %v8764_v22 = vld [vmem:[%s19094_s6 + $0x68] sm:$0xff] }
 0x707   : > { %10293 = vmatprep.mubr.msk.f32.mxu0 %vm12389_vm7, %v18776_v6 }
 0x79d   : > { %v8476_v55 = vpop.f32.mrb[32].mxu0 }
 0x79e   : > { %v8478_v44 = vpop.f32.mrb[33].mxu0 }
 0x7a1   : > { %v8482_v4 = vpop.f32.mrb[34].mxu0 }
 0x7a2   : > { %v18769_v59 = vpack.c.bf16 %v8482_v4, %v8476_v55  ;;  %v8484_v3 = vpop.f32.mrb[35].mxu0  ;;  %v8789_v55 = vld [vmem:[%s19095_s7 + $0x40] sm:$0xff] }
 0x7a3   : > { %v11408_v25 = vpack.c.bf16 %v8484_v3, %v8478_v44  ;;  %v8790_v44 = vld [vmem:[%s19095_s7 + $0x48] sm:$0xff]  ;;  %v8792_v3 = vld [vmem:[%s19095_s7 + $0x58] sm:$0xff] }
 0x7a4   : > { %v11485_v4 = vpack.c.bf16 %v8790_v44, %v8789_v55  ;;  %v8766_v55 = vld [vmem:[%s19094_s6 + $0x78] sm:$0xff] }
 0x7a5   : > { %v8488_v46 = vpop.f32.mrb[36].mxu0  ;;  %11409 = vmatprep.subr.bf16.mxu1 %v11408_v25 }
 0x7a6   : > { %v8490_v16 = vpop.f32.mrb[37].mxu0  ;;  %11411 = vmatpush1.bf16.msra.mxu1 %v18769_v59 }
 0x7a9   : > { %v8494_v35 = vpop.f32.mrb[38].mxu0 }
 0x7aa   : > { %v11414_v0 = vpack.c.bf16 %v8494_v35, %v8488_v46  ;;  %v8496_v19 = vpop.f32.mrb[39].mxu0  ;;  %v8793_v46 = vld [vmem:[%s19095_s7 + $0x60] sm:$0xff] }
 0x7ab   : > { %v11412_v57 = vpack.c.bf16 %v8496_v19, %v8490_v16  ;;  %v8794_v16 = vld [vmem:[%s19095_s7 + $0x68] sm:$0xff]  ;;  %v8796_v19 = vld [vmem:[%s19095_s7 + $0x78] sm:$0xff] }
 0x7ac   : > { %v11491_v35 = vpack.c.bf16 %v8794_v16, %v8793_v46  ;;  %v8770_v46 = vld [vmem:[%s19094_s6 + $0x98] sm:$0xff] }
 0x7ad   : > { %v8500_v8 = vpop.f32.mrb[40].mxu0  ;;  %11413 = vmatprep.subr.bf16.mxu1 %v11412_v57 }
 0x7ae   : > { %v8502_v51 = vpop.f32.mrb[41].mxu0  ;;  %11415 = vmatpush1.bf16.msra.mxu1 %v11414_v0 }
 0x7b1   : > { %v8506_v38 = vpop.f32.mrb[42].mxu0 }
 0x7b2   : > { %v11418_v48 = vpack.c.bf16 %v8506_v38, %v8500_v8  ;;  %v8508_v43 = vpop.f32.mrb[43].mxu0 }
 0x7b3   : > { %v11416_v17 = vpack.c.bf16 %v8508_v43, %v8502_v51  ;;  %v8798_v51 = vld [vmem:[%s19095_s7 + $0x88] sm:$0xff]  ;;  %v8800_v43 = vld [vmem:[%s19095_s7 + $0x98] sm:$0xff] }
 0x7b5   : > { %v8512_v1 = vpop.f32.mrb[44].mxu0  ;;  %11417 = vmatprep.subr.bf16.mxu1 %v11416_v17 }
 0x7b6   : > { %v8514_v12 = vpop.f32.mrb[45].mxu0  ;;  %11419 = vmatpush1.bf16.msra.mxu1 %v11418_v48 }
 0x7b9   : > { %v8518_v42 = vpop.f32.mrb[46].mxu0 }
 0x7ba   : > { %v11422_v53 = vpack.c.bf16 %v8518_v42, %v8512_v1  ;;  %v8520_v27 = vpop.f32.mrb[47].mxu0  ;;  %v8801_v1 = vld [vmem:[%s19095_s7 + $0xa0] sm:$0xff] }
 0x7bb   : > { %v11420_v32 = vpack.c.bf16 %v8520_v27, %v8514_v12  ;;  %v8802_v12 = vld [vmem:[%s19095_s7 + $0xa8] sm:$0xff]  ;;  %v8804_v27 = vld [vmem:[%s19095_s7 + $0xb8] sm:$0xff] }
 0x7bc   : > { %v11503_v42 = vpack.c.bf16 %v8802_v12, %v8801_v1  ;;  %v8778_v1 = vld [vmem:[%s19094_s6 + $0xd8] sm:$0xff] }
 0x7bd   : > { %v8524_v33 = vpop.f32.mrb[48].mxu0  ;;  %11421 = vmatprep.subr.bf16.mxu1 %v11420_v32 }
 0x7be   : > { %v8526_v20 = vpop.f32.mrb[49].mxu0  ;;  %11423 = vmatpush1.bf16.msra.mxu1 %v11422_v53 }
 0x7c1   : > { %v8530_v10 = vpop.f32.mrb[50].mxu0 }
 0x7c2   : > { %v11426_v11 = vpack.c.bf16 %v8530_v10, %v8524_v33  ;;  %v8532_v26 = vpop.f32.mrb[51].mxu0  ;;  %v8805_v33 = vld [vmem:[%s19095_s7 + $0xc0] sm:$0xff] }
 0x7c3   : > { %v11424_v28 = vpack.c.bf16 %v8532_v26, %v8526_v20  ;;  %v8806_v20 = vld [vmem:[%s19095_s7 + $0xc8] sm:$0xff]  ;;  %v8808_v26 = vld [vmem:[%s19095_s7 + $0xd8] sm:$0xff] }
 0x7c4   : > { %v11509_v10 = vpack.c.bf16 %v8806_v20, %v8805_v33  ;;  %v8967_v33 = vld [vmem:[%s19097_s9] sm:$0xff]  ;;  %v8968_v20 = vld [vmem:[%s19097_s9 + $0x8] sm:$0xff] }
 0x7c5   : > { %v8536_v62 = vpop.f32.mrb[52].mxu0  ;;  %11425 = vmatprep.subr.bf16.mxu1 %v11424_v28 }
 0x7c6   : > { %v8538_v56 = vpop.f32.mrb[53].mxu0  ;;  %11427 = vmatpush1.bf16.msra.mxu1 %v11426_v11 }
 0x7c9   : > { %v8542_v58 = vpop.f32.mrb[54].mxu0 }
 0x7ca   : > { %v11430_v39 = vpack.c.bf16 %v8542_v58, %v8536_v62  ;;  %v8544_v15 = vpop.f32.mrb[55].mxu0  ;;  %v8809_v62 = vld [vmem:[%s19095_s7 + $0xe0] sm:$0xff] }
 0x7cb   : > { %v11428_v9 = vpack.c.bf16 %v8544_v15, %v8538_v56  ;;  %v8810_v56 = vld [vmem:[%s19095_s7 + $0xe8] sm:$0xff] }
 0x7cc   : > { %v11515_v58 = vpack.c.bf16 %v8810_v56, %v8809_v62  ;;  %v8971_v62 = vld [vmem:[%s19097_s9 + $0x20] sm:$0xff]  ;;  %v8972_v56 = vld [vmem:[%s19097_s9 + $0x28] sm:$0xff] }
 0x7cd   : > { %v8548_v30 = vpop.f32.mrb[56].mxu0  ;;  %11429 = vmatprep.subr.bf16.mxu1 %v11428_v9 }
 0x7ce   : > { %v8550_v5 = vpop.f32.mrb[57].mxu0  ;;  %11431 = vmatpush1.bf16.msra.mxu1 %v11430_v39 }
 0x7d1   : > { %v8554_v61 = vpop.f32.mrb[58].mxu0 }
 0x7d2   : > { %v11434_v36 = vpack.c.bf16 %v8554_v61, %v8548_v30  ;;  %v8556_v14 = vpop.f32.mrb[59].mxu0  ;;  %v8752_v30 = vld [vmem:[%s19094_s6 + $0x8] sm:$0xff] }
 0x7d3   : > { %v11432_v49 = vpack.c.bf16 %v8556_v14, %v8550_v5 }
 0x7d5   : > { %v8560_v37 = vpop.f32.mrb[60].mxu0  ;;  %11433 = vmatprep.subr.bf16.mxu1 %v11432_v49 }
 0x7d6   : > { %v8562_v34 = vpop.f32.mrb[61].mxu0  ;;  %11435 = vmatpush1.bf16.msra.mxu1 %v11434_v36 }
 0x7d9   : > { %v8566_v47 = vpop.f32.mrb[62].mxu0 }
 0x7da   : > { %v11438_v63 = vpack.c.bf16 %v8566_v47, %v8560_v37  ;;  %v8568_v2 = vpop.f32.mrb[63].mxu0  ;;  %v8753_v37 = vld [vmem:[%s19094_s6 + $0x10] sm:$0xff] }
 0x7db   : > { %v11436_v41 = vpack.c.bf16 %v8568_v2, %v8562_v34  ;;  %v8754_v34 = vld [vmem:[%s19094_s6 + $0x18] sm:$0xff]  ;;  %v8755_v2 = vld [vmem:[%s19094_s6 + $0x20] sm:$0xff] }
 0x7dd   : > { %11437 = vmatprep.subr.bf16.mxu1 %v11436_v41 }
 0x7de   : > { %11439 = vmatpush1.bf16.msra.mxu1 %v11438_v63 }
 0x7df   : > { %11441 = vmatprep.subr.bf16.mxu1 %v11408_v25 }
 0x7e1   : > { %8669 = vmatmul.mubr.f32.vlgmr.msra.gmra.mrb[64].mxu1 %v8603_v54 }
 0x7e2   : > { %11443 = vmatpush1.bf16.msra.mxu1 %v18769_v59  ;;  %8742 = vmatprep.mubr.f32.mxu1 %v18776_v6  ;;  %v8791_v59 = vld [vmem:[%s19095_s7 + $0x50] sm:$0xff] }
 0x7e3   : > { %11445 = vmatprep.subr.bf16.mxu1 %v11412_v57  ;;  %v11488_v25 = vpack.c.bf16 %v8792_v3, %v8791_v59  ;;  %v8797_v57 = vld [vmem:[%s19095_s7 + $0x80] sm:$0xff]  ;;  %v8768_v59 = vld [vmem:[%s19094_s6 + $0x88] sm:$0xff] }
 0x7e4   : > { %v11497_v38 = vpack.c.bf16 %v8798_v51, %v8797_v57  ;;  %v8773_v57 = vld [vmem:[%s19094_s6 + $0xb0] sm:$0xff] }
 0x7e6   : > { %11447 = vmatpush1.bf16.msra.mxu1 %v11414_v0  ;;  %v8795_v0 = vld [vmem:[%s19095_s7 + $0x70] sm:$0xff] }
 0x7e7   : > { %11449 = vmatprep.subr.bf16.mxu1 %v11416_v17  ;;  %v11494_v8 = vpack.c.bf16 %v8796_v19, %v8795_v0  ;;  %v8772_v0 = vld [vmem:[%s19094_s6 + $0xa8] sm:$0xff] }
 0x7ea   : > { %11451 = vmatpush1.bf16.msra.mxu1 %v11418_v48  ;;  %v8799_v48 = vld [vmem:[%s19095_s7 + $0x90] sm:$0xff] }
 0x7eb   : > { %11453 = vmatprep.subr.bf16.mxu1 %v11420_v32  ;;  %v11500_v17 = vpack.c.bf16 %v8800_v43, %v8799_v48  ;;  %v8776_v48 = vld [vmem:[%s19094_s6 + $0xc8] sm:$0xff] }
 0x7ee   : > { %11455 = vmatpush1.bf16.msra.mxu1 %v11422_v53  ;;  %v8803_v53 = vld [vmem:[%s19095_s7 + $0xb0] sm:$0xff] }
 0x7ef   : > { %11457 = vmatprep.subr.bf16.mxu1 %v11424_v28  ;;  %v11506_v32 = vpack.c.bf16 %v8804_v27, %v8803_v53  ;;  %v8780_v53 = vld [vmem:[%s19094_s6 + $0xe8] sm:$0xff] }
 0x7f2   : > { %11459 = vmatpush1.bf16.msra.mxu1 %v11426_v11  ;;  %v8807_v11 = vld [vmem:[%s19095_s7 + $0xd0] sm:$0xff] }
 0x7f3   : > { %11461 = vmatprep.subr.bf16.mxu1 %v11428_v9  ;;  %v11512_v28 = vpack.c.bf16 %v8808_v26, %v8807_v11  ;;  %v8751_v9 = vld [vmem:[%s19094_s6] sm:$0xff]  ;;  %v11563_v11 = vpack.c.bf16 %v8968_v20, %v8967_v33  ;;  %v8970_v26 = vld [vmem:[%s19097_s9 + $0x18] sm:$0xff] }
 0x7f4   : > { %v11518_v14 = vpack.c.bf16 %v8752_v30, %v8751_v9  ;;  %v8975_v30 = vld [vmem:[%s19097_s9 + $0x40] sm:$0xff] }
 0x7f5   : > { %11564 = vmatpush3.bf16.msra.mxu0 %v11563_v11 }
 0x7f6   : > { %11463 = vmatpush1.bf16.msra.mxu1 %v11430_v39  ;;  %11565 = vmatprep.subr.bf16.mxu0 %v12388_v13 }
 0x7f7   : > { %11465 = vmatprep.subr.bf16.mxu1 %v11432_v49 }
 0x7fa   : > { %11467 = vmatpush1.bf16.msra.mxu1 %v11434_v36 }
 0x7fb   : > { %11469 = vmatprep.subr.bf16.mxu1 %v11436_v41  ;;  %v8756_v41 = vld [vmem:[%s19094_s6 + $0x28] sm:$0xff] }
 0x7fc   : > { %v11524_v54 = vpack.c.bf16 %v8756_v41, %v8755_v2 }
 0x7fe   : > { %11471 = vmatpush1.bf16.msra.mxu1 %v11438_v63  ;;  %v11521_v63 = vpack.c.bf16 %v8754_v34, %v8753_v37 }
 0x7ff   : > { %11472 = vmatprep.subr.bf16.mxu1 %v12388_v13 }
 0x801   : > { %8743 = vmatmul.mubr.f32.vlgmr.msra.gmra.mrb[66].mxu1 %v8677_v23  ;;  %v11527_v23 = vpack.c.bf16 %v8758_v50, %v8757_v7 }
 0x802   : > { %11474 = vmatpush1.bf16.msra.mxu1 %v11473_v18  ;;  %v8759_v18 = vld [vmem:[%s19094_s6 + $0x40] sm:$0xff] }
 0x803   : > { %11475 = vmatprep.subr.bf16.mxu1 %v12388_v13  ;;  %v11530_v31 = vpack.c.bf16 %v8760_v40, %v8759_v18 }
 0x806   : > { %11477 = vmatpush1.bf16.msra.mxu1 %v11476_v29  ;;  %v8761_v29 = vld [vmem:[%s19094_s6 + $0x50] sm:$0xff] }
 0x807   : > { %11478 = vmatprep.subr.bf16.mxu1 %v12388_v13  ;;  %v11533_v21 = vpack.c.bf16 %v8762_v24, %v8761_v29 }
 0x80a   : > { %11480 = vmatpush1.bf16.msra.mxu1 %v11479_v60  ;;  %v8763_v60 = vld [vmem:[%s19094_s6 + $0x60] sm:$0xff] }
 0x80b   : > { %11481 = vmatprep.subr.bf16.mxu1 %v12388_v13  ;;  %v11536_v45 = vpack.c.bf16 %v8764_v22, %v8763_v60 }
 0x80e   : > { %11483 = vmatpush1.bf16.msra.mxu1 %v11482_v52  ;;  %v8765_v52 = vld [vmem:[%s19094_s6 + $0x70] sm:$0xff] }
 0x80f   : > { %11484 = vmatprep.subr.bf16.mxu1 %v12388_v13  ;;  %v11539_v44 = vpack.c.bf16 %v8766_v55, %v8765_v52 }
 0x812   : > { %11486 = vmatpush1.bf16.msra.mxu1 %v11485_v4  ;;  %v8767_v4 = vld [vmem:[%s19094_s6 + $0x80] sm:$0xff] }
 0x813   : > { %11487 = vmatprep.subr.bf16.mxu1 %v12388_v13  ;;  %v11542_v3 = vpack.c.bf16 %v8768_v59, %v8767_v4 }
 0x816   : > { %11489 = vmatpush1.bf16.msra.mxu1 %v11488_v25  ;;  %v8769_v25 = vld [vmem:[%s19094_s6 + $0x90] sm:$0xff] }
 0x817   : > { %11490 = vmatprep.subr.bf16.mxu1 %v12388_v13  ;;  %v11545_v16 = vpack.c.bf16 %v8770_v46, %v8769_v25 }
 0x81a   : > { %11492 = vmatpush1.bf16.msra.mxu1 %v11491_v35  ;;  %v8771_v35 = vld [vmem:[%s19094_s6 + $0xa0] sm:$0xff] }
 0x81b   : > { %11493 = vmatprep.subr.bf16.mxu1 %v12388_v13  ;;  %v11548_v19 = vpack.c.bf16 %v8772_v0, %v8771_v35 }
 0x81e   : > { %11495 = vmatpush1.bf16.msra.mxu1 %v11494_v8  ;;  %v8774_v8 = vld [vmem:[%s19094_s6 + $0xb8] sm:$0xff] }
 0x81f   : > { %11496 = vmatprep.subr.bf16.mxu1 %v12388_v13  ;;  %v11551_v51 = vpack.c.bf16 %v8774_v8, %v8773_v57 }
 0x822   : > { %11498 = vmatpush1.bf16.msra.mxu1 %v11497_v38  ;;  %v8775_v38 = vld [vmem:[%s19094_s6 + $0xc0] sm:$0xff] }
 0x823   : > { %11499 = vmatprep.subr.bf16.mxu1 %v12388_v13  ;;  %v11554_v43 = vpack.c.bf16 %v8776_v48, %v8775_v38 }
 0x826   : > { %11501 = vmatpush1.bf16.msra.mxu1 %v11500_v17  ;;  %v8777_v17 = vld [vmem:[%s19094_s6 + $0xd0] sm:$0xff] }
 0x827   : > { %11502 = vmatprep.subr.bf16.mxu1 %v12388_v13  ;;  %v11557_v12 = vpack.c.bf16 %v8778_v1, %v8777_v17 }
 0x82a   : > { %11504 = vmatpush1.bf16.msra.mxu1 %v11503_v42  ;;  %v8779_v42 = vld [vmem:[%s19094_s6 + $0xe0] sm:$0xff] }
 0x82b   : > { %11505 = vmatprep.subr.bf16.mxu1 %v12388_v13  ;;  %v11560_v27 = vpack.c.bf16 %v8780_v53, %v8779_v42 }
 0x82e   : > { %11507 = vmatpush1.bf16.msra.mxu1 %v11506_v32 }
 0x82f   : > { %11508 = vmatprep.subr.bf16.mxu1 %v12388_v13 }
 0x832   : > { %11510 = vmatpush1.bf16.msra.mxu1 %v11509_v10  ;;  %v8969_v10 = vld [vmem:[%s19097_s9 + $0x10] sm:$0xff] }
 0x833   : > { %11511 = vmatprep.subr.bf16.mxu1 %v12388_v13 }
 0x836   : > { %11513 = vmatpush1.bf16.msra.mxu1 %v11512_v28  ;;  %v11566_v28 = vpack.c.bf16 %v8970_v26, %v8969_v10 }
 0x837   : > { %11514 = vmatprep.subr.bf16.mxu1 %v12388_v13 }
 0x838   : > { %11567 = vmatpush3.bf16.msra.mxu0 %v11566_v28 }
 0x839   : > { %11568 = vmatprep.subr.bf16.mxu0 %v12388_v13 }
 0x83a   : > { %11516 = vmatpush1.bf16.msra.mxu1 %v11515_v58  ;;  %v11569_v58 = vpack.c.bf16 %v8972_v56, %v8971_v62 }
 0x83b   : > { %11517 = vmatprep.subr.bf16.mxu1 %v12388_v13 }
 0x83c   : > { %11570 = vmatpush3.bf16.msra.mxu0 %v11569_v58 }
 0x83d   : > { %11571 = vmatprep.subr.bf16.mxu0 %v12388_v13 }
 0x8b4   : > { %v18888_v39 = vpop.f32.mrb[64].mxu1 }
 0x8b5   : > { %v8672_v15 = vpop.f32.mrb[65].mxu1  ;;  %v8675_v32 = vmax.f32 %v18888_v39, 0.0  ;;  %v8973_v39 = vld [vmem:[%s19097_s9 + $0x30] sm:$0xff] }
 0x8b6   : > { %v8676_v47 = vmax.f32 %v8672_v15, 0.0  ;;  %v8974_v15 = vld [vmem:[%s19097_s9 + $0x38] sm:$0xff] }
 0x8b7   : > { %v11572_v9 = vpack.c.bf16 %v8974_v15, %v8973_v39 }
 0x8b9   : > { %11573 = vmatpush3.bf16.msra.mxu0 %v11572_v9 }
 0x8ba   : > { %11574 = vmatprep.subr.bf16.mxu0 %v12388_v13 }
 0x8d4   : > { %v8744_v5 = vpop.f32.mrb[66].mxu1 }
 0x8d5   : > { %v8746_v61 = vpop.f32.mrb[67].mxu1  ;;  %v8749_v49 = vmax.f32 %v8744_v5, 0.0  ;;  %v8976_v5 = vld [vmem:[%s19097_s9 + $0x48] sm:$0xff] }
 0x8d6   : > { %v8750_v36 = vmax.f32 %v8746_v61, 0.0  ;;  %v11575_v61 = vpack.c.bf16 %v8976_v5, %v8975_v30 }
 0x8d8   : > { %10248 = vmatprep.mubr.msk.f32.mxu1 %vm8811_vm6, %v8750_v36  ;;  %11576 = vmatpush3.bf16.msra.mxu0 %v11575_v61  ;;  %v8977_v36 = vld [vmem:[%s19097_s9 + $0x50] sm:$0xf] }
 0x8d9   : > { %8880 = vmatmul.mubr.f32.vlgmr.msra.gmra.mrb[68].mxu1 %v8749_v49  ;;  %10291 = vmatprep.subr.mxu0 %v18776_v6  ;;  %v10251_v6 = vld [vmem:[%s19098_s10] ss:$0 sm:$0xff] }
 0x8da   : > { %11519 = vmatpush1.bf16.msra.mxu1 %v11518_v14  ;;  %10249 = vmatprep.mubr.msk.f32.mxu1 %vm8811_vm6, %v8676_v47 }
 0x8db   : > { %11520 = vmatprep.subr.bf16.mxu1 %v12388_v13 }
 0x8dc   : > { %10292 = vmatpush3.msk.msra.mxu0 %vm3230_vm4, %v8977_v36 }
 0x8de   : > { %11522 = vmatpush1.bf16.msra.mxu1 %v11521_v63 }
 0x8df   : > { %11523 = vmatprep.subr.bf16.mxu1 %v12388_v13 }
 0x8e2   : > { %11525 = vmatpush1.bf16.msra.mxu1 %v11524_v54 }
 0x8e3   : > { %11526 = vmatprep.subr.bf16.mxu1 %v12388_v13 }
 0x8e6   : > { %11528 = vmatpush1.bf16.msra.mxu1 %v11527_v23 }
 0x8e7   : > { %11529 = vmatprep.subr.bf16.mxu1 %v12388_v13 }
 0x8ea   : > { %11531 = vmatpush1.bf16.msra.mxu1 %v11530_v31 }
 0x8eb   : > { %11532 = vmatprep.subr.bf16.mxu1 %v12388_v13 }
 0x8ee   : > { %11534 = vmatpush1.bf16.msra.mxu1 %v11533_v21 }
 0x8ef   : > { %11535 = vmatprep.subr.bf16.mxu1 %v12388_v13 }
 0x8f2   : > { %11537 = vmatpush1.bf16.msra.mxu1 %v11536_v45 }
 0x8f3   : > { %11538 = vmatprep.subr.bf16.mxu1 %v12388_v13 }
 0x8f6   : > { %11540 = vmatpush1.bf16.msra.mxu1 %v11539_v44 }
 0x8f7   : > { %11541 = vmatprep.subr.bf16.mxu1 %v12388_v13 }
 0x8fa   : > { %11543 = vmatpush1.bf16.msra.mxu1 %v11542_v3 }
 0x8fb   : > { %11544 = vmatprep.subr.bf16.mxu1 %v12388_v13 }
 0x8fe   : > { %11546 = vmatpush1.bf16.msra.mxu1 %v11545_v16 }
 0x8ff   : > { %11547 = vmatprep.subr.bf16.mxu1 %v12388_v13 }
 0x902   : > { %11549 = vmatpush1.bf16.msra.mxu1 %v11548_v19 }
 0x903   : > { %11550 = vmatprep.subr.bf16.mxu1 %v12388_v13 }
 0x906   : > { %11552 = vmatpush1.bf16.msra.mxu1 %v11551_v51 }
 0x907   : > { %11553 = vmatprep.subr.bf16.mxu1 %v12388_v13 }
 0x90a   : > { %11555 = vmatpush1.bf16.msra.mxu1 %v11554_v43 }
 0x90b   : > { %11556 = vmatprep.subr.bf16.mxu1 %v12388_v13 }
 0x90e   : > { %11558 = vmatpush1.bf16.msra.mxu1 %v11557_v12 }
 0x90f   : > { %11559 = vmatprep.subr.bf16.mxu1 %v12388_v13  ;;  %v10250_v13 = vld [vmem:[%s19096_s8] ss:$0 sm:$0xff] }
 0x912   : > { %11561 = vmatpush1.bf16.msra.mxu1 %v11560_v27 }
 0x915   : > { %8953 = vmatmul.mubr.f32.vlgmr.msra.gmra.mrb[70].mxu1 %v8675_v32 }
 0x9ac   : > { %v8881_v14 = vpop.f32.mrb[68].mxu1 }
 0x9ad   : > { %v8883_v49 = vpop.f32.mrb[69].mxu1 }
 0x9e8   : > { %v8954_v37 = vpop.f32.mrb[70].mxu1 }
 0x9e9   : > { %v8955_v34 = vadd.f32 %v8954_v37, %v8881_v14  ;;  %v8956_v47 = vpop.f32.mrb[71].mxu1 }
 0x9eb   : > { %v8965_v63 = vadd.f32 %v10250_v13, %v8955_v34 }
 0x9ed   : > { %v8966_v2 = vmax.f32 %v8965_v63, 0.0 }
 0x9ef   : > { %10294 = vmatmul.mubr.msk.f32.vlgmr.msra.gmra.mrb[64].mxu0 %vm8985_vm8, %v8966_v2 }
 0xac2   : > { %v9058_v41 = vpop.f32.mrb[64].mxu0 }
 0xac3   : > { %v9059_v54 = vadd.f32 %v10251_v6, %v9058_v41  ;;  %v10295_v7 = vpop.f32.mrb[65].mxu0 }
 0xac5   : > { %9063 = vst.msk [vmem:[%s379_s12] sm:$0xf] %vm9062_vm9, %v9059_v54 }
 0xac6   : > { %12336 = shalt.err (!%p12333_p3)
}
 0xac7   : > { %s12337_s16 = scalar_lea.hbm %s19046_s19, 64  ;;  %s12341_s12 = scalar_lea.hbm %s19099_s11, 128 }
 0xac8   : > { %p12338_p4 = scmp.ne.s32.totalorder %s19046_s19, %s12337_s16  ;;  %p12342_p9 = scmp.lt.u32.totalorder %s19046_s19, %s19099_s11 }
 0xac9   : > { %p12343_p10 = scmp.lt.u32.totalorder %s12341_s12, %s12337_s16  ;;  %p12345_p12 = scmp.lt.u32.totalorder %s12337_s16, %s19046_s19 }
 0xaca   : > { %p12339_p7 = pnand %p12338_p4, %p12489_p5 }
 0xacb   : > { %p12344_p11 = por %p12343_p10, %p12342_p9 }
 0xacc   : > { %p12340_p8 = pneg %p12339_p7 }
 0xacd   : > { %p12346_p13 = por %p12345_p12, %p12344_p11 }
 0xacf   : > { %p12347_p0 = pnand %p12346_p13, %p12340_p8 }
 0xad1   : > { %12350 = shalt.err (!%p12347_p0)
}
 0xad2   : > { %12185 = dma.vmem_to_hbm [thread:$0]  (%p12489_p5), %s19048_s13, 64, %s19046_s19, %s9065_s26  }
 0xad3 PF: > { %p12191_p1 = scmp.ge.s32.totalorder %s12385_s20, 2  ;;  %s9090_s15 = sand.u32 1, %s12373_s17  }
 0xad4   : > { %s9091_s21 = scalar_lea.sflag [#allocation6], %s9090_s15 }
 0xad5   : > { %p12188_p2 = pnand %p12191_p1, %p12493_p6 }
 0xad7   : > { %12368 = dma.done.wait (!%p12188_p2), %s9091_s21, 64  }
 0xad8   : > { %12370 = vsyncadd (!%p12188_p2), %s9091_s21, 4294967232  ;;  %s19602_s22 = sld [smem:[#allocation8_spill]]  ;;  %s19603_s19 = sld [smem:[#allocation9_spill]] }
 0xad9   : > { %p21_p3 = scmp.ge.s32.totalorder %s12476_s23, 4   ;;  %s19604_s17 = smov %s12377_s18 }
 0xada   : > { %s19606_s20 = smov %s12476_s23 }
 0xadb   :  { %23 = sbr.rel (!%p21_p3) target bundleno = 3 (0x3), region = 110 }
 0xade   : > { %s19605_s18 = smov %s19602_s22 }
 0xae2   :  { %9096 = vsyncpa [#allocation6], 1 }
 0xae3   :  { %9098 = vsyncpa [#allocation6 + $0x1], 1 }

</bundles_post_ra>
